<compile_context>
chip_gen: v7x
topology: tpu7x:2x2x1
jax: 0.10.0
libtpu: 0.0.40
codegen_flags: <defaults>
</compile_context>

<pallas_src>
import jax
import jax.numpy as jnp
from jax.experimental import pallas as pl
from jax.experimental.pallas import tpu as pltpu

_LANE = 128      # channel padding granularity (vreg lane width)
_COL_OFF = 16    # column offset of the image inside the halo scratch
                 # (16-aligned so the bf16 interior store is unmasked)


def _round_up(x, m):
    return (x + m - 1) // m * m


def _basic_block_kernel(x_ref, w1_ref, w2_ref, s1_ref, b1_ref, s2_ref, b2_ref,
                        o_ref, xpad_ref, mid_ref):
    """Fused conv3x3+BN+ReLU+conv3x3+BN for one batch element.

    x_ref  : (1, H, W, Cin)   bf16 input tile (channels padded to 128)
    w1_ref : (9*Cin, Cmid)    conv1 weights, taps folded into K (bf16)
    w2_ref : (9*Cmid, Cout)   conv2 weights, taps folded into K (bf16)
    s*/b*  : (1, C)           BN scale / bias (f32)
    o_ref  : (1, H, W, Cout)  f32 output tile (lane-dense)
    xpad_ref, mid_ref         VMEM halo buffers (H+2, W+_COL_OFF+8, C)
    """
    _, h, w, _ = x_ref.shape

    def zero_halo(ref):
        # Only the 1-pixel border that the 3x3 window actually reads needs to be
        # zero; the interior is fully overwritten below.  Done unconditionally so
        # correctness does not depend on which core runs grid step 0.
        c = ref.shape[-1]
        zrow = jnp.zeros((1, ref.shape[1], c), ref.dtype)
        ref[0:1, :, :] = zrow                                # top halo row
        ref[h + 1:h + 2, :, :] = zrow                        # bottom halo row
        zcol = jnp.zeros((h + 2, 1, c), ref.dtype)
        ref[:, _COL_OFF - 1:_COL_OFF, :] = zcol              # left halo column
        ref[:, _COL_OFF + w:_COL_OFF + w + 1, :] = zcol      # right halo column

    zero_halo(xpad_ref)
    zero_halo(mid_ref)

    def conv3x3_bn(src_ref, w_ref, s_ref, b_ref):
        c = src_ref.shape[-1]
        # im2col: fold the 3x3 taps into the contraction axis -> one deep-K matmul.
        cols = [
            src_ref[ky:ky + h, _COL_OFF - 1 + kx:_COL_OFF - 1 + kx + w, :]
            .reshape(h * w, c)
            for ky in range(3) for kx in range(3)
        ]
        lhs = jnp.concatenate(cols, axis=1)                    # (H*W, 9*C) bf16
        acc = jnp.dot(lhs, w_ref[...],
                      preferred_element_type=jnp.float32)      # MXU, f32 accum
        return acc * s_ref[...] + b_ref[...]                   # affine BN in f32

    # Stage 0: place this image inside the zero-bordered VMEM halo buffer
    # (aligned interior store; halo columns/rows stay zero).
    xpad_ref[1:h + 1, _COL_OFF:_COL_OFF + w, :] = x_ref[0]

    # Stage 1: conv1 + BN1 + ReLU. Intermediate stays in VMEM (bf16 for the MXU).
    y = jnp.maximum(conv3x3_bn(xpad_ref, w1_ref, s1_ref, b1_ref), 0.0)
    mid_ref[1:h + 1, _COL_OFF:_COL_OFF + w, :] = (
        y.reshape(h, w, mid_ref.shape[-1]).astype(mid_ref.dtype))

    # Stage 2: conv2 + BN2.
    y2 = conv3x3_bn(mid_ref, w2_ref, s2_ref, b2_ref)
    o_ref[0] = y2.reshape(h, w, o_ref.shape[-1]).astype(o_ref.dtype)


def basic_block_forward_nhwc(x, params):
    """x: (N, H, W, Cin); returns (N, H, W, planes) float32."""
    n, h, w, cin = x.shape
    w1, w2 = params["w1"], params["w2"]          # (3,3,Cin,Cmid), (3,3,Cmid,Cout)
    cmid, cout = w1.shape[-1], w2.shape[-1]
    cin_p, cmid_p, cout_p = (_round_up(c, _LANE) for c in (cin, cmid, cout))

    # Lane-pad channels (no-op for real ResNet widths) and cast MXU operands to
    # bf16; BN parameters stay f32.
    xb = jnp.pad(x, ((0, 0), (0, 0), (0, 0), (0, cin_p - cin))).astype(jnp.bfloat16)
    w1m = jnp.pad(w1, ((0, 0), (0, 0), (0, cin_p - cin), (0, cmid_p - cmid))
                  ).reshape(9 * cin_p, cmid_p).astype(jnp.bfloat16)
    w2m = jnp.pad(w2, ((0, 0), (0, 0), (0, cmid_p - cmid), (0, cout_p - cout))
                  ).reshape(9 * cmid_p, cout_p).astype(jnp.bfloat16)
    s1 = jnp.pad(params["s1"], (0, cmid_p - cmid)).reshape(1, cmid_p).astype(jnp.float32)
    b1 = jnp.pad(params["b1"], (0, cmid_p - cmid)).reshape(1, cmid_p).astype(jnp.float32)
    s2 = jnp.pad(params["s2"], (0, cout_p - cout)).reshape(1, cout_p).astype(jnp.float32)
    b2 = jnp.pad(params["b2"], (0, cout_p - cout)).reshape(1, cout_p).astype(jnp.float32)

    wb = w + _COL_OFF + 8    # halo-buffer width (image at col _COL_OFF, halo around)

    out = pl.pallas_call(
        _basic_block_kernel,
        out_shape=jax.ShapeDtypeStruct((n, h, w, cout_p), jnp.float32),
        grid_spec=pltpu.PrefetchScalarGridSpec(
            num_scalar_prefetch=0,
            grid=(n,),
            in_specs=[
                pl.BlockSpec((1, h, w, cin_p), lambda i: (i, 0, 0, 0)),
                pl.BlockSpec((9 * cin_p, cmid_p), lambda i: (0, 0)),
                pl.BlockSpec((9 * cmid_p, cout_p), lambda i: (0, 0)),
                pl.BlockSpec((1, cmid_p), lambda i: (0, 0)),
                pl.BlockSpec((1, cmid_p), lambda i: (0, 0)),
                pl.BlockSpec((1, cout_p), lambda i: (0, 0)),
                pl.BlockSpec((1, cout_p), lambda i: (0, 0)),
            ],
            out_specs=pl.BlockSpec((1, h, w, cout_p), lambda i: (i, 0, 0, 0)),
            scratch_shapes=[
                pltpu.VMEM((h + 2, wb, cin_p), jnp.bfloat16),   # input halo buffer
                pltpu.VMEM((h + 2, wb, cmid_p), jnp.bfloat16),  # intermediate (never hits HBM)
            ],
        ),
        compiler_params=pltpu.CompilerParams(
            dimension_semantics=("parallel",),
            vmem_limit_bytes=32 * 1024 * 1024,
        ),
    )(xb, w1m, w2m, s1, b1, s2, b2)
    return out[..., :cout]


def basic_block_forward(x_nchw, params):
    """PyTorch-compatible NCHW entry point.

    TODO(synk): in a full network keep activations NHWC end-to-end; these two
    transposes exist only to match the PyTorch module's NCHW interface.
    """
    x = jnp.transpose(x_nchw, (0, 2, 3, 1))         # NCHW -> NHWC
    out = basic_block_forward_nhwc(x, params)
    return jnp.transpose(out, (0, 3, 1, 2))         # NHWC -> NCHW


def _make_params(key, inplanes, planes, eps=1e-5):
    ks = jax.random.split(key, 8)
    # conv weights stored HWIO (3, 3, Cin, Cout), deterministic init
    w1 = jax.random.normal(ks[0], (3, 3, inplanes, planes), jnp.float32) * 0.1
    w2 = jax.random.normal(ks[1], (3, 3, planes, planes), jnp.float32) * 0.1
    gamma1 = 1.0 + 0.1 * jax.random.normal(ks[2], (planes,), jnp.float32)
    beta1 = 0.1 * jax.random.normal(ks[3], (planes,), jnp.float32)
    mean1 = 0.1 * jax.random.normal(ks[4], (planes,), jnp.float32)
    var1 = jnp.abs(jax.random.normal(ks[5], (planes,), jnp.float32)) + 0.5
    gamma2 = 1.0 + 0.1 * jax.random.normal(ks[6], (planes,), jnp.float32)
    beta2 = 0.1 * jax.random.normal(ks[7], (planes,), jnp.float32)
    mean2 = jnp.zeros((planes,), jnp.float32)
    var2 = jnp.ones((planes,), jnp.float32)

    s1 = gamma1 / jnp.sqrt(var1 + eps)
    b1 = beta1 - mean1 * s1
    s2 = gamma2 / jnp.sqrt(var2 + eps)
    b2 = beta2 - mean2 * s2
    return {"w1": w1, "w2": w2, "s1": s1, "b1": b1, "s2": s2, "b2": b2}


def _reference_forward(x_nchw, params):
    """Pure-JAX reference with matching bf16 operand rounding (f32 accumulation)."""
    def bf16r(a):
        return a.astype(jnp.bfloat16).astype(jnp.float32)

    dn = ("NCHW", "HWIO", "NCHW")
    hi = jax.lax.Precision.HIGHEST
    y = jax.lax.conv_general_dilated(bf16r(x_nchw), bf16r(params["w1"]), (1, 1),
                                     "SAME", dimension_numbers=dn, precision=hi)
    y = y * params["s1"][None, :, None, None] + params["b1"][None, :, None, None]
    y = jnp.maximum(y, 0.0)
    y = jax.lax.conv_general_dilated(bf16r(y), bf16r(params["w2"]), (1, 1),
                                     "SAME", dimension_numbers=dn, precision=hi)
    y = y * params["s2"][None, :, None, None] + params["b2"][None, :, None, None]
    return y


if __name__ == "__main__":
    key = jax.random.PRNGKey(0)
    kx_, kp = jax.random.split(key)

    N, C, H, W = 2, 4, 16, 16
    planes = 4
    x = jax.random.normal(kx_, (N, C, H, W), jnp.float32)
    params = _make_params(kp, C, planes)

    out = jax.block_until_ready(basic_block_forward(x, params))

    ref = _reference_forward(x, params)
    assert out.shape == (N, planes, H, W)
    err = float(jnp.max(jnp.abs(out - ref)))
    assert err < 2e-3, f"max abs err {err}"
    print("KERNEL_OK")
</pallas_src>

<mosaic_0001>
module attributes {stable_mosaic.version = 11 : i64} {
  func.func @_basic_block_kernel(%arg0: i32, %arg1: memref<1x16x16x128xbf16, #tpu.memory_space<vmem>>, %arg2: memref<1152x128xbf16, #tpu.memory_space<vmem>>, %arg3: memref<1152x128xbf16, #tpu.memory_space<vmem>>, %arg4: memref<1x128xf32, #tpu.memory_space<vmem>>, %arg5: memref<1x128xf32, #tpu.memory_space<vmem>>, %arg6: memref<1x128xf32, #tpu.memory_space<vmem>>, %arg7: memref<1x128xf32, #tpu.memory_space<vmem>>, %arg8: memref<1x16x16x128xf32, #tpu.memory_space<vmem>>, %arg9: memref<18x40x128xbf16, #tpu.memory_space<vmem>>, %arg10: memref<18x40x128xbf16, #tpu.memory_space<vmem>>) attributes {dimension_semantics = [#tpu.dimension_semantics<parallel>], iteration_bounds = array<i64: 2>, scalar_prefetch = 0 : i64, scratch_operands = 2 : i64, tpu.core_type = #tpu.core_type<tc>, window_params = [{transform_indices = @transform_0, window_bounds = array<i64: 1, 16, 16, 128>}, {pipeline_mode = #tpu.pipeline_mode<synchronous>, transform_indices = @transform_1, window_bounds = array<i64: 1152, 128>}, {pipeline_mode = #tpu.pipeline_mode<synchronous>, transform_indices = @transform_2, window_bounds = array<i64: 1152, 128>}, {pipeline_mode = #tpu.pipeline_mode<synchronous>, transform_indices = @transform_3, window_bounds = array<i64: 1, 128>}, {pipeline_mode = #tpu.pipeline_mode<synchronous>, transform_indices = @transform_4, window_bounds = array<i64: 1, 128>}, {pipeline_mode = #tpu.pipeline_mode<synchronous>, transform_indices = @transform_5, window_bounds = array<i64: 1, 128>}, {pipeline_mode = #tpu.pipeline_mode<synchronous>, transform_indices = @transform_6, window_bounds = array<i64: 1, 128>}, {transform_indices = @transform_7, window_bounds = array<i64: 1, 16, 16, 128>}]} {
    %cst = arith.constant 0.000000e+00 : bf16
    %0 = vector.broadcast %cst : bf16 to vector<1x40x128xbf16>
    %c0 = arith.constant 0 : index
    %c0_0 = arith.constant 0 : index
    %c0_1 = arith.constant 0 : index
    %1 = vector.load %arg9[%c0, %c0_0, %c0_1] : memref<18x40x128xbf16, #tpu.memory_space<vmem>>, vector<1x40x128xbf16>
    tpu.vector_store %arg9[%c0, %c0_0, %c0_1], %0 {strides = array<i32>} : memref<18x40x128xbf16, #tpu.memory_space<vmem>>, vector<1x40x128xbf16>,
    %c17 = arith.constant 17 : index
    %c0_2 = arith.constant 0 : index
    %c0_3 = arith.constant 0 : index
    %2 = vector.load %arg9[%c17, %c0_2, %c0_3] : memref<18x40x128xbf16, #tpu.memory_space<vmem>>, vector<1x40x128xbf16>
    tpu.vector_store %arg9[%c17, %c0_2, %c0_3], %0 {strides = array<i32>} : memref<18x40x128xbf16, #tpu.memory_space<vmem>>, vector<1x40x128xbf16>,
    %cst_4 = arith.constant 0.000000e+00 : bf16
    %3 = vector.broadcast %cst_4 : bf16 to vector<18x1x128xbf16>
    %c0_5 = arith.constant 0 : index
    %c15 = arith.constant 15 : index
    %c0_6 = arith.constant 0 : index
    %4 = vector.load %arg9[%c0_5, %c15, %c0_6] : memref<18x40x128xbf16, #tpu.memory_space<vmem>>, vector<18x1x128xbf16>
    tpu.vector_store %arg9[%c0_5, %c15, %c0_6], %3 {strides = array<i32>} : memref<18x40x128xbf16, #tpu.memory_space<vmem>>, vector<18x1x128xbf16>,
    %c0_7 = arith.constant 0 : index
    %c32 = arith.constant 32 : index
    %c0_8 = arith.constant 0 : index
    %5 = vector.load %arg9[%c0_7, %c32, %c0_8] : memref<18x40x128xbf16, #tpu.memory_space<vmem>>, vector<18x1x128xbf16>
    tpu.vector_store %arg9[%c0_7, %c32, %c0_8], %3 {strides = array<i32>} : memref<18x40x128xbf16, #tpu.memory_space<vmem>>, vector<18x1x128xbf16>,
    %cst_9 = arith.constant 0.000000e+00 : bf16
    %6 = vector.broadcast %cst_9 : bf16 to vector<1x40x128xbf16>
    %c0_10 = arith.constant 0 : index
    %c0_11 = arith.constant 0 : index
    %c0_12 = arith.constant 0 : index
    %7 = vector.load %arg10[%c0_10, %c0_11, %c0_12] : memref<18x40x128xbf16, #tpu.memory_space<vmem>>, vector<1x40x128xbf16>
    tpu.vector_store %arg10[%c0_10, %c0_11, %c0_12], %6 {strides = array<i32>} : memref<18x40x128xbf16, #tpu.memory_space<vmem>>, vector<1x40x128xbf16>,
    %c17_13 = arith.constant 17 : index
    %c0_14 = arith.constant 0 : index
    %c0_15 = arith.constant 0 : index
    %8 = vector.load %arg10[%c17_13, %c0_14, %c0_15] : memref<18x40x128xbf16, #tpu.memory_space<vmem>>, vector<1x40x128xbf16>
    tpu.vector_store %arg10[%c17_13, %c0_14, %c0_15], %6 {strides = array<i32>} : memref<18x40x128xbf16, #tpu.memory_space<vmem>>, vector<1x40x128xbf16>,
    %cst_16 = arith.constant 0.000000e+00 : bf16
    %9 = vector.broadcast %cst_16 : bf16 to vector<18x1x128xbf16>
    %c0_17 = arith.constant 0 : index
    %c15_18 = arith.constant 15 : index
    %c0_19 = arith.constant 0 : index
    %10 = vector.load %arg10[%c0_17, %c15_18, %c0_19] : memref<18x40x128xbf16, #tpu.memory_space<vmem>>, vector<18x1x128xbf16>
    tpu.vector_store %arg10[%c0_17, %c15_18, %c0_19], %9 {strides = array<i32>} : memref<18x40x128xbf16, #tpu.memory_space<vmem>>, vector<18x1x128xbf16>,
    %c0_20 = arith.constant 0 : index
    %c32_21 = arith.constant 32 : index
    %c0_22 = arith.constant 0 : index
    %11 = vector.load %arg10[%c0_20, %c32_21, %c0_22] : memref<18x40x128xbf16, #tpu.memory_space<vmem>>, vector<18x1x128xbf16>
    tpu.vector_store %arg10[%c0_20, %c32_21, %c0_22], %9 {strides = array<i32>} : memref<18x40x128xbf16, #tpu.memory_space<vmem>>, vector<18x1x128xbf16>,
    %c0_23 = arith.constant 0 : index
    %c0_24 = arith.constant 0 : index
    %c0_25 = arith.constant 0 : index
    %c0_26 = arith.constant 0 : index
    %12 = vector.load %arg1[%c0_23, %c0_24, %c0_25, %c0_26] : memref<1x16x16x128xbf16, #tpu.memory_space<vmem>>, vector<1x16x16x128xbf16>
    %13 = vector.shape_cast %12 : vector<1x16x16x128xbf16> to vector<16x16x128xbf16>
    %c1 = arith.constant 1 : index
    %c16 = arith.constant 16 : index
    %c0_27 = arith.constant 0 : index
    %14 = vector.load %arg9[%c1, %c16, %c0_27] : memref<18x40x128xbf16, #tpu.memory_space<vmem>>, vector<16x16x128xbf16>
    tpu.vector_store %arg9[%c1, %c16, %c0_27], %13 {strides = array<i32>} : memref<18x40x128xbf16, #tpu.memory_space<vmem>>, vector<16x16x128xbf16>,
    %c0_28 = arith.constant 0 : index
    %c15_29 = arith.constant 15 : index
    %c0_30 = arith.constant 0 : index
    %15 = vector.load %arg9[%c0_28, %c15_29, %c0_30] : memref<18x40x128xbf16, #tpu.memory_space<vmem>>, vector<16x16x128xbf16>
    %16 = vector.shape_cast %15 : vector<16x16x128xbf16> to vector<256x128xbf16>
    %c0_31 = arith.constant 0 : index
    %c16_32 = arith.constant 16 : index
    %c0_33 = arith.constant 0 : index
    %17 = vector.load %arg9[%c0_31, %c16_32, %c0_33] : memref<18x40x128xbf16, #tpu.memory_space<vmem>>, vector<16x16x128xbf16>
    %18 = vector.shape_cast %17 : vector<16x16x128xbf16> to vector<256x128xbf16>
    %c0_34 = arith.constant 0 : index
    %c17_35 = arith.constant 17 : index
    %c0_36 = arith.constant 0 : index
    %19 = vector.load %arg9[%c0_34, %c17_35, %c0_36] : memref<18x40x128xbf16, #tpu.memory_space<vmem>>, vector<16x16x128xbf16>
    %20 = vector.shape_cast %19 : vector<16x16x128xbf16> to vector<256x128xbf16>
    %c1_37 = arith.constant 1 : index
    %c15_38 = arith.constant 15 : index
    %c0_39 = arith.constant 0 : index
    %21 = vector.load %arg9[%c1_37, %c15_38, %c0_39] : memref<18x40x128xbf16, #tpu.memory_space<vmem>>, vector<16x16x128xbf16>
    %22 = vector.shape_cast %21 : vector<16x16x128xbf16> to vector<256x128xbf16>
    %c1_40 = arith.constant 1 : index
    %c16_41 = arith.constant 16 : index
    %c0_42 = arith.constant 0 : index
    %23 = vector.load %arg9[%c1_40, %c16_41, %c0_42] : memref<18x40x128xbf16, #tpu.memory_space<vmem>>, vector<16x16x128xbf16>
    %24 = vector.shape_cast %23 : vector<16x16x128xbf16> to vector<256x128xbf16>
    %c1_43 = arith.constant 1 : index
    %c17_44 = arith.constant 17 : index
    %c0_45 = arith.constant 0 : index
    %25 = vector.load %arg9[%c1_43, %c17_44, %c0_45] : memref<18x40x128xbf16, #tpu.memory_space<vmem>>, vector<16x16x128xbf16>
    %26 = vector.shape_cast %25 : vector<16x16x128xbf16> to vector<256x128xbf16>
    %c2 = arith.constant 2 : index
    %c15_46 = arith.constant 15 : index
    %c0_47 = arith.constant 0 : index
    %27 = vector.load %arg9[%c2, %c15_46, %c0_47] : memref<18x40x128xbf16, #tpu.memory_space<vmem>>, vector<16x16x128xbf16>
    %28 = vector.shape_cast %27 : vector<16x16x128xbf16> to vector<256x128xbf16>
    %c2_48 = arith.constant 2 : index
    %c16_49 = arith.constant 16 : index
    %c0_50 = arith.constant 0 : index
    %29 = vector.load %arg9[%c2_48, %c16_49, %c0_50] : memref<18x40x128xbf16, #tpu.memory_space<vmem>>, vector<16x16x128xbf16>
    %30 = vector.shape_cast %29 : vector<16x16x128xbf16> to vector<256x128xbf16>
    %c2_51 = arith.constant 2 : index
    %c17_52 = arith.constant 17 : index
    %c0_53 = arith.constant 0 : index
    %31 = vector.load %arg9[%c2_51, %c17_52, %c0_53] : memref<18x40x128xbf16, #tpu.memory_space<vmem>>, vector<16x16x128xbf16>
    %32 = vector.shape_cast %31 : vector<16x16x128xbf16> to vector<256x128xbf16>
    %33 = tpu.concatenate %16, %18, %20, %22, %24, %26, %28, %30, %32 in 1 : vector<256x128xbf16>, vector<256x128xbf16>, vector<256x128xbf16>, vector<256x128xbf16>, vector<256x128xbf16>, vector<256x128xbf16>, vector<256x128xbf16>, vector<256x128xbf16>, vector<256x128xbf16> -> vector<256x1152xbf16>
    %c0_54 = arith.constant 0 : index
    %c0_55 = arith.constant 0 : index
    %34 = vector.load %arg2[%c0_54, %c0_55] : memref<1152x128xbf16, #tpu.memory_space<vmem>>, vector<1152x128xbf16>
    %cst_56 = arith.constant dense<0.000000e+00> : vector<256x128xf32>
    %35 = tpu.matmul %33, %34, %cst_56 {dimension_numbers = #tpu.dot_dimension_numbers<[1], [0], [0], [1], [0, 0, 1, 1], [], []>} : vector<256x1152xbf16>, vector<1152x128xbf16>, vector<256x128xf32> -> vector<256x128xf32>
    %c0_57 = arith.constant 0 : index
    %c0_58 = arith.constant 0 : index
    %36 = vector.load %arg4[%c0_57, %c0_58] : memref<1x128xf32, #tpu.memory_space<vmem>>, vector<1x128xf32>
    %37 = vector.broadcast %36 : vector<1x128xf32> to vector<256x128xf32>
    %38 = arith.mulf %35, %37 : vector<256x128xf32>
    %c0_59 = arith.constant 0 : index
    %c0_60 = arith.constant 0 : index
    %39 = vector.load %arg5[%c0_59, %c0_60] : memref<1x128xf32, #tpu.memory_space<vmem>>, vector<1x128xf32>
    %40 = vector.broadcast %39 : vector<1x128xf32> to vector<256x128xf32>
    %41 = arith.addf %38, %40 : vector<256x128xf32>
    %cst_61 = arith.constant 0.000000e+00 : f32
    %42 = vector.broadcast %cst_61 : f32 to vector<256x128xf32>
    %43 = arith.maximumf %41, %42 : vector<256x128xf32>
    %44 = vector.shape_cast %43 : vector<256x128xf32> to vector<16x16x128xf32>
    %45 = arith.truncf %44 : vector<16x16x128xf32> to vector<16x16x128xbf16>
    %c1_62 = arith.constant 1 : index
    %c16_63 = arith.constant 16 : index
    %c0_64 = arith.constant 0 : index
    %46 = vector.load %arg10[%c1_62, %c16_63, %c0_64] : memref<18x40x128xbf16, #tpu.memory_space<vmem>>, vector<16x16x128xbf16>
    tpu.vector_store %arg10[%c1_62, %c16_63, %c0_64], %45 {strides = array<i32>} : memref<18x40x128xbf16, #tpu.memory_space<vmem>>, vector<16x16x128xbf16>,
    %c0_65 = arith.constant 0 : index
    %c15_66 = arith.constant 15 : index
    %c0_67 = arith.constant 0 : index
    %47 = vector.load %arg10[%c0_65, %c15_66, %c0_67] : memref<18x40x128xbf16, #tpu.memory_space<vmem>>, vector<16x16x128xbf16>
    %48 = vector.shape_cast %47 : vector<16x16x128xbf16> to vector<256x128xbf16>
    %c0_68 = arith.constant 0 : index
    %c16_69 = arith.constant 16 : index
    %c0_70 = arith.constant 0 : index
    %49 = vector.load %arg10[%c0_68, %c16_69, %c0_70] : memref<18x40x128xbf16, #tpu.memory_space<vmem>>, vector<16x16x128xbf16>
    %50 = vector.shape_cast %49 : vector<16x16x128xbf16> to vector<256x128xbf16>
    %c0_71 = arith.constant 0 : index
    %c17_72 = arith.constant 17 : index
    %c0_73 = arith.constant 0 : index
    %51 = vector.load %arg10[%c0_71, %c17_72, %c0_73] : memref<18x40x128xbf16, #tpu.memory_space<vmem>>, vector<16x16x128xbf16>
    %52 = vector.shape_cast %51 : vector<16x16x128xbf16> to vector<256x128xbf16>
    %c1_74 = arith.constant 1 : index
    %c15_75 = arith.constant 15 : index
    %c0_76 = arith.constant 0 : index
    %53 = vector.load %arg10[%c1_74, %c15_75, %c0_76] : memref<18x40x128xbf16, #tpu.memory_space<vmem>>, vector<16x16x128xbf16>
    %54 = vector.shape_cast %53 : vector<16x16x128xbf16> to vector<256x128xbf16>
    %c1_77 = arith.constant 1 : index
    %c16_78 = arith.constant 16 : index
    %c0_79 = arith.constant 0 : index
    %55 = vector.load %arg10[%c1_77, %c16_78, %c0_79] : memref<18x40x128xbf16, #tpu.memory_space<vmem>>, vector<16x16x128xbf16>
    %56 = vector.shape_cast %55 : vector<16x16x128xbf16> to vector<256x128xbf16>
    %c1_80 = arith.constant 1 : index
    %c17_81 = arith.constant 17 : index
    %c0_82 = arith.constant 0 : index
    %57 = vector.load %arg10[%c1_80, %c17_81, %c0_82] : memref<18x40x128xbf16, #tpu.memory_space<vmem>>, vector<16x16x128xbf16>
    %58 = vector.shape_cast %57 : vector<16x16x128xbf16> to vector<256x128xbf16>
    %c2_83 = arith.constant 2 : index
    %c15_84 = arith.constant 15 : index
    %c0_85 = arith.constant 0 : index
    %59 = vector.load %arg10[%c2_83, %c15_84, %c0_85] : memref<18x40x128xbf16, #tpu.memory_space<vmem>>, vector<16x16x128xbf16>
    %60 = vector.shape_cast %59 : vector<16x16x128xbf16> to vector<256x128xbf16>
    %c2_86 = arith.constant 2 : index
    %c16_87 = arith.constant 16 : index
    %c0_88 = arith.constant 0 : index
    %61 = vector.load %arg10[%c2_86, %c16_87, %c0_88] : memref<18x40x128xbf16, #tpu.memory_space<vmem>>, vector<16x16x128xbf16>
    %62 = vector.shape_cast %61 : vector<16x16x128xbf16> to vector<256x128xbf16>
    %c2_89 = arith.constant 2 : index
    %c17_90 = arith.constant 17 : index
    %c0_91 = arith.constant 0 : index
    %63 = vector.load %arg10[%c2_89, %c17_90, %c0_91] : memref<18x40x128xbf16, #tpu.memory_space<vmem>>, vector<16x16x128xbf16>
    %64 = vector.shape_cast %63 : vector<16x16x128xbf16> to vector<256x128xbf16>
    %65 = tpu.concatenate %48, %50, %52, %54, %56, %58, %60, %62, %64 in 1 : vector<256x128xbf16>, vector<256x128xbf16>, vector<256x128xbf16>, vector<256x128xbf16>, vector<256x128xbf16>, vector<256x128xbf16>, vector<256x128xbf16>, vector<256x128xbf16>, vector<256x128xbf16> -> vector<256x1152xbf16>
    %c0_92 = arith.constant 0 : index
    %c0_93 = arith.constant 0 : index
    %66 = vector.load %arg3[%c0_92, %c0_93] : memref<1152x128xbf16, #tpu.memory_space<vmem>>, vector<1152x128xbf16>
    %cst_94 = arith.constant dense<0.000000e+00> : vector<256x128xf32>
    %67 = tpu.matmul %65, %66, %cst_94 {dimension_numbers = #tpu.dot_dimension_numbers<[1], [0], [0], [1], [0, 0, 1, 1], [], []>} : vector<256x1152xbf16>, vector<1152x128xbf16>, vector<256x128xf32> -> vector<256x128xf32>
    %c0_95 = arith.constant 0 : index
    %c0_96 = arith.constant 0 : index
    %68 = vector.load %arg6[%c0_95, %c0_96] : memref<1x128xf32, #tpu.memory_space<vmem>>, vector<1x128xf32>
    %69 = vector.broadcast %68 : vector<1x128xf32> to vector<256x128xf32>
    %70 = arith.mulf %67, %69 : vector<256x128xf32>
    %c0_97 = arith.constant 0 : index
    %c0_98 = arith.constant 0 : index
    %71 = vector.load %arg7[%c0_97, %c0_98] : memref<1x128xf32, #tpu.memory_space<vmem>>, vector<1x128xf32>
    %72 = vector.broadcast %71 : vector<1x128xf32> to vector<256x128xf32>
    %73 = arith.addf %70, %72 : vector<256x128xf32>
    %74 = vector.shape_cast %73 : vector<256x128xf32> to vector<16x16x128xf32>
    %c0_99 = arith.constant 0 : index
    %c0_100 = arith.constant 0 : index
    %c0_101 = arith.constant 0 : index
    %c0_102 = arith.constant 0 : index
    %75 = vector.load %arg8[%c0_99, %c0_100, %c0_101, %c0_102] : memref<1x16x16x128xf32, #tpu.memory_space<vmem>>, vector<1x16x16x128xf32>
    %76 = vector.shape_cast %75 : vector<1x16x16x128xf32> to vector<16x16x128xf32>
    %77 = vector.shape_cast %74 : vector<16x16x128xf32> to vector<1x16x16x128xf32>
    tpu.vector_store %arg8[%c0_99, %c0_100, %c0_101, %c0_102], %77 {strides = array<i32>} : memref<1x16x16x128xf32, #tpu.memory_space<vmem>>, vector<1x16x16x128xf32>,
    return
  }
  func.func @transform_0(%arg0: i32) -> (i32, i32, i32, i32) {
    %c0_i32 = arith.constant 0 : i32
    %c0_i32_0 = arith.constant 0 : i32
    %c0_i32_1 = arith.constant 0 : i32
    %c0_i32_2 = arith.constant 0 : i32
    return %arg0, %c0_i32, %c0_i32_0, %c0_i32_1 : i32, i32, i32, i32
  }
  func.func @transform_1(%arg0: i32) -> (i32, i32) {
    %c0_i32 = arith.constant 0 : i32
    %c0_i32_0 = arith.constant 0 : i32
    %c0_i32_1 = arith.constant 0 : i32
    return %c0_i32, %c0_i32_0 : i32, i32
  }
  func.func @transform_2(%arg0: i32) -> (i32, i32) {
    %c0_i32 = arith.constant 0 : i32
    %c0_i32_0 = arith.constant 0 : i32
    %c0_i32_1 = arith.constant 0 : i32
    return %c0_i32, %c0_i32_0 : i32, i32
  }
  func.func @transform_3(%arg0: i32) -> (i32, i32) {
    %c0_i32 = arith.constant 0 : i32
    %c0_i32_0 = arith.constant 0 : i32
    %c0_i32_1 = arith.constant 0 : i32
    return %c0_i32, %c0_i32_0 : i32, i32
  }
  func.func @transform_4(%arg0: i32) -> (i32, i32) {
    %c0_i32 = arith.constant 0 : i32
    %c0_i32_0 = arith.constant 0 : i32
    %c0_i32_1 = arith.constant 0 : i32
    return %c0_i32, %c0_i32_0 : i32, i32
  }
  func.func @transform_5(%arg0: i32) -> (i32, i32) {
    %c0_i32 = arith.constant 0 : i32
    %c0_i32_0 = arith.constant 0 : i32
    %c0_i32_1 = arith.constant 0 : i32
    return %c0_i32, %c0_i32_0 : i32, i32
  }
  func.func @transform_6(%arg0: i32) -> (i32, i32) {
    %c0_i32 = arith.constant 0 : i32
    %c0_i32_0 = arith.constant 0 : i32
    %c0_i32_1 = arith.constant 0 : i32
    return %c0_i32, %c0_i32_0 : i32, i32
  }
  func.func @transform_7(%arg0: i32) -> (i32, i32, i32, i32) {
    %c0_i32 = arith.constant 0 : i32
    %c0_i32_0 = arith.constant 0 : i32
    %c0_i32_1 = arith.constant 0 : i32
    %c0_i32_2 = arith.constant 0 : i32
    return %arg0, %c0_i32, %c0_i32_0, %c0_i32_1 : i32, i32, i32, i32
  }
}

</mosaic_0001>

<bundles_post_ra>
// kernel: tpu_custom_call.1
= control target key start
LH: loop header
LB: loop body
LE: loop exit
PB: predicated region body
PF: predicated region fallthrough
CT: control target
= control target key end

     0   :  { %12 = vsyncpa [#allocation5], 0  ;;  %s16002_s0 = inlined_call_operand.hbm [shape: bf16[2,16,16,128], index: 0, kind: input, shape index: {}]   ;;  %s16003_s1 = inlined_call_operand.hbm [shape: bf16[1152,128], index: 1, kind: input, shape index: {}]   ;;  %s16004_s2 = inlined_call_operand.hbm [shape: bf16[1152,128], index: 2, kind: input, shape index: {}]   ;;  %s16005_s3 = inlined_call_operand.vmem [shape: f32[1,128], index: 3, kind: input, shape index: {}]   ;;  %s16006_s4 = inlined_call_operand.vmem [shape: f32[1,128], index: 4, kind: input, shape index: {}]   ;;  %s16007_s5 = inlined_call_operand.vmem [shape: f32[1,128], index: 5, kind: input, shape index: {}]   ;;  %s16008_s6 = inlined_call_operand.vmem [shape: f32[1,128], index: 6, kind: input, shape index: {}]   ;;  %s16009_s7 = inlined_call_operand.hbm [shape: f32[2,16,16,128], index: 7, kind: output, shape index: {}]  }
   0x1   :  { %14 = vsyncpa [#allocation5 + $0x1], 0 }
   0x2   :  { %15 = vsyncpa [#allocation8], 0 }
   0x3   :  { %16 = vsyncpa [#allocation6], 0 }
   0x4   :  { %18 = vsyncpa [#allocation6 + $0x1], 0  ;;  %s11349_s24 = smov 0   ;;  %s11351_s25 = smov 0  }
   0x5   :  { %s11353_s26 = smov 0   ;;  %s11355_s27 = smov 0  }
   0x6 LB: > { %s11370_s28 = sadd.s32 4294967295, %s11298_s27   ;;  %s9076_s29 = sadd.s32 4294967294, %s11298_s27   ;;  %s11298_s27 = sphi %s11355_s27, %s16820_s27   ;;  %s11294_s26 = sphi %s11353_s26, %s16819_s26   ;;  %s11290_s25 = sphi %s11351_s25, %s16818_s25   ;;  %s11286_s24 = sphi %s11349_s24, %s16817_s24  }
   0x7   : > { %p44_p0 = scmp.ne.s32.totalorder %s11290_s25, %s11286_s24  ;;  %p16010_p1 = scmp.eq.s32.totalorder %s11370_s28, 0 }
   0x8   : > { %p200_p3 = scmp.eq.s32.totalorder %s9076_s29, 1  ;;  %p9077_p5 = scmp.ge.s32.totalorder %s11298_s27, 1 }
   0x9   : > { %p11379_p4 = por %p16010_p1, %p44_p0  ;;  %p207_p7 = scmp.lt.s32.totalorder %s11298_s27, 3 }
   0xa   : > { %p11384_p6 = por %p200_p3, %p44_p0  ;;  %s11300_s10 = smov [#allocation7]  }
   0xb   : > { %s16256_s30 = scalar_select %p11379_p4, 1, 0 }
   0xc   : > { %s16257_s8 = scalar_select %p11384_p6, 1, 0 }
   0xd   : > { %p11389_p8 = pnand %p9077_p5, %p207_p7  ;;  %s219_s11 = sshll.u32 %s11300_s10, 4  ;;  %s11393_s11 = int_to_ptr.vmem [resolvable:$true] %s219_s11 }
   0xe   : > { %s11301_s13 = smov [#allocation9]   ;;  %s11142_s17 = scalar_lea.hbm %s16003_s1, 9216 }
   0xf   : > { %p10792_p9 = pneg %p11389_p8  ;;  %s232_s14 = sshll.u32 %s11301_s13, 4  ;;  %s11404_s14 = int_to_ptr.vmem [resolvable:$true] %s232_s14 }
  0x10   : > { %p11143_p12 = scmp.ne.s32.totalorder %s16003_s1, %s11142_s17  ;;  %p11149_p5 = scmp.lt.u32.totalorder %s11142_s17, %s16003_s1 }
  0x11   : > { %p11400_p11 = pnand %p10792_p9, %p16010_p1 }
  0x13   : > { %p11144_p13 = pneg %p11400_p11 }
  0x15   : > { %p11145_p0 = pnand %p11144_p13, %p11143_p12 }
  0x17   : > { %p11146_p3 = pneg %p11145_p0 }
  0x19   : > { %p11151_p7 = pnand %p11149_p5, %p11146_p3 }
  0x1b   : > { %11154 = shalt.err (!%p11151_p7)
}
  0x1c   : > { %s11155_s22 = scalar_lea.vmem %s11393_s11, 9216  ;;  %p11163_p2 = scmp.lt.s32.totalorder %s11393_s11, %s11393_s11 }
  0x1d   : > { %p11156_p9 = scmp.ne.s32.totalorder %s11393_s11, %s11155_s22  ;;  %p11164_p12 = scmp.lt.s32.totalorder %s11155_s22, %s11155_s22 }
  0x1f   : > { %p11158_p10 = pnand %p11156_p9, %p11144_p13  ;;  %p11165_p0 = por %p11164_p12, %p11163_p2 }
  0x21   : > { %p11159_p1 = pneg %p11158_p10 }
  0x23   : > { %p11166_p6 = pnand %p11165_p0, %p11159_p1 }
  0x25   : > { %11169 = shalt.err (!%p11166_p6)
}
  0x26   : > { %s16011_s23 = smov 64   ;;  %s11303_s29 = smov 4  }
  0x27   : > { %10795 = dma.hbm_to_vmem [thread:$0]  (!%p11400_p11), %s16003_s1, 9216, %s11393_s11, [#allocation8], %s16011_s23, %s16011_s23, %s11303_s29  }
  0x28   : > { %s11170_s17 = scalar_lea.hbm %s16004_s2, 9216 }
  0x29   : > { %p11171_p1 = scmp.ne.s32.totalorder %s16004_s2, %s11170_s17  ;;  %p11177_p10 = scmp.lt.u32.totalorder %s11170_s17, %s16004_s2 }
  0x2b   : > { %p11173_p2 = pnand %p11171_p1, %p11144_p13 }
  0x2d   : > { %p11174_p6 = pneg %p11173_p2 }
  0x2f   : > { %p11179_p3 = pnand %p11177_p10, %p11174_p6 }
  0x31   : > { %11182 = shalt.err (!%p11179_p3)
}
  0x32   : > { %s11183_s11 = scalar_lea.vmem %s11404_s14, 9216  ;;  %p11191_p12 = scmp.lt.s32.totalorder %s11404_s14, %s11404_s14 }
  0x33   : > { %p11184_p5 = scmp.ne.s32.totalorder %s11404_s14, %s11183_s11  ;;  %p11192_p0 = scmp.lt.s32.totalorder %s11183_s11, %s11183_s11 }
  0x35   : > { %p11186_p7 = pnand %p11184_p5, %p11144_p13  ;;  %p11193_p1 = por %p11192_p0, %p11191_p12 }
  0x37   : > { %p11187_p9 = pneg %p11186_p7 }
  0x39   : > { %p11194_p2 = pnand %p11193_p1, %p11187_p9 }
  0x3b   : > { %11197 = shalt.err (!%p11194_p2)
}
  0x3c   : > { %10798 = dma.hbm_to_vmem [thread:$0]  (!%p11400_p11), %s16004_s2, 9216, %s11404_s14, [#allocation8], %s16011_s23, %s16011_s23, %s11303_s29  }
  0x3d   : > { %s11465_s12 = sadd.s32 1, %s11298_s27   ;;  %s31_s13 = sadd.s32 1, %s11294_s26 }
  0x3e   : > { %s28_s15 = ssub.s32 %s11298_s27, %s11465_s12  ;;  %p38_p13 = scmp.ne.s32.totalorder %s11294_s26, %s11290_s25 }
  0x3f   : > { %p29_p6 = scmp.eq.s32.totalorder %s28_s15, 0  ;;  %p39_p10 = scmp.eq.s32.totalorder %s11298_s27, 0 }
  0x40   : > { %p16260_p3 = scmp.eq.s32.totalorder %s11370_s28, 1  ;;  %p10809_p7 = scmp.lt.s32.totalorder %s11298_s27, 2 }
  0x41   : > { %s11481_s17 = scalar_select %p29_p6, %s11294_s26, %s31_s13  }
  0x42   : > { %p11475_p5 = por %p16260_p3, %p38_p13  ;;  %p40_p9 = por %p39_p10, %p38_p13 }
  0x43   : > { %s258_s18 = sand.u32 1, %s11294_s26   ;;  %s9658_s14 = sshll.u32 %s11298_s27, 11 }
  0x44   : > { %s16261_s16 = scalar_select %p11475_p5, 1, 0 }
  0x45   : > { %s9081_s19 = sshll.u32 %s258_s18, 7  ;;  %s11488_s11 = scalar_lea.hbm %s16002_s0, %s9658_s14 }
  0x46   : > { %s262_s22 = scalar_lea.vmem [#allocation4], %s9081_s19  ;;  %p11492_p11 = pnand %p10809_p7, %p40_p9 }
  0x47   : > { %s269_s10 = sshll.u32 %s262_s22, 4  ;;  %s11496_s15 = scalar_lea.sflag [#allocation5], %s258_s18  ;;  %s11490_s10 = int_to_ptr.vmem [resolvable:$true] %s269_s10 }
  0x48   : > { %s11198_s23 = scalar_lea.hbm %s11488_s11, 2048  ;;  %p11200_p0 = pneg %p11492_p11 }
  0x49   : > { %p11199_p12 = scmp.ne.s32.totalorder %s11488_s11, %s11198_s23  ;;  %s11203_s20 = scalar_lea.hbm %s16002_s0, 4096 }
  0x4a   : > { %p11204_p13 = scmp.lt.u32.totalorder %s11488_s11, %s16002_s0  ;;  %p11205_p6 = scmp.lt.u32.totalorder %s11203_s20, %s11198_s23 }
  0x4b   : > { %p11201_p1 = pnand %p11200_p0, %p11199_p12  ;;  %p11207_p3 = scmp.lt.u32.totalorder %s11198_s23, %s11488_s11 }
  0x4c   : > { %p11206_p10 = por %p11205_p6, %p11204_p13 }
  0x4d   : > { %p11202_p2 = pneg %p11201_p1 }
  0x4e   : > { %p11208_p7 = por %p11207_p3, %p11206_p10 }
  0x50   : > { %p11209_p9 = pnand %p11208_p7, %p11202_p2 }
  0x52   : > { %11212 = shalt.err (!%p11209_p9)
}
  0x53   : > { %s11213_s18 = scalar_lea.vmem %s11490_s10, 2048  ;;  %s11304_s19 = smov [#allocation4]  }
  0x54   : > { %p11214_p12 = scmp.ne.s32.totalorder %s11490_s10, %s11213_s18  ;;  %s11218_s14 = sshll.u32 %s11304_s19, 4  ;;  %s11219_s14 = int_to_ptr.vmem [resolvable:$false] %s11218_s14 }
  0x55   : > { %s11220_s21 = scalar_lea.vmem %s11219_s14, 4096  ;;  %p11221_p4 = scmp.lt.s32.totalorder %s11490_s10, %s11219_s14 }
  0x56   : > { %p11216_p1 = pnand %p11214_p12, %p11200_p0  ;;  %p11222_p13 = scmp.lt.s32.totalorder %s11220_s21, %s11213_s18 }
  0x58   : > { %p11217_p5 = pneg %p11216_p1  ;;  %p11223_p6 = por %p11222_p13, %p11221_p4 }
  0x5a   : > { %p11224_p10 = pnand %p11223_p6, %p11217_p5 }
  0x5c   : > { %11227 = shalt.err (!%p11224_p10)
}
  0x5d   : > { %s16263_s23 = smov 64   ;;  %281 = sbr.rel (%p11389_p8) target bundleno = 1352 (0x548), region = 48 }
  0x5e   : > { %10802 = dma.hbm_to_vmem [thread:$0]  (!%p11492_p11), %s11488_s11, 2048, %s11490_s10, %s11496_s15, %s16263_s23, %s16263_s23, %s11303_s29  }
  0x64   : > { %s11530_s20 = sand.u32 1, %s11290_s25   ;;  %p16264_p4 = scmp.ne.s32.totalorder %s16256_s30, 0 }
  0x65   : > { %s9085_s22 = sshll.u32 %s11530_s20, 7  ;;  %s284_s18 = scalar_lea.sflag [#allocation5], %s11530_s20 }
  0x66   : > { %s11534_s19 = scalar_lea.vmem [#allocation4], %s9085_s22 }
  0x67   : > { %11273 = dma.done.wait (%p16264_p4), %s284_s18, 2048  }
  0x68   : > { %11275 = vsyncadd (%p16264_p4), %s284_s18, 4294965248  ;;  %p16265_p5 = scmp.eq.s32.totalorder %s11370_s28, 0 }
  0x6a   : > { %11277 = dma.done.wait (%p16265_p5), [#allocation8], 18432   ;;  %p16266_p8 = pmov %p16265_p5 }
  0x6b   : > { %v11305_v0 = vmov 0   ;;  %v10852_v1 = vld [vmem:[#allocation7 + $0x40] sm:$0xff]   ;;  %v10856_v5 = vld [vmem:[#allocation7 + $0x48] sm:$0xff]   ;;  %v10860_v9 = vld [vmem:[#allocation7 + $0x50] sm:$0xff]   ;;  %vm339_vm0 = vsmask.f32 7950 }
  0x6c   : > { %11279 = vsyncadd (%p16266_p8), [#allocation8], 4294948864  ;;  %329 = vst [vmem:[#allocation2 + $0x8] sm:$0xf] %v11305_v0  ;;  %v10853_v2 = vld [vmem:[#allocation7 + $0xc0] sm:$0xff]   ;;  %9740 = vmatprep.subr.bf16.mxu0 %v10852_v1  ;;  %v10857_v6 = vld [vmem:[#allocation7 + $0xc8] sm:$0xff]  }
  0x6d   : > { %330 = vst [vmem:[#allocation2 + $0xc] sm:$0xf] %v11305_v0  ;;  %328 = vst [vmem:[#allocation2 + $0x4] sm:$0xf] %v11305_v0  ;;  %v10854_v3 = vld [vmem:[#allocation7] sm:$0xff]   ;;  %9852 = vmatprep.subr.bf16.mxu1 %v10853_v2  ;;  %v10858_v7 = vld [vmem:[#allocation7 + $0x8] sm:$0xff]  }
  0x6e   : > { %331 = vst [vmem:[#allocation2 + $0x10] sm:$0xf] %v11305_v0  ;;  %334 = vst [vmem:[#allocation2 + $0x158] sm:$0xf] %v11305_v0  ;;  %v10855_v4 = vld [vmem:[#allocation7 + $0x80] sm:$0xff]   ;;  %9741 = vmatpush3.bf16.msra.mxu0 %v10854_v3  ;;  %v10859_v8 = vld [vmem:[#allocation7 + $0x88] sm:$0xff]  }
  0x6f   : > { %335 = vst [vmem:[#allocation2 + $0x15c] sm:$0xf] %v11305_v0  ;;  %336 = vst [vmem:[#allocation2 + $0x160] sm:$0xf] %v11305_v0  ;;  %9853 = vmatpush3.bf16.msra.mxu1 %v10855_v4  ;;  %9742 = vmatprep.subr.bf16.mxu0 %v10856_v5  ;;  %v10861_v10 = vld [vmem:[#allocation7 + $0xd0] sm:$0xff]   ;;  %v10864_v13 = vld [vmem:[#allocation7 + $0x58] sm:$0xff]  }
  0x70   : > { %337 = vst [vmem:[#allocation2 + $0x164] sm:$0xf] %v11305_v0  ;;  %453 = vst [vmem:[#allocation3 + $0x4] sm:$0xf] %v11305_v0  ;;  %9854 = vmatprep.subr.bf16.mxu1 %v10857_v6  ;;  %v10862_v11 = vld [vmem:[#allocation7 + $0x10] sm:$0xff]   ;;  %v10865_v14 = vld [vmem:[#allocation7 + $0xd8] sm:$0xff]  }
  0x71   : > { %454 = vst [vmem:[#allocation3 + $0x8] sm:$0xf] %v11305_v0  ;;  %455 = vst [vmem:[#allocation3 + $0xc] sm:$0xf] %v11305_v0  ;;  %v10863_v12 = vld [vmem:[#allocation7 + $0x90] sm:$0xff]   ;;  %v10866_v15 = vld [vmem:[#allocation7 + $0x18] sm:$0xff]  }
  0x72   : > { %456 = vst [vmem:[#allocation3 + $0x10] sm:$0xf] %v11305_v0  ;;  %459 = vst [vmem:[#allocation3 + $0x158] sm:$0xf] %v11305_v0  ;;  %9743 = vmatpush3.bf16.msra.mxu0 %v10858_v7  ;;  %v10867_v16 = vld [vmem:[#allocation7 + $0x98] sm:$0xff]   ;;  %v10868_v17 = vld [vmem:[#allocation7 + $0x60] sm:$0xff]  }
  0x73   : > { %460 = vst [vmem:[#allocation3 + $0x15c] sm:$0xf] %v11305_v0  ;;  %461 = vst [vmem:[#allocation3 + $0x160] sm:$0xf] %v11305_v0  ;;  %9855 = vmatpush3.bf16.msra.mxu1 %v10859_v8  ;;  %9744 = vmatprep.subr.bf16.mxu0 %v10860_v9  ;;  %v10869_v18 = vld [vmem:[#allocation7 + $0xe0] sm:$0xff]   ;;  %v10872_v21 = vld [vmem:[#allocation7 + $0x68] sm:$0xff]  }
  0x74   : > { %462 = vst [vmem:[#allocation3 + $0x164] sm:$0xf] %v11305_v0  ;;  %9856 = vmatprep.subr.bf16.mxu1 %v10861_v10  ;;  %v10870_v19 = vld [vmem:[#allocation7 + $0x20] sm:$0xff]   ;;  %vm338_vm1 = vcmask 1043459   ;;  %v10873_v22 = vld [vmem:[#allocation7 + $0xe8] sm:$0xff]   ;;  %v16267_v25 = vmov 0 }
  0x75   : > { %v10871_v20 = vld [vmem:[#allocation7 + $0xa0] sm:$0xff]   ;;  %v10874_v23 = vld [vmem:[#allocation7 + $0x28] sm:$0xff]   ;;  %vm396_vm2 = vsmask.f32 256  ;;  %vm11545_vm3 = vmand %vm338_vm1, %vm339_vm0  ;;  %vm684_vm4 = vsmask.f32 4368 }
  0x76   : > { %9745 = vmatpush3.bf16.msra.mxu0 %v10862_v11  ;;  %v10875_v24 = vld [vmem:[#allocation7 + $0xa8] sm:$0xff]   ;;  %v16268_v25 = vsel %vm11545_vm3, 4294967295, %v16267_v25  ;;  %v10876_v26 = vld [vmem:[#allocation7 + $0x70] sm:$0xff]   ;;  %v10880_v30 = vld [vmem:[#allocation7 + $0x78] sm:$0xff]   ;;  %vm1054_vm5 = vsmask.f32 3328 }
  0x77   : > { %9857 = vmatpush3.bf16.msra.mxu1 %v10863_v12  ;;  %9746 = vmatprep.subr.bf16.mxu0 %v10864_v13  ;;  %16269 = vst [vmem:[#allocation14_spill] sm:$0xff] %v16268_v25  ;;  %v10877_v27 = vld [vmem:[#allocation7 + $0xf0] sm:$0xff]   ;;  %v10881_v31 = vld [vmem:[#allocation7 + $0xf8] sm:$0xff]   ;;  %vm1055_vm6 = vsmask.f32 7440  ;;  %vm395_vm7 = vcmask 1040384   ;;  %vm11561_vm9 = vmor %vm396_vm2, %vm684_vm4 }
  0x78   : > { %9858 = vmatprep.subr.bf16.mxu1 %v10865_v14  ;;  %v10878_v28 = vld [vmem:[#allocation7 + $0x30] sm:$0xff]   ;;  %v10882_v32 = vld [vmem:[#allocation7 + $0x38] sm:$0xff]   ;;  %v344_v36 = vld [vmem:[#allocation2 + $0x18] sm:$0x8]  ;;  %v16270_v42 = vmov 0  ;;  %s9088_s15 = sshll.u32 %s11530_s20, 8 }
  0x79   : > { %v10879_v29 = vld [vmem:[#allocation7 + $0xb0] sm:$0xff]   ;;  %v10883_v33 = vld [vmem:[#allocation7 + $0xb8] sm:$0xff]   ;;  %v571_v41 = vld [vmem:[%s11534_s19] sm:$0xff]   ;;  %v345_v45 = vsel %vm11545_vm3, 0, %v344_v36  ;;  %s15827_s23 = scalar_lea.vmem [#allocation10], %s9088_s15  ;;  %s9691_s22 = sshll.u32 %s11370_s28, 12 }
  0x7a   : > { %9747 = vmatpush3.bf16.msra.mxu0 %v10866_v15  ;;  %v637_v34 = vld [vmem:[#allocation2 + $0x8] sm:$0xf]  ;;  %v638_v35 = vld [vmem:[#allocation2 + $0xc] sm:$0xf]  ;;  %vm11551_vm8 = vmand %vm395_vm7, %vm396_vm2  ;;  %604 = vst [vmem:[#allocation2 + $0x1c] sm:$0xff] %v571_v41   ;;  %s8984_s18 = sshll.u32 %s15827_s23, 4  ;;  %s15952_s9 = scalar_lea.hbm %s16009_s7, %s9691_s22  ;;  %s15954_s18 = int_to_ptr.vmem [resolvable:$true] %s8984_s18 }
  0x7b   : > { %9859 = vmatpush3.bf16.msra.mxu1 %v10867_v16  ;;  %9748 = vmatprep.subr.bf16.mxu0 %v10868_v17  ;;  %v692_v37 = vshrl.u32 %v637_v34, 16  ;;  %v695_v38 = vshll.u32 %v637_v34, 16  ;;  %v701_v39 = vshrl.u32 %v638_v35, 16  ;;  %v704_v40 = vshll.u32 %v638_v35, 16  ;;  %v10885_v43 = vld [vmem:[#allocation7 + $0x140] sm:$0xff]   ;;  %v573_v60 = vld [vmem:[%s11534_s19 + $0x8] sm:$0xff]   ;;  %vm11582_vm10 = vmor %vm1054_vm5, %vm1055_vm6 }
  0x7c   : > { %9860 = vmatprep.subr.bf16.mxu1 %v10869_v18  ;;  %v16271_v42 = vsel %vm11551_vm8, 4294967295, %v16270_v42  ;;  %v9153_v44 = vcombine.low %v637_v34, %v638_v35  ;;  %v341_v46 = vld [vmem:[#allocation2 + $0x4] sm:$0x8]  ;;  %v398_v47 = vld [vmem:[#allocation2 + $0x10] sm:$0x1]  ;;  %606 = vst [vmem:[#allocation2 + $0x30] sm:$0xff] %v573_v60  }
  0x7d   : > { %16272 = vst [vmem:[#allocation15_spill] sm:$0xff] %v16271_v42  ;;  %v694_v48 = vrot.slane %v692_v37, 7  ;;  %v703_v49 = vrot.slane %v701_v39, 7  ;;  %v1057_v50 = vrot.slane %v692_v37, 4  ;;  %v1058_v51 = vrot.slane %v695_v38, 5  ;;  %v575_v4 = vld [vmem:[%s11534_s19 + $0x10] sm:$0xff]  }
  0x7e   : > { %9749 = vmatpush3.bf16.msra.mxu0 %v10870_v19  ;;  %346 = vst [vmem:[#allocation2 + $0x18] sm:$0x8] %v345_v45  ;;  %v11557_v52 = vrot.slane %v704_v40, 5  ;;  %v1063_v53 = vrot.slane %v701_v39, 4  ;;  %3842 = vmatprep.mubr.bf16.mxu0 %v9153_v44  ;;  %v342_v55 = vsel %vm11545_vm3, 0, %v341_v46  ;;  %v399_v56 = vsel %vm11551_vm8, 0, %v398_v47 }
  0x7f   : > { %9861 = vmatpush3.bf16.msra.mxu1 %v10871_v20  ;;  %9750 = vmatprep.subr.bf16.mxu0 %v10872_v21  ;;  %v699_v57 = vrot.slane %v694_v48, 4  ;;  %v706_v58 = vor.u32 %v704_v40, %v703_v49  ;;  %v1059_v59 = vor.u32 %v1058_v51, %v1057_v50  ;;  %343 = vst [vmem:[#allocation2 + $0x4] sm:$0x8] %v342_v55  ;;  %400 = vst [vmem:[#allocation2 + $0x10] sm:$0x1] %v399_v56  ;;  %v10886_v55 = vld [vmem:[#allocation7 + $0x100] sm:$0xff]  }
  0x80   : > { %9862 = vmatprep.subr.bf16.mxu1 %v10873_v22  ;;  %v1064_v61 = vor.u32 %v1063_v53, %v11557_v52  ;;  %v347_v62 = vld [vmem:[#allocation2 + $0x2c] sm:$0x8]  ;;  %v401_v63 = vld [vmem:[#allocation2 + $0x24] sm:$0x1]  ;;  %v350_v0 = vld [vmem:[#allocation2 + $0x40] sm:$0x8]  ;;  %v697_v10 = vor.u32 %v695_v38, %v694_v48 }
  0x81   : > { %v11571_v1 = vrot.slane %v1059_v59, 4  ;;  %v348_v2 = vsel %vm11545_vm3, 0, %v347_v62  ;;  %v402_v3 = vsel %vm11551_vm8, 0, %v401_v63  ;;  %v404_v5 = vld [vmem:[#allocation2 + $0x38] sm:$0x1]  ;;  %v351_v8 = vsel %vm11545_vm3, 0, %v350_v0 }
  0x82   : > { %9751 = vmatpush3.bf16.msra.mxu0 %v10874_v23  ;;  %v11578_v6 = vrot.slane %v1064_v61, 4  ;;  %349 = vst [vmem:[#allocation2 + $0x2c] sm:$0x8] %v348_v2  ;;  %403 = vst [vmem:[#allocation2 + $0x24] sm:$0x1] %v402_v3  ;;  %v405_v9 = vsel %vm11551_vm8, 0, %v404_v5  ;;  %v707_v13 = vsel %vm11561_vm9, %v699_v57, %v706_v58 }
  0x83   : > { %9863 = vmatpush3.bf16.msra.mxu1 %v10875_v24  ;;  %9752 = vmatprep.subr.bf16.mxu0 %v10876_v26  ;;  %608 = vst [vmem:[#allocation2 + $0x44] sm:$0xff] %v575_v4   ;;  %v1282_v11 = vld [vmem:[#allocation2 + $0x1c] sm:$0xf]  ;;  %v11590_v12 = vld [vmem:[#allocation2 + $0x20] sm:$0xf]  ;;  %v1062_v21 = vsel %vm11582_vm10, %v11571_v1, %v11557_v52  ;;  %v577_v0 = vld [vmem:[%s11534_s19 + $0x18] sm:$0xff]  }
  0x84   : > { %9864 = vmatprep.subr.bf16.mxu1 %v10877_v27  ;;  %v11594_v14 = vld [vmem:[#allocation2 + $0x1c] sm:$0xf]  ;;  %352 = vst [vmem:[#allocation2 + $0x40] sm:$0x8] %v351_v8  ;;  %406 = vst [vmem:[#allocation2 + $0x38] sm:$0x1] %v405_v9 }
  0x85   : > { %v1281_v15 = vld [vmem:[#allocation2 + $0x18] sm:$0x8]  ;;  %v1335_v16 = vshrl.u32 %v1282_v11, 16  ;;  %v1338_v17 = vshll.u32 %v1282_v11, 16  ;;  %v1344_v18 = vshrl.u32 %v11590_v12, 16  ;;  %v16058_v19 = vshll.u32 %v11590_v12, 16 }
  0x86   : > { %9753 = vmatpush3.bf16.msra.mxu0 %v10878_v28  ;;  %v1330_v20 = vshrl.u32 %v1281_v15, 16  ;;  %v11602_v22 = vld [vmem:[#allocation2 + $0x20] sm:$0xf]  ;;  %v714_v23 = vshrl.u32 %v11594_v14, 16  ;;  %v717_v24 = vshll.u32 %v11594_v14, 16  ;;  %v10889_v63 = vld [vmem:[#allocation7 + $0x148] sm:$0xff]  }
  0x87   : > { %9865 = vmatpush3.bf16.msra.mxu1 %v10879_v29  ;;  %9754 = vmatprep.subr.bf16.mxu0 %v10880_v30  ;;  %v1337_v26 = vrot.slane %v1335_v16, 7  ;;  %v1346_v27 = vrot.slane %v1344_v18, 7  ;;  %v11606_v28 = vrot.slane %v1335_v16, 4  ;;  %v11608_v29 = vrot.slane %v1338_v17, 5  ;;  %v636_v30 = vld [vmem:[#allocation2 + $0x4] sm:$0x8] }
  0x88   : > { %9866 = vmatprep.subr.bf16.mxu1 %v10881_v31  ;;  %v9105_v31 = vrot.slane %v1330_v20, 11  ;;  %v1038_v34 = vld [vmem:[#allocation2 + $0x10] sm:$0x1]  ;;  %v11612_v35 = vrot.slane %v714_v23, 7  ;;  %v723_v41 = vshrl.u32 %v11602_v22, 16  ;;  %v1071_v44 = vrot.slane %v714_v23, 4 }
  0x89   : > { %v1340_v36 = vor.u32 %v1338_v17, %v1337_v26  ;;  %v1342_v37 = vrot.slane %v1337_v26, 4  ;;  %v1349_v38 = vor.u32 %v16058_v19, %v1346_v27  ;;  %v1067_v39 = vshll.u32 %v1038_v34, 16  ;;  %v1284_v45 = vld [vmem:[#allocation2 + $0x2c] sm:$0x8]  ;;  %v11622_v50 = vld [vmem:[#allocation2 + $0x30] sm:$0xf] }
  0x8a   : > { %9755 = vmatpush3.bf16.msra.mxu0 %v10882_v32  ;;  %v11610_v32 = vrot.slane %v1344_v18, 4  ;;  %v1072_v49 = vrot.slane %v717_v24, 5  ;;  %v11624_v51 = vld [vmem:[#allocation2 + $0x34] sm:$0xf]  ;;  %v725_v56 = vrot.slane %v723_v41, 7  ;;  %v1077_v57 = vrot.slane %v723_v41, 4 }
  0x8b   : > { %9867 = vmatpush3.bf16.msra.mxu1 %v10883_v33  ;;  %9964 = vmatprep.subr.bf16.mxu0 %v10885_v43  ;;  %v687_v33 = vshrl.u32 %v636_v30, 16  ;;  %v726_v43 = vshll.u32 %v11602_v22, 16  ;;  %v1341_v46 = vsel %vm11561_vm9, %v9105_v31, %v1340_v36  ;;  %v1350_v47 = vsel %vm11561_vm9, %v1342_v37, %v1349_v38  ;;  %v639_v58 = vld [vmem:[#allocation2 + $0x18] sm:$0x8]  ;;  %v1039_v5 = vld [vmem:[#allocation2 + $0x24] sm:$0x1] }
  0x8c   : > { %v1069_v48 = vrot.slane %v1067_v39, 5  ;;  %v9185_v52 = vcombine.low %v1341_v46, %v1350_v47  ;;  %v9154_v61 = vcombine.low %v11594_v14, %v11602_v22  ;;  %v1352_v62 = vshrl.u32 %v1284_v45, 16  ;;  %610 = vst [vmem:[#allocation2 + $0x58] sm:$0xff] %v577_v0   ;;  %v579_v8 = vld [vmem:[%s11534_s19 + $0x20] sm:$0xff]   ;;  %v10893_v20 = vld [vmem:[#allocation7 + $0x150] sm:$0xff]   ;;  %v581_v26 = vld [vmem:[%s11534_s19 + $0x28] sm:$0xff]  }
  0x8d   : > { %v9089_v40 = vrot.slane %v687_v33, 11  ;;  %v16053_v2 = vshrl.u32 %v11622_v50, 16  ;;  %v16052_v3 = vshll.u32 %v11622_v50, 16  ;;  %v16046_v4 = vshrl.u32 %v11624_v51, 16  ;;  %612 = vst [vmem:[#allocation2 + $0x6c] sm:$0xff] %v579_v8   ;;  %614 = vst [vmem:[#allocation2 + $0x80] sm:$0xff] %v581_v26  }
  0x8e   : > { %v1070_v60 = vsel %vm11582_vm10, %v11578_v6, %v1069_v48  ;;  %4003 = vmatprep.mubr.bf16.mxu1 %v9185_v52  ;;  %v9106_v9 = vrot.slane %v1352_v62, 11  ;;  %v16051_v6 = vshll.u32 %v11624_v51, 16  ;;  %v719_v11 = vor.u32 %v717_v24, %v11612_v35  ;;  %v11645_v18 = vld [vmem:[#allocation2 + $0x30] sm:$0xf]  ;;  %v583_v34 = vld [vmem:[%s11534_s19 + $0x30] sm:$0xff]   ;;  %s8971_s28 = scalar_lea.sflag [#allocation6], %s11530_s20 }
  0x8f   : > { %v698_v53 = vsel %vm11561_vm9, %v9089_v40, %v697_v10  ;;  %v9169_v1 = vcombine.low %v1062_v21, %v1070_v60  ;;  %v709_v10 = vshrl.u32 %v639_v58, 16  ;;  %v1359_v14 = vrot.slane %v16053_v2, 7  ;;  %v644_v39 = vld [vmem:[#allocation2 + $0x34] sm:$0xf]  ;;  %616 = vst [vmem:[#allocation2 + $0x94] sm:$0xff] %v583_v34   ;;  %v10894_v46 = vld [vmem:[#allocation7 + $0x110] sm:$0xff]  }
  0x90   : > { %v9137_v59 = vcombine.low %v698_v53, %v707_v13  ;;  %v10890_v13 = vld [vmem:[#allocation7 + $0x108] sm:$0xff]   ;;  %v1368_v15 = vrot.slane %v16046_v4, 7  ;;  %v721_v16 = vrot.slane %v11612_v35, 4  ;;  %v728_v17 = vor.u32 %v726_v43, %v725_v56  ;;  %v1287_v45 = vld [vmem:[#allocation2 + $0x40] sm:$0x8]  ;;  %s11228_s29 = scalar_lea.vmem %s15954_s18, 4096 }
  0x91   : > { %4004 = vmatmul.mubr.bf16.vlgmr.msra.gmra.mrb[0].mxu1 %v9169_v1  ;;  %v9090_v21 = vrot.slane %v709_v10, 11  ;;  %v1073_v22 = vor.u32 %v1072_v49, %v1071_v44  ;;  %v1075_v23 = vrot.slane %v726_v43, 5  ;;  %v1081_v24 = vshll.u32 %v1039_v5, 16  ;;  %v11665_v53 = vld [vmem:[#allocation2 + $0x44] sm:$0xf]  ;;  %p11229_p11 = scmp.ne.s32.totalorder %s15954_s18, %s11228_s29  ;;  %p16814_p0 = scmp.ne.s32.totalorder %s16261_s16, 0 }
  0x92   : > { %3843 = vmatmul.mubr.bf16.vlgmr.msra.gmra.mrb[0].mxu0 %v9137_v59  ;;  %v1362_v27 = vor.u32 %v16052_v3, %v1359_v14  ;;  %v1364_v30 = vrot.slane %v1359_v14, 4  ;;  %v1371_v31 = vor.u32 %v16051_v6, %v1368_v15  ;;  %v729_v33 = vsel %vm11561_vm9, %v721_v16, %v728_v17  ;;  %v11667_v60 = vld [vmem:[#allocation2 + $0x48] sm:$0xf]  ;;  %v642_v1 = vld [vmem:[#allocation2 + $0x2c] sm:$0x8]  ;;  %s11306_s11 = smov [#allocation10]  }
  0x93   : > { %9965 = vmatpush3.bf16.msra.mxu0 %v10886_v55  ;;  %3850 = vmatprep.mubr.bf16.mxu0 %v9154_v61  ;;  %v720_v35 = vsel %vm11561_vm9, %v9090_v21, %v719_v11  ;;  %v1074_v36 = vrot.slane %v1073_v22, 4  ;;  %v1078_v37 = vor.u32 %v1077_v57, %v1075_v23  ;;  %v1083_v38 = vrot.slane %v1081_v24, 5  ;;  %v10897_v55 = vld [vmem:[#allocation7 + $0x158] sm:$0xff]   ;;  %v1040_v17 = vld [vmem:[#allocation2 + $0x38] sm:$0x1]  ;;  %p11230_p2 = pnand %p11229_p11, %p16814_p0  ;;  %s11232_s10 = sshll.u32 %s11306_s11, 4  ;;  %s11233_s10 = int_to_ptr.vmem [resolvable:$false] %s11232_s10 }
  0x94   : > { %9966 = vmatprep.subr.bf16.mxu0 %v10889_v63  ;;  %v1363_v40 = vsel %vm11561_vm9, %v9106_v9, %v1362_v27  ;;  %v1372_v41 = vsel %vm11561_vm9, %v1364_v30, %v1371_v31  ;;  %v9138_v43 = vcombine.low %v720_v35, %v729_v33  ;;  %v736_v44 = vshrl.u32 %v11645_v18, 16  ;;  %v10898_v11 = vld [vmem:[#allocation7 + $0x118] sm:$0xff]   ;;  %s11234_s13 = scalar_lea.vmem %s11233_s10, 8192  ;;  %p11235_p7 = scmp.lt.s32.totalorder %s15954_s18, %s11233_s10 }
  0x95   : > { %v9186_v47 = vcombine.low %v1363_v40, %v1372_v41  ;;  %v1076_v48 = vsel %vm11582_vm10, %v1074_v36, %v1075_v23  ;;  %v1079_v49 = vrot.slane %v1078_v37, 4  ;;  %v739_v52 = vshll.u32 %v11645_v18, 16  ;;  %v11678_v23 = vld [vmem:[#allocation2 + $0x44] sm:$0xf]  ;;  %v585_v24 = vld [vmem:[%s11534_s19 + $0x38] sm:$0xff]   ;;  %p11231_p3 = pneg %p11230_p2  ;;  %p11236_p9 = scmp.lt.s32.totalorder %s11234_s13, %s11228_s29 }
  0x96   : > { %v738_v56 = vrot.slane %v736_v44, 7  ;;  %v745_v57 = vshrl.u32 %v644_v39, 16  ;;  %v748_v58 = vshll.u32 %v644_v39, 16  ;;  %v1085_v59 = vrot.slane %v736_v44, 4  ;;  %v11683_v33 = vld [vmem:[#allocation2 + $0x48] sm:$0xf] }
  0x97   : > { %9967 = vmatpush3.bf16.msra.mxu0 %v10890_v13  ;;  %4011 = vmatprep.mubr.bf16.mxu1 %v9186_v47  ;;  %v1084_v61 = vsel %vm11582_vm10, %v1079_v49, %v1083_v38  ;;  %v1086_v62 = vrot.slane %v739_v52, 5  ;;  %v9155_v63 = vcombine.low %v11645_v18, %v644_v39  ;;  %v1374_v0 = vshrl.u32 %v1287_v45, 16  ;;  %618 = vst [vmem:[#allocation2 + $0xa8] sm:$0xff] %v585_v24   ;;  %v587_v38 = vld [vmem:[%s11534_s19 + $0x40] sm:$0xff]   ;;  %v407_v24 = vld [vmem:[#allocation2 + $0x4c] sm:$0x1]  ;;  %p11237_p12 = por %p11236_p9, %p11235_p7 }
  0x98   : > { %9968 = vmatprep.subr.bf16.mxu0 %v10893_v20  ;;  %v9170_v5 = vcombine.low %v1076_v48, %v1084_v61  ;;  %v747_v8 = vrot.slane %v745_v57, 7  ;;  %v1091_v9 = vrot.slane %v745_v57, 4  ;;  %v16045_v10 = vshrl.u32 %v11665_v53, 16  ;;  %620 = vst [vmem:[#allocation2 + $0xbc] sm:$0xff] %v587_v38   ;;  %v10901_v44 = vld [vmem:[#allocation7 + $0x160] sm:$0xff]   ;;  %v10905_v38 = vld [vmem:[#allocation7 + $0x168] sm:$0xff]  }
  0x99   : > { %v9107_v13 = vrot.slane %v1374_v0, 11  ;;  %v16040_v14 = vshll.u32 %v11665_v53, 16  ;;  %v16034_v15 = vshrl.u32 %v11667_v60, 16  ;;  %v16039_v16 = vshll.u32 %v11667_v60, 16  ;;  %v353_v57 = vld [vmem:[#allocation2 + $0x54] sm:$0x8]  ;;  %p11238_p1 = pnand %p11237_p12, %p11231_p3 }
  0x9a   : > { %3851 = vmatmul.mubr.bf16.gmra.mrb[4].mxu0 %v9138_v43  ;;  %4012 = vmatmul.mubr.bf16.gmra.mrb[4].mxu1 %v9170_v5  ;;  %v1381_v18 = vrot.slane %v16045_v10, 7  ;;  %v731_v20 = vshrl.u32 %v642_v1, 16  ;;  %v741_v21 = vor.u32 %v739_v52, %v738_v56  ;;  %v743_v22 = vrot.slane %v738_v56, 4  ;;  %v11705_v1 = vld [vmem:[#allocation2 + $0x5c] sm:$0xf] }
  0x9b   : > { %9969 = vmatpush3.bf16.msra.mxu0 %v10894_v46  ;;  %3858 = vmatprep.mubr.bf16.mxu0 %v9155_v63  ;;  %v1390_v26 = vrot.slane %v16034_v15, 7  ;;  %v750_v27 = vor.u32 %v748_v58, %v747_v8  ;;  %v1087_v30 = vor.u32 %v1086_v62, %v1085_v59  ;;  %v1089_v31 = vrot.slane %v748_v58, 5  ;;  %v11701_v58 = vld [vmem:[#allocation2 + $0x58] sm:$0xf]  ;;  %v10902_v59 = vld [vmem:[#allocation7 + $0x120] sm:$0xff]  }
  0x9c   : > { %9970 = vmatprep.subr.bf16.mxu0 %v10897_v55  ;;  %v1384_v34 = vor.u32 %v16040_v14, %v1381_v18  ;;  %v1386_v35 = vrot.slane %v1381_v18, 4  ;;  %v9091_v36 = vrot.slane %v731_v20, 11  ;;  %v1095_v37 = vshll.u32 %v1040_v17, 16  ;;  %v589_v5 = vld [vmem:[%s11534_s19 + $0x48] sm:$0xff]   ;;  %v645_v17 = vld [vmem:[#allocation2 + $0x40] sm:$0x8] }
  0x9d   : > { %v1393_v39 = vor.u32 %v16039_v16, %v1390_v26  ;;  %v751_v40 = vsel %vm11561_vm9, %v743_v22, %v750_v27  ;;  %v1088_v41 = vrot.slane %v1087_v30, 4  ;;  %v1092_v43 = vor.u32 %v1091_v9, %v1089_v31  ;;  %622 = vst [vmem:[#allocation2 + $0xd0] sm:$0xff] %v589_v5   ;;  %v591_v26 = vld [vmem:[%s11534_s19 + $0x50] sm:$0xff]  }
  0x9e   : > { %v1385_v45 = vsel %vm11561_vm9, %v9107_v13, %v1384_v34  ;;  %v742_v46 = vsel %vm11561_vm9, %v9091_v36, %v741_v21  ;;  %v1097_v47 = vrot.slane %v1095_v37, 5  ;;  %v758_v48 = vshrl.u32 %v11678_v23, 16  ;;  %624 = vst [vmem:[#allocation2 + $0xe4] sm:$0xff] %v591_v26  }
  0x9f   : > { %9971 = vmatpush3.bf16.msra.mxu0 %v10898_v11  ;;  %v1394_v49 = vsel %vm11561_vm9, %v1386_v35, %v1393_v39  ;;  %v9139_v52 = vcombine.low %v742_v46, %v751_v40  ;;  %v1090_v55 = vsel %vm11582_vm10, %v1088_v41, %v1089_v31  ;;  %v1093_v56 = vrot.slane %v1092_v43, 4 }
  0xa0   : > { %9972 = vmatprep.subr.bf16.mxu0 %v10901_v44  ;;  %v9187_v61 = vcombine.low %v1385_v45, %v1394_v49  ;;  %v760_v62 = vrot.slane %v758_v48, 7  ;;  %v761_v63 = vshll.u32 %v11678_v23, 16  ;;  %v767_v0 = vshrl.u32 %v11683_v33, 16  ;;  %v10906_v44 = vld [vmem:[#allocation7 + $0x128] sm:$0xff]  }
  0xa1   : > { %v1098_v8 = vsel %vm11582_vm10, %v1093_v56, %v1097_v47  ;;  %v770_v9 = vshll.u32 %v11683_v33, 16  ;;  %v1099_v11 = vrot.slane %v758_v48, 4  ;;  %v9156_v13 = vcombine.low %v11678_v23, %v11683_v33  ;;  %v11719_v33 = vld [vmem:[#allocation2 + $0x58] sm:$0xf]  ;;  %v11730_v48 = vld [vmem:[#allocation2 + $0x5c] sm:$0xf] }
  0xa2   : > { %3859 = vmatmul.mubr.bf16.gmra.mrb[8].mxu0 %v9139_v52  ;;  %4019 = vmatprep.mubr.bf16.mxu1 %v9187_v61  ;;  %v9171_v18 = vcombine.low %v1090_v55, %v1098_v8  ;;  %v769_v20 = vrot.slane %v767_v0, 7  ;;  %v1100_v21 = vrot.slane %v761_v63, 5  ;;  %v1105_v22 = vrot.slane %v767_v0, 4  ;;  %v593_v52 = vld [vmem:[%s11534_s19 + $0x58] sm:$0xff]  }
  0xa3   : > { %9973 = vmatpush3.bf16.msra.mxu0 %v10902_v59  ;;  %3866 = vmatprep.mubr.bf16.mxu0 %v9156_v13  ;;  %v354_v27 = vsel %vm11545_vm3, 0, %v353_v57  ;;  %v16033_v30 = vshrl.u32 %v11701_v58, 16  ;;  %v16028_v31 = vshll.u32 %v11701_v58, 16  ;;  %v16022_v23 = vshrl.u32 %v11705_v1, 16  ;;  %v356_v61 = vld [vmem:[#allocation2 + $0x68] sm:$0x8] }
  0xa4   : > { %4020 = vmatmul.mubr.bf16.gmra.mrb[8].mxu1 %v9171_v18  ;;  %355 = vst [vmem:[#allocation2 + $0x54] sm:$0x8] %v354_v27  ;;  %v16027_v34 = vshll.u32 %v11705_v1, 16  ;;  %v753_v35 = vshrl.u32 %v645_v17, 16  ;;  %v763_v36 = vor.u32 %v761_v63, %v760_v62  ;;  %v765_v37 = vrot.slane %v760_v62, 4  ;;  %9974 = vmatprep.subr.bf16.mxu0 %v10905_v38  ;;  %626 = vst [vmem:[#allocation2 + $0xf8] sm:$0xff] %v593_v52  }
  0xa5   : > { %v1403_v39 = vrot.slane %v16033_v30, 7  ;;  %v1412_v40 = vrot.slane %v16022_v23, 7  ;;  %v772_v41 = vor.u32 %v770_v9, %v769_v20  ;;  %v408_v43 = vsel %vm11551_vm8, 0, %v407_v24  ;;  %v595_v62 = vld [vmem:[%s11534_s19 + $0x60] sm:$0xff]   ;;  %v11752_v18 = vld [vmem:[#allocation2 + $0x6c] sm:$0xf] }
  0xa6   : > { %v9092_v45 = vrot.slane %v753_v35, 11  ;;  %409 = vst [vmem:[#allocation2 + $0x4c] sm:$0x1] %v408_v43  ;;  %v1101_v46 = vor.u32 %v1100_v21, %v1099_v11  ;;  %v11728_v47 = vrot.slane %v770_v9, 5  ;;  %v780_v49 = vshrl.u32 %v11719_v33, 16  ;;  %628 = vst [vmem:[#allocation2 + $0x10c] sm:$0xff] %v595_v62  }
  0xa7   : > { %v11736_v55 = vor.u32 %v16028_v31, %v1403_v39  ;;  %v1408_v56 = vrot.slane %v1403_v39, 4  ;;  %v1415_v57 = vor.u32 %v16027_v34, %v1412_v40  ;;  %v773_v59 = vsel %vm11561_vm9, %v765_v37, %v772_v41  ;;  %9975 = vmatpush3.bf16.msra.mxu0 %v10906_v44  ;;  %v11754_v20 = vld [vmem:[#allocation2 + $0x70] sm:$0xf]  ;;  %v410_v27 = vld [vmem:[#allocation2 + $0x60] sm:$0x1] }
  0xa8   : > { %v764_v63 = vsel %vm11561_vm9, %v9092_v45, %v763_v36  ;;  %v11745_v0 = vrot.slane %v1101_v46, 4  ;;  %v1106_v5 = vor.u32 %v1105_v22, %v11728_v47  ;;  %v782_v8 = vrot.slane %v780_v49, 7  ;;  %v10909_v35 = vld [vmem:[#allocation7 + $0x170] sm:$0xff]   ;;  %v11935_v34 = vld [vmem:[#allocation2 + $0xac] sm:$0xf] }
  0xa9   : > { %v1416_v9 = vsel %vm11561_vm9, %v1408_v56, %v1415_v57  ;;  %v9140_v11 = vcombine.low %v764_v63, %v773_v59  ;;  %v783_v13 = vshll.u32 %v11719_v33, 16  ;;  %v789_v17 = vshrl.u32 %v11730_v48, 16  ;;  %v10910_v41 = vld [vmem:[#allocation7 + $0x130] sm:$0xff]   ;;  %9976 = vmatprep.subr.bf16.mxu0 %v10909_v35  ;;  %v10912_v35 = vld [vmem:[#allocation7 + $0x180] sm:$0xff]  }
  0xaa   : > { %v1104_v21 = vsel %vm11582_vm10, %v11745_v0, %v11728_v47  ;;  %v1107_v22 = vrot.slane %v1106_v5, 4  ;;  %v792_v24 = vshll.u32 %v11730_v48, 16  ;;  %v1113_v26 = vrot.slane %v780_v49, 4  ;;  %v10929_v31 = vld [vmem:[#allocation7 + $0x1b0] sm:$0xff]  }
  0xab   : > { %v1290_v36 = vld [vmem:[#allocation2 + $0x54] sm:$0x8]  ;;  %3867 = vmatmul.mubr.bf16.gmra.mrb[12].mxu0 %v9140_v11  ;;  %v791_v37 = vrot.slane %v789_v17, 7  ;;  %v1114_v38 = vrot.slane %v783_v13, 5  ;;  %v11761_v39 = vrot.slane %v789_v17, 4  ;;  %v9157_v40 = vcombine.low %v11719_v33, %v11730_v48 }
  0xac   : > { %v1396_v43 = vshrl.u32 %v1290_v36, 16  ;;  %v357_v44 = vsel %vm11545_vm3, 0, %v356_v61  ;;  %v16021_v45 = vshrl.u32 %v11752_v18, 16  ;;  %v16020_v46 = vshll.u32 %v11752_v18, 16  ;;  %v648_v47 = vld [vmem:[#allocation2 + $0x54] sm:$0x8]  ;;  %9977 = vmatpush3.bf16.msra.mxu0 %v10910_v41 }
  0xad   : > { %v1041_v49 = vld [vmem:[#allocation2 + $0x4c] sm:$0x1]  ;;  %3874 = vmatprep.mubr.bf16.mxu0 %v9157_v40  ;;  %358 = vst [vmem:[#allocation2 + $0x68] sm:$0x8] %v357_v44  ;;  %v16014_v52 = vshrl.u32 %v11754_v20, 16  ;;  %v16015_v56 = vshll.u32 %v11754_v20, 16  ;;  %v785_v33 = vor.u32 %v783_v13, %v782_v8  ;;  %v794_v11 = vor.u32 %v792_v24, %v791_v37 }
  0xae   : > { %v775_v57 = vshrl.u32 %v648_v47, 16  ;;  %v10911_v48 = vld [vmem:[#allocation7 + $0x1c0] sm:$0xff]   ;;  %v9108_v59 = vrot.slane %v1396_v43, 11  ;;  %v1109_v62 = vshll.u32 %v1041_v49, 16  ;;  %v1425_v61 = vrot.slane %v16021_v45, 7 }
  0xaf   : > { %v787_v63 = vrot.slane %v782_v8, 4  ;;  %v1434_v0 = vrot.slane %v16014_v52, 7  ;;  %v411_v17 = vsel %vm11551_vm8, 0, %v410_v27  ;;  %10076 = vmatprep.subr.bf16.mxu1 %v10911_v48  ;;  %v652_v41 = vld [vmem:[#allocation2 + $0x6c] sm:$0xf]  ;;  %v11794_v48 = vrot.slane %v792_v24, 5 }
  0xb0   : > { %v9093_v5 = vrot.slane %v775_v57, 11  ;;  %v1407_v13 = vsel %vm11561_vm9, %v9108_v59, %v11736_v55  ;;  %v1111_v36 = vrot.slane %v1109_v62, 5  ;;  %v11782_v40 = vor.u32 %v16020_v46, %v1425_v61  ;;  %412 = vst [vmem:[#allocation2 + $0x60] sm:$0x1] %v411_v17  ;;  %v11790_v47 = vld [vmem:[#allocation2 + $0x70] sm:$0xf]  ;;  %10077 = vmatpush3.bf16.msra.mxu1 %v10912_v35 }
  0xb1   : > { %v1430_v8 = vrot.slane %v1425_v61, 4  ;;  %v9188_v43 = vcombine.low %v1407_v13, %v1416_v9  ;;  %v1437_v37 = vor.u32 %v16015_v56, %v1434_v0  ;;  %v795_v44 = vsel %vm11561_vm9, %v787_v63, %v794_v11  ;;  %v359_v9 = vld [vmem:[#allocation2 + $0x7c] sm:$0x8]  ;;  %v11796_v59 = vld [vmem:[#allocation2 + $0x80] sm:$0xf]  ;;  %v10923_v45 = vld [vmem:[#allocation7 + $0x1e0] sm:$0xff]  }
  0xb2   : > { %v786_v27 = vsel %vm11561_vm9, %v9093_v5, %v785_v33  ;;  %v1112_v55 = vsel %vm11582_vm10, %v1107_v22, %v1111_v36  ;;  %v1115_v57 = vor.u32 %v1114_v38, %v1113_v26  ;;  %v10913_v62 = vld [vmem:[#allocation7 + $0x1c8] sm:$0xff]   ;;  %v802_v63 = vshrl.u32 %v652_v41, 16  ;;  %v11800_v5 = vld [vmem:[#allocation2 + $0x84] sm:$0xf] }
  0xb3   : > { %v9141_v49 = vcombine.low %v786_v27, %v795_v44  ;;  %4027 = vmatprep.mubr.bf16.mxu1 %v9188_v43  ;;  %v9172_v33 = vcombine.low %v1104_v21, %v1112_v55  ;;  %v1438_v61 = vsel %vm11561_vm9, %v1430_v8, %v1437_v37  ;;  %v805_v0 = vshll.u32 %v652_v41, 16  ;;  %10078 = vmatprep.subr.bf16.mxu1 %v10913_v62  ;;  %v597_v17 = vld [vmem:[%s11534_s19 + $0x68] sm:$0xff]   ;;  %v10917_v56 = vld [vmem:[#allocation7 + $0x190] sm:$0xff]  }
  0xb4   : > { %v1293_v11 = vld [vmem:[#allocation2 + $0x68] sm:$0x8]  ;;  %v1116_v22 = vrot.slane %v1115_v57, 4  ;;  %v1120_v24 = vor.u32 %v11761_v39, %v11794_v48  ;;  %v811_v26 = vshrl.u32 %v11790_v47, 16  ;;  %v814_v38 = vshll.u32 %v11790_v47, 16  ;;  %630 = vst [vmem:[#allocation2 + $0x120] sm:$0xff] %v597_v17  }
  0xb5   : > { %3875 = vmatmul.mubr.bf16.gmra.mrb[16].mxu0 %v9141_v49  ;;  %4028 = vmatmul.mubr.bf16.gmra.mrb[12].mxu1 %v9172_v33  ;;  %v1418_v21 = vshrl.u32 %v1293_v11, 16  ;;  %v804_v35 = vrot.slane %v802_v63, 7  ;;  %v1127_v13 = vrot.slane %v802_v63, 4  ;;  %v1128_v36 = vrot.slane %v805_v0, 5  ;;  %v651_v8 = vld [vmem:[#allocation2 + $0x68] sm:$0x8] }
  0xb6   : > { %v1118_v43 = vsel %vm11582_vm10, %v1116_v22, %v11794_v48  ;;  %v1121_v37 = vrot.slane %v1120_v24, 4  ;;  %v813_v27 = vrot.slane %v811_v26, 7  ;;  %v11810_v39 = vrot.slane %v811_v26, 4  ;;  %v10915_v44 = vld [vmem:[#allocation7 + $0x188] sm:$0xff]   ;;  %v10916_v63 = vld [vmem:[#allocation7 + $0x1d0] sm:$0xff]  }
  0xb7   : > { %v9109_v55 = vrot.slane %v1418_v21, 11  ;;  %v1042_v49 = vld [vmem:[#allocation2 + $0x60] sm:$0x1]  ;;  %v9158_v57 = vcombine.low %v652_v41, %v11790_v47  ;;  %v360_v62 = vsel %vm11545_vm3, 0, %v359_v9  ;;  %v16016_v33 = vshrl.u32 %v11796_v59, 16  ;;  %10079 = vmatpush3.bf16.msra.mxu1 %v10915_v44 }
  0xb8   : > { %v1123_v11 = vshll.u32 %v1042_v49, 16  ;;  %361 = vst [vmem:[#allocation2 + $0x7c] sm:$0x8] %v360_v62  ;;  %v16019_v17 = vshll.u32 %v11796_v59, 16  ;;  %v16017_v48 = vshrl.u32 %v11800_v5, 16  ;;  %v16018_v22 = vshll.u32 %v11800_v5, 16  ;;  %10080 = vmatprep.subr.bf16.mxu1 %v10916_v63 }
  0xb9   : > { %v1429_v24 = vsel %vm11561_vm9, %v9109_v55, %v11782_v40  ;;  %3882 = vmatprep.mubr.bf16.mxu0 %v9158_v57  ;;  %v1447_v41 = vrot.slane %v16016_v33, 7  ;;  %v797_v47 = vshrl.u32 %v651_v8, 16  ;;  %v807_v9 = vor.u32 %v805_v0, %v804_v35  ;;  %v413_v26 = vld [vmem:[#allocation2 + $0x74] sm:$0x1]  ;;  %v655_v33 = vld [vmem:[#allocation2 + $0x80] sm:$0xf] }
  0xba   : > { %v9189_v21 = vcombine.low %v1429_v24, %v1438_v61  ;;  %v1125_v49 = vrot.slane %v1123_v11, 5  ;;  %v1456_v62 = vrot.slane %v16017_v48, 7  ;;  %v809_v52 = vrot.slane %v804_v35, 4  ;;  %v11836_v63 = vld [vmem:[#allocation2 + $0x84] sm:$0xf]  ;;  %v10918_v11 = vld [vmem:[#allocation7 + $0x1d8] sm:$0xff]  }
  0xbb   : > { %v11828_v44 = vor.u32 %v16019_v17, %v1447_v41  ;;  %v1452_v40 = vrot.slane %v1447_v41, 4  ;;  %v9094_v55 = vrot.slane %v797_v47, 11  ;;  %v816_v57 = vor.u32 %v814_v38, %v813_v27  ;;  %10081 = vmatpush3.bf16.msra.mxu1 %v10917_v56  ;;  %v362_v47 = vld [vmem:[#allocation2 + $0x90] sm:$0x8]  ;;  %v11870_v17 = vld [vmem:[#allocation2 + $0x94] sm:$0xf] }
  0xbc   : > { %4035 = vmatprep.mubr.bf16.mxu1 %v9189_v21  ;;  %v1126_v0 = vsel %vm11582_vm10, %v1121_v37, %v1125_v49  ;;  %v1459_v61 = vor.u32 %v16018_v22, %v1456_v62  ;;  %v414_v35 = vsel %vm11551_vm8, 0, %v413_v26  ;;  %v1129_v8 = vor.u32 %v1128_v36, %v1127_v13  ;;  %v599_v21 = vld [vmem:[%s11534_s19 + $0x70] sm:$0xff]   ;;  %v11849_v49 = vld [vmem:[#allocation2 + $0x94] sm:$0xf]  ;;  %10082 = vmatprep.subr.bf16.mxu1 %v10918_v11  ;;  %v10921_v11 = vld [vmem:[#allocation7 + $0x178] sm:$0xff]  }
  0xbd   : > { %v9173_v24 = vcombine.low %v1118_v43, %v1126_v0  ;;  %v808_v27 = vsel %vm11561_vm9, %v9094_v55, %v807_v9  ;;  %v817_v41 = vsel %vm11561_vm9, %v809_v52, %v816_v57  ;;  %415 = vst [vmem:[#allocation2 + $0x74] sm:$0x1] %v414_v35  ;;  %v11842_v37 = vrot.slane %v814_v38, 5  ;;  %v11851_v43 = vld [vmem:[#allocation2 + $0x98] sm:$0xf]  ;;  %632 = vst [vmem:[#allocation2 + $0x134] sm:$0xff] %v599_v21  }
  0xbe   : > { %v1460_v26 = vsel %vm11561_vm9, %v1452_v40, %v1459_v61  ;;  %v9142_v13 = vcombine.low %v808_v27, %v817_v41  ;;  %v11847_v36 = vrot.slane %v1129_v8, 4  ;;  %v824_v56 = vshrl.u32 %v655_v33, 16  ;;  %v10920_v55 = vld [vmem:[#allocation7 + $0x198] sm:$0xff]   ;;  %9978 = vmatprep.subr.bf16.mxu0 %v10921_v11 }
  0xbf   : > { %4036 = vmatmul.mubr.bf16.gmra.mrb[16].mxu1 %v9173_v24  ;;  %v1296_v52 = vld [vmem:[#allocation2 + $0x7c] sm:$0x8]  ;;  %v1134_v38 = vor.u32 %v11810_v39, %v11842_v37  ;;  %v827_v9 = vshll.u32 %v655_v33, 16  ;;  %v833_v62 = vshrl.u32 %v11836_v63, 16  ;;  %v836_v40 = vshll.u32 %v11836_v63, 16 }
  0xc0   : > { %v1440_v57 = vshrl.u32 %v1296_v52, 16  ;;  %3883 = vmatmul.mubr.bf16.gmra.mrb[20].mxu0 %v9142_v13  ;;  %v1132_v0 = vsel %vm11582_vm10, %v11847_v36, %v11842_v37  ;;  %v826_v61 = vrot.slane %v824_v56, 7  ;;  %v1141_v35 = vrot.slane %v824_v56, 4  ;;  %v654_v8 = vld [vmem:[#allocation2 + $0x7c] sm:$0x8]  ;;  %10083 = vmatpush3.bf16.msra.mxu1 %v10920_v55  ;;  %v10922_v37 = vld [vmem:[#allocation7 + $0x138] sm:$0xff]  }
  0xc1   : > { %v1135_v24 = vrot.slane %v1134_v38, 4  ;;  %v835_v27 = vrot.slane %v833_v62, 7  ;;  %v1142_v39 = vrot.slane %v827_v9, 5  ;;  %v11861_v41 = vrot.slane %v833_v62, 4  ;;  %v416_v21 = vld [vmem:[#allocation2 + $0x88] sm:$0x1]  ;;  %9979 = vmatpush3.bf16.msra.mxu0 %v10922_v37  ;;  %10084 = vmatprep.subr.bf16.mxu1 %v10923_v45 }
  0xc2   : > { %v9110_v48 = vrot.slane %v1440_v57, 11  ;;  %v9159_v52 = vcombine.low %v655_v33, %v11836_v63  ;;  %v363_v13 = vsel %vm11545_vm3, 0, %v362_v47  ;;  %v16026_v22 = vshrl.u32 %v11849_v49, 16  ;;  %v365_v45 = vld [vmem:[#allocation2 + $0xa4] sm:$0x8] }
  0xc3   : > { %364 = vst [vmem:[#allocation2 + $0x90] sm:$0x8] %v363_v13  ;;  %v16025_v36 = vshll.u32 %v11849_v49, 16  ;;  %v16023_v56 = vshrl.u32 %v11851_v43, 16  ;;  %v16024_v38 = vshll.u32 %v11851_v43, 16  ;;  %v819_v62 = vshrl.u32 %v654_v8, 16 }
  0xc4   : > { %v1451_v33 = vsel %vm11561_vm9, %v9110_v48, %v11828_v44  ;;  %v1043_v63 = vld [vmem:[#allocation2 + $0x74] sm:$0x1]  ;;  %3890 = vmatprep.mubr.bf16.mxu0 %v9159_v52  ;;  %v1469_v47 = vrot.slane %v16026_v22, 7  ;;  %v829_v55 = vor.u32 %v827_v9, %v826_v61  ;;  %v831_v57 = vrot.slane %v826_v61, 4 }
  0xc5   : > { %v9190_v11 = vcombine.low %v1451_v33, %v1460_v26  ;;  %v1137_v13 = vshll.u32 %v1043_v63, 16  ;;  %v1478_v46 = vrot.slane %v16023_v56, 7  ;;  %v9095_v8 = vrot.slane %v819_v62, 11  ;;  %v11889_v62 = vld [vmem:[#allocation2 + $0x98] sm:$0xf]  ;;  %v10924_v33 = vld [vmem:[#allocation7 + $0x1a0] sm:$0xff]  }
  0xc6   : > { %v11881_v23 = vor.u32 %v16025_v36, %v1469_v47  ;;  %v1474_v48 = vrot.slane %v1469_v47, 4  ;;  %v838_v44 = vor.u32 %v836_v40, %v835_v27  ;;  %v417_v52 = vsel %vm11551_vm8, 0, %v416_v21  ;;  %10085 = vmatpush3.bf16.msra.mxu1 %v10924_v33 }
  0xc7   : > { %4043 = vmatprep.mubr.bf16.mxu1 %v9190_v11  ;;  %v1139_v9 = vrot.slane %v1137_v13, 5  ;;  %v1481_v26 = vor.u32 %v16024_v38, %v1478_v46  ;;  %v830_v61 = vsel %vm11561_vm9, %v9095_v8, %v829_v55  ;;  %418 = vst [vmem:[#allocation2 + $0x88] sm:$0x1] %v417_v52  ;;  %v1143_v37 = vor.u32 %v1142_v39, %v1141_v35  ;;  %v10925_v46 = vld [vmem:[#allocation7 + $0x1e8] sm:$0xff]   ;;  %v11903_v13 = vld [vmem:[#allocation2 + $0xa8] sm:$0xf] }
  0xc8   : > { %v839_v27 = vsel %vm11561_vm9, %v831_v57, %v838_v44  ;;  %v11893_v63 = vrot.slane %v836_v40, 5  ;;  %v846_v21 = vshrl.u32 %v11870_v17, 16  ;;  %v849_v47 = vshll.u32 %v11870_v17, 16  ;;  %v601_v40 = vld [vmem:[%s11534_s19 + $0x78] sm:$0xff]   ;;  %10086 = vmatprep.subr.bf16.mxu1 %v10925_v46 }
  0xc9   : > { %v1140_v55 = vsel %vm11582_vm10, %v1135_v24, %v1139_v9  ;;  %v1482_v35 = vsel %vm11561_vm9, %v1474_v48, %v1481_v26  ;;  %v9143_v39 = vcombine.low %v830_v61, %v839_v27  ;;  %v11901_v11 = vrot.slane %v1143_v37, 4  ;;  %v11909_v24 = vld [vmem:[#allocation2 + $0xac] sm:$0xf]  ;;  %634 = vst [vmem:[#allocation2 + $0x148] sm:$0xff] %v601_v40   ;;  %v10927_v37 = vld [vmem:[#allocation7 + $0x1a8] sm:$0xff]  }
  0xca   : > { %v9174_v57 = vcombine.low %v1132_v0, %v1140_v55  ;;  %v1299_v8 = vld [vmem:[#allocation2 + $0x90] sm:$0x8]  ;;  %v1148_v44 = vor.u32 %v11861_v41, %v11893_v63  ;;  %v848_v52 = vrot.slane %v846_v21, 7  ;;  %v855_v56 = vshrl.u32 %v11889_v62, 16  ;;  %10087 = vmatpush3.bf16.msra.mxu1 %v10927_v37  ;;  %v419_v37 = vld [vmem:[#allocation2 + $0x9c] sm:$0x1] }
  0xcb   : > { %v1462_v48 = vshrl.u32 %v1299_v8, 16  ;;  %3891 = vmatmul.mubr.bf16.gmra.mrb[24].mxu0 %v9143_v39  ;;  %v1146_v9 = vsel %vm11582_vm10, %v11901_v11, %v11893_v63  ;;  %v858_v0 = vshll.u32 %v11889_v62, 16  ;;  %v1155_v26 = vrot.slane %v846_v21, 4  ;;  %v657_v61 = vld [vmem:[#allocation2 + $0x90] sm:$0x8]  ;;  %v10928_v11 = vld [vmem:[#allocation7 + $0x1f0] sm:$0xff]  }
  0xcc   : > { %4044 = vmatmul.mubr.bf16.gmra.mrb[20].mxu1 %v9174_v57  ;;  %v1149_v41 = vrot.slane %v1148_v44, 4  ;;  %v857_v33 = vrot.slane %v855_v56, 7  ;;  %v1156_v27 = vrot.slane %v849_v47, 5  ;;  %v11916_v55 = vrot.slane %v855_v56, 4  ;;  %v11931_v38 = vld [vmem:[#allocation2 + $0xa8] sm:$0xf]  ;;  %10088 = vmatprep.subr.bf16.mxu1 %v10928_v11 }
  0xcd   : > { %v9111_v46 = vrot.slane %v1462_v48, 11  ;;  %v9160_v39 = vcombine.low %v11870_v17, %v11889_v62  ;;  %v366_v40 = vsel %vm11545_vm3, 0, %v365_v45  ;;  %v16032_v63 = vshrl.u32 %v11903_v13, 16 }
  0xce   : > { %v1044_v21 = vld [vmem:[#allocation2 + $0x88] sm:$0x1]  ;;  %367 = vst [vmem:[#allocation2 + $0xa4] sm:$0x8] %v366_v40  ;;  %v16031_v57 = vshll.u32 %v11903_v13, 16  ;;  %v16029_v8 = vshrl.u32 %v11909_v24, 16  ;;  %v851_v48 = vor.u32 %v849_v47, %v848_v52  ;;  %10089 = vmatpush3.bf16.msra.mxu1 %v10929_v31 }
  0xcf   : > { %v16030_v56 = vshll.u32 %v11909_v24, 16  ;;  %v841_v44 = vshrl.u32 %v657_v61, 16  ;;  %v1473_v17 = vsel %vm11561_vm9, %v9111_v46, %v11881_v23  ;;  %v1151_v62 = vshll.u32 %v1044_v21, 16  ;;  %3898 = vmatprep.mubr.bf16.mxu0 %v9160_v39 }
  0xd0   : > { %v1491_v45 = vrot.slane %v16032_v63, 7  ;;  %v9191_v40 = vcombine.low %v1473_v17, %v1482_v35  ;;  %v1500_v36 = vrot.slane %v16029_v8, 7  ;;  %v853_v61 = vrot.slane %v848_v52, 4  ;;  %v664_v63 = vld [vmem:[#allocation2 + $0xbc] sm:$0xf] }
  0xd1   : > { %v9096_v22 = vrot.slane %v841_v44, 11  ;;  %v1153_v23 = vrot.slane %v1151_v62, 5  ;;  %v860_v21 = vor.u32 %v858_v0, %v857_v33  ;;  %v420_v11 = vsel %vm11551_vm8, 0, %v419_v37  ;;  %v10930_v44 = vld [vmem:[#allocation7 + $0x1f8] sm:$0xff]  }
  0xd2   : > { %v1494_v46 = vor.u32 %v16031_v57, %v1491_v45  ;;  %v1496_v39 = vrot.slane %v1491_v45, 4  ;;  %4051 = vmatprep.mubr.bf16.mxu1 %v9191_v40  ;;  %v1503_v47 = vor.u32 %v16030_v56, %v1500_v36  ;;  %v1157_v52 = vor.u32 %v1156_v27, %v1155_v26  ;;  %421 = vst [vmem:[#allocation2 + $0x9c] sm:$0x1] %v420_v11  ;;  %v368_v45 = vld [vmem:[#allocation2 + $0xb8] sm:$0x8] }
  0xd3   : > { %v852_v35 = vsel %vm11561_vm9, %v9096_v22, %v851_v48  ;;  %v1154_v17 = vsel %vm11582_vm10, %v1149_v41, %v1153_v23  ;;  %v861_v62 = vsel %vm11561_vm9, %v853_v61, %v860_v21  ;;  %v11949_v33 = vrot.slane %v858_v0, 5  ;;  %v11952_v40 = vld [vmem:[#allocation2 + $0xbc] sm:$0xf]  ;;  %v11958_v48 = vld [vmem:[#allocation2 + $0xc0] sm:$0xf]  ;;  %10090 = vmatprep.subr.bf16.mxu1 %v10930_v44  ;;  %v10931_v41 = vld [vmem:[#allocation7 + $0x1b8] sm:$0xff]  }
  0xd4   : > { %v868_v36 = vshrl.u32 %v11931_v38, 16  ;;  %v9175_v22 = vcombine.low %v1146_v9, %v1154_v17  ;;  %v1504_v26 = vsel %vm11561_vm9, %v1496_v39, %v1503_v47  ;;  %v9144_v31 = vcombine.low %v852_v35, %v861_v62  ;;  %v10932_v9 = vld [vmem:[#allocation7 + $0x200] sm:$0xff]   ;;  %10091 = vmatpush3.bf16.msra.mxu1 %v10931_v41 }
  0xd5   : > { %v11956_v27 = vrot.slane %v1157_v52, 4  ;;  %v1302_v37 = vld [vmem:[#allocation2 + $0xa4] sm:$0x8]  ;;  %v1162_v0 = vor.u32 %v11916_v55, %v11949_v33  ;;  %v871_v23 = vshll.u32 %v11931_v38, 16  ;;  %v877_v21 = vshrl.u32 %v11935_v34, 16  ;;  %10684 = vmatprep.subr.bf16.mxu0 %v10932_v9 }
  0xd6   : > { %v870_v61 = vrot.slane %v868_v36, 7  ;;  %4052 = vmatmul.mubr.bf16.gmra.mrb[24].mxu1 %v9175_v22  ;;  %v1484_v11 = vshrl.u32 %v1302_v37, 16  ;;  %3899 = vmatmul.mubr.bf16.gmra.mrb[28].mxu0 %v9144_v31  ;;  %v880_v47 = vshll.u32 %v11935_v34, 16  ;;  %v1169_v35 = vrot.slane %v868_v36, 4  ;;  %v660_v52 = vld [vmem:[#allocation2 + $0xa4] sm:$0x8] }
  0xd7   : > { %v1160_v39 = vsel %vm11582_vm10, %v11956_v27, %v11949_v33  ;;  %v1163_v44 = vrot.slane %v1162_v0, 4  ;;  %v879_v55 = vrot.slane %v877_v21, 7  ;;  %v1170_v17 = vrot.slane %v871_v23, 5 }
  0xd8   : > { %v1175_v62 = vrot.slane %v877_v21, 4  ;;  %v9112_v8 = vrot.slane %v1484_v11, 11  ;;  %v9161_v22 = vcombine.low %v11931_v38, %v11935_v34  ;;  %v369_v31 = vsel %vm11545_vm3, 0, %v368_v45  ;;  %v422_v21 = vld [vmem:[#allocation2 + $0xb0] sm:$0x1] }
  0xd9   : > { %v16038_v37 = vshrl.u32 %v11952_v40, 16  ;;  %370 = vst [vmem:[#allocation2 + $0xb8] sm:$0x8] %v369_v31  ;;  %v16037_v33 = vshll.u32 %v11952_v40, 16  ;;  %v16035_v36 = vshrl.u32 %v11958_v48, 16  ;;  %v16036_v27 = vshll.u32 %v11958_v48, 16 }
  0xda   : > { %v863_v0 = vshrl.u32 %v660_v52, 16  ;;  %v1495_v41 = vsel %vm11561_vm9, %v9112_v8, %v1494_v46  ;;  %v1045_v9 = vld [vmem:[#allocation2 + $0x9c] sm:$0x1]  ;;  %3906 = vmatprep.mubr.bf16.mxu0 %v9161_v22  ;;  %v873_v38 = vor.u32 %v871_v23, %v870_v61  ;;  %v875_v45 = vrot.slane %v870_v61, 4  ;;  %v665_v22 = vld [vmem:[#allocation2 + $0xc0] sm:$0xf] }
  0xdb   : > { %v1513_v34 = vrot.slane %v16038_v37, 7  ;;  %v9192_v11 = vcombine.low %v1495_v41, %v1504_v26  ;;  %v1165_v31 = vshll.u32 %v1045_v9, 16  ;;  %v1522_v56 = vrot.slane %v16035_v36, 7  ;;  %v667_v37 = vld [vmem:[#allocation2 + $0xd0] sm:$0xf] }
  0xdc   : > { %v9097_v57 = vrot.slane %v863_v0, 11  ;;  %v882_v15 = vor.u32 %v880_v47, %v879_v55  ;;  %v423_v8 = vsel %vm11551_vm8, 0, %v422_v21  ;;  %v1171_v23 = vor.u32 %v1170_v17, %v1169_v35  ;;  %v11995_v21 = vld [vmem:[#allocation2 + $0xd0] sm:$0xf]  ;;  %v12001_v35 = vld [vmem:[#allocation2 + $0xd4] sm:$0xf] }
  0xdd   : > { %v1516_v52 = vor.u32 %v16037_v33, %v1513_v34  ;;  %v1518_v30 = vrot.slane %v1513_v34, 4  ;;  %4059 = vmatprep.mubr.bf16.mxu1 %v9192_v11  ;;  %v1167_v46 = vrot.slane %v1165_v31, 5  ;;  %v1525_v61 = vor.u32 %v16036_v27, %v1522_v56  ;;  %424 = vst [vmem:[#allocation2 + $0xb0] sm:$0x1] %v423_v8  ;;  %v371_v34 = vld [vmem:[#allocation2 + $0xcc] sm:$0x8] }
  0xde   : > { %v874_v26 = vsel %vm11561_vm9, %v9097_v57, %v873_v38  ;;  %v883_v0 = vsel %vm11561_vm9, %v875_v45, %v882_v15  ;;  %v11993_v41 = vrot.slane %v880_v47, 5  ;;  %v890_v55 = vshrl.u32 %v664_v63, 16 }
  0xdf   : > { %v893_v9 = vshll.u32 %v664_v63, 16  ;;  %v1168_v11 = vsel %vm11582_vm10, %v1163_v44, %v1167_v46  ;;  %v1526_v56 = vsel %vm11561_vm9, %v1518_v30, %v1525_v61  ;;  %v9145_v57 = vcombine.low %v874_v26, %v883_v0 }
  0xe0   : > { %v1172_v38 = vrot.slane %v1171_v23, 4  ;;  %v9176_v17 = vcombine.low %v1160_v39, %v1168_v11  ;;  %v1305_v31 = vld [vmem:[#allocation2 + $0xb8] sm:$0x8]  ;;  %v1176_v15 = vor.u32 %v1175_v62, %v11993_v41  ;;  %v892_v47 = vrot.slane %v890_v55, 7 }
  0xe1   : > { %v899_v45 = vshrl.u32 %v665_v22, 16  ;;  %v663_v8 = vld [vmem:[#allocation2 + $0xb8] sm:$0x8]  ;;  %v1506_v36 = vshrl.u32 %v1305_v31, 16  ;;  %3907 = vmatmul.mubr.bf16.gmra.mrb[32].mxu0 %v9145_v57  ;;  %v902_v46 = vshll.u32 %v665_v22, 16  ;;  %v1183_v27 = vrot.slane %v890_v55, 4 }
  0xe2   : > { %v1174_v44 = vsel %vm11582_vm10, %v1172_v38, %v11993_v41  ;;  %4060 = vmatmul.mubr.bf16.gmra.mrb[28].mxu1 %v9176_v17  ;;  %v1177_v30 = vrot.slane %v1176_v15, 4  ;;  %v1184_v26 = vrot.slane %v893_v9, 5  ;;  %v9162_v0 = vcombine.low %v664_v63, %v665_v22  ;;  %v425_v22 = vld [vmem:[#allocation2 + $0xc4] sm:$0x1] }
  0xe3   : > { %v901_v61 = vrot.slane %v899_v45, 7  ;;  %v1189_v23 = vrot.slane %v899_v45, 4  ;;  %v9113_v39 = vrot.slane %v1506_v36, 11  ;;  %v372_v62 = vsel %vm11545_vm3, 0, %v371_v34 }
  0xe4   : > { %v16044_v11 = vshrl.u32 %v11995_v21, 16  ;;  %v1046_v31 = vld [vmem:[#allocation2 + $0xb0] sm:$0x1]  ;;  %373 = vst [vmem:[#allocation2 + $0xcc] sm:$0x8] %v372_v62  ;;  %v16043_v57 = vshll.u32 %v11995_v21, 16  ;;  %3914 = vmatprep.mubr.bf16.mxu0 %v9162_v0  ;;  %v895_v36 = vor.u32 %v893_v9, %v892_v47 }
  0xe5   : > { %v16041_v41 = vshrl.u32 %v12001_v35, 16  ;;  %v16042_v55 = vshll.u32 %v12001_v35, 16  ;;  %v885_v38 = vshrl.u32 %v663_v8, 16  ;;  %v1517_v17 = vsel %vm11561_vm9, %v9113_v39, %v1516_v52  ;;  %v12021_v39 = vld [vmem:[#allocation2 + $0xd4] sm:$0xf] }
  0xe6   : > { %v1179_v15 = vshll.u32 %v1046_v31, 16  ;;  %v1535_v63 = vrot.slane %v16044_v11, 7  ;;  %v9193_v34 = vcombine.low %v1517_v17, %v1526_v56  ;;  %v897_v33 = vrot.slane %v892_v47, 4 }
  0xe7   : > { %v1544_v45 = vrot.slane %v16041_v41, 7  ;;  %v9098_v62 = vrot.slane %v885_v38, 11  ;;  %v904_v52 = vor.u32 %v902_v46, %v901_v61  ;;  %v426_v0 = vsel %vm11551_vm8, 0, %v425_v22 }
  0xe8   : > { %v1181_v16 = vrot.slane %v1179_v15, 5  ;;  %v1538_v8 = vor.u32 %v16043_v57, %v1535_v63  ;;  %v1540_v14 = vrot.slane %v1535_v63, 4  ;;  %4067 = vmatprep.mubr.bf16.mxu1 %v9193_v34  ;;  %v1185_v47 = vor.u32 %v1184_v26, %v1183_v27  ;;  %427 = vst [vmem:[#allocation2 + $0xc4] sm:$0x1] %v426_v0  ;;  %v374_v15 = vld [vmem:[#allocation2 + $0xe0] sm:$0x8] }
  0xe9   : > { %v1547_v9 = vor.u32 %v16042_v55, %v1544_v45  ;;  %v896_v56 = vsel %vm11561_vm9, %v9098_v62, %v895_v36  ;;  %v905_v38 = vsel %vm11561_vm9, %v897_v33, %v904_v52  ;;  %v12033_v61 = vrot.slane %v902_v46, 5  ;;  %v12035_v63 = vld [vmem:[#allocation2 + $0xe4] sm:$0xf]  ;;  %v12039_v27 = vld [vmem:[#allocation2 + $0xe8] sm:$0xf] }
  0xea   : > { %v1182_v31 = vsel %vm11582_vm10, %v1177_v30, %v1181_v16  ;;  %v912_v17 = vshrl.u32 %v667_v37, 16  ;;  %v9146_v45 = vcombine.low %v896_v56, %v905_v38  ;;  %v1186_v22 = vrot.slane %v1185_v47, 4 }
  0xeb   : > { %v9177_v34 = vcombine.low %v1174_v44, %v1182_v31  ;;  %v1548_v36 = vsel %vm11561_vm9, %v1540_v14, %v1547_v9  ;;  %v1308_v26 = vld [vmem:[#allocation2 + $0xcc] sm:$0x8]  ;;  %v1190_v16 = vor.u32 %v1189_v23, %v12033_v61  ;;  %v915_v33 = vshll.u32 %v667_v37, 16  ;;  %v428_v23 = vld [vmem:[#allocation2 + $0xd8] sm:$0x1] }
  0xec   : > { %v914_v30 = vrot.slane %v912_v17, 7  ;;  %v921_v46 = vshrl.u32 %v12021_v39, 16  ;;  %v1528_v62 = vshrl.u32 %v1308_v26, 16  ;;  %3915 = vmatmul.mubr.bf16.gmra.mrb[36].mxu0 %v9146_v45  ;;  %v1188_v44 = vsel %vm11582_vm10, %v1186_v22, %v12033_v61  ;;  %v666_v9 = vld [vmem:[#allocation2 + $0xcc] sm:$0x8] }
  0xed   : > { %4068 = vmatmul.mubr.bf16.gmra.mrb[32].mxu1 %v9177_v34  ;;  %v924_v14 = vshll.u32 %v12021_v39, 16  ;;  %v1197_v52 = vrot.slane %v912_v17, 4  ;;  %v1191_v56 = vrot.slane %v1190_v16, 4  ;;  %v1198_v47 = vrot.slane %v915_v33, 5  ;;  %v12054_v16 = vld [vmem:[#allocation2 + $0xe4] sm:$0xf] }
  0xee   : > { %v923_v0 = vrot.slane %v921_v46, 7  ;;  %v1203_v31 = vrot.slane %v921_v46, 4  ;;  %v9114_v38 = vrot.slane %v1528_v62, 11  ;;  %v9163_v41 = vcombine.low %v667_v37, %v12021_v39 }
  0xef   : > { %v375_v34 = vsel %vm11545_vm3, 0, %v374_v15  ;;  %v16050_v45 = vshrl.u32 %v12035_v63, 16  ;;  %v16049_v61 = vshll.u32 %v12035_v63, 16  ;;  %v16047_v22 = vshrl.u32 %v12039_v27, 16  ;;  %v1047_v62 = vld [vmem:[#allocation2 + $0xc4] sm:$0x1] }
  0xf0   : > { %376 = vst [vmem:[#allocation2 + $0xe0] sm:$0x8] %v375_v34  ;;  %v16048_v17 = vshll.u32 %v12039_v27, 16  ;;  %v907_v26 = vshrl.u32 %v666_v9, 16  ;;  %v1539_v46 = vsel %vm11561_vm9, %v9114_v38, %v1538_v8  ;;  %3922 = vmatprep.mubr.bf16.mxu0 %v9163_v41  ;;  %v917_v39 = vor.u32 %v915_v33, %v914_v30  ;;  %v671_v38 = vld [vmem:[#allocation2 + $0xe8] sm:$0xf] }
  0xf1   : > { %v1557_v37 = vrot.slane %v16050_v45, 7  ;;  %v919_v15 = vrot.slane %v914_v30, 4  ;;  %v9194_v34 = vcombine.low %v1539_v46, %v1548_v36  ;;  %v1193_v55 = vshll.u32 %v1047_v62, 16  ;;  %v377_v62 = vld [vmem:[#allocation2 + $0xf4] sm:$0x8] }
  0xf2   : > { %v1566_v57 = vrot.slane %v16047_v22, 7  ;;  %v9099_v11 = vrot.slane %v907_v26, 11  ;;  %v926_v4 = vor.u32 %v924_v14, %v923_v0  ;;  %v429_v8 = vsel %vm11551_vm8, 0, %v428_v23 }
  0xf3   : > { %v1560_v9 = vor.u32 %v16049_v61, %v1557_v37  ;;  %v1562_v10 = vrot.slane %v1557_v37, 4  ;;  %4075 = vmatprep.mubr.bf16.mxu1 %v9194_v34  ;;  %v1195_v41 = vrot.slane %v1193_v55, 5  ;;  %430 = vst [vmem:[#allocation2 + $0xd8] sm:$0x1] %v429_v8  ;;  %v1199_v30 = vor.u32 %v1198_v47, %v1197_v52  ;;  %v12080_v52 = vld [vmem:[#allocation2 + $0xf8] sm:$0xf] }
  0xf4   : > { %v1569_v33 = vor.u32 %v16048_v17, %v1566_v57  ;;  %v918_v36 = vsel %vm11561_vm9, %v9099_v11, %v917_v39  ;;  %v927_v26 = vsel %vm11561_vm9, %v919_v15, %v926_v4  ;;  %v12072_v46 = vrot.slane %v924_v14, 5  ;;  %v12082_v47 = vld [vmem:[#allocation2 + $0xfc] sm:$0xf] }
  0xf5   : > { %v934_v0 = vshrl.u32 %v12054_v16, 16  ;;  %v937_v23 = vshll.u32 %v12054_v16, 16  ;;  %v1196_v55 = vsel %vm11582_vm10, %v1191_v56, %v1195_v41  ;;  %v9147_v11 = vcombine.low %v918_v36, %v927_v26 }
  0xf6   : > { %v1570_v57 = vsel %vm11561_vm9, %v1562_v10, %v1569_v33  ;;  %v1200_v37 = vrot.slane %v1199_v30, 4  ;;  %v9178_v4 = vcombine.low %v1188_v44, %v1196_v55  ;;  %v1204_v39 = vor.u32 %v1203_v31, %v12072_v46 }
  0xf7   : > { %v1311_v14 = vld [vmem:[#allocation2 + $0xe0] sm:$0x8]  ;;  %v936_v15 = vrot.slane %v934_v0, 7  ;;  %v943_v34 = vshrl.u32 %v671_v38, 16  ;;  %3923 = vmatmul.mubr.bf16.gmra.mrb[40].mxu0 %v9147_v11  ;;  %v946_v10 = vshll.u32 %v671_v38, 16  ;;  %v1211_v41 = vrot.slane %v934_v0, 4 }
  0xf8   : > { %v669_v8 = vld [vmem:[#allocation2 + $0xe0] sm:$0x8]  ;;  %v1550_v22 = vshrl.u32 %v1311_v14, 16  ;;  %v1202_v56 = vsel %vm11582_vm10, %v1200_v37, %v12072_v46  ;;  %4076 = vmatmul.mubr.bf16.gmra.mrb[36].mxu1 %v9178_v4  ;;  %v1205_v33 = vrot.slane %v1204_v39, 4  ;;  %v1212_v30 = vrot.slane %v937_v23, 5 }
  0xf9   : > { %v945_v36 = vrot.slane %v943_v34, 7  ;;  %v1217_v26 = vrot.slane %v943_v34, 4  ;;  %v9164_v55 = vcombine.low %v12054_v16, %v671_v38  ;;  %v378_v31 = vsel %vm11545_vm3, 0, %v377_v62  ;;  %v431_v11 = vld [vmem:[#allocation2 + $0xec] sm:$0x1] }
  0xfa   : > { %v9115_v44 = vrot.slane %v1550_v22, 11  ;;  %v16057_v14 = vshrl.u32 %v12080_v52, 16  ;;  %v1048_v17 = vld [vmem:[#allocation2 + $0xd8] sm:$0x1]  ;;  %379 = vst [vmem:[#allocation2 + $0xf4] sm:$0x8] %v378_v31  ;;  %v939_v62 = vor.u32 %v937_v23, %v936_v15 }
  0xfb   : > { %v16056_v46 = vshll.u32 %v12080_v52, 16  ;;  %v16054_v0 = vshrl.u32 %v12082_v47, 16  ;;  %v16055_v37 = vshll.u32 %v12082_v47, 16  ;;  %v929_v4 = vshrl.u32 %v669_v8, 16  ;;  %v12095_v39 = vld [vmem:[#allocation2 + $0xf8] sm:$0xf]  ;;  %3930 = vmatprep.mubr.bf16.mxu0 %v9164_v55 }
  0xfc   : > { %v1561_v22 = vsel %vm11561_vm9, %v9115_v44, %v1560_v9  ;;  %v1207_v16 = vshll.u32 %v1048_v17, 16  ;;  %v1579_v38 = vrot.slane %v16057_v14, 7  ;;  %v941_v45 = vrot.slane %v936_v15, 4  ;;  %v12111_v44 = vld [vmem:[#allocation2 + $0xfc] sm:$0xf] }
  0xfd   : > { %v9195_v34 = vcombine.low %v1561_v22, %v1570_v57  ;;  %v1588_v31 = vrot.slane %v16054_v0, 7  ;;  %v9100_v61 = vrot.slane %v929_v4, 11  ;;  %v948_v2 = vor.u32 %v946_v10, %v945_v36  ;;  %v380_v22 = vld [vmem:[#allocation2 + $0x108] sm:$0x8] }
  0xfe   : > { %v1209_v6 = vrot.slane %v1207_v16, 5  ;;  %v1582_v8 = vor.u32 %v16056_v46, %v1579_v38  ;;  %v1584_v3 = vrot.slane %v1579_v38, 4  ;;  %v432_v23 = vsel %vm11551_vm8, 0, %v431_v11  ;;  %v12120_v16 = vld [vmem:[#allocation2 + $0x10c] sm:$0xf] }
  0xff   : > { %4083 = vmatprep.mubr.bf16.mxu1 %v9195_v34  ;;  %v1591_v17 = vor.u32 %v16055_v37, %v1588_v31  ;;  %v940_v9 = vsel %vm11561_vm9, %v9100_v61, %v939_v62  ;;  %v1213_v57 = vor.u32 %v1212_v30, %v1211_v41  ;;  %v949_v55 = vsel %vm11561_vm9, %v941_v45, %v948_v2  ;;  %v12124_v38 = vld [vmem:[#allocation2 + $0x110] sm:$0xf]  ;;  %v676_v46 = vld [vmem:[#allocation2 + $0x10c] sm:$0xf] }
 0x100   : > { %v1210_v15 = vsel %vm11582_vm10, %v1205_v33, %v1209_v6  ;;  %433 = vst [vmem:[#allocation2 + $0xec] sm:$0x1] %v432_v23  ;;  %v12117_v36 = vrot.slane %v946_v10, 5  ;;  %v956_v4 = vshrl.u32 %v12095_v39, 16  ;;  %v9148_v30 = vcombine.low %v940_v9, %v949_v55  ;;  %16277 = vst [vmem:[#allocation16_spill] sm:$0xff] %v12124_v38 }
 0x101   : > { %v9179_v61 = vcombine.low %v1202_v56, %v1210_v15  ;;  %v1592_v41 = vsel %vm11561_vm9, %v1584_v3, %v1591_v17  ;;  %v1214_v11 = vrot.slane %v1213_v57, 4  ;;  %v1314_v6 = vld [vmem:[#allocation2 + $0xf4] sm:$0x8]  ;;  %v959_v45 = vshll.u32 %v12095_v39, 16 }
 0x102   : > { %v1218_v33 = vor.u32 %v1217_v26, %v12117_v36  ;;  %v958_v2 = vrot.slane %v956_v4, 7  ;;  %v965_v10 = vshrl.u32 %v12111_v44, 16  ;;  %v1572_v62 = vshrl.u32 %v1314_v6, 16  ;;  %3931 = vmatmul.mubr.bf16.gmra.mrb[44].mxu0 %v9148_v30  ;;  %v672_v31 = vld [vmem:[#allocation2 + $0xf4] sm:$0x8] }
 0x103   : > { %4084 = vmatmul.mubr.bf16.gmra.mrb[40].mxu1 %v9179_v61  ;;  %v1216_v56 = vsel %vm11582_vm10, %v1214_v11, %v12117_v36  ;;  %v968_v3 = vshll.u32 %v12111_v44, 16  ;;  %v1225_v34 = vrot.slane %v956_v4, 4  ;;  %v1226_v23 = vrot.slane %v959_v45, 5  ;;  %v434_v6 = vld [vmem:[#allocation2 + $0x100] sm:$0x1] }
 0x104   : > { %v1219_v17 = vrot.slane %v1218_v33, 4  ;;  %v967_v9 = vrot.slane %v965_v10, 7  ;;  %v1231_v26 = vrot.slane %v965_v10, 4  ;;  %v9116_v57 = vrot.slane %v1572_v62, 11 }
 0x105   : > { %v9165_v15 = vcombine.low %v12095_v39, %v12111_v44  ;;  %v381_v55 = vsel %vm11545_vm3, 0, %v380_v22  ;;  %v16062_v61 = vshrl.u32 %v12120_v16, 16  ;;  %v16061_v36 = vshll.u32 %v12120_v16, 16 }
 0x106   : > { %382 = vst [vmem:[#allocation2 + $0x108] sm:$0x8] %v381_v55  ;;  %v16059_v30 = vshrl.u32 %v12124_v38, 16  ;;  %v16060_v4 = vshll.u32 %v12124_v38, 16  ;;  %v951_v11 = vshrl.u32 %v672_v31, 16  ;;  %v1583_v33 = vsel %vm11561_vm9, %v9116_v57, %v1582_v8 }
 0x107   : > { %v1049_v10 = vld [vmem:[#allocation2 + $0xec] sm:$0x1]  ;;  %3938 = vmatprep.mubr.bf16.mxu0 %v9165_v15  ;;  %v1601_v39 = vrot.slane %v16062_v61, 7  ;;  %v961_v44 = vor.u32 %v959_v45, %v958_v2  ;;  %v963_v22 = vrot.slane %v958_v2, 4  ;;  %v9196_v62 = vcombine.low %v1583_v33, %v1592_v41  ;;  %v677_v15 = vld [vmem:[#allocation2 + $0x110] sm:$0xf] }
 0x108   : > { %v1221_v55 = vshll.u32 %v1049_v10, 16  ;;  %v1610_v0 = vrot.slane %v16059_v30, 7  ;;  %v9101_v37 = vrot.slane %v951_v11, 11  ;;  %v970_v19 = vor.u32 %v968_v3, %v967_v9  ;;  %v679_v61 = vld [vmem:[#allocation2 + $0x120] sm:$0xf] }
 0x109   : > { %v1604_v31 = vor.u32 %v16061_v36, %v1601_v39  ;;  %v1606_v14 = vrot.slane %v1601_v39, 4  ;;  %v435_v8 = vsel %vm11551_vm8, 0, %v434_v6  ;;  %4091 = vmatprep.mubr.bf16.mxu1 %v9196_v62  ;;  %v1227_v45 = vor.u32 %v1226_v23, %v1225_v34 }
 0x10a   : > { %v1223_v57 = vrot.slane %v1221_v55, 5  ;;  %v1613_v2 = vor.u32 %v16060_v4, %v1610_v0  ;;  %v962_v41 = vsel %vm11561_vm9, %v9101_v37, %v961_v44  ;;  %436 = vst [vmem:[#allocation2 + $0x100] sm:$0x1] %v435_v8  ;;  %v971_v11 = vsel %vm11561_vm9, %v963_v22, %v970_v19  ;;  %v383_v55 = vld [vmem:[#allocation2 + $0x11c] sm:$0x8] }
 0x10b   : > { %v12157_v33 = vrot.slane %v968_v3, 5  ;;  %v978_v9 = vshrl.u32 %v676_v46, 16  ;;  %v981_v10 = vshll.u32 %v676_v46, 16  ;;  %v9149_v0 = vcombine.low %v962_v41, %v971_v11  ;;  %v12163_v37 = vld [vmem:[#allocation2 + $0x120] sm:$0xf] }
 0x10c   : > { %v1224_v6 = vsel %vm11582_vm10, %v1219_v17, %v1223_v57  ;;  %v1614_v39 = vsel %vm11561_vm9, %v1606_v14, %v1613_v2  ;;  %v1228_v62 = vrot.slane %v1227_v45, 4  ;;  %16278 = vst [vmem:[#allocation17_spill] sm:$0xff] %v12163_v37  ;;  %v987_v3 = vshrl.u32 %v677_v15, 16  ;;  %v12166_v22 = vld [vmem:[#allocation2 + $0x124] sm:$0xf] }
 0x10d   : > { %v9180_v34 = vcombine.low %v1216_v56, %v1224_v6  ;;  %v1317_v23 = vld [vmem:[#allocation2 + $0x108] sm:$0x8]  ;;  %v1232_v44 = vor.u32 %v1231_v26, %v12157_v33  ;;  %v980_v19 = vrot.slane %v978_v9, 7  ;;  %16279 = vst [vmem:[#allocation18_spill] sm:$0xff] %v12166_v22  ;;  %3939 = vmatmul.mubr.bf16.gmra.mrb[48].mxu0 %v9149_v0  ;;  %v990_v14 = vshll.u32 %v677_v15, 16 }
 0x10e   : > { %v1594_v8 = vshrl.u32 %v1317_v23, 16  ;;  %v1230_v17 = vsel %vm11582_vm10, %v1228_v62, %v12157_v33  ;;  %v1239_v57 = vrot.slane %v978_v9, 4  ;;  %v675_v2 = vld [vmem:[#allocation2 + $0x108] sm:$0x8]  ;;  %v989_v45 = vrot.slane %v987_v3, 7 }
 0x10f   : > { %4092 = vmatmul.mubr.bf16.gmra.mrb[44].mxu1 %v9180_v34  ;;  %v1233_v41 = vrot.slane %v1232_v44, 4  ;;  %v1240_v56 = vrot.slane %v981_v10, 5  ;;  %v1245_v11 = vrot.slane %v987_v3, 4  ;;  %v9166_v26 = vcombine.low %v676_v46, %v677_v15 }
 0x110   : > { %v9117_v6 = vrot.slane %v1594_v8, 11  ;;  %v384_v30 = vsel %vm11545_vm3, 0, %v383_v55  ;;  %v16066_v23 = vshrl.u32 %v12163_v37, 16  ;;  %v16065_v33 = vshrl.u32 %v12166_v22, 16  ;;  %v437_v55 = vld [vmem:[#allocation2 + $0x114] sm:$0x1] }
 0x111   : > { %v1050_v0 = vld [vmem:[#allocation2 + $0x100] sm:$0x1]  ;;  %385 = vst [vmem:[#allocation2 + $0x11c] sm:$0x8] %v384_v30  ;;  %v973_v62 = vshrl.u32 %v675_v2, 16  ;;  %3946 = vmatprep.mubr.bf16.mxu0 %v9166_v26  ;;  %v983_v15 = vor.u32 %v981_v10, %v980_v19  ;;  %v985_v36 = vrot.slane %v980_v19, 4 }
 0x112   : > { %v1605_v34 = vsel %vm11561_vm9, %v9117_v6, %v1604_v31  ;;  %v1235_v44 = vshll.u32 %v1050_v0, 16  ;;  %v1623_v46 = vrot.slane %v16066_v23, 7  ;;  %v1632_v30 = vrot.slane %v16065_v33, 7 }
 0x113   : > { %v9197_v3 = vcombine.low %v1605_v34, %v1614_v39  ;;  %v9102_v8 = vrot.slane %v973_v62, 11  ;;  %v16280_v2 = vshll.u32 %v12163_v37, 16  ;;  %v992_v31 = vor.u32 %v990_v14, %v989_v45  ;;  %v12191_v62 = vld [vmem:[#allocation2 + $0x124] sm:$0xf] }
 0x114   : > { %v1237_v4 = vrot.slane %v1235_v44, 5  ;;  %v1628_v38 = vrot.slane %v1623_v46, 4  ;;  %v16281_v6 = vshll.u32 %v12166_v22, 16  ;;  %v438_v39 = vsel %vm11551_vm8, 0, %v437_v55 }
 0x115   : > { %v1626_v9 = vor.u32 %v16280_v2, %v1623_v46  ;;  %4099 = vmatprep.mubr.bf16.mxu1 %v9197_v3  ;;  %v984_v10 = vsel %vm11561_vm9, %v9102_v8, %v983_v15  ;;  %v1241_v0 = vor.u32 %v1240_v56, %v1239_v57  ;;  %v993_v34 = vsel %vm11561_vm9, %v985_v36, %v992_v31  ;;  %v386_v46 = vld [vmem:[#allocation2 + $0x130] sm:$0x8]  ;;  %v12203_v57 = vld [vmem:[#allocation2 + $0x134] sm:$0xf]  ;;  %v12205_v56 = vld [vmem:[#allocation2 + $0x138] sm:$0xf] }
 0x116   : > { %v1635_v26 = vor.u32 %v16281_v6, %v1632_v30  ;;  %v1238_v19 = vsel %vm11582_vm10, %v1233_v41, %v1237_v4  ;;  %439 = vst [vmem:[#allocation2 + $0x114] sm:$0x1] %v438_v39  ;;  %v12197_v45 = vrot.slane %v990_v14, 5  ;;  %v1000_v44 = vshrl.u32 %v679_v61, 16  ;;  %16282 = vst [vmem:[#allocation19_spill] sm:$0xff] %v12205_v56 }
 0x117   : > { %v9181_v3 = vcombine.low %v1230_v17, %v1238_v19  ;;  %v9150_v30 = vcombine.low %v984_v10, %v993_v34  ;;  %v12201_v55 = vrot.slane %v1241_v0, 4  ;;  %v1003_v8 = vshll.u32 %v679_v61, 16 }
 0x118   : > { %v1636_v15 = vsel %vm11561_vm9, %v1628_v38, %v1635_v26  ;;  %v1320_v4 = vld [vmem:[#allocation2 + $0x11c] sm:$0x8]  ;;  %v1246_v41 = vor.u32 %v1245_v11, %v12197_v45  ;;  %v1002_v36 = vrot.slane %v1000_v44, 7  ;;  %v1009_v14 = vshrl.u32 %v12191_v62, 16 }
 0x119   : > { %4100 = vmatmul.mubr.bf16.gmra.mrb[48].mxu1 %v9181_v3  ;;  %v1616_v2 = vshrl.u32 %v1320_v4, 16  ;;  %3947 = vmatmul.mubr.bf16.gmra.mrb[52].mxu0 %v9150_v30  ;;  %v1244_v38 = vsel %vm11582_vm10, %v12201_v55, %v12197_v45  ;;  %v1012_v17 = vshll.u32 %v12191_v62, 16  ;;  %v1253_v31 = vrot.slane %v1000_v44, 4  ;;  %v678_v6 = vld [vmem:[#allocation2 + $0x11c] sm:$0x8] }
 0x11a   : > { %v1247_v26 = vrot.slane %v1246_v41, 4  ;;  %v1011_v10 = vrot.slane %v1009_v14, 7  ;;  %v1254_v39 = vrot.slane %v1003_v8, 5  ;;  %v1259_v11 = vrot.slane %v1009_v14, 4  ;;  %v440_v30 = vld [vmem:[#allocation2 + $0x128] sm:$0x1] }
 0x11b   : > { %v9118_v0 = vrot.slane %v1616_v2, 11  ;;  %v9167_v19 = vcombine.low %v679_v61, %v12191_v62  ;;  %v387_v34 = vsel %vm11545_vm3, 0, %v386_v46  ;;  %v16072_v3 = vshrl.u32 %v12203_v57, 16  ;;  %v682_v45 = vld [vmem:[#allocation2 + $0x134] sm:$0xf] }
 0x11c   : > { %388 = vst [vmem:[#allocation2 + $0x130] sm:$0x8] %v387_v34  ;;  %v16071_v55 = vshrl.u32 %v12205_v56, 16  ;;  %v995_v4 = vshrl.u32 %v678_v6, 16  ;;  %v1005_v62 = vor.u32 %v1003_v8, %v1002_v36  ;;  %v1007_v46 = vrot.slane %v1002_v36, 4 }
 0x11d   : > { %v1627_v41 = vsel %vm11561_vm9, %v9118_v0, %v1626_v9  ;;  %v1051_v14 = vld [vmem:[#allocation2 + $0x114] sm:$0x1]  ;;  %3954 = vmatprep.mubr.bf16.mxu0 %v9167_v19  ;;  %v1645_v61 = vrot.slane %v16072_v3, 7  ;;  %v16283_v44 = vshll.u32 %v12203_v57, 16  ;;  %v1014_v37 = vor.u32 %v1012_v17, %v1011_v10 }
 0x11e   : > { %v9198_v2 = vcombine.low %v1627_v41, %v1636_v15  ;;  %v1249_v33 = vshll.u32 %v1051_v14, 16  ;;  %v1654_v34 = vrot.slane %v16071_v55, 7  ;;  %v9103_v23 = vrot.slane %v995_v4, 11  ;;  %v683_v4 = vld [vmem:[#allocation2 + $0x138] sm:$0xf] }
 0x11f   : > { %v1648_v6 = vor.u32 %v16283_v44, %v1645_v61  ;;  %v1650_v22 = vrot.slane %v1645_v61, 4  ;;  %v441_v9 = vsel %vm11551_vm8, 0, %v440_v30  ;;  %v16284_v8 = vshll.u32 %v12205_v56, 16  ;;  %v389_v61 = vld [vmem:[#allocation2 + $0x144] sm:$0x8] }
 0x120   : > { %4107 = vmatprep.mubr.bf16.mxu1 %v9198_v2  ;;  %v1251_v0 = vrot.slane %v1249_v33, 5  ;;  %v1006_v15 = vsel %vm11561_vm9, %v9103_v23, %v1005_v62  ;;  %442 = vst [vmem:[#allocation2 + $0x128] sm:$0x1] %v441_v9  ;;  %v1255_v19 = vor.u32 %v1254_v39, %v1253_v31  ;;  %v1015_v41 = vsel %vm11561_vm9, %v1007_v46, %v1014_v37  ;;  %v12243_v23 = vld [vmem:[#allocation2 + $0x148] sm:$0xf] }
 0x121   : > { %v1657_v36 = vor.u32 %v16284_v8, %v1654_v34  ;;  %v12237_v44 = vrot.slane %v1012_v17, 5  ;;  %v1022_v10 = vshrl.u32 %v682_v45, 16  ;;  %v1025_v14 = vshll.u32 %v682_v45, 16  ;;  %v12245_v31 = vld [vmem:[#allocation2 + $0x14c] sm:$0xf] }
 0x122   : > { %v1252_v33 = vsel %vm11582_vm10, %v1247_v26, %v1251_v0  ;;  %v9151_v2 = vcombine.low %v1006_v15, %v1015_v41  ;;  %v1256_v34 = vrot.slane %v1255_v19, 4  ;;  %16285 = vst [vmem:[#allocation20_spill] sm:$0xff] %v12245_v31  ;;  %v1031_v46 = vshrl.u32 %v683_v4, 16 }
 0x123   : > { %v1658_v30 = vsel %vm11561_vm9, %v1650_v22, %v1657_v36  ;;  %v9182_v39 = vcombine.low %v1244_v38, %v1252_v33  ;;  %v1323_v62 = vld [vmem:[#allocation2 + $0x130] sm:$0x8]  ;;  %v1260_v37 = vor.u32 %v1259_v11, %v12237_v44  ;;  %v1024_v17 = vrot.slane %v1022_v10, 7 }
 0x124   : > { %v681_v9 = vld [vmem:[#allocation2 + $0x130] sm:$0x8]  ;;  %v1638_v8 = vshrl.u32 %v1323_v62, 16  ;;  %3955 = vmatmul.mubr.bf16.gmra.mrb[56].mxu0 %v9151_v2  ;;  %v1258_v26 = vsel %vm11582_vm10, %v1256_v34, %v12237_v44  ;;  %v1034_v22 = vshll.u32 %v683_v4, 16  ;;  %v1267_v0 = vrot.slane %v1022_v10, 4 }
 0x125   : > { %4108 = vmatmul.mubr.bf16.gmra.mrb[52].mxu1 %v9182_v39  ;;  %v1261_v36 = vrot.slane %v1260_v37, 4  ;;  %v1033_v15 = vrot.slane %v1031_v46, 7  ;;  %v1268_v19 = vrot.slane %v1025_v14, 5  ;;  %v1273_v41 = vrot.slane %v1031_v46, 4 }
 0x126   : > { %v9119_v38 = vrot.slane %v1638_v8, 11  ;;  %v9168_v33 = vcombine.low %v682_v45, %v683_v4  ;;  %v390_v11 = vsel %vm11545_vm3, 0, %v389_v61  ;;  %v16080_v55 = vshrl.u32 %v12243_v23, 16  ;;  %v443_v61 = vld [vmem:[#allocation2 + $0x13c] sm:$0x1] }
 0x127   : > { %v1052_v62 = vld [vmem:[#allocation2 + $0x128] sm:$0x1]  ;;  %391 = vst [vmem:[#allocation2 + $0x144] sm:$0x8] %v390_v11  ;;  %v16078_v44 = vshrl.u32 %v12245_v31, 16  ;;  %v1017_v34 = vshrl.u32 %v681_v9, 16  ;;  %v1027_v4 = vor.u32 %v1025_v14, %v1024_v17  ;;  %v1036_v56 = vor.u32 %v1034_v22, %v1033_v15 }
 0x128   : > { %v1649_v39 = vsel %vm11561_vm9, %v9119_v38, %v1648_v6  ;;  %v1263_v37 = vshll.u32 %v1052_v62, 16  ;;  %3962 = vmatprep.mubr.bf16.mxu0 %v9168_v33  ;;  %v1667_v45 = vrot.slane %v16080_v55, 7  ;;  %v1029_v3 = vrot.slane %v1024_v17, 4  ;;  %v1681_v62 = vld [vmem:[#allocation2 + $0x24] sm:$0x1] }
 0x129   : > { %v9199_v46 = vcombine.low %v1649_v39, %v1658_v30  ;;  %v1676_v8 = vrot.slane %v16078_v44, 7  ;;  %v9104_v11 = vrot.slane %v1017_v34, 11  ;;  %v16286_v10 = vshll.u32 %v12243_v23, 16  ;;  %v12271_v34 = vld [vmem:[#allocation2 + $0x30] sm:$0xf]  ;;  %v10952_v44 = vld [vmem:[#allocation7 + $0x228] sm:$0xff]  }
 0x12a   : > { %v1265_v2 = vrot.slane %v1263_v37, 5  ;;  %v1672_v25 = vrot.slane %v1667_v45, 4  ;;  %v16287_v6 = vshll.u32 %v12245_v31, 16  ;;  %v444_v30 = vsel %vm11551_vm8, 0, %v443_v61 }
 0x12b   : > { %v1670_v9 = vor.u32 %v16286_v10, %v1667_v45  ;;  %4115 = vmatprep.mubr.bf16.mxu1 %v9199_v46  ;;  %v1028_v14 = vsel %vm11561_vm9, %v9104_v11, %v1027_v4  ;;  %v1269_v33 = vor.u32 %v1268_v19, %v1267_v0  ;;  %v1037_v15 = vsel %vm11561_vm9, %v1029_v3, %v1036_v56  ;;  %v12285_v4 = vld [vmem:[#allocation2 + $0x34] sm:$0xf] }
 0x12c   : > { %v1679_v38 = vor.u32 %v16287_v6, %v1676_v8  ;;  %v1266_v17 = vsel %vm11582_vm10, %v1261_v36, %v1265_v2  ;;  %445 = vst [vmem:[#allocation2 + $0x13c] sm:$0x1] %v444_v30  ;;  %v12277_v10 = vrot.slane %v1034_v22, 5  ;;  %v1699_v39 = vor.u32 %v11608_v29, %v11606_v28  ;;  %16288 = vst [vmem:[#allocation21_spill] sm:$0xff] %v12285_v4  ;;  %v11076_v28 = vld [vmem:[#allocation2 + $0x1c] sm:$0xf] }
 0x12d   : > { %v9183_v37 = vcombine.low %v1258_v26, %v1266_v17  ;;  %v9152_v0 = vcombine.low %v1028_v14, %v1037_v15  ;;  %v12283_v19 = vrot.slane %v1269_v33, 4  ;;  %v16289_v56 = vshll.u32 %v11590_v12, 16  ;;  %v11077_v29 = vld [vmem:[#allocation2 + $0x20] sm:$0xf] }
 0x12e   : > { %v1680_v45 = vsel %vm11561_vm9, %v1672_v25, %v1679_v38  ;;  %v1326_v61 = vld [vmem:[#allocation2 + $0x144] sm:$0x8]  ;;  %v1274_v36 = vor.u32 %v1273_v41, %v12277_v10  ;;  %v1700_v2 = vrot.slane %v1699_v39, 4  ;;  %v1707_v22 = vshll.u32 %v1681_v62, 16  ;;  %v1922_v39 = vld [vmem:[#allocation2 + $0x2c] sm:$0x8] }
 0x12f   : > { %v1701_v3 = vrot.slane %v16289_v56, 5  ;;  %4116 = vmatmul.mubr.bf16.gmra.mrb[56].mxu1 %v9183_v37  ;;  %v1660_v46 = vshrl.u32 %v1326_v61, 16  ;;  %3963 = vmatmul.mubr.bf16.gmra.mrb[60].mxu0 %v9152_v0  ;;  %v1272_v25 = vsel %vm11582_vm10, %v12283_v19, %v12277_v10  ;;  %v9201_v26 = vcombine.low %v11076_v28, %v11077_v29 }
 0x130   : > { %v1976_v8 = vshrl.u32 %v12271_v34, 16  ;;  %v1275_v11 = vrot.slane %v1274_v36, 4  ;;  %v1709_v6 = vrot.slane %v1707_v22, 5  ;;  %v1979_v30 = vshll.u32 %v12271_v34, 16  ;;  %v1682_v22 = vld [vmem:[#allocation2 + $0x38] sm:$0x1] }
 0x131   : > { %v1702_v41 = vsel %vm11582_vm10, %v1700_v2, %v1701_v3  ;;  %v1704_v12 = vor.u32 %v11610_v32, %v1701_v3  ;;  %v9120_v38 = vrot.slane %v1660_v46, 11  ;;  %v1985_v33 = vshrl.u32 %v12285_v4, 16 }
 0x132   : > { %v1978_v14 = vrot.slane %v1976_v8, 7  ;;  %v16077_v17 = vshll.u32 %v12285_v4, 16  ;;  %v12301_v15 = vrot.slane %v1976_v8, 4  ;;  %v9249_v10 = vcombine.low %v12271_v34, %v12285_v4 }
 0x133   : > { %v1705_v62 = vrot.slane %v1704_v12, 4  ;;  %v1671_v37 = vsel %vm11561_vm9, %v9120_v38, %v1670_v9  ;;  %v1053_v32 = vld [vmem:[#allocation2 + $0x13c] sm:$0x1]  ;;  %v1987_v61 = vrot.slane %v1985_v33, 7  ;;  %v12309_v3 = vrot.slane %v1979_v30, 5 }
 0x134   : > { %16290 = vst [vmem:[#allocation22_spill] sm:$0xff] %v12301_v15  ;;  %v1981_v0 = vor.u32 %v1979_v30, %v1978_v14  ;;  %v1983_v19 = vrot.slane %v1978_v14, 4  ;;  %v9200_v36 = vcombine.low %v1671_v37, %v1680_v45  ;;  %v1277_v2 = vshll.u32 %v1053_v32, 16  ;;  %v12315_v9 = vld [vmem:[#allocation2 + $0x44] sm:$0xf] }
 0x135   : > { %v1710_v56 = vsel %vm11582_vm10, %v1705_v62, %v1709_v6  ;;  %16291 = vst [vmem:[#allocation23_spill] sm:$0xff] %v12309_v3  ;;  %v1990_v34 = vor.u32 %v16077_v17, %v1987_v61  ;;  %v12313_v28 = vrot.slane %v1985_v33, 4  ;;  %v1971_v29 = vshrl.u32 %v1922_v39, 16  ;;  %v12388_v17 = vld [vmem:[#allocation2 + $0x70] sm:$0xf] }
 0x136   : > { %v9217_v46 = vcombine.low %v1702_v41, %v1710_v56  ;;  %4123 = vmatprep.mubr.bf16.mxu1 %v9200_v36  ;;  %v1279_v8 = vrot.slane %v1277_v2, 5  ;;  %v16293_v45 = vshrl.u32 %v11622_v50, 16  ;;  %v16294_v38 = vshll.u32 %v11622_v50, 16  ;;  %v10936_v41 = vld [vmem:[#allocation7 + $0x208] sm:$0xff]   ;;  %v11078_v50 = vld [vmem:[#allocation2 + $0x30] sm:$0xf] }
 0x137   : > { %16292 = vst [vmem:[#allocation24_spill] sm:$0xff] %v12313_v28  ;;  %v16295_v14 = vshll.u32 %v11624_v51, 16  ;;  %v9121_v62 = vrot.slane %v1971_v29, 11  ;;  %v1991_v33 = vsel %vm11561_vm9, %v1983_v19, %v1990_v34  ;;  %v16296_v39 = vshrl.u32 %v11624_v51, 16  ;;  %v11079_v2 = vld [vmem:[#allocation2 + $0x34] sm:$0xf] }
 0x138   : > { %v1711_v12 = vrot.slane %v16293_v45, 4  ;;  %v1712_v6 = vrot.slane %v16294_v38, 5  ;;  %4164 = vmatprep.mubr.bf16.mxu0 %v9217_v46  ;;  %v1721_v32 = vshll.u32 %v1682_v22, 16  ;;  %v1280_v61 = vsel %vm11582_vm10, %v1275_v11, %v1279_v8  ;;  %v12329_v45 = vld [vmem:[#allocation2 + $0x48] sm:$0xf]  ;;  %v11080_v38 = vld [vmem:[#allocation7 + $0x200] sm:$0xff]  }
 0x139   : > { %v1715_v30 = vrot.slane %v16295_v14, 5  ;;  %v1717_v37 = vrot.slane %v16296_v39, 4  ;;  %4165 = vmatmul.mubr.bf16.vlgmr.msra.gmra.mrb[64].mxu0 %v9201_v26  ;;  %v9202_v56 = vcombine.low %v11078_v50, %v11079_v2  ;;  %v1998_v46 = vshrl.u32 %v12315_v9, 16  ;;  %v1925_v34 = vld [vmem:[#allocation2 + $0x40] sm:$0x8]  ;;  %16309 = vst [vmem:[#allocation32_spill] sm:$0xff] %v12388_v17 }
 0x13a   : > { %v1713_v36 = vor.u32 %v1712_v6, %v1711_v12  ;;  %v9184_v29 = vcombine.low %v1272_v25, %v1280_v61  ;;  %10685 = vmatpush3.bf16.msra.mxu0 %v11080_v38  ;;  %v1982_v51 = vsel %vm11561_vm9, %v9121_v62, %v1981_v0  ;;  %v1723_v22 = vrot.slane %v1721_v32, 5  ;;  %v10940_v12 = vld [vmem:[#allocation7 + $0x210] sm:$0xff]  }
 0x13b   : > { %v1718_v19 = vor.u32 %v1717_v37, %v1715_v30  ;;  %v9233_v14 = vcombine.low %v1982_v51, %v1991_v33  ;;  %v2000_v26 = vrot.slane %v1998_v46, 7  ;;  %v2001_v8 = vshll.u32 %v12315_v9, 16  ;;  %10686 = vmatprep.subr.bf16.mxu0 %v10936_v41  ;;  %v1683_v51 = vld [vmem:[#allocation2 + $0x4c] sm:$0x1] }
 0x13c   : > { %v1714_v11 = vrot.slane %v1713_v36, 4  ;;  %4124 = vmatmul.mubr.bf16.gmra.mrb[60].mxu1 %v9184_v29  ;;  %v2007_v39 = vshrl.u32 %v12329_v45, 16  ;;  %v2010_v25 = vshll.u32 %v12329_v45, 16  ;;  %v2352_v61 = vrot.slane %v1998_v46, 4 }
 0x13d   : > { %v1719_v6 = vrot.slane %v1718_v19, 4  ;;  %4325 = vmatprep.mubr.bf16.mxu1 %v9249_v10  ;;  %v2353_v62 = vrot.slane %v2001_v8, 5  ;;  %v9250_v33 = vcombine.low %v12315_v9, %v12329_v45  ;;  %v1993_v37 = vshrl.u32 %v1925_v34, 16 }
 0x13e   : > { %v1716_v0 = vsel %vm11582_vm10, %v1714_v11, %v1715_v30  ;;  %v2009_v36 = vrot.slane %v2007_v39, 7  ;;  %v12343_v50 = vrot.slane %v2010_v25, 5  ;;  %v2358_v2 = vrot.slane %v2007_v39, 4  ;;  %10687 = vmatpush3.bf16.msra.mxu0 %v10936_v41  ;;  %v10944_v30 = vld [vmem:[#allocation7 + $0x218] sm:$0xff]  }
 0x13f   : > { %v1724_v32 = vsel %vm11582_vm10, %v1719_v6, %v1723_v22  ;;  %v2354_v38 = vor.u32 %v2353_v62, %v2352_v61  ;;  %v9122_v46 = vrot.slane %v1993_v37, 11  ;;  %v2003_v10 = vor.u32 %v2001_v8, %v2000_v26  ;;  %10688 = vmatprep.subr.bf16.mxu0 %v10940_v12  ;;  %v12348_v22 = vld [vmem:[#allocation2 + $0x58] sm:$0xf]  ;;  %v12358_v62 = vld [vmem:[#allocation2 + $0x5c] sm:$0xf] }
 0x140   : > { %16297 = vst [vmem:[#allocation25_spill] sm:$0xff] %v12343_v50  ;;  %v9218_v29 = vcombine.low %v1716_v0, %v1724_v32  ;;  %v2359_v19 = vor.u32 %v2358_v2, %v12343_v50  ;;  %v2005_v11 = vrot.slane %v2000_v26, 4  ;;  %v2012_v9 = vor.u32 %v2010_v25, %v2009_v36  ;;  %16302 = vst [vmem:[#allocation27_spill] sm:$0xff] %v12358_v62  ;;  %v1928_v2 = vld [vmem:[#allocation2 + $0x54] sm:$0x8] }
 0x141   : > { %v16298_v45 = vshrl.u32 %v11665_v53, 16  ;;  %v12350_v6 = vrot.slane %v2354_v38, 4  ;;  %v2004_v41 = vsel %vm11561_vm9, %v9122_v46, %v2003_v10  ;;  %v16300_v8 = vshll.u32 %v11665_v53, 16  ;;  %v11081_v53 = vld [vmem:[#allocation2 + $0x44] sm:$0xf] }
 0x142   : > { %4172 = vmatprep.mubr.bf16.mxu0 %v9218_v29  ;;  %v16301_v61 = vshll.u32 %v11667_v60, 16  ;;  %v12360_v26 = vrot.slane %v2359_v19, 4  ;;  %v2013_v25 = vsel %vm11561_vm9, %v2005_v11, %v2012_v9  ;;  %v16304_v37 = vshrl.u32 %v11667_v60, 16  ;;  %v11082_v46 = vld [vmem:[#allocation2 + $0x48] sm:$0xf]  ;;  %10689 = vmatpush3.bf16.msra.mxu0 %v10940_v12  ;;  %v10948_v60 = vld [vmem:[#allocation7 + $0x220] sm:$0xff]  }
 0x143   : > { %v1725_v34 = vrot.slane %v16298_v45, 4  ;;  %16299 = vst [vmem:[#allocation26_spill] sm:$0xff] %v12350_v6  ;;  %v1726_v39 = vrot.slane %v16300_v8, 5  ;;  %4173 = vmatmul.mubr.bf16.gmra.mrb[68].mxu0 %v9202_v56  ;;  %v1735_v36 = vshll.u32 %v1683_v51, 16  ;;  %v9234_v29 = vcombine.low %v2004_v41, %v2013_v25  ;;  %10690 = vmatprep.subr.bf16.mxu0 %v10944_v30 }
 0x144   : > { %v1729_v0 = vrot.slane %v16301_v61, 5  ;;  %16303 = vst [vmem:[#allocation28_spill] sm:$0xff] %v12360_v26  ;;  %v1731_v32 = vrot.slane %v16304_v37, 4  ;;  %v9203_v10 = vcombine.low %v11081_v53, %v11082_v46  ;;  %v2020_v45 = vshrl.u32 %v12348_v22, 16  ;;  %4326 = vmatmul.mubr.bf16.vlgmr.msra.gmra.mrb[64].mxu1 %v9233_v14 }
 0x145   : > { %v1727_v38 = vor.u32 %v1726_v39, %v1725_v34  ;;  %v1737_v19 = vrot.slane %v1735_v36, 5  ;;  %v2023_v8 = vshll.u32 %v12348_v22, 16  ;;  %v2029_v11 = vshrl.u32 %v12358_v62, 16  ;;  %4333 = vmatprep.mubr.bf16.mxu1 %v9250_v33  ;;  %v1684_v39 = vld [vmem:[#allocation2 + $0x60] sm:$0x1] }
 0x146   : > { %v1732_v56 = vor.u32 %v1731_v32, %v1729_v0  ;;  %v2022_v9 = vrot.slane %v2020_v45, 7  ;;  %v16079_v34 = vshll.u32 %v12358_v62, 16  ;;  %v12370_v41 = vrot.slane %v2020_v45, 4  ;;  %10691 = vmatpush3.bf16.msra.mxu0 %v10944_v30 }
 0x147   : > { %v1728_v51 = vrot.slane %v1727_v38, 4  ;;  %v2031_v25 = vrot.slane %v2029_v11, 7  ;;  %v12372_v12 = vrot.slane %v2023_v8, 5  ;;  %v12374_v14 = vrot.slane %v2029_v11, 4  ;;  %v12380_v38 = vld [vmem:[#allocation2 + $0x6c] sm:$0xf]  ;;  %10692 = vmatprep.subr.bf16.mxu0 %v10948_v60 }
 0x148   : > { %16305 = vst [vmem:[#allocation29_spill] sm:$0xff] %v12370_v41  ;;  %v1733_v61 = vrot.slane %v1732_v56, 4  ;;  %v9251_v32 = vcombine.low %v12348_v22, %v12358_v62  ;;  %v2015_v33 = vshrl.u32 %v1928_v2, 16  ;;  %v2025_v36 = vor.u32 %v2023_v8, %v2022_v9 }
 0x149   : > { %16306 = vst [vmem:[#allocation30_spill] sm:$0xff] %v12372_v12  ;;  %16307 = vst [vmem:[#allocation31_spill] sm:$0xff] %v12374_v14  ;;  %v1730_v37 = vsel %vm11582_vm10, %v1728_v51, %v1729_v0  ;;  %v2027_v46 = vrot.slane %v2022_v9, 4  ;;  %v2034_v45 = vor.u32 %v16079_v34, %v2031_v25  ;;  %v16308_v56 = vshrl.u32 %v11701_v58, 16  ;;  %v11084_v34 = vld [vmem:[#allocation2 + $0x5c] sm:$0xf] }
 0x14a   : > { %v1738_v53 = vsel %vm11582_vm10, %v1733_v61, %v1737_v19  ;;  %v9123_v22 = vrot.slane %v2015_v33, 11  ;;  %v16310_v2 = vshll.u32 %v11701_v58, 16  ;;  %v16311_v30 = vshll.u32 %v11705_v1, 16  ;;  %v1931_v14 = vld [vmem:[#allocation2 + $0x68] sm:$0x8]  ;;  %10693 = vmatpush3.bf16.msra.mxu0 %v10948_v60 }
 0x14b   : > { %v1739_v11 = vrot.slane %v16308_v56, 4  ;;  %v9219_v0 = vcombine.low %v1730_v37, %v1738_v53  ;;  %v2035_v19 = vsel %vm11561_vm9, %v2027_v46, %v2034_v45  ;;  %v16312_v9 = vshrl.u32 %v11705_v1, 16  ;;  %v11083_v56 = vld [vmem:[#allocation2 + $0x58] sm:$0xf]  ;;  %v10956_v37 = vld [vmem:[#allocation7 + $0x230] sm:$0xff]   ;;  %10694 = vmatprep.subr.bf16.mxu0 %v10952_v44 }
 0x14c   : > { %v1740_v8 = vrot.slane %v16310_v2, 5  ;;  %v1743_v51 = vrot.slane %v16311_v30, 5  ;;  %v1749_v25 = vshll.u32 %v1684_v39, 16  ;;  %v9204_v55 = vcombine.low %v11083_v56, %v11084_v34  ;;  %4334 = vmatmul.mubr.bf16.gmra.mrb[68].mxu1 %v9234_v29 }
 0x14d   : > { %v1745_v61 = vrot.slane %v16312_v9, 4  ;;  %4180 = vmatprep.mubr.bf16.mxu0 %v9219_v0  ;;  %v2026_v58 = vsel %vm11561_vm9, %v9123_v22, %v2025_v36  ;;  %v2042_v53 = vshrl.u32 %v12380_v38, 16  ;;  %v2045_v2 = vshll.u32 %v12380_v38, 16  ;;  %4341 = vmatprep.mubr.bf16.mxu1 %v9251_v32  ;;  %v1685_v36 = vld [vmem:[#allocation2 + $0x74] sm:$0x1] }
 0x14e   : > { %v1741_v33 = vor.u32 %v1740_v8, %v1739_v11  ;;  %4181 = vmatmul.mubr.bf16.gmra.mrb[72].mxu0 %v9203_v10  ;;  %v9235_v1 = vcombine.low %v2026_v58, %v2035_v19  ;;  %v1751_v39 = vrot.slane %v1749_v25, 5  ;;  %v2051_v45 = vshrl.u32 %v12388_v17, 16 }
 0x14f   : > { %v1746_v46 = vor.u32 %v1745_v61, %v1743_v51  ;;  %v2044_v30 = vrot.slane %v2042_v53, 7  ;;  %v16081_v0 = vshll.u32 %v12388_v17, 16  ;;  %v12404_v9 = vrot.slane %v2042_v53, 4  ;;  %v12414_v61 = vld [vmem:[#allocation2 + $0x80] sm:$0xf]  ;;  %10695 = vmatpush3.bf16.msra.mxu0 %v10952_v44 }
 0x150   : > { %v1742_v34 = vrot.slane %v1741_v33, 4  ;;  %v2053_v22 = vrot.slane %v2051_v45, 7  ;;  %v12406_v8 = vrot.slane %v2045_v2, 5  ;;  %v12408_v29 = vrot.slane %v2051_v45, 4  ;;  %10696 = vmatprep.subr.bf16.mxu0 %v10956_v37 }
 0x151   : > { %16313 = vst [vmem:[#allocation33_spill] sm:$0xff] %v12404_v9  ;;  %v1747_v11 = vrot.slane %v1746_v46, 4  ;;  %v9252_v60 = vcombine.low %v12380_v38, %v12388_v17  ;;  %v2037_v32 = vshrl.u32 %v1931_v14, 16  ;;  %v2047_v19 = vor.u32 %v2045_v2, %v2044_v30  ;;  %v12422_v46 = vld [vmem:[#allocation2 + $0x84] sm:$0xf] }
 0x152   : > { %16314 = vst [vmem:[#allocation34_spill] sm:$0xff] %v12406_v8  ;;  %16315 = vst [vmem:[#allocation35_spill] sm:$0xff] %v12408_v29  ;;  %v1744_v10 = vsel %vm11582_vm10, %v1742_v34, %v1743_v51  ;;  %v2049_v56 = vrot.slane %v2044_v30, 4  ;;  %v2056_v58 = vor.u32 %v16081_v0, %v2053_v22  ;;  %v16316_v33 = vshrl.u32 %v11752_v18, 16  ;;  %v10960_v34 = vld [vmem:[#allocation7 + $0x238] sm:$0xff]  }
 0x153   : > { %v1752_v25 = vsel %vm11582_vm10, %v1747_v11, %v1751_v39  ;;  %16317 = vst [vmem:[#allocation36_spill] sm:$0xff] %v12422_v46  ;;  %v9124_v38 = vrot.slane %v2037_v32, 11  ;;  %v16318_v14 = vshll.u32 %v11752_v18, 16  ;;  %v16319_v44 = vshll.u32 %v11754_v20, 16  ;;  %v11086_v0 = vld [vmem:[#allocation2 + $0x70] sm:$0xf]  ;;  %10697 = vmatpush3.bf16.msra.mxu0 %v10956_v37 }
 0x154   : > { %v1753_v53 = vrot.slane %v16316_v33, 4  ;;  %v9220_v51 = vcombine.low %v1744_v10, %v1752_v25  ;;  %v2057_v39 = vsel %vm11561_vm9, %v2049_v56, %v2056_v58  ;;  %v16320_v30 = vshrl.u32 %v11754_v20, 16  ;;  %v11085_v33 = vld [vmem:[#allocation2 + $0x6c] sm:$0xf]  ;;  %v1934_v17 = vld [vmem:[#allocation2 + $0x7c] sm:$0x8]  ;;  %4342 = vmatmul.mubr.bf16.gmra.mrb[72].mxu1 %v9235_v1  ;;  %10698 = vmatprep.subr.bf16.mxu0 %v10960_v34 }
 0x155   : > { %v1754_v2 = vrot.slane %v16318_v14, 5  ;;  %v1757_v45 = vrot.slane %v16319_v44, 5  ;;  %v1763_v22 = vshll.u32 %v1685_v36, 16  ;;  %v9205_v29 = vcombine.low %v11085_v33, %v11086_v0  ;;  %4349 = vmatprep.mubr.bf16.mxu1 %v9252_v60 }
 0x156   : > { %v1759_v11 = vrot.slane %v16320_v30, 4  ;;  %4188 = vmatprep.mubr.bf16.mxu0 %v9220_v51  ;;  %v2048_v18 = vsel %vm11561_vm9, %v9124_v38, %v2047_v19  ;;  %v2064_v32 = vshrl.u32 %v12414_v61, 16  ;;  %v2067_v25 = vshll.u32 %v12414_v61, 16  ;;  %v1686_v19 = vld [vmem:[#allocation2 + $0x88] sm:$0x1] }
 0x157   : > { %v1755_v10 = vor.u32 %v1754_v2, %v1753_v53  ;;  %4189 = vmatmul.mubr.bf16.gmra.mrb[76].mxu0 %v9204_v55  ;;  %v9236_v56 = vcombine.low %v2048_v18, %v2057_v39  ;;  %v1765_v58 = vrot.slane %v1763_v22, 5  ;;  %v2073_v36 = vshrl.u32 %v12422_v46, 16  ;;  %v12448_v30 = vld [vmem:[#allocation2 + $0x94] sm:$0xf] }
 0x158   : > { %v1760_v20 = vor.u32 %v1759_v11, %v1757_v45  ;;  %v2066_v14 = vrot.slane %v2064_v32, 7  ;;  %v16083_v51 = vshll.u32 %v12422_v46, 16  ;;  %v12438_v44 = vrot.slane %v2064_v32, 4  ;;  %10699 = vmatpush3.bf16.msra.mxu0 %v10960_v34  ;;  %v12456_v32 = vld [vmem:[#allocation2 + $0x98] sm:$0xf] }
 0x159   : > { %v1756_v0 = vrot.slane %v1755_v10, 4  ;;  %v2075_v38 = vrot.slane %v2073_v36, 7  ;;  %v12440_v2 = vrot.slane %v2067_v25, 5  ;;  %v12442_v37 = vrot.slane %v2073_v36, 4  ;;  %16325 = vst [vmem:[#allocation40_spill] sm:$0xff] %v12456_v32 }
 0x15a   : > { %16321 = vst [vmem:[#allocation37_spill] sm:$0xff] %v12438_v44  ;;  %v1761_v53 = vrot.slane %v1760_v20, 4  ;;  %v9253_v1 = vcombine.low %v12414_v61, %v12422_v46  ;;  %v2059_v60 = vshrl.u32 %v1934_v17, 16  ;;  %v2069_v39 = vor.u32 %v2067_v25, %v2066_v14 }
 0x15b   : > { %16322 = vst [vmem:[#allocation38_spill] sm:$0xff] %v12440_v2  ;;  %16323 = vst [vmem:[#allocation39_spill] sm:$0xff] %v12442_v37  ;;  %v1758_v55 = vsel %vm11582_vm10, %v1756_v0, %v1757_v45  ;;  %v2071_v22 = vrot.slane %v2066_v14, 4  ;;  %v2078_v33 = vor.u32 %v16083_v51, %v2075_v38  ;;  %v16324_v18 = vshrl.u32 %v11796_v59, 16  ;;  %v11088_v38 = vld [vmem:[#allocation2 + $0x84] sm:$0xf] }
 0x15c   : > { %v1766_v11 = vsel %vm11582_vm10, %v1761_v53, %v1765_v58  ;;  %v9125_v20 = vrot.slane %v2059_v60, 11  ;;  %v16326_v17 = vshll.u32 %v11796_v59, 16  ;;  %v16327_v25 = vshll.u32 %v11800_v5, 16  ;;  %v11087_v53 = vld [vmem:[#allocation2 + $0x80] sm:$0xf]  ;;  %4350 = vmatmul.mubr.bf16.gmra.mrb[76].mxu1 %v9236_v56 }
 0x15d   : > { %v1767_v10 = vrot.slane %v16324_v18, 4  ;;  %v9221_v45 = vcombine.low %v1758_v55, %v1766_v11  ;;  %v2079_v58 = vsel %vm11561_vm9, %v2071_v22, %v2078_v33  ;;  %v16328_v36 = vshrl.u32 %v11800_v5, 16  ;;  %v1937_v51 = vld [vmem:[#allocation2 + $0x90] sm:$0x8]  ;;  %4357 = vmatprep.mubr.bf16.mxu1 %v9253_v1  ;;  %v1940_v37 = vld [vmem:[#allocation2 + $0xa4] sm:$0x8] }
 0x15e   : > { %v1768_v61 = vrot.slane %v16326_v17, 5  ;;  %v1771_v34 = vrot.slane %v16327_v25, 5  ;;  %v1777_v14 = vshll.u32 %v1686_v19, 16  ;;  %v9206_v18 = vcombine.low %v11087_v53, %v11088_v38 }
 0x15f   : > { %v1773_v0 = vrot.slane %v16328_v36, 4  ;;  %4196 = vmatprep.mubr.bf16.mxu0 %v9221_v45  ;;  %v2070_v55 = vsel %vm11561_vm9, %v9125_v20, %v2069_v39  ;;  %v2086_v60 = vshrl.u32 %v12448_v30, 16  ;;  %v2089_v11 = vshll.u32 %v12448_v30, 16  ;;  %v1687_v39 = vld [vmem:[#allocation2 + $0x9c] sm:$0x1] }
 0x160   : > { %v1769_v59 = vor.u32 %v1768_v61, %v1767_v10  ;;  %4197 = vmatmul.mubr.bf16.gmra.mrb[80].mxu0 %v9205_v29  ;;  %v9237_v22 = vcombine.low %v2070_v55, %v2079_v58  ;;  %v1779_v5 = vrot.slane %v1777_v14, 5  ;;  %v2095_v19 = vshrl.u32 %v12456_v32, 16 }
 0x161   : > { %v1774_v33 = vor.u32 %v1773_v0, %v1771_v34  ;;  %v2088_v25 = vrot.slane %v2086_v60, 7  ;;  %v16084_v45 = vshll.u32 %v12456_v32, 16  ;;  %v12472_v36 = vrot.slane %v2086_v60, 4  ;;  %v12482_v0 = vld [vmem:[#allocation2 + $0xa8] sm:$0xf] }
 0x162   : > { %v1770_v17 = vrot.slane %v1769_v59, 4  ;;  %v2097_v20 = vrot.slane %v2095_v19, 7  ;;  %v12474_v61 = vrot.slane %v2089_v11, 5  ;;  %v12476_v53 = vrot.slane %v2095_v19, 4 }
 0x163   : > { %16329 = vst [vmem:[#allocation41_spill] sm:$0xff] %v12472_v36  ;;  %v1775_v10 = vrot.slane %v1774_v33, 4  ;;  %v9254_v56 = vcombine.low %v12448_v30, %v12456_v32  ;;  %v2081_v1 = vshrl.u32 %v1937_v51, 16  ;;  %v2091_v58 = vor.u32 %v2089_v11, %v2088_v25  ;;  %v12490_v33 = vld [vmem:[#allocation2 + $0xac] sm:$0xf] }
 0x164   : > { %16330 = vst [vmem:[#allocation42_spill] sm:$0xff] %v12474_v61  ;;  %16331 = vst [vmem:[#allocation43_spill] sm:$0xff] %v12476_v53  ;;  %v1772_v29 = vsel %vm11582_vm10, %v1770_v17, %v1771_v34  ;;  %v2093_v38 = vrot.slane %v2088_v25, 4  ;;  %v2100_v55 = vor.u32 %v16084_v45, %v2097_v20  ;;  %v16332_v59 = vshrl.u32 %v11849_v49, 16  ;;  %v11089_v45 = vld [vmem:[#allocation2 + $0x94] sm:$0xf]  ;;  %4358 = vmatmul.mubr.bf16.gmra.mrb[80].mxu1 %v9237_v22 }
 0x165   : > { %v1780_v14 = vsel %vm11582_vm10, %v1775_v10, %v1779_v5  ;;  %16333 = vst [vmem:[#allocation44_spill] sm:$0xff] %v12490_v33  ;;  %v9126_v19 = vrot.slane %v2081_v1, 11  ;;  %v16334_v30 = vshll.u32 %v11849_v49, 16  ;;  %v16335_v11 = vshll.u32 %v11851_v43, 16  ;;  %v11090_v53 = vld [vmem:[#allocation2 + $0x98] sm:$0xf]  ;;  %4365 = vmatprep.mubr.bf16.mxu1 %v9254_v56 }
 0x166   : > { %v1781_v60 = vrot.slane %v16332_v59, 4  ;;  %v9222_v34 = vcombine.low %v1772_v29, %v1780_v14  ;;  %v2101_v5 = vsel %vm11561_vm9, %v2093_v38, %v2100_v55  ;;  %v16336_v25 = vshrl.u32 %v11851_v43, 16  ;;  %v12538_v32 = vld [vmem:[#allocation2 + $0xc0] sm:$0xf] }
 0x167   : > { %v1782_v51 = vrot.slane %v16334_v30, 5  ;;  %v1785_v17 = vrot.slane %v16335_v11, 5  ;;  %v1791_v20 = vshll.u32 %v1687_v39, 16  ;;  %v9207_v59 = vcombine.low %v11089_v45, %v11090_v53  ;;  %v12505_v30 = vpop.f32.mrb[0].mxu0  ;;  %16342 = vst [vmem:[#allocation48_spill] sm:$0xff] %v12538_v32 }
 0x168   : > { %v1787_v10 = vrot.slane %v16336_v25, 4  ;;  %4204 = vmatprep.mubr.bf16.mxu0 %v9222_v34  ;;  %v2092_v29 = vsel %vm11561_vm9, %v9126_v19, %v2091_v58  ;;  %v2108_v1 = vshrl.u32 %v12482_v0, 16  ;;  %v2111_v14 = vshll.u32 %v12482_v0, 16  ;;  %v12510_v19 = vpop.f32.mrb[0].mxu1 }
 0x169   : > { %v1783_v49 = vor.u32 %v1782_v51, %v1781_v60  ;;  %4205 = vmatmul.mubr.bf16.gmra.mrb[84].mxu0 %v9206_v18  ;;  %v9238_v38 = vcombine.low %v2092_v29, %v2101_v5  ;;  %v1793_v43 = vrot.slane %v1791_v20, 5  ;;  %v2117_v39 = vshrl.u32 %v12490_v33, 16  ;;  %v1688_v60 = vld [vmem:[#allocation2 + $0xb0] sm:$0x1]  ;;  %v12512_v51 = vpop.f32.mrb[1].mxu0  ;;  %v12518_v25 = vpop.f32.mrb[1].mxu1 }
 0x16a   : > { %v1788_v55 = vor.u32 %v1787_v10, %v1785_v17  ;;  %v2110_v53 = vrot.slane %v2108_v1, 7  ;;  %v12508_v58 = vrot.slane %v2108_v1, 4  ;;  %v12514_v11 = vrot.slane %v2111_v14, 5  ;;  %v12520_v56 = vpop.f32.mrb[2].mxu0  ;;  %v12526_v1 = vld [vmem:[#allocation2 + $0xbc] sm:$0xf] }
 0x16b   : > { %v1784_v45 = vrot.slane %v1783_v49, 4  ;;  %v2119_v22 = vrot.slane %v2117_v39, 7  ;;  %v12516_v5 = vrot.slane %v2117_v39, 4  ;;  %v9255_v20 = vcombine.low %v12482_v0, %v12490_v33  ;;  %v12530_v34 = vpop.f32.mrb[3].mxu0 }
 0x16c   : > { %16337 = vst [vmem:[#allocation45_spill] sm:$0xff] %v12508_v58  ;;  %v1789_v18 = vrot.slane %v1788_v55, 4  ;;  %16338 = vst [vmem:[#allocation46_spill] sm:$0xff] %v12514_v11  ;;  %v2103_v29 = vshrl.u32 %v1940_v37, 16  ;;  %v2113_v49 = vor.u32 %v2111_v14, %v2110_v53  ;;  %v12528_v55 = vpop.f32.mrb[2].mxu1  ;;  %v16340_v11 = vshll.u32 %v12490_v33, 16  ;;  %4366 = vmatmul.mubr.bf16.gmra.mrb[84].mxu1 %v9238_v38 }
 0x16d   : > { %16339 = vst [vmem:[#allocation47_spill] sm:$0xff] %v12516_v5  ;;  %v1786_v10 = vsel %vm11582_vm10, %v1784_v45, %v1785_v17  ;;  %v2115_v5 = vrot.slane %v2110_v53, 4  ;;  %v16341_v17 = vshrl.u32 %v11903_v13, 16  ;;  %v12540_v37 = vpop.f32.mrb[3].mxu1  ;;  %v16343_v61 = vshll.u32 %v11903_v13, 16  ;;  %4373 = vmatprep.mubr.bf16.mxu1 %v9255_v20 }
 0x16e   : > { %v1794_v39 = vsel %vm11582_vm10, %v1789_v18, %v1793_v43  ;;  %v2122_v58 = vor.u32 %v16340_v11, %v2119_v22  ;;  %v9127_v14 = vrot.slane %v2103_v29, 11  ;;  %v16344_v46 = vshll.u32 %v11909_v24, 16  ;;  %v1943_v11 = vld [vmem:[#allocation2 + $0xb8] sm:$0x8] }
 0x16f   : > { %v1795_v45 = vrot.slane %v16341_v17, 4  ;;  %v9223_v0 = vcombine.low %v1786_v10, %v1794_v39  ;;  %v1796_v36 = vrot.slane %v16343_v61, 5  ;;  %v16345_v53 = vshrl.u32 %v11909_v24, 16  ;;  %v11091_v39 = vld [vmem:[#allocation2 + $0xa8] sm:$0xf] }
 0x170   : > { %v1799_v2 = vrot.slane %v16344_v46, 5  ;;  %v2123_v43 = vsel %vm11561_vm9, %v2115_v5, %v2122_v58  ;;  %v1805_v22 = vshll.u32 %v1688_v60, 16  ;;  %v2114_v17 = vsel %vm11561_vm9, %v9127_v14, %v2113_v49  ;;  %v11092_v58 = vld [vmem:[#allocation2 + $0xac] sm:$0xf]  ;;  %v12555_v60 = vpop.f32.mrb[4].mxu0 }
 0x171   : > { %v1801_v18 = vrot.slane %v16345_v53, 4  ;;  %4212 = vmatprep.mubr.bf16.mxu0 %v9223_v0  ;;  %v1797_v10 = vor.u32 %v1796_v36, %v1795_v45  ;;  %v2130_v29 = vshrl.u32 %v12526_v1, 16  ;;  %v2133_v13 = vshll.u32 %v12526_v1, 16  ;;  %v12558_v45 = vpop.f32.mrb[5].mxu0 }
 0x172   : > { %4213 = vmatmul.mubr.bf16.gmra.mrb[88].mxu0 %v9207_v59  ;;  %v1807_v61 = vrot.slane %v1805_v22, 5  ;;  %v9208_v5 = vcombine.low %v11091_v39, %v11092_v58  ;;  %v2139_v24 = vshrl.u32 %v12538_v32, 16  ;;  %v9239_v0 = vcombine.low %v2114_v17, %v2123_v43  ;;  %v12564_v22 = vpop.f32.mrb[6].mxu0  ;;  %v12570_v58 = vpop.f32.mrb[4].mxu1 }
 0x173   : > { %v1802_v46 = vor.u32 %v1801_v18, %v1799_v2  ;;  %v1798_v53 = vrot.slane %v1797_v10, 4  ;;  %v2132_v49 = vrot.slane %v2130_v29, 7  ;;  %v12560_v59 = vrot.slane %v2130_v29, 4  ;;  %v1689_v10 = vld [vmem:[#allocation2 + $0xc4] sm:$0x1]  ;;  %v12572_v36 = vpop.f32.mrb[7].mxu0 }
 0x174   : > { %v2141_v38 = vrot.slane %v2139_v24, 7  ;;  %v12562_v18 = vrot.slane %v2133_v13, 5  ;;  %v9256_v20 = vcombine.low %v12526_v1, %v12538_v32  ;;  %v2125_v43 = vshrl.u32 %v1943_v11, 16  ;;  %v12582_v1 = vpop.f32.mrb[5].mxu1  ;;  %4374 = vmatmul.mubr.bf16.gmra.mrb[88].mxu1 %v9239_v0 }
 0x175   : > { %v1803_v14 = vrot.slane %v1802_v46, 4  ;;  %16346 = vst [vmem:[#allocation49_spill] sm:$0xff] %v12560_v59  ;;  %v1800_v39 = vsel %vm11582_vm10, %v1798_v53, %v1799_v2  ;;  %v2135_v17 = vor.u32 %v2133_v13, %v2132_v49  ;;  %v2137_v46 = vrot.slane %v2132_v49, 4  ;;  %v12580_v53 = vld [vmem:[#allocation2 + $0xd0] sm:$0xf]  ;;  %v12590_v49 = vpop.f32.mrb[6].mxu1 }
 0x176   : > { %16347 = vst [vmem:[#allocation50_spill] sm:$0xff] %v12562_v18  ;;  %v16348_v18 = vshll.u32 %v12538_v32, 16  ;;  %v16349_v33 = vshrl.u32 %v11952_v40, 16  ;;  %v9128_v13 = vrot.slane %v2125_v43, 11  ;;  %v16350_v44 = vshll.u32 %v11952_v40, 16  ;;  %4381 = vmatprep.mubr.bf16.mxu1 %v9256_v20 }
 0x177   : > { %v1808_v29 = vsel %vm11582_vm10, %v1803_v14, %v1807_v61  ;;  %v16351_v9 = vshll.u32 %v11958_v48, 16  ;;  %v12588_v61 = vld [vmem:[#allocation2 + $0xd4] sm:$0xf]  ;;  %v12592_v14 = vrot.slane %v2139_v24, 4  ;;  %v1946_v43 = vld [vmem:[#allocation2 + $0xcc] sm:$0x8] }
 0x178   : > { %v2144_v59 = vor.u32 %v16348_v18, %v2141_v38  ;;  %v1809_v2 = vrot.slane %v16349_v33, 4  ;;  %v9224_v11 = vcombine.low %v1800_v39, %v1808_v29  ;;  %v1810_v8 = vrot.slane %v16350_v44, 5  ;;  %16352 = vst [vmem:[#allocation51_spill] sm:$0xff] %v12588_v61  ;;  %v12598_v29 = vpop.f32.mrb[7].mxu1 }
 0x179   : > { %v1813_v62 = vrot.slane %v16351_v9, 5  ;;  %16353 = vst [vmem:[#allocation52_spill] sm:$0xff] %v12592_v14  ;;  %v16354_v38 = vshrl.u32 %v11958_v48, 16  ;;  %v1819_v39 = vshll.u32 %v1689_v10, 16  ;;  %v2136_v40 = vsel %vm11561_vm9, %v9128_v13, %v2135_v17  ;;  %v11094_v48 = vld [vmem:[#allocation2 + $0xc0] sm:$0xf] }
 0x17a   : > { %v2145_v33 = vsel %vm11561_vm9, %v2137_v46, %v2144_v59  ;;  %4220 = vmatprep.mubr.bf16.mxu0 %v9224_v11  ;;  %v1811_v9 = vor.u32 %v1810_v8, %v1809_v2  ;;  %v2152_v44 = vshrl.u32 %v12580_v53, 16  ;;  %v2155_v24 = vshll.u32 %v12580_v53, 16  ;;  %v11093_v46 = vld [vmem:[#allocation2 + $0xbc] sm:$0xf]  ;;  %v1690_v8 = vld [vmem:[#allocation2 + $0xd8] sm:$0x1] }
 0x17b   : > { %v1815_v18 = vrot.slane %v16354_v38, 4  ;;  %4221 = vmatmul.mubr.bf16.gmra.mrb[92].mxu0 %v9208_v5  ;;  %v1821_v59 = vrot.slane %v1819_v39, 5  ;;  %v9209_v38 = vcombine.low %v11093_v46, %v11094_v48  ;;  %v2161_v10 = vshrl.u32 %v12588_v61, 16  ;;  %v12610_v5 = vld [vmem:[#allocation2 + $0xe4] sm:$0xf]  ;;  %v12634_v6 = vpop.f32.mrb[8].mxu1 }
 0x17c   : > { %v9240_v32 = vcombine.low %v2136_v40, %v2145_v33  ;;  %v1812_v11 = vrot.slane %v1811_v9, 4  ;;  %v2154_v26 = vrot.slane %v2152_v44, 7  ;;  %v16090_v17 = vshll.u32 %v12588_v61, 16  ;;  %v12618_v9 = vld [vmem:[#allocation2 + $0xe8] sm:$0xf] }
 0x17d   : > { %v1816_v14 = vor.u32 %v1815_v18, %v1813_v62  ;;  %v2163_v13 = vrot.slane %v2161_v10, 7  ;;  %v12606_v12 = vrot.slane %v2152_v44, 4  ;;  %v12608_v0 = vrot.slane %v2155_v24, 5  ;;  %v12612_v18 = vpop.f32.mrb[8].mxu0  ;;  %16357 = vst [vmem:[#allocation55_spill] sm:$0xff] %v12618_v9 }
 0x17e   : > { %v1814_v39 = vsel %vm11582_vm10, %v1812_v11, %v1813_v62  ;;  %v9257_v20 = vcombine.low %v12580_v53, %v12588_v61  ;;  %v2147_v33 = vshrl.u32 %v1946_v43, 16  ;;  %v2157_v40 = vor.u32 %v2155_v24, %v2154_v26  ;;  %4382 = vmatmul.mubr.bf16.gmra.mrb[92].mxu1 %v9240_v32  ;;  %v1691_v61 = vld [vmem:[#allocation2 + $0xec] sm:$0x1] }
 0x17f   : > { %v1817_v2 = vrot.slane %v1816_v14, 4  ;;  %16355 = vst [vmem:[#allocation53_spill] sm:$0xff] %v12606_v12  ;;  %16356 = vst [vmem:[#allocation54_spill] sm:$0xff] %v12608_v0  ;;  %v12620_v14 = vpop.f32.mrb[9].mxu0  ;;  %v2159_v46 = vrot.slane %v2154_v26, 4  ;;  %v2166_v48 = vor.u32 %v16090_v17, %v2163_v13  ;;  %v16358_v0 = vshrl.u32 %v11995_v21, 16 }
 0x180   : > { %v12628_v62 = vpop.f32.mrb[10].mxu0  ;;  %v9129_v53 = vrot.slane %v2147_v33, 11  ;;  %v16359_v43 = vshll.u32 %v11995_v21, 16  ;;  %v16360_v41 = vshll.u32 %v12001_v35, 16  ;;  %v12638_v26 = vrot.slane %v2161_v10, 4  ;;  %4389 = vmatprep.mubr.bf16.mxu1 %v9257_v20 }
 0x181   : > { %v1822_v44 = vsel %vm11582_vm10, %v1817_v2, %v1821_v59  ;;  %v1823_v12 = vrot.slane %v16358_v0, 4  ;;  %v12636_v59 = vpop.f32.mrb[11].mxu0  ;;  %v2167_v2 = vsel %vm11561_vm9, %v2159_v46, %v2166_v48  ;;  %v16362_v13 = vshrl.u32 %v12001_v35, 16  ;;  %v1949_v33 = vld [vmem:[#allocation2 + $0xe0] sm:$0x8] }
 0x182   : > { %v9225_v11 = vcombine.low %v1814_v39, %v1822_v44  ;;  %v1824_v24 = vrot.slane %v16359_v43, 5  ;;  %v1827_v28 = vrot.slane %v16360_v41, 5  ;;  %16361 = vst [vmem:[#allocation56_spill] sm:$0xff] %v12638_v26  ;;  %v1833_v39 = vshll.u32 %v1690_v8, 16  ;;  %v12644_v44 = vpop.f32.mrb[9].mxu1 }
 0x183   : > { %v1829_v0 = vrot.slane %v16362_v13, 4  ;;  %v2158_v21 = vsel %vm11561_vm9, %v9129_v53, %v2157_v40  ;;  %v2174_v43 = vshrl.u32 %v12610_v5, 16  ;;  %v2177_v10 = vshll.u32 %v12610_v5, 16  ;;  %v12650_v17 = vpop.f32.mrb[10].mxu1  ;;  %v11095_v48 = vld [vmem:[#allocation2 + $0xd0] sm:$0xf] }
 0x184   : > { %4228 = vmatprep.mubr.bf16.mxu0 %v9225_v11  ;;  %v1825_v41 = vor.u32 %v1824_v24, %v1823_v12  ;;  %v1835_v35 = vrot.slane %v1833_v39, 5  ;;  %v11096_v8 = vld [vmem:[#allocation2 + $0xd4] sm:$0xf]  ;;  %v2183_v26 = vshrl.u32 %v12618_v9, 16  ;;  %v12653_v11 = vpop.f32.mrb[11].mxu1  ;;  %v9241_v40 = vcombine.low %v2158_v21, %v2167_v2 }
 0x185   : > { %4229 = vmatmul.mubr.bf16.gmra.mrb[96].mxu0 %v9209_v38  ;;  %v1830_v46 = vor.u32 %v1829_v0, %v1827_v28  ;;  %v9210_v13 = vcombine.low %v11095_v48, %v11096_v8  ;;  %v2176_v53 = vrot.slane %v2174_v43, 7  ;;  %v16094_v24 = vshll.u32 %v12618_v9, 16  ;;  %v12660_v0 = vld [vmem:[#allocation2 + $0xf8] sm:$0xf] }
 0x186   : > { %v1826_v12 = vrot.slane %v1825_v41, 4  ;;  %v2185_v4 = vrot.slane %v2183_v26, 7  ;;  %v12656_v32 = vrot.slane %v2174_v43, 4  ;;  %v12658_v38 = vrot.slane %v2177_v10, 5  ;;  %v12666_v41 = vld [vmem:[#allocation2 + $0xfc] sm:$0xf]  ;;  %4390 = vmatmul.mubr.bf16.gmra.mrb[96].mxu1 %v9241_v40 }
 0x187   : > { %v1831_v50 = vrot.slane %v1830_v46, 4  ;;  %v9258_v20 = vcombine.low %v12610_v5, %v12618_v9  ;;  %v2169_v2 = vshrl.u32 %v1949_v33, 16  ;;  %v2179_v21 = vor.u32 %v2177_v10, %v2176_v53 }
 0x188   : > { %16363 = vst [vmem:[#allocation57_spill] sm:$0xff] %v12656_v32  ;;  %16364 = vst [vmem:[#allocation58_spill] sm:$0xff] %v12658_v38  ;;  %v1828_v39 = vsel %vm11582_vm10, %v1826_v12, %v1827_v28  ;;  %v2181_v48 = vrot.slane %v2176_v53, 4  ;;  %v2188_v43 = vor.u32 %v16094_v24, %v2185_v4  ;;  %v16365_v8 = vshrl.u32 %v12035_v63, 16  ;;  %v12674_v32 = vpop.f32.mrb[12].mxu0 }
 0x189   : > { %v1836_v46 = vsel %vm11582_vm10, %v1831_v50, %v1835_v35  ;;  %v9130_v12 = vrot.slane %v2169_v2, 11  ;;  %v16366_v5 = vshll.u32 %v12035_v63, 16  ;;  %v16367_v10 = vshll.u32 %v12039_v27, 16  ;;  %v12680_v15 = vpop.f32.mrb[13].mxu0  ;;  %v1952_v24 = vld [vmem:[#allocation2 + $0xf4] sm:$0x8]  ;;  %4397 = vmatprep.mubr.bf16.mxu1 %v9258_v20 }
 0x18a   : > { %v1837_v38 = vrot.slane %v16365_v8, 4  ;;  %v9226_v28 = vcombine.low %v1828_v39, %v1836_v46  ;;  %v12682_v50 = vrot.slane %v2183_v26, 4  ;;  %v2189_v4 = vsel %vm11561_vm9, %v2181_v48, %v2188_v43  ;;  %v12688_v39 = vpop.f32.mrb[14].mxu0  ;;  %v11097_v43 = vld [vmem:[#allocation2 + $0xe4] sm:$0xf] }
 0x18b   : > { %v1838_v33 = vrot.slane %v16366_v5, 5  ;;  %v1841_v3 = vrot.slane %v16367_v10, 5  ;;  %v16369_v35 = vshrl.u32 %v12039_v27, 16  ;;  %v1847_v8 = vshll.u32 %v1691_v61, 16  ;;  %v12694_v5 = vpop.f32.mrb[15].mxu0 }
 0x18c   : > { %16368 = vst [vmem:[#allocation59_spill] sm:$0xff] %v12682_v50  ;;  %4236 = vmatprep.mubr.bf16.mxu0 %v9226_v28  ;;  %v2180_v63 = vsel %vm11561_vm9, %v9130_v12, %v2179_v21  ;;  %v2196_v46 = vshrl.u32 %v12660_v0, 16  ;;  %v2199_v26 = vshll.u32 %v12660_v0, 16  ;;  %v11098_v61 = vld [vmem:[#allocation2 + $0xe8] sm:$0xf] }
 0x18d   : > { %v1843_v53 = vrot.slane %v16369_v35, 4  ;;  %v1839_v2 = vor.u32 %v1838_v33, %v1837_v38  ;;  %4237 = vmatmul.mubr.bf16.gmra.mrb[100].mxu0 %v9210_v13  ;;  %v1849_v27 = vrot.slane %v1847_v8, 5  ;;  %v9211_v10 = vcombine.low %v11097_v43, %v11098_v61  ;;  %v1692_v13 = vld [vmem:[#allocation2 + $0x100] sm:$0x1]  ;;  %v12716_v43 = vld [vmem:[#allocation2 + $0x110] sm:$0xf] }
 0x18e   : > { %v2205_v35 = vshrl.u32 %v12666_v41, 16  ;;  %v9242_v28 = vcombine.low %v2180_v63, %v2189_v4  ;;  %v2198_v21 = vrot.slane %v2196_v46, 7  ;;  %v16098_v38 = vshll.u32 %v12666_v41, 16  ;;  %v12706_v4 = vld [vmem:[#allocation2 + $0x10c] sm:$0xf] }
 0x18f   : > { %v1844_v48 = vor.u32 %v1843_v53, %v1841_v3  ;;  %v1840_v50 = vrot.slane %v1839_v2, 4  ;;  %v12698_v9 = vrot.slane %v2196_v46, 4  ;;  %v12700_v31 = vrot.slane %v2199_v26, 5 }
 0x190   : > { %v2207_v33 = vrot.slane %v2205_v35, 7  ;;  %v9259_v53 = vcombine.low %v12660_v0, %v12666_v41  ;;  %v2191_v8 = vshrl.u32 %v1952_v24, 16  ;;  %v2201_v20 = vor.u32 %v2199_v26, %v2198_v21  ;;  %v12726_v26 = vpop.f32.mrb[16].mxu0  ;;  %4398 = vmatmul.mubr.bf16.gmra.mrb[100].mxu1 %v9242_v28  ;;  %v11100_v28 = vld [vmem:[#allocation2 + $0xfc] sm:$0xf] }
 0x191   : > { %v1845_v12 = vrot.slane %v1844_v48, 4  ;;  %v1842_v40 = vsel %vm11582_vm10, %v1840_v50, %v1841_v3  ;;  %v2203_v2 = vrot.slane %v2198_v21, 4  ;;  %v12714_v48 = vadd.f32 %v12512_v51, %v12505_v30 }
 0x192   : > { %v2210_v46 = vor.u32 %v16098_v38, %v2207_v33  ;;  %v9131_v50 = vrot.slane %v2191_v8, 11  ;;  %v12720_v24 = vadd.f32 %v12518_v25, %v12510_v19  ;;  %v12724_v0 = vadd.f32 %v12530_v34, %v12520_v56  ;;  %v12738_v25 = vpop.f32.mrb[12].mxu1  ;;  %v1955_v8 = vld [vmem:[#allocation2 + $0x108] sm:$0x8]  ;;  %4405 = vmatprep.mubr.bf16.mxu1 %v9259_v53 }
 0x193   : > { %v1850_v63 = vsel %vm11582_vm10, %v1845_v12, %v1849_v27  ;;  %16370 = vst [vmem:[#allocation60_spill] sm:$0xff] %v12714_v48  ;;  %v12732_v30 = vadd.f32 %v12540_v37, %v12528_v55  ;;  %v16374_v51 = vshrl.u32 %v12080_v52, 16  ;;  %v16375_v21 = vshll.u32 %v12080_v52, 16  ;;  %v12740_v12 = vpop.f32.mrb[17].mxu0  ;;  %v12772_v48 = vld [vmem:[#allocation2 + $0x120] sm:$0xf] }
 0x194   : > { %v9227_v3 = vcombine.low %v1842_v40, %v1850_v63  ;;  %16371 = vst [vmem:[#allocation61_spill] sm:$0xff] %v12720_v24  ;;  %16372 = vst [vmem:[#allocation62_spill] sm:$0xff] %v12724_v0  ;;  %v2211_v27 = vsel %vm11561_vm9, %v2203_v2, %v2210_v46  ;;  %v2202_v34 = vsel %vm11561_vm9, %v9131_v50, %v2201_v20  ;;  %v16376_v56 = vshll.u32 %v12082_v47, 16  ;;  %v12748_v63 = vpop.f32.mrb[13].mxu1  ;;  %v12750_v52 = vpop.f32.mrb[18].mxu0 }
 0x195   : > { %16373 = vst [vmem:[#allocation63_spill] sm:$0xff] %v12732_v30  ;;  %v1851_v61 = vrot.slane %v16374_v51, 4  ;;  %v1852_v19 = vrot.slane %v16375_v21, 5  ;;  %v16377_v55 = vshrl.u32 %v12082_v47, 16  ;;  %v1861_v40 = vshll.u32 %v1692_v13, 16  ;;  %v12755_v50 = vpop.f32.mrb[14].mxu1 }
 0x196   : > { %4244 = vmatprep.mubr.bf16.mxu0 %v9227_v3  ;;  %v1855_v33 = vrot.slane %v16376_v56, 5  ;;  %v12752_v2 = vrot.slane %v2205_v35, 4  ;;  %v9243_v46 = vcombine.low %v2202_v34, %v2211_v27  ;;  %v2218_v20 = vshrl.u32 %v12706_v4, 16  ;;  %v12757_v51 = vpop.f32.mrb[19].mxu0  ;;  %v11099_v35 = vld [vmem:[#allocation2 + $0xf8] sm:$0xf] }
 0x197   : > { %v1857_v37 = vrot.slane %v16377_v55, 4  ;;  %4245 = vmatmul.mubr.bf16.gmra.mrb[104].mxu0 %v9211_v10  ;;  %v1853_v3 = vor.u32 %v1852_v19, %v1851_v61  ;;  %v1863_v13 = vrot.slane %v1861_v40, 5  ;;  %v2221_v21 = vshll.u32 %v12706_v4, 16  ;;  %v12761_v55 = vpop.f32.mrb[15].mxu1 }
 0x198   : > { %16378 = vst [vmem:[#allocation64_spill] sm:$0xff] %v12752_v2  ;;  %v2227_v56 = vshrl.u32 %v12716_v43, 16  ;;  %v9212_v27 = vcombine.low %v11099_v35, %v11100_v28  ;;  %v2220_v61 = vrot.slane %v2218_v20, 7  ;;  %v16099_v19 = vshll.u32 %v12716_v43, 16  ;;  %v12782_v2 = vld [vmem:[#allocation2 + $0x124] sm:$0xf]  ;;  %4406 = vmatmul.mubr.bf16.gmra.mrb[104].mxu1 %v9243_v46 }
 0x199   : > { %v1858_v47 = vor.u32 %v1857_v37, %v1855_v33  ;;  %v1854_v10 = vrot.slane %v1853_v3, 4  ;;  %v12764_v30 = vrot.slane %v2218_v20, 4  ;;  %v12766_v53 = vrot.slane %v2221_v21, 5  ;;  %v1693_v37 = vld [vmem:[#allocation2 + $0x114] sm:$0x1] }
 0x19a   : > { %v2229_v38 = vrot.slane %v2227_v56, 7  ;;  %v9260_v0 = vcombine.low %v12706_v4, %v12716_v43  ;;  %v2213_v3 = vshrl.u32 %v1955_v8, 16  ;;  %v2223_v24 = vor.u32 %v2221_v21, %v2220_v61 }
 0x19b   : > { %v1859_v34 = vrot.slane %v1858_v47, 4  ;;  %v1856_v40 = vsel %vm11582_vm10, %v1854_v10, %v1855_v33  ;;  %v2225_v47 = vrot.slane %v2220_v61, 4  ;;  %v12780_v28 = vadd.f32 %v12558_v45, %v12555_v60 }
 0x19c   : > { %v2232_v20 = vor.u32 %v16099_v19, %v2229_v38  ;;  %v9132_v10 = vrot.slane %v2213_v3, 11  ;;  %v12786_v4 = vadd.f32 %v12582_v1, %v12570_v58  ;;  %v12790_v8 = vadd.f32 %v12572_v36, %v12564_v22  ;;  %v16385_v36 = vld [vmem:[#allocation16_spill] sm:$0xff]  ;;  %4413 = vmatprep.mubr.bf16.mxu1 %v9260_v0  ;;  %v11101_v0 = vld [vmem:[#allocation2 + $0x10c] sm:$0xf] }
 0x19d   : > { %v1864_v35 = vsel %vm11582_vm10, %v1859_v34, %v1863_v13  ;;  %16379 = vst [vmem:[#allocation65_spill] sm:$0xff] %v12780_v28  ;;  %v12796_v38 = vadd.f32 %v12598_v29, %v12590_v49  ;;  %v16383_v60 = vshrl.u32 %v12120_v16, 16  ;;  %v16384_v21 = vshll.u32 %v12120_v16, 16  ;;  %v1958_v49 = vld [vmem:[#allocation2 + $0x11c] sm:$0x8]  ;;  %v12808_v29 = vpop.f32.mrb[16].mxu1 }
 0x19e   : > { %v9228_v33 = vcombine.low %v1856_v40, %v1864_v35  ;;  %16380 = vst [vmem:[#allocation66_spill] sm:$0xff] %v12786_v4  ;;  %16381 = vst [vmem:[#allocation67_spill] sm:$0xff] %v12790_v8  ;;  %v2233_v13 = vsel %vm11561_vm9, %v2225_v47, %v2232_v20  ;;  %v2224_v58 = vsel %vm11561_vm9, %v9132_v10, %v2223_v24  ;;  %v16386_v22 = vshll.u32 %v16385_v36, 16  ;;  %v12813_v20 = vpop.f32.mrb[17].mxu1  ;;  %v12815_v24 = vpop.f32.mrb[20].mxu0 }
 0x19f   : > { %16382 = vst [vmem:[#allocation68_spill] sm:$0xff] %v12796_v38  ;;  %v1865_v45 = vrot.slane %v16383_v60, 4  ;;  %v1866_v61 = vrot.slane %v16384_v21, 5  ;;  %v16387_v34 = vshrl.u32 %v16385_v36, 16  ;;  %v1875_v3 = vshll.u32 %v1693_v37, 16  ;;  %v12819_v21 = vpop.f32.mrb[18].mxu1 }
 0x1a0   : > { %4252 = vmatprep.mubr.bf16.mxu0 %v9228_v33  ;;  %v1869_v1 = vrot.slane %v16386_v22, 5  ;;  %v12810_v35 = vrot.slane %v2227_v56, 4  ;;  %v9244_v16 = vcombine.low %v2224_v58, %v2233_v13  ;;  %v2240_v47 = vshrl.u32 %v12772_v48, 16  ;;  %v11102_v13 = vld [vmem:[#allocation2 + $0x110] sm:$0xf]  ;;  %v12824_v36 = vpop.f32.mrb[19].mxu1 }
 0x1a1   : > { %v1871_v40 = vrot.slane %v16387_v34, 4  ;;  %4253 = vmatmul.mubr.bf16.gmra.mrb[108].mxu0 %v9212_v27  ;;  %v1867_v46 = vor.u32 %v1866_v61, %v1865_v45  ;;  %v1877_v10 = vrot.slane %v1875_v3, 5  ;;  %v2243_v60 = vshll.u32 %v12772_v48, 16  ;;  %v12821_v27 = vpop.f32.mrb[21].mxu0  ;;  %v1694_v38 = vld [vmem:[#allocation2 + $0x128] sm:$0x1] }
 0x1a2   : > { %16388 = vst [vmem:[#allocation16_spill] sm:$0xff] %v12810_v35  ;;  %v2249_v37 = vshrl.u32 %v12782_v2, 16  ;;  %v9213_v45 = vcombine.low %v11101_v0, %v11102_v13  ;;  %v2242_v61 = vrot.slane %v2240_v47, 7  ;;  %v12826_v22 = vpop.f32.mrb[22].mxu0  ;;  %v12828_v3 = vrot.slane %v2240_v47, 4  ;;  %4414 = vmatmul.mubr.bf16.gmra.mrb[108].mxu1 %v9244_v16 }
 0x1a3   : > { %v1872_v33 = vor.u32 %v1871_v40, %v1869_v1  ;;  %v1868_v56 = vrot.slane %v1867_v46, 4  ;;  %v12830_v19 = vrot.slane %v2243_v60, 5  ;;  %v12832_v8 = vpop.f32.mrb[23].mxu0  ;;  %v9261_v0 = vcombine.low %v12772_v48, %v12782_v2  ;;  %v12838_v4 = vld [vmem:[#allocation2 + $0x134] sm:$0xf] }
 0x1a4   : > { %v2251_v40 = vrot.slane %v2249_v37, 7  ;;  %16389 = vst [vmem:[#allocation69_spill] sm:$0xff] %v12828_v3  ;;  %v2235_v13 = vshrl.u32 %v1958_v49, 16  ;;  %v2245_v58 = vor.u32 %v2243_v60, %v2242_v61  ;;  %v2247_v47 = vrot.slane %v2242_v61, 4  ;;  %v12848_v3 = vld [vmem:[#allocation2 + $0x138] sm:$0xf] }
 0x1a5   : > { %v1873_v34 = vrot.slane %v1872_v33, 4  ;;  %16390 = vst [vmem:[#allocation70_spill] sm:$0xff] %v12830_v19  ;;  %v1870_v46 = vsel %vm11582_vm10, %v1868_v56, %v1869_v1  ;;  %v16391_v28 = vshll.u32 %v12782_v2, 16  ;;  %v12846_v19 = vadd.f32 %v12620_v14, %v12612_v18  ;;  %v16396_v14 = vld [vmem:[#allocation17_spill] sm:$0xff]  ;;  %4421 = vmatprep.mubr.bf16.mxu1 %v9261_v0 }
 0x1a6   : > { %v9133_v56 = vrot.slane %v2235_v13, 11  ;;  %v12852_v48 = vadd.f32 %v12644_v44, %v12634_v6  ;;  %v12856_v49 = vadd.f32 %v12636_v59, %v12628_v62  ;;  %v12862_v18 = vadd.f32 %v12653_v11, %v12650_v17  ;;  %v16399_v62 = vld [vmem:[#allocation18_spill] sm:$0xff] }
 0x1a7   : > { %v1878_v33 = vsel %vm11582_vm10, %v1873_v34, %v1877_v10  ;;  %v2254_v35 = vor.u32 %v16391_v28, %v2251_v40  ;;  %16392 = vst [vmem:[#allocation71_spill] sm:$0xff] %v12846_v19  ;;  %v16397_v10 = vshrl.u32 %v16396_v14, 16  ;;  %v16398_v61 = vshll.u32 %v16396_v14, 16  ;;  %v1961_v17 = vld [vmem:[#allocation2 + $0x130] sm:$0x8] }
 0x1a8   : > { %v9229_v1 = vcombine.low %v1870_v46, %v1878_v33  ;;  %16393 = vst [vmem:[#allocation72_spill] sm:$0xff] %v12852_v48  ;;  %16394 = vst [vmem:[#allocation73_spill] sm:$0xff] %v12856_v49  ;;  %v2246_v6 = vsel %vm11561_vm9, %v9133_v56, %v2245_v58  ;;  %v16400_v59 = vshll.u32 %v16399_v62, 16  ;;  %v1889_v40 = vshll.u32 %v1694_v38, 16 }
 0x1a9   : > { %v2255_v28 = vsel %vm11561_vm9, %v2247_v47, %v2254_v35  ;;  %16395 = vst [vmem:[#allocation74_spill] sm:$0xff] %v12862_v18  ;;  %v1879_v60 = vrot.slane %v16397_v10, 4  ;;  %v1880_v34 = vrot.slane %v16398_v61, 5  ;;  %v16401_v35 = vshrl.u32 %v16399_v62, 16  ;;  %v12880_v61 = vpop.f32.mrb[24].mxu0 }
 0x1aa   : > { %4260 = vmatprep.mubr.bf16.mxu0 %v9229_v1  ;;  %v1883_v44 = vrot.slane %v16400_v59, 5  ;;  %v12874_v11 = vrot.slane %v2249_v37, 4  ;;  %v2262_v13 = vshrl.u32 %v12838_v4, 16  ;;  %v1891_v47 = vrot.slane %v1889_v40, 5  ;;  %v11104_v37 = vld [vmem:[#allocation2 + $0x124] sm:$0xf] }
 0x1ab   : > { %v1885_v16 = vrot.slane %v16401_v35, 4  ;;  %4261 = vmatmul.mubr.bf16.gmra.mrb[112].mxu0 %v9213_v45  ;;  %v1881_v46 = vor.u32 %v1880_v34, %v1879_v60  ;;  %v2265_v0 = vshll.u32 %v12838_v4, 16  ;;  %v2271_v58 = vshrl.u32 %v12848_v3, 16  ;;  %v11103_v45 = vld [vmem:[#allocation2 + $0x120] sm:$0xf]  ;;  %v12884_v35 = vpop.f32.mrb[20].mxu1 }
 0x1ac   : > { %v9245_v1 = vcombine.low %v2246_v6, %v2255_v28  ;;  %v2264_v14 = vrot.slane %v2262_v13, 7  ;;  %v9214_v62 = vcombine.low %v11103_v45, %v11104_v37  ;;  %v12882_v34 = vrot.slane %v2262_v13, 4  ;;  %v1695_v59 = vld [vmem:[#allocation2 + $0x13c] sm:$0x1]  ;;  %v12894_v10 = vpop.f32.mrb[21].mxu1 }
 0x1ad   : > { %v1886_v33 = vor.u32 %v1885_v16, %v1883_v44  ;;  %v1882_v56 = vrot.slane %v1881_v46, 4  ;;  %v2273_v60 = vrot.slane %v2271_v58, 7  ;;  %v12886_v16 = vpop.f32.mrb[25].mxu0  ;;  %v9262_v6 = vcombine.low %v12838_v4, %v12848_v3  ;;  %v12906_v4 = vld [vmem:[#allocation2 + $0x14c] sm:$0xf] }
 0x1ae   : > { %v2257_v40 = vshrl.u32 %v1961_v17, 16  ;;  %v2267_v46 = vor.u32 %v2265_v0, %v2264_v14  ;;  %v12896_v45 = vpop.f32.mrb[26].mxu0  ;;  %v2269_v37 = vrot.slane %v2264_v14, 4  ;;  %v16402_v18 = vshll.u32 %v12848_v3, 16  ;;  %v12908_v17 = vpop.f32.mrb[22].mxu1  ;;  %4422 = vmatmul.mubr.bf16.gmra.mrb[112].mxu1 %v9245_v1 }
 0x1af   : > { %v1887_v38 = vrot.slane %v1886_v33, 4  ;;  %v1884_v28 = vsel %vm11582_vm10, %v1882_v56, %v1883_v44  ;;  %v12892_v33 = vld [vmem:[#allocation2 + $0x148] sm:$0xf]  ;;  %v12904_v44 = vadd.f32 %v12680_v15, %v12674_v32  ;;  %v12910_v56 = vpop.f32.mrb[27].mxu0  ;;  %v12920_v14 = vpop.f32.mrb[23].mxu1  ;;  %4429 = vmatprep.mubr.bf16.mxu1 %v9262_v6  ;;  %v12926_v32 = vadd.f32 %v12761_v55, %v12755_v50 }
 0x1b0   : > { %v2276_v49 = vor.u32 %v16402_v18, %v2273_v60  ;;  %v9134_v19 = vrot.slane %v2257_v40, 11  ;;  %v12918_v18 = vadd.f32 %v12694_v5, %v12688_v39  ;;  %v16407_v1 = vshrl.u32 %v12203_v57, 16  ;;  %v16409_v5 = vld [vmem:[#allocation19_spill] sm:$0xff] }
 0x1b1   : > { %v1892_v13 = vsel %vm11582_vm10, %v1887_v38, %v1891_v47  ;;  %16403 = vst [vmem:[#allocation17_spill] sm:$0xff] %v12904_v44  ;;  %v12914_v47 = vadd.f32 %v12748_v63, %v12738_v25  ;;  %16406 = vst [vmem:[#allocation76_spill] sm:$0xff] %v12926_v32  ;;  %v16408_v25 = vshll.u32 %v12203_v57, 16  ;;  %v16410_v60 = vshll.u32 %v16409_v5, 16  ;;  %v11106_v32 = vld [vmem:[#allocation2 + $0x138] sm:$0xf] }
 0x1b2   : > { %v9230_v48 = vcombine.low %v1884_v28, %v1892_v13  ;;  %16405 = vst [vmem:[#allocation75_spill] sm:$0xff] %v12918_v18  ;;  %v2277_v15 = vsel %vm11561_vm9, %v2269_v37, %v2276_v49  ;;  %v1893_v38 = vrot.slane %v16407_v1, 4  ;;  %v2268_v39 = vsel %vm11561_vm9, %v9134_v19, %v2267_v46  ;;  %v1964_v13 = vld [vmem:[#allocation2 + $0x144] sm:$0x8]  ;;  %v12954_v18 = vpop.f32.mrb[24].mxu1 }
 0x1b3   : > { %16404 = vst [vmem:[#allocation18_spill] sm:$0xff] %v12914_v47  ;;  %v1894_v63 = vrot.slane %v16408_v25, 5  ;;  %v1897_v28 = vrot.slane %v16410_v60, 5  ;;  %v16411_v6 = vshrl.u32 %v16409_v5, 16  ;;  %v1903_v40 = vshll.u32 %v1695_v59, 16  ;;  %v12956_v59 = vpop.f32.mrb[28].mxu0 }
 0x1b4   : > { %4268 = vmatprep.mubr.bf16.mxu0 %v9230_v48  ;;  %v12938_v50 = vrot.slane %v2265_v0, 5  ;;  %v9246_v55 = vcombine.low %v2268_v39, %v2277_v15  ;;  %v2284_v57 = vshrl.u32 %v12892_v33, 16  ;;  %v2287_v25 = vshll.u32 %v12892_v33, 16  ;;  %v11105_v0 = vld [vmem:[#allocation2 + $0x134] sm:$0xf]  ;;  %v12970_v44 = vpop.f32.mrb[29].mxu0 }
 0x1b5   : > { %v1899_v49 = vrot.slane %v16411_v6, 4  ;;  %4269 = vmatmul.mubr.bf16.gmra.mrb[116].mxu0 %v9214_v62  ;;  %v1895_v37 = vor.u32 %v1894_v63, %v1893_v38  ;;  %v1905_v48 = vrot.slane %v1903_v40, 5  ;;  %v2293_v19 = vshrl.u32 %v12906_v4, 16  ;;  %v446_v6 = vld [vmem:[#allocation2 + $0x150] sm:$0x1] }
 0x1b6   : > { %v12943_v46 = vrot.slane %v2271_v58, 4  ;;  %v2286_v5 = vrot.slane %v2284_v57, 7  ;;  %v9215_v15 = vcombine.low %v11105_v0, %v11106_v32  ;;  %v12946_v63 = vrot.slane %v2284_v57, 4  ;;  %v10965_v47 = vld [vmem:[#allocation9] sm:$0xff]   ;;  %4430 = vmatmul.mubr.bf16.gmra.mrb[116].mxu1 %v9246_v55  ;;  %v12968_v0 = vpop.f32.mrb[25].mxu1 }
 0x1b7   : > { %v1900_v1 = vor.u32 %v1899_v49, %v1897_v28  ;;  %v1896_v60 = vrot.slane %v1895_v37, 4  ;;  %v2295_v38 = vrot.slane %v2293_v19, 7  ;;  %v9263_v49 = vcombine.low %v12892_v33, %v12906_v4  ;;  %v12952_v37 = vld [vmem:[#allocation2 + $0x15c] sm:$0xf] }
 0x1b8   : > { %16412 = vst [vmem:[#allocation19_spill] sm:$0xff] %v12943_v46  ;;  %v2279_v58 = vshrl.u32 %v1964_v13, 16  ;;  %v2289_v40 = vor.u32 %v2287_v25, %v2286_v5  ;;  %16413 = vst [vmem:[#allocation77_spill] sm:$0xff] %v12952_v37  ;;  %v2291_v57 = vrot.slane %v2286_v5, 4  ;;  %v12964_v33 = vadd.f32 %v12740_v12, %v12726_v26  ;;  %v12966_v13 = vld [vmem:[#allocation2 + $0x160] sm:$0xf] }
 0x1b9   : > { %v1901_v62 = vrot.slane %v1900_v1, 4  ;;  %v1898_v39 = vsel %vm11582_vm10, %v1896_v60, %v1897_v28  ;;  %v10964_v1 = vld [vmem:[#allocation9 + $0x40] sm:$0xff]   ;;  %v16414_v28 = vshll.u32 %v12906_v4, 16  ;;  %16415 = vst [vmem:[#allocation78_spill] sm:$0xff] %v12966_v13  ;;  %4437 = vmatprep.mubr.bf16.mxu1 %v9263_v49  ;;  %v12978_v5 = vadd.f32 %v12757_v51, %v12750_v52  ;;  %v12982_v26 = vpop.f32.mrb[30].mxu0 }
 0x1ba   : > { %v9135_v55 = vrot.slane %v2279_v58, 11  ;;  %10212 = vmatprep.subr.bf16.mxu1 %v10964_v1  ;;  %v12996_v51 = vpop.f32.mrb[31].mxu0  ;;  %v16420_v58 = vshll.u32 %v12243_v23, 16 }
 0x1bb   : > { %v1906_v32 = vsel %vm11582_vm10, %v1901_v62, %v1905_v48  ;;  %v2298_v60 = vor.u32 %v16414_v28, %v2295_v38  ;;  %v12974_v48 = vadd.f32 %v12813_v20, %v12808_v29  ;;  %16417 = vst [vmem:[#allocation80_spill] sm:$0xff] %v12978_v5  ;;  %v12980_v62 = vpop.f32.mrb[26].mxu1  ;;  %v12988_v38 = vadd.f32 %v12824_v36, %v12819_v21  ;;  %v16421_v36 = vld [vmem:[#allocation20_spill] sm:$0xff]  ;;  %v392_v28 = vld [vmem:[#allocation2 + $0x158] sm:$0x8] }
 0x1bc   : > { %v9231_v46 = vcombine.low %v1898_v39, %v1906_v32  ;;  %v447_v29 = vsel %vm11551_vm8, 0, %v446_v6  ;;  %v16419_v20 = vshrl.u32 %v12243_v23, 16  ;;  %v12994_v52 = vpop.f32.mrb[27].mxu1  ;;  %10213 = vmatpush3.bf16.msra.mxu1 %v10965_v47  ;;  %v2290_v49 = vsel %vm11561_vm9, %v9135_v55, %v2289_v40 }
 0x1bd   : > { %16416 = vst [vmem:[#allocation79_spill] sm:$0xff] %v12974_v48  ;;  %v2299_v12 = vsel %vm11561_vm9, %v2291_v57, %v2298_v60  ;;  %16418 = vst [vmem:[#allocation81_spill] sm:$0xff] %v12988_v38  ;;  %v1908_v21 = vrot.slane %v16420_v58, 5  ;;  %v16422_v1 = vshll.u32 %v16421_v36, 16  ;;  %v16423_v6 = vshrl.u32 %v16421_v36, 16 }
 0x1be   : > { %v1907_v39 = vrot.slane %v16419_v20, 4  ;;  %4276 = vmatprep.mubr.bf16.mxu0 %v9231_v46  ;;  %448 = vst [vmem:[#allocation2 + $0x150] sm:$0x1] %v447_v29  ;;  %v9247_v60 = vcombine.low %v2290_v49, %v2299_v12  ;;  %v16100_v47 = vshrl.u32 %v12952_v37, 16  ;;  %v16102_v46 = vshll.u32 %v12952_v37, 16 }
 0x1bf   : > { %v13004_v32 = vrot.slane %v16422_v1, 5  ;;  %v1913_v57 = vrot.slane %v16423_v6, 4  ;;  %4277 = vmatmul.mubr.bf16.gmra.mrb[120].mxu0 %v9215_v15  ;;  %v16101_v23 = vshrl.u32 %v12966_v13, 16  ;;  %v2322_v29 = vld [vmem:[#allocation2 + $0x38] sm:$0x1]  ;;  %v13013_v58 = vrot.slane %v2287_v25, 5 }
 0x1c0   : > { %v1909_v20 = vor.u32 %v1908_v21, %v1907_v39  ;;  %v13015_v1 = vrot.slane %v2293_v19, 4  ;;  %v2308_v15 = vrot.slane %v16100_v47, 7  ;;  %v9264_v12 = vcombine.low %v12952_v37, %v12966_v13  ;;  %v2323_v49 = vld [vmem:[#allocation2 + $0x4c] sm:$0x1]  ;;  %v13021_v21 = vld [vmem:[#allocation2 + $0x148] sm:$0xf]  ;;  %4438 = vmatmul.mubr.bf16.gmra.mrb[120].mxu1 %v9247_v60 }
 0x1c1   : > { %v1914_v40 = vor.u32 %v1913_v57, %v13004_v32  ;;  %v13023_v6 = vld [vmem:[#allocation2 + $0x14c] sm:$0xf]  ;;  %v2317_v25 = vrot.slane %v16101_v23, 7  ;;  %v393_v47 = vsel %vm11545_vm3, 0, %v392_v28  ;;  %v16426_v60 = vshll.u32 %v12966_v13, 16  ;;  %v9910_v37 = vpop.f32.mrb[28].mxu1 }
 0x1c2   : > { %v1910_v36 = vrot.slane %v1909_v20, 4  ;;  %v13033_v55 = vor.u32 %v16102_v46, %v2308_v15  ;;  %v2313_v20 = vrot.slane %v2308_v15, 4  ;;  %4445 = vmatprep.mubr.bf16.mxu1 %v9264_v12  ;;  %394 = vst [vmem:[#allocation2 + $0x158] sm:$0x8] %v393_v47  ;;  %v13046_v28 = vadd.f32 %v12894_v10, %v12884_v35  ;;  %v16432_v47 = vld [vmem:[#allocation21_spill] sm:$0xff] }
 0x1c3   : > { %v1915_v39 = vrot.slane %v1914_v40, 4  ;;  %v13037_v40 = vadd.f32 %v12821_v27, %v12815_v24  ;;  %v2320_v23 = vor.u32 %v16426_v60, %v2317_v25  ;;  %v13050_v15 = vadd.f32 %v12832_v8, %v12826_v22  ;;  %v16430_v27 = vld [vmem:[#allocation22_spill] sm:$0xff]  ;;  %v13060_v60 = vpop.f32.mrb[32].mxu0  ;;  %v16434_v8 = vld [vmem:[#allocation25_spill] sm:$0xff]  ;;  %v2324_v13 = vld [vmem:[#allocation2 + $0x60] sm:$0x1] }
 0x1c4   : > { %v1912_v57 = vsel %vm11582_vm10, %v1910_v36, %v13004_v32  ;;  %16427 = vst [vmem:[#allocation82_spill] sm:$0xff] %v13046_v28  ;;  %v13054_v24 = vadd.f32 %v12920_v14, %v12908_v17  ;;  %v16431_v32 = vld [vmem:[#allocation23_spill] sm:$0xff]  ;;  %v16433_v36 = vshll.u32 %v16432_v47, 16  ;;  %v2348_v25 = vshll.u32 %v2322_v29, 16  ;;  %v16435_v22 = vld [vmem:[#allocation26_spill] sm:$0xff]  ;;  %v16436_v47 = vld [vmem:[#allocation24_spill] sm:$0xff] }
 0x1c5   : > { %16425 = vst [vmem:[#allocation20_spill] sm:$0xff] %v13037_v40  ;;  %16428 = vst [vmem:[#allocation83_spill] sm:$0xff] %v13050_v15  ;;  %v1696_v46 = vld [vmem:[#allocation2 + $0x150] sm:$0x1]  ;;  %v2340_v12 = vor.u32 %v16431_v32, %v16430_v27  ;;  %v13064_v35 = vsel %vm11561_vm9, %v2313_v20, %v2320_v23  ;;  %v2357_v17 = vsel %vm11582_vm10, %v16435_v22, %v16434_v8  ;;  %v2362_v14 = vshll.u32 %v2323_v49, 16  ;;  %v13070_v27 = vpop.f32.mrb[33].mxu0 }
 0x1c6   : > { %16429 = vst [vmem:[#allocation84_spill] sm:$0xff] %v13054_v24  ;;  %v2342_v19 = vrot.slane %v16433_v36, 5  ;;  %v1917_v10 = vshll.u32 %v1696_v46, 16  ;;  %v2350_v36 = vrot.slane %v2348_v25, 5  ;;  %v13075_v46 = vadd.f32 %v12886_v16, %v12880_v61  ;;  %v9911_v23 = vpop.f32.mrb[29].mxu1  ;;  %v13077_v20 = vpop.f32.mrb[34].mxu0 }
 0x1c7   : > { %v2341_v32 = vrot.slane %v2340_v12, 4  ;;  %v2364_v15 = vrot.slane %v2362_v14, 5  ;;  %v13081_v49 = vadd.f32 %v12968_v0, %v12954_v18  ;;  %v13085_v8 = vadd.f32 %v12910_v56, %v12896_v45  ;;  %v2325_v12 = vld [vmem:[#allocation2 + $0x74] sm:$0x1]  ;;  %v9913_v22 = vpop.f32.mrb[30].mxu1  ;;  %v13087_v25 = vpop.f32.mrb[35].mxu0 }
 0x1c8   : > { %v2345_v29 = vor.u32 %v16436_v47, %v2342_v19  ;;  %16437 = vst [vmem:[#allocation22_spill] sm:$0xff] %v13075_v46  ;;  %v1919_v24 = vrot.slane %v1917_v10, 5  ;;  %v13093_v10 = vadd.f32 %v12994_v52, %v12980_v62  ;;  %v16441_v14 = vld [vmem:[#allocation29_spill] sm:$0xff]  ;;  %v16442_v47 = vld [vmem:[#allocation30_spill] sm:$0xff]  ;;  %v9914_v0 = vpop.f32.mrb[31].mxu1  ;;  %v16443_v56 = vld [vmem:[#allocation28_spill] sm:$0xff] }
 0x1c9   : > { %16438 = vst [vmem:[#allocation23_spill] sm:$0xff] %v13081_v49  ;;  %16439 = vst [vmem:[#allocation21_spill] sm:$0xff] %v13085_v8  ;;  %v2343_v61 = vsel %vm11582_vm10, %v2341_v32, %v2342_v19  ;;  %v2368_v18 = vor.u32 %v16442_v47, %v16441_v14  ;;  %v2365_v8 = vsel %vm11582_vm10, %v16443_v56, %v2364_v15  ;;  %v16444_v49 = vld [vmem:[#allocation27_spill] sm:$0xff]  ;;  %v2376_v19 = vshll.u32 %v2324_v13, 16  ;;  %v16447_v13 = vld [vmem:[#allocation33_spill] sm:$0xff] }
 0x1ca   : > { %v2346_v16 = vrot.slane %v2345_v29, 4  ;;  %16440 = vst [vmem:[#allocation25_spill] sm:$0xff] %v13093_v10  ;;  %v1920_v45 = vsel %vm11582_vm10, %v1915_v39, %v1919_v24  ;;  %v16445_v46 = vshll.u32 %v16444_v49, 16  ;;  %v10966_v32 = vld [vmem:[#allocation9 + $0x48] sm:$0xff]   ;;  %v9266_v14 = vcombine.low %v2357_v17, %v2365_v8 }
 0x1cb   : > { %v10967_v29 = vld [vmem:[#allocation9 + $0x8] sm:$0xff]   ;;  %v9232_v40 = vcombine.low %v1912_v57, %v1920_v45  ;;  %v2369_v47 = vrot.slane %v2368_v18, 4  ;;  %v2378_v5 = vrot.slane %v2376_v19, 5  ;;  %10214 = vmatprep.subr.bf16.mxu1 %v10966_v32  ;;  %v16449_v57 = vld [vmem:[#allocation32_spill] sm:$0xff]  ;;  %v2390_v48 = vshll.u32 %v2325_v12, 16 }
 0x1cc   : > { %v2370_v28 = vrot.slane %v16445_v46, 5  ;;  %v1967_v62 = vld [vmem:[#allocation2 + $0x158] sm:$0x8]  ;;  %v2351_v52 = vsel %vm11582_vm10, %v2346_v16, %v2350_v36  ;;  %v16448_v46 = vld [vmem:[#allocation34_spill] sm:$0xff]  ;;  %v16450_v45 = vshll.u32 %v16449_v57, 16  ;;  %10215 = vmatpush3.bf16.msra.mxu1 %v10967_v29  ;;  %v16451_v17 = vcombine.low %v13021_v21, %v13023_v6 }
 0x1cd   : > { %v2301_v10 = vshrl.u32 %v1967_v62, 16  ;;  %v9265_v38 = vcombine.low %v2343_v61, %v2351_v52  ;;  %v16446_v39 = vld [vmem:[#allocation31_spill] sm:$0xff]  ;;  %4284 = vmatprep.mubr.bf16.mxu0 %v9232_v40  ;;  %v2382_v49 = vor.u32 %v16448_v46, %v16447_v13  ;;  %v13118_v40 = vadd.f32 %v12970_v44, %v12956_v59  ;;  %v2326_v32 = vld [vmem:[#allocation2 + $0x88] sm:$0x1]  ;;  %v16458_v13 = vld [vmem:[#allocation42_spill] sm:$0xff] }
 0x1ce   : > { %v2373_v24 = vor.u32 %v16446_v39, %v2370_v28  ;;  %v2371_v15 = vsel %vm11582_vm10, %v2369_v47, %v2370_v28  ;;  %v2384_v56 = vrot.slane %v16450_v45, 5  ;;  %4285 = vmatmul.mubr.bf16.gmra.mrb[124].mxu0 %v16451_v17  ;;  %v13120_v61 = vadd.f32 %v9911_v23, %v9910_v37  ;;  %v16452_v16 = vld [vmem:[#allocation35_spill] sm:$0xff]  ;;  %v16453_v37 = vld [vmem:[#allocation37_spill] sm:$0xff]  ;;  %v16455_v39 = vld [vmem:[#allocation36_spill] sm:$0xff] }
 0x1cf   : > { %v9136_v36 = vrot.slane %v2301_v10, 11  ;;  %10700 = vmatprep.mubr.bf16.mxu0 %v9265_v38  ;;  %v2383_v28 = vrot.slane %v2382_v49, 4  ;;  %v2392_v19 = vrot.slane %v2390_v48, 5  ;;  %v13125_v12 = vadd.f32 %v12996_v51, %v12982_v26  ;;  %v16454_v38 = vld [vmem:[#allocation38_spill] sm:$0xff]  ;;  %v2327_v23 = vld [vmem:[#allocation2 + $0x9c] sm:$0x1] }
 0x1d0   : > { %v2374_v8 = vrot.slane %v2373_v24, 4  ;;  %v2387_v18 = vor.u32 %v16452_v16, %v2384_v56  ;;  %v13132_v59 = vadd.f32 %v9914_v0, %v9913_v22  ;;  %v2396_v6 = vor.u32 %v16454_v38, %v16453_v37  ;;  %v9916_v10 = vpop.f32.mrb[32].mxu1  ;;  %v9810_v48 = vpop.f32.mrb[36].mxu0  ;;  %v16457_v24 = vld [vmem:[#allocation41_spill] sm:$0xff]  ;;  %v16462_v38 = vld [vmem:[#allocation43_spill] sm:$0xff] }
 0x1d1   : > { %v2312_v21 = vsel %vm11561_vm9, %v9136_v36, %v13033_v55  ;;  %v2385_v51 = vsel %vm11582_vm10, %v2383_v28, %v2384_v56  ;;  %v9917_v52 = vpop.f32.mrb[33].mxu1  ;;  %v9811_v55 = vpop.f32.mrb[37].mxu0  ;;  %v2404_v0 = vshll.u32 %v2326_v32, 16  ;;  %v2410_v46 = vor.u32 %v16458_v13, %v16457_v24  ;;  %v16461_v32 = vld [vmem:[#allocation39_spill] sm:$0xff]  ;;  %v16465_v24 = vld [vmem:[#allocation44_spill] sm:$0xff] }
 0x1d2   : > { %v2379_v44 = vsel %vm11582_vm10, %v2374_v8, %v2378_v5  ;;  %v9248_v29 = vcombine.low %v2312_v21, %v13064_v35  ;;  %v2388_v62 = vrot.slane %v2387_v18, 4  ;;  %v2397_v47 = vrot.slane %v2396_v6, 4  ;;  %v9919_v49 = vpop.f32.mrb[34].mxu1  ;;  %v9813_v57 = vpop.f32.mrb[38].mxu0 }
 0x1d3   : > { %v9267_v26 = vcombine.low %v2371_v15, %v2379_v44  ;;  %v16456_v5 = vshll.u32 %v16455_v39, 16  ;;  %v16459_v15 = vld [vmem:[#allocation40_spill] sm:$0xff]  ;;  %v2418_v17 = vshll.u32 %v2327_v23, 16  ;;  %v9806_v36 = vadd.f32 %v13070_v27, %v13060_v60  ;;  %v9920_v8 = vpop.f32.mrb[35].mxu1  ;;  %v9814_v28 = vpop.f32.mrb[39].mxu0  ;;  %v16463_v39 = vld [vmem:[#allocation45_spill] sm:$0xff] }
 0x1d4   : > { %4446 = vmatmul.mubr.bf16.gmra.mrb[124].mxu1 %v9248_v29  ;;  %v2393_v35 = vsel %vm11582_vm10, %v2388_v62, %v2392_v19  ;;  %v16460_v45 = vshll.u32 %v16459_v15, 16  ;;  %v2406_v44 = vrot.slane %v2404_v0, 5  ;;  %v2411_v37 = vrot.slane %v2410_v46, 4  ;;  %v2328_v62 = vld [vmem:[#allocation2 + $0xb0] sm:$0x1] }
 0x1d5   : > { %v2398_v22 = vrot.slane %v16456_v5, 5  ;;  %v9268_v16 = vcombine.low %v2385_v51, %v2393_v35  ;;  %v2420_v19 = vrot.slane %v2418_v17, 5  ;;  %v9918_v29 = vadd.f32 %v9917_v52, %v9916_v10  ;;  %v16464_v51 = vld [vmem:[#allocation46_spill] sm:$0xff]  ;;  %v2329_v46 = vld [vmem:[#allocation2 + $0xc4] sm:$0x1]  ;;  %v16467_v35 = vld [vmem:[#allocation47_spill] sm:$0xff] }
 0x1d6   : > { %v2412_v56 = vrot.slane %v16460_v45, 5  ;;  %10701 = vmatmul.mubr.bf16.vlgmr.msra.gmra.mrb[128].mxu0 %v9266_v14  ;;  %v9809_v60 = vadd.f32 %v13087_v25, %v13077_v20  ;;  %v9921_v27 = vadd.f32 %v9920_v8, %v9919_v49  ;;  %v2424_v5 = vor.u32 %v16464_v51, %v16463_v39  ;;  %v16468_v45 = vld [vmem:[#allocation49_spill] sm:$0xff]  ;;  %v9922_v51 = vpop.f32.mrb[36].mxu1 }
 0x1d7   : > { %v2399_v18 = vsel %vm11582_vm10, %v2397_v47, %v2398_v22  ;;  %v2401_v21 = vor.u32 %v16461_v32, %v2398_v22  ;;  %10704 = vmatprep.mubr.bf16.mxu0 %v9267_v26  ;;  %v13159_v0 = vadd.f32 %v9918_v29, %v9806_v36  ;;  %v16466_v13 = vshll.u32 %v16465_v24, 16 }
 0x1d8   : > { %v2415_v6 = vor.u32 %v16462_v38, %v2412_v56  ;;  %v2413_v47 = vsel %vm11582_vm10, %v2411_v37, %v2412_v56  ;;  %v13165_v52 = vadd.f32 %v9921_v27, %v9809_v60  ;;  %v2425_v20 = vrot.slane %v2424_v5, 4  ;;  %v16469_v56 = vld [vmem:[#allocation50_spill] sm:$0xff]  ;;  %v2330_v38 = vld [vmem:[#allocation2 + $0xd8] sm:$0x1]  ;;  %v9816_v60 = vpop.f32.mrb[40].mxu0  ;;  %v16472_v27 = vld [vmem:[#allocation52_spill] sm:$0xff] }
 0x1d9   : > { %v2402_v23 = vrot.slane %v2401_v21, 4  ;;  %v2426_v10 = vrot.slane %v16466_v13, 5  ;;  %v2432_v25 = vshll.u32 %v2328_v62, 16  ;;  %v2438_v17 = vor.u32 %v16469_v56, %v16468_v45  ;;  %v16470_v21 = vld [vmem:[#allocation48_spill] sm:$0xff]  ;;  %v16475_v13 = vld [vmem:[#allocation51_spill] sm:$0xff] }
 0x1da   : > { %v2416_v22 = vrot.slane %v2415_v6, 4  ;;  %v10968_v6 = vld [vmem:[#allocation9 + $0x50] sm:$0xff]   ;;  %v9815_v5 = vadd.f32 %v9814_v28, %v9813_v57 }
 0x1db   : > { %v2407_v14 = vsel %vm11582_vm10, %v2402_v23, %v2406_v44  ;;  %v2429_v15 = vor.u32 %v16467_v35, %v2426_v10  ;;  %v2427_v8 = vsel %vm11582_vm10, %v2425_v20, %v2426_v10  ;;  %v2434_v32 = vrot.slane %v2432_v25, 5  ;;  %v9817_v20 = vpop.f32.mrb[41].mxu0  ;;  %10216 = vmatprep.subr.bf16.mxu1 %v10968_v6 }
 0x1dc   : > { %v9269_v49 = vcombine.low %v2399_v18, %v2407_v14  ;;  %v2421_v26 = vsel %vm11582_vm10, %v2416_v22, %v2420_v19  ;;  %v16471_v44 = vshll.u32 %v16470_v21, 16  ;;  %v10969_v18 = vld [vmem:[#allocation9 + $0x10] sm:$0xff]   ;;  %v2439_v62 = vrot.slane %v2438_v17, 4  ;;  %v16474_v22 = vld [vmem:[#allocation54_spill] sm:$0xff]  ;;  %v9819_v35 = vpop.f32.mrb[42].mxu0 }
 0x1dd   : > { %v13172_v36 = vcombine.low %v2413_v47, %v2421_v26  ;;  %v2430_v29 = vrot.slane %v2429_v15, 4  ;;  %v2446_v19 = vshll.u32 %v2329_v46, 16  ;;  %v9812_v23 = vadd.f32 %v9811_v55, %v9810_v48  ;;  %v16473_v47 = vld [vmem:[#allocation53_spill] sm:$0xff]  ;;  %v9923_v55 = vpop.f32.mrb[37].mxu1  ;;  %10217 = vmatpush3.bf16.msra.mxu1 %v10969_v18  ;;  %v9820_v17 = vpop.f32.mrb[43].mxu0 }
 0x1de   : > { %v2440_v37 = vrot.slane %v16471_v44, 5  ;;  %v2452_v24 = vor.u32 %v16474_v22, %v16473_v47  ;;  %v16476_v10 = vshll.u32 %v16475_v13, 16  ;;  %v2460_v26 = vshll.u32 %v2330_v38, 16  ;;  %10705 = vmatmul.mubr.bf16.gmra.mrb[132].mxu0 %v9268_v16  ;;  %v9925_v45 = vpop.f32.mrb[38].mxu1  ;;  %v16477_v44 = vld [vmem:[#allocation56_spill] sm:$0xff] }
 0x1df   : > { %v2435_v25 = vsel %vm11582_vm10, %v2430_v29, %v2434_v32  ;;  %v2448_v48 = vrot.slane %v2446_v19, 5  ;;  %v9924_v15 = vadd.f32 %v9923_v55, %v9922_v51  ;;  %10708 = vmatprep.mubr.bf16.mxu0 %v9269_v49  ;;  %v9926_v21 = vpop.f32.mrb[39].mxu1  ;;  %v2331_v29 = vld [vmem:[#allocation2 + $0xec] sm:$0x1]  ;;  %v16480_v19 = vld [vmem:[#allocation55_spill] sm:$0xff] }
 0x1e0   : > { %v2443_v39 = vor.u32 %v16472_v27, %v2440_v37  ;;  %v2454_v14 = vrot.slane %v16476_v10, 5  ;;  %v2441_v46 = vsel %vm11582_vm10, %v2439_v62, %v2440_v37  ;;  %v9271_v57 = vcombine.low %v2427_v8, %v2435_v25  ;;  %v16478_v27 = vld [vmem:[#allocation57_spill] sm:$0xff]  ;;  %v16479_v37 = vld [vmem:[#allocation58_spill] sm:$0xff]  ;;  %v2332_v10 = vld [vmem:[#allocation2 + $0x100] sm:$0x1] }
 0x1e1   : > { %v2453_v56 = vrot.slane %v2452_v24, 4  ;;  %v2462_v32 = vrot.slane %v2460_v26, 5  ;;  %v2466_v62 = vor.u32 %v16479_v37, %v16478_v27  ;;  %v16481_v38 = vshll.u32 %v16480_v19, 16  ;;  %v16482_v24 = vld [vmem:[#allocation59_spill] sm:$0xff]  ;;  %v2333_v27 = vld [vmem:[#allocation2 + $0x114] sm:$0x1] }
 0x1e2   : > { %v2444_v28 = vrot.slane %v2443_v39, 4  ;;  %v2457_v6 = vor.u32 %v16477_v44, %v2454_v14  ;;  %v13194_v8 = vadd.f32 %v9924_v15, %v9812_v23  ;;  %v9927_v18 = vadd.f32 %v9926_v21, %v9925_v45  ;;  %v16486_v37 = vld [vmem:[#allocation69_spill] sm:$0xff] }
 0x1e3   : > { %v2468_v47 = vrot.slane %v16481_v38, 5  ;;  %v2455_v49 = vsel %vm11582_vm10, %v2453_v56, %v2454_v14  ;;  %v2467_v22 = vrot.slane %v2466_v62, 4  ;;  %v2474_v55 = vshll.u32 %v2331_v29, 16  ;;  %v16487_v62 = vld [vmem:[#allocation70_spill] sm:$0xff] }
 0x1e4   : > { %v2449_v16 = vsel %vm11582_vm10, %v2444_v28, %v2448_v48  ;;  %v2458_v51 = vrot.slane %v2457_v6, 4  ;;  %v13201_v25 = vadd.f32 %v9927_v18, %v9815_v5  ;;  %v9818_v26 = vadd.f32 %v9817_v20, %v9816_v60 }
 0x1e5   : > { %v13198_v39 = vcombine.low %v2441_v46, %v2449_v16  ;;  %v2471_v13 = vor.u32 %v16482_v24, %v2468_v47  ;;  %v9821_v44 = vadd.f32 %v9820_v17, %v9819_v35  ;;  %v2469_v48 = vsel %vm11582_vm10, %v2467_v22, %v2468_v47 }
 0x1e6   : > { %v2463_v23 = vsel %vm11582_vm10, %v2458_v51, %v2462_v32  ;;  %v2480_v46 = vor.u32 %v12700_v31, %v12698_v9  ;;  %v2476_v15 = vrot.slane %v2474_v55, 5  ;;  %v16483_v45 = vshll.u32 %v12666_v41, 16  ;;  %10709 = vmatmul.mubr.bf16.gmra.mrb[136].mxu0 %v13172_v36  ;;  %v9928_v31 = vpop.f32.mrb[40].mxu1  ;;  %v16485_v9 = vld [vmem:[#allocation64_spill] sm:$0xff]  ;;  %v9822_v41 = vpop.f32.mrb[44].mxu0 }
 0x1e7   : > { %v2472_v14 = vrot.slane %v2471_v13, 4  ;;  %v9273_v28 = vcombine.low %v2455_v49, %v2463_v23  ;;  %v2488_v56 = vshll.u32 %v2332_v10, 16  ;;  %v2494_v60 = vor.u32 %v12766_v53, %v12764_v30  ;;  %10712 = vmatprep.mubr.bf16.mxu0 %v9271_v57  ;;  %v9929_v30 = vpop.f32.mrb[41].mxu1  ;;  %v16488_v36 = vld [vmem:[#allocation16_spill] sm:$0xff]  ;;  %v9823_v16 = vpop.f32.mrb[45].mxu0 }
 0x1e8   : > { %v2482_v5 = vrot.slane %v16483_v45, 5  ;;  %v2481_v21 = vrot.slane %v2480_v46, 4  ;;  %v16484_v20 = vshll.u32 %v12716_v43, 16  ;;  %v2502_v17 = vshll.u32 %v2333_v27, 16  ;;  %v9931_v49 = vpop.f32.mrb[42].mxu1  ;;  %v9825_v13 = vpop.f32.mrb[46].mxu0 }
 0x1e9   : > { %v2477_v6 = vsel %vm11582_vm10, %v2472_v14, %v2476_v15  ;;  %v2490_v29 = vrot.slane %v2488_v56, 5  ;;  %v2508_v19 = vor.u32 %v16487_v62, %v16486_v37  ;;  %v2495_v53 = vrot.slane %v2494_v60, 4  ;;  %v2334_v10 = vld [vmem:[#allocation2 + $0x128] sm:$0x1]  ;;  %v9932_v55 = vpop.f32.mrb[43].mxu1  ;;  %v9826_v23 = vpop.f32.mrb[47].mxu0 }
 0x1ea   : > { %v2496_v35 = vrot.slane %v16484_v20, 5  ;;  %v2485_v32 = vor.u32 %v16485_v9, %v2482_v5  ;;  %v13221_v38 = vcombine.low %v2469_v48, %v2477_v6  ;;  %v2483_v43 = vsel %vm11582_vm10, %v2481_v21, %v2482_v5  ;;  %v2335_v21 = vld [vmem:[#allocation2 + $0x13c] sm:$0x1]  ;;  %v10970_v60 = vld [vmem:[#allocation9 + $0x58] sm:$0xff]  }
 0x1eb   : > { %v9930_v18 = vadd.f32 %v9929_v30, %v9928_v31  ;;  %v2504_v22 = vrot.slane %v2502_v17, 5  ;;  %v13226_v24 = vadd.f32 %v9823_v16, %v9822_v41  ;;  %v2509_v48 = vrot.slane %v2508_v19, 4  ;;  %v10971_v20 = vld [vmem:[#allocation9 + $0x18] sm:$0xff]   ;;  %v449_v41 = vld [vmem:[#allocation2 + $0x164] sm:$0x1]  ;;  %10218 = vmatprep.subr.bf16.mxu1 %v10970_v60 }
 0x1ec   : > { %v2499_v47 = vor.u32 %v16488_v36, %v2496_v35  ;;  %v2486_v51 = vrot.slane %v2485_v32, 4  ;;  %v2497_v57 = vsel %vm11582_vm10, %v2495_v53, %v2496_v35  ;;  %v16489_v14 = vshll.u32 %v12782_v2, 16  ;;  %10219 = vmatpush3.bf16.msra.mxu1 %v10971_v20  ;;  %v16497_v60 = vld [vmem:[#allocation65_spill] sm:$0xff]  ;;  %v16498_v20 = vld [vmem:[#allocation66_spill] sm:$0xff] }
 0x1ed   : > { %v13232_v15 = vadd.f32 %v9930_v18, %v9818_v26  ;;  %v9933_v45 = vadd.f32 %v9932_v55, %v9931_v49  ;;  %v13236_v56 = vadd.f32 %v9826_v23, %v9825_v13  ;;  %v2336_v26 = vld [vmem:[#allocation2 + $0x150] sm:$0x1]  ;;  %v2516_v32 = vshll.u32 %v2334_v10, 16  ;;  %v9934_v13 = vpop.f32.mrb[44].mxu1 }
 0x1ee   : > { %v2500_v27 = vrot.slane %v2499_v47, 4  ;;  %v2510_v46 = vrot.slane %v16489_v14, 5  ;;  %v2491_v5 = vsel %vm11582_vm10, %v2486_v51, %v2490_v29  ;;  %v2522_v29 = vor.u32 %v12938_v50, %v12882_v34  ;;  %10713 = vmatmul.mubr.bf16.gmra.mrb[140].mxu0 %v13198_v39  ;;  %v16492_v34 = vld [vmem:[#allocation19_spill] sm:$0xff] }
 0x1ef   : > { %v9275_v17 = vcombine.low %v2483_v43, %v2491_v5  ;;  %v13243_v31 = vadd.f32 %v9933_v45, %v9821_v44  ;;  %v16490_v62 = vshll.u32 %v12848_v3, 16  ;;  %v2530_v30 = vshll.u32 %v2335_v21, 16  ;;  %10716 = vmatprep.mubr.bf16.mxu0 %v9273_v28  ;;  %v9828_v28 = vpop.f32.mrb[48].mxu0  ;;  %v16496_v14 = vld [vmem:[#allocation63_spill] sm:$0xff] }
 0x1f0   : > { %v2505_v35 = vsel %vm11582_vm10, %v2500_v27, %v2504_v22  ;;  %v2511_v6 = vsel %vm11582_vm10, %v2509_v48, %v2510_v46  ;;  %v2513_v2 = vor.u32 %v12874_v11, %v2510_v46  ;;  %v2536_v43 = vor.u32 %v13013_v58, %v12946_v63  ;;  %v9829_v10 = vpop.f32.mrb[49].mxu0  ;;  %v16494_v27 = vld [vmem:[#allocation61_spill] sm:$0xff]  ;;  %v16495_v48 = vld [vmem:[#allocation62_spill] sm:$0xff] }
 0x1f1   : > { %v13245_v9 = vcombine.low %v2497_v57, %v2505_v35  ;;  %v2524_v19 = vrot.slane %v16490_v62, 5  ;;  %v2518_v11 = vrot.slane %v2516_v32, 5  ;;  %v2523_v44 = vrot.slane %v2522_v29, 4  ;;  %v16493_v57 = vld [vmem:[#allocation60_spill] sm:$0xff]  ;;  %v9831_v21 = vpop.f32.mrb[50].mxu0 }
 0x1f2   : > { %v2514_v37 = vrot.slane %v2513_v2, 4  ;;  %v16491_v53 = vshll.u32 %v12906_v4, 16  ;;  %v2544_v47 = vshll.u32 %v2336_v26, 16  ;;  %v2532_v16 = vrot.slane %v2530_v30, 5  ;;  %v9832_v32 = vpop.f32.mrb[51].mxu0  ;;  %v16500_v30 = vld [vmem:[#allocation68_spill] sm:$0xff] }
 0x1f3   : > { %v2527_v50 = vor.u32 %v16492_v34, %v2524_v19  ;;  %v2537_v18 = vrot.slane %v2536_v43, 4  ;;  %v450_v3 = vsel %vm11551_vm8, 0, %v449_v41  ;;  %v2525_v58 = vsel %vm11582_vm10, %v2523_v44, %v2524_v19  ;;  %v16499_v19 = vld [vmem:[#allocation67_spill] sm:$0xff]  ;;  %v16503_v34 = vld [vmem:[#allocation73_spill] sm:$0xff] }
 0x1f4   : > { %v2538_v36 = vrot.slane %v16491_v53, 5  ;;  %v2519_v63 = vsel %vm11582_vm10, %v2514_v37, %v2518_v11  ;;  %v2546_v49 = vrot.slane %v2544_v47, 5  ;;  %451 = vst [vmem:[#allocation2 + $0x164] sm:$0x1] %v450_v3  ;;  %v13268_v23 = vadd.f32 %v16494_v27, %v16493_v57  ;;  %v16501_v53 = vld [vmem:[#allocation71_spill] sm:$0xff]  ;;  %v16506_v3 = vld [vmem:[#allocation18_spill] sm:$0xff] }
 0x1f5   : > { %v9277_v4 = vcombine.low %v2511_v6, %v2519_v63  ;;  %v2528_v51 = vrot.slane %v2527_v50, 4  ;;  %v13272_v46 = vadd.f32 %v16496_v14, %v16495_v48  ;;  %v9830_v5 = vadd.f32 %v9829_v10, %v9828_v28  ;;  %v16504_v50 = vld [vmem:[#allocation74_spill] sm:$0xff]  ;;  %v16511_v28 = vld [vmem:[#allocation81_spill] sm:$0xff]  ;;  %v16514_v57 = vld [vmem:[#allocation83_spill] sm:$0xff] }
 0x1f6   : > { %v2541_v39 = vor.u32 %v13015_v1, %v2538_v36  ;;  %v2539_v22 = vsel %vm11582_vm10, %v2537_v18, %v2538_v36  ;;  %v9935_v1 = vpop.f32.mrb[45].mxu1  ;;  %v13278_v35 = vadd.f32 %v16498_v20, %v16497_v60  ;;  %v9833_v37 = vadd.f32 %v9832_v32, %v9831_v21  ;;  %10717 = vmatmul.mubr.bf16.gmra.mrb[144].mxu0 %v13221_v38  ;;  %v16502_v36 = vld [vmem:[#allocation72_spill] sm:$0xff]  ;;  %v16505_v18 = vld [vmem:[#allocation17_spill] sm:$0xff]  ;;  %v16513_v10 = vld [vmem:[#allocation82_spill] sm:$0xff] }
 0x1f7   : > { %v2533_v45 = vsel %vm11582_vm10, %v2528_v51, %v2532_v16  ;;  %v9936_v6 = vadd.f32 %v9935_v1, %v9934_v13  ;;  %v9937_v2 = vpop.f32.mrb[46].mxu1  ;;  %v13284_v43 = vadd.f32 %v16500_v30, %v16499_v19  ;;  %v13292_v47 = vadd.f32 %v16502_v36, %v16501_v53  ;;  %10720 = vmatprep.mubr.bf16.mxu0 %v9275_v17  ;;  %v16510_v17 = vld [vmem:[#allocation80_spill] sm:$0xff]  ;;  %v16516_v14 = vld [vmem:[#allocation22_spill] sm:$0xff]  ;;  %v16517_v1 = vld [vmem:[#allocation23_spill] sm:$0xff] }
 0x1f8   : > { %v2542_v55 = vrot.slane %v2541_v39, 4  ;;  %v9278_v26 = vcombine.low %v2525_v58, %v2533_v45  ;;  %v9938_v41 = vpop.f32.mrb[47].mxu1  ;;  %v13296_v16 = vadd.f32 %v16504_v50, %v16503_v34  ;;  %v13300_v63 = vadd.f32 %v16506_v3, %v16505_v18  ;;  %v16507_v58 = vld [vmem:[#allocation75_spill] sm:$0xff]  ;;  %v16508_v39 = vld [vmem:[#allocation76_spill] sm:$0xff]  ;;  %v16519_v21 = vld [vmem:[#allocation25_spill] sm:$0xff]  ;;  %v9834_v18 = vpop.f32.mrb[52].mxu0 }
 0x1f9   : > { %v13288_v11 = vadd.f32 %v9936_v6, %v13226_v24  ;;  %v9939_v44 = vadd.f32 %v9938_v41, %v9937_v2  ;;  %v13304_v38 = vadd.f32 %v16508_v39, %v16507_v58  ;;  %v16509_v24 = vld [vmem:[#allocation79_spill] sm:$0xff]  ;;  %v16512_v13 = vld [vmem:[#allocation20_spill] sm:$0xff]  ;;  %v13327_v45 = vadd.f32 %v16517_v1, %v16516_v14  ;;  %v10972_v6 = vld [vmem:[#allocation9 + $0x60] sm:$0xff]  }
 0x1fa   : > { %v2547_v29 = vsel %vm11582_vm10, %v2542_v55, %v2546_v49  ;;  %v13308_v49 = vadd.f32 %v16509_v24, %v12964_v33  ;;  %v13319_v55 = vadd.f32 %v16513_v10, %v16512_v13  ;;  %v16515_v27 = vld [vmem:[#allocation84_spill] sm:$0xff]  ;;  %v16518_v33 = vld [vmem:[#allocation21_spill] sm:$0xff]  ;;  %v13335_v60 = vadd.f32 %v13120_v61, %v13118_v40  ;;  %v10973_v2 = vld [vmem:[#allocation9 + $0x20] sm:$0xff]   ;;  %v9940_v40 = vpop.f32.mrb[48].mxu1  ;;  %10220 = vmatprep.subr.bf16.mxu1 %v10972_v6 }
 0x1fb   : > { %v9279_v62 = vcombine.low %v2539_v22, %v2547_v29  ;;  %v13311_v51 = vadd.f32 %v9939_v44, %v13236_v56  ;;  %v13315_v22 = vadd.f32 %v16511_v28, %v16510_v17  ;;  %v13323_v48 = vadd.f32 %v16515_v27, %v16514_v57  ;;  %v16520_v32 = vld [vmem:[#allocation77_spill] sm:$0xff]  ;;  %v16523_v44 = vld [vmem:[#allocation78_spill] sm:$0xff]  ;;  %v2337_v61 = vld [vmem:[#allocation2 + $0x164] sm:$0x1]  ;;  %10221 = vmatpush3.bf16.msra.mxu1 %v10973_v2 }
 0x1fc   : > { %v13331_v56 = vadd.f32 %v16519_v21, %v16518_v33  ;;  %v13339_v20 = vadd.f32 %v13132_v59, %v13125_v12  ;;  %v16521_v29 = vshrl.u32 %v16520_v32, 16  ;;  %v16522_v19 = vshll.u32 %v16520_v32, 16  ;;  %v9941_v12 = vpop.f32.mrb[49].mxu1  ;;  %v9835_v59 = vpop.f32.mrb[53].mxu0 }
 0x1fd   : > { %v16524_v53 = vshrl.u32 %v16523_v44, 16  ;;  %v16525_v34 = vshll.u32 %v16523_v44, 16  ;;  %v9942_v3 = vadd.f32 %v9941_v12, %v9940_v40  ;;  %v9943_v58 = vpop.f32.mrb[50].mxu1  ;;  %v9836_v39 = vadd.f32 %v9835_v59, %v9834_v18  ;;  %v9837_v24 = vpop.f32.mrb[54].mxu0  ;;  %v10975_v40 = vld [vmem:[#allocation9 + $0x28] sm:$0xff]  }
 0x1fe   : > { %v2548_v41 = vrot.slane %v16521_v29, 4  ;;  %v2549_v30 = vrot.slane %v16522_v19, 5  ;;  %10721 = vmatmul.mubr.bf16.gmra.mrb[148].mxu0 %v13245_v9  ;;  %v9944_v17 = vpop.f32.mrb[51].mxu1  ;;  %v2558_v10 = vshll.u32 %v2337_v61, 16  ;;  %v9838_v57 = vpop.f32.mrb[55].mxu0 }
 0x1ff   : > { %v2554_v36 = vrot.slane %v16524_v53, 4  ;;  %v2552_v50 = vrot.slane %v16525_v34, 5  ;;  %10724 = vmatprep.mubr.bf16.mxu0 %v9277_v4  ;;  %v13350_v27 = vadd.f32 %v9942_v3, %v9830_v5  ;;  %v9945_v14 = vadd.f32 %v9944_v17, %v9943_v58  ;;  %v9840_v32 = vpop.f32.mrb[56].mxu0  ;;  %v9946_v29 = vpop.f32.mrb[52].mxu1  ;;  %v10974_v34 = vld [vmem:[#allocation9 + $0x68] sm:$0xff]  }
 0x200   : > { %v2550_v28 = vor.u32 %v2549_v30, %v2548_v41  ;;  %v9839_v1 = vadd.f32 %v9838_v57, %v9837_v24  ;;  %v2560_v2 = vrot.slane %v2558_v10, 5  ;;  %v9841_v41 = vpop.f32.mrb[57].mxu0  ;;  %v9947_v5 = vpop.f32.mrb[53].mxu1  ;;  %10222 = vmatprep.subr.bf16.mxu1 %v10974_v34  ;;  %v10977_v34 = vld [vmem:[#allocation9 + $0x30] sm:$0xff]  }
 0x201   : > { %v2555_v13 = vor.u32 %v2554_v36, %v2552_v50  ;;  %v13352_v33 = vadd.f32 %v9945_v14, %v9833_v37  ;;  %v9842_v19 = vadd.f32 %v9841_v41, %v9840_v32  ;;  %v9843_v30 = vpop.f32.mrb[58].mxu0  ;;  %v9948_v37 = vadd.f32 %v9947_v5, %v9946_v29  ;;  %v9949_v53 = vpop.f32.mrb[54].mxu1  ;;  %10223 = vmatpush3.bf16.msra.mxu1 %v10975_v40 }
 0x202   : > { %v2551_v21 = vrot.slane %v2550_v28, 4  ;;  %v9844_v36 = vpop.f32.mrb[59].mxu0 }
 0x203   : > { %v2556_v6 = vrot.slane %v2555_v13, 4  ;;  %v13358_v61 = vadd.f32 %v9948_v37, %v9836_v39  ;;  %v9846_v59 = vpop.f32.mrb[60].mxu0 }
 0x204   : > { %v2553_v9 = vsel %vm11582_vm10, %v2551_v21, %v2552_v50  ;;  %v9847_v58 = vpop.f32.mrb[61].mxu0 }
 0x205   : > { %v2561_v4 = vsel %vm11582_vm10, %v2556_v6, %v2560_v2  ;;  %v9848_v28 = vadd.f32 %v9847_v58, %v9846_v59  ;;  %v9849_v13 = vpop.f32.mrb[62].mxu0  ;;  %v10976_v2 = vld [vmem:[#allocation9 + $0x70] sm:$0xff]  }
 0x206   : > { %10725 = vmatmul.mubr.bf16.gmra.mrb[152].mxu0 %v9278_v26  ;;  %v9280_v44 = vcombine.low %v2553_v9, %v2561_v4  ;;  %v9950_v26 = vpop.f32.mrb[55].mxu1  ;;  %v9850_v57 = vpop.f32.mrb[63].mxu0  ;;  %10224 = vmatprep.subr.bf16.mxu1 %v10976_v2 }
 0x207   : > { %10728 = vmatprep.mubr.bf16.mxu0 %v9279_v62  ;;  %v9845_v62 = vadd.f32 %v9844_v36, %v9843_v30  ;;  %v9951_v50 = vadd.f32 %v9950_v26, %v9949_v53  ;;  %v9952_v12 = vpop.f32.mrb[56].mxu1  ;;  %v9851_v21 = vadd.f32 %v9850_v57, %v9849_v13  ;;  %10225 = vmatpush3.bf16.msra.mxu1 %v10977_v34 }
 0x208   : > { %v9953_v3 = vpop.f32.mrb[57].mxu1 }
 0x209   : > { %v13360_v18 = vadd.f32 %v9951_v50, %v9839_v1  ;;  %v9954_v24 = vadd.f32 %v9953_v3, %v9952_v12  ;;  %v9955_v17 = vpop.f32.mrb[58].mxu1 }
 0x20a   : > { %v9956_v10 = vpop.f32.mrb[59].mxu1 }
 0x20b   : > { %v13362_v14 = vadd.f32 %v9954_v24, %v9842_v19  ;;  %v9957_v39 = vadd.f32 %v9956_v10, %v9955_v17 }
 0x20c   : > { %v9980_v9 = vpop.f32.mrb[64].mxu0 }
 0x20d   : > { %v13364_v6 = vadd.f32 %v9957_v39, %v9845_v62  ;;  %v9981_v1 = vpop.f32.mrb[65].mxu0 }
 0x20e   : > { %10729 = vmatmul.mubr.bf16.gmra.mrb[156].mxu0 %v9280_v44  ;;  %v9982_v4 = vadd.f32 %v9981_v1, %v9980_v9  ;;  %v9983_v32 = vpop.f32.mrb[66].mxu0 }
 0x20f   : > { %v9958_v29 = vpop.f32.mrb[60].mxu1  ;;  %v9984_v41 = vpop.f32.mrb[67].mxu0 }
 0x210   : > { %v9959_v5 = vpop.f32.mrb[61].mxu1  ;;  %v4167_v30 = vadd.f32 %v9982_v4, %v13268_v23  ;;  %v9985_v44 = vadd.f32 %v9984_v41, %v9983_v32 }
 0x211   : > { %v9960_v37 = vadd.f32 %v9959_v5, %v9958_v29  ;;  %v9961_v53 = vpop.f32.mrb[62].mxu1 }
 0x212   : > { %v9962_v19 = vpop.f32.mrb[63].mxu1  ;;  %v4170_v36 = vadd.f32 %v9985_v44, %v13272_v46 }
 0x213   : > { %v13368_v40 = vadd.f32 %v9960_v37, %v9848_v28  ;;  %v9963_v26 = vadd.f32 %v9962_v19, %v9961_v53  ;;  %v10978_v37 = vld [vmem:[#allocation9 + $0xc0] sm:$0xff]  }
 0x214   : > { %10324 = vmatprep.subr.bf16.mxu0 %v10978_v37 }
 0x215   : > { %v13370_v62 = vadd.f32 %v9963_v26, %v9851_v21 }
 0x216   : > { %v9986_v50 = vpop.f32.mrb[68].mxu0 }
 0x217   : > { %v9987_v12 = vpop.f32.mrb[69].mxu0  ;;  %v10092_v59 = vpop.f32.mrb[64].mxu1 }
 0x218   : > { %v9988_v3 = vadd.f32 %v9987_v12, %v9986_v50  ;;  %v9989_v58 = vpop.f32.mrb[70].mxu0  ;;  %v10093_v24 = vpop.f32.mrb[65].mxu1  ;;  %v10979_v50 = vld [vmem:[#allocation9 + $0x80] sm:$0xff]  }
 0x219   : > { %v9990_v23 = vpop.f32.mrb[71].mxu0  ;;  %v10094_v17 = vadd.f32 %v10093_v24, %v10092_v59  ;;  %v10095_v13 = vpop.f32.mrb[66].mxu1  ;;  %10325 = vmatpush3.bf16.msra.mxu0 %v10979_v50  ;;  %v10980_v24 = vld [vmem:[#allocation9 + $0xc8] sm:$0xff]  }
 0x21a   : > { %v4175_v10 = vadd.f32 %v9988_v3, %v13278_v35  ;;  %v9991_v57 = vadd.f32 %v9990_v23, %v9989_v58  ;;  %v10096_v46 = vpop.f32.mrb[67].mxu1  ;;  %v10981_v23 = vld [vmem:[#allocation9 + $0x88] sm:$0xff]   ;;  %10326 = vmatprep.subr.bf16.mxu0 %v10980_v24 }
 0x21b   : > { %v10097_v39 = vadd.f32 %v10096_v46, %v10095_v13  ;;  %v13374_v2 = vadd.f32 %v10094_v17, %v4167_v30  ;;  %v10982_v17 = vld [vmem:[#allocation9 + $0x78] sm:$0xff]  }
 0x21c   : > { %v4178_v28 = vadd.f32 %v9991_v57, %v13284_v43  ;;  %10226 = vmatprep.subr.bf16.mxu1 %v10982_v17 }
 0x21d   : > { %v13376_v21 = vadd.f32 %v10097_v39, %v4170_v36  ;;  %v10984_v39 = vld [vmem:[#allocation9 + $0xd0] sm:$0xff]   ;;  %10327 = vmatpush3.bf16.msra.mxu0 %v10981_v23 }
 0x21e   : > { %10328 = vmatprep.subr.bf16.mxu0 %v10984_v39 }
 0x21f   : > { %v10098_v9 = vpop.f32.mrb[68].mxu1 }
 0x220   : > { %v10099_v4 = vpop.f32.mrb[69].mxu1 }
 0x221   : > { %v9992_v1 = vpop.f32.mrb[72].mxu0  ;;  %v10100_v29 = vadd.f32 %v10099_v4, %v10098_v9  ;;  %v10101_v41 = vpop.f32.mrb[70].mxu1 }
 0x222   : > { %v9993_v32 = vpop.f32.mrb[73].mxu0  ;;  %v10102_v53 = vpop.f32.mrb[71].mxu1 }
 0x223   : > { %v9994_v5 = vadd.f32 %v9993_v32, %v9992_v1  ;;  %v9995_v44 = vpop.f32.mrb[74].mxu0  ;;  %v10103_v19 = vadd.f32 %v10102_v53, %v10101_v41  ;;  %v13379_v43 = vadd.f32 %v10100_v29, %v4175_v10  ;;  %v10983_v10 = vld [vmem:[#allocation9 + $0x38] sm:$0xff]  }
 0x224   : > { %v9996_v35 = vpop.f32.mrb[75].mxu0  ;;  %10227 = vmatpush3.bf16.msra.mxu1 %v10983_v10 }
 0x225   : > { %v4183_v34 = vadd.f32 %v9994_v5, %v13292_v47  ;;  %v9997_v26 = vadd.f32 %v9996_v35, %v9995_v44  ;;  %v13382_v36 = vadd.f32 %v10103_v19, %v4178_v28  ;;  %v10985_v5 = vld [vmem:[#allocation9 + $0x90] sm:$0xff]   ;;  %v10986_v19 = vld [vmem:[#allocation9 + $0xd8] sm:$0xff]  }
 0x226   : > { %10329 = vmatpush3.bf16.msra.mxu0 %v10985_v5 }
 0x227   : > { %v4186_v30 = vadd.f32 %v9997_v26, %v13296_v16  ;;  %v10104_v12 = vpop.f32.mrb[72].mxu1  ;;  %v10987_v26 = vld [vmem:[#allocation9 + $0x98] sm:$0xff]   ;;  %10330 = vmatprep.subr.bf16.mxu0 %v10986_v19 }
 0x228   : > { %v10105_v3 = vpop.f32.mrb[73].mxu1 }
 0x229   : > { %v10106_v13 = vadd.f32 %v10105_v3, %v10104_v12  ;;  %v10107_v57 = vpop.f32.mrb[74].mxu1 }
 0x22a   : > { %v9998_v59 = vpop.f32.mrb[76].mxu0  ;;  %v10108_v9 = vpop.f32.mrb[75].mxu1  ;;  %10331 = vmatpush3.bf16.msra.mxu0 %v10987_v26 }
 0x22b   : > { %v9999_v58 = vpop.f32.mrb[77].mxu0  ;;  %v10109_v16 = vadd.f32 %v10108_v9, %v10107_v57  ;;  %v13385_v32 = vadd.f32 %v10106_v13, %v4183_v34  ;;  %v10988_v34 = vld [vmem:[#allocation9 + $0xe0] sm:$0xff]  }
 0x22c   : > { %v10000_v47 = vadd.f32 %v9999_v58, %v9998_v59  ;;  %v10001_v46 = vpop.f32.mrb[78].mxu0  ;;  %10332 = vmatprep.subr.bf16.mxu0 %v10988_v34  ;;  %v10989_v57 = vld [vmem:[#allocation9 + $0xa0] sm:$0xff]  }
 0x22d   : > { %v10002_v1 = vpop.f32.mrb[79].mxu0  ;;  %v13388_v41 = vadd.f32 %v10109_v16, %v4186_v30  ;;  %v13396_v9 = vld [vmem:[#allocation3 + $0x8] sm:$0xf] }
 0x22e   : > { %v4191_v28 = vadd.f32 %v10000_v47, %v13300_v63  ;;  %v10003_v4 = vadd.f32 %v10002_v1, %v10001_v46  ;;  %10333 = vmatpush3.bf16.msra.mxu0 %v10989_v57  ;;  %v13398_v1 = vld [vmem:[#allocation3 + $0xc] sm:$0xf]  ;;  %v4940_v5 = vshrl.u32 %v13396_v9, 16 }
 0x22f   : > { %v10110_v44 = vpop.f32.mrb[76].mxu1  ;;  %v4952_v19 = vshll.u32 %v13398_v1, 16  ;;  %v9451_v26 = vcombine.low %v13396_v9, %v13398_v1  ;;  %v10993_v34 = vld [vmem:[#allocation9 + $0x140] sm:$0xff]  }
 0x230   : > { %v4194_v29 = vadd.f32 %v10003_v4, %v13304_v38  ;;  %v10111_v53 = vpop.f32.mrb[77].mxu1  ;;  %10436 = vmatprep.subr.bf16.mxu1 %v10993_v34  ;;  %v466_v34 = vld [vmem:[#allocation3 + $0x18] sm:$0x8] }
 0x231   : > { %v10112_v50 = vadd.f32 %v10111_v53, %v10110_v44  ;;  %v10113_v63 = vpop.f32.mrb[78].mxu1  ;;  %v4943_v53 = vshll.u32 %v13396_v9, 16  ;;  %8087 = vmatprep.mubr.bf16.mxu1 %v9451_v26 }
 0x232   : > { %v10114_v3 = vpop.f32.mrb[79].mxu1 }
 0x233   : > { %v10004_v37 = vpop.f32.mrb[80].mxu0  ;;  %v10115_v38 = vadd.f32 %v10114_v3, %v10113_v63  ;;  %v13391_v23 = vadd.f32 %v10112_v50, %v4191_v28  ;;  %v10995_v3 = vld [vmem:[#allocation9 + $0xf0] sm:$0xff]  }
 0x234   : > { %v10005_v35 = vpop.f32.mrb[81].mxu0 }
 0x235   : > { %v10006_v12 = vadd.f32 %v10005_v35, %v10004_v37  ;;  %v10007_v59 = vpop.f32.mrb[82].mxu0  ;;  %v13394_v13 = vadd.f32 %v10115_v38, %v4194_v29  ;;  %v10992_v29 = vld [vmem:[#allocation9 + $0xa8] sm:$0xff]   ;;  %v4949_v35 = vshrl.u32 %v13398_v1, 16  ;;  %v5303_v38 = vrot.slane %v4943_v53, 5 }
 0x236   : > { %v10008_v58 = vpop.f32.mrb[83].mxu0 }
 0x237   : > { %v4199_v30 = vadd.f32 %v10006_v12, %v13308_v49  ;;  %v10009_v24 = vadd.f32 %v10008_v58, %v10007_v59  ;;  %v10116_v47 = vpop.f32.mrb[80].mxu1  ;;  %v5302_v58 = vrot.slane %v4940_v5, 4 }
 0x238   : > { %v10117_v10 = vpop.f32.mrb[81].mxu1 }
 0x239   : > { %v4202_v17 = vadd.f32 %v10009_v24, %v13315_v22  ;;  %v10118_v49 = vadd.f32 %v10117_v10, %v10116_v47  ;;  %v10119_v16 = vpop.f32.mrb[82].mxu1  ;;  %v10991_v22 = vld [vmem:[#allocation9 + $0xe8] sm:$0xff]   ;;  %v463_v24 = vld [vmem:[#allocation3 + $0x4] sm:$0x8]  ;;  %v10997_v10 = vld [vmem:[#allocation9 + $0xb0] sm:$0xff]  }
 0x23a   : > { %v10120_v44 = vpop.f32.mrb[83].mxu1  ;;  %10334 = vmatprep.subr.bf16.mxu0 %v10991_v22 }
 0x23b   : > { %v10121_v50 = vadd.f32 %v10120_v44, %v10119_v16  ;;  %v13407_v59 = vadd.f32 %v10118_v49, %v4199_v30  ;;  %10335 = vmatpush3.bf16.msra.mxu0 %v10992_v29  ;;  %v5304_v30 = vor.u32 %v5303_v38, %v5302_v58  ;;  %v4951_v38 = vrot.slane %v4949_v35, 7 }
 0x23c   : > { %v10010_v46 = vpop.f32.mrb[84].mxu0  ;;  %10336 = vmatprep.subr.bf16.mxu0 %v10995_v3 }
 0x23d   : > { %v10011_v39 = vpop.f32.mrb[85].mxu0  ;;  %v13412_v47 = vadd.f32 %v10121_v50, %v4202_v17  ;;  %v13419_v29 = vrot.slane %v5304_v30, 4  ;;  %v10999_v17 = vld [vmem:[#allocation9 + $0xb8] sm:$0xff]  }
 0x23e   : > { %v10012_v28 = vadd.f32 %v10011_v39, %v10010_v46  ;;  %v10013_v4 = vpop.f32.mrb[86].mxu0  ;;  %v13414_v46 = vrot.slane %v4952_v19, 5 }
 0x23f   : > { %v10014_v37 = vpop.f32.mrb[87].mxu0  ;;  %v10122_v39 = vpop.f32.mrb[84].mxu1  ;;  %10337 = vmatpush3.bf16.msra.mxu0 %v10997_v10 }
 0x240   : > { %v4207_v63 = vadd.f32 %v10012_v28, %v13319_v55  ;;  %v10015_v12 = vadd.f32 %v10014_v37, %v10013_v4  ;;  %v5308_v55 = vrot.slane %v4949_v35, 4  ;;  %v464_v28 = vsel %vm11545_vm3, 0, %v463_v24  ;;  %v10123_v4 = vpop.f32.mrb[85].mxu1 }
 0x241   : > { %465 = vst [vmem:[#allocation3 + $0x4] sm:$0x8] %v464_v28  ;;  %v10124_v44 = vadd.f32 %v10123_v4, %v10122_v39  ;;  %v10125_v37 = vpop.f32.mrb[86].mxu1  ;;  %v467_v24 = vsel %vm11545_vm3, 0, %v466_v34  ;;  %v5307_v30 = vsel %vm11582_vm10, %v13419_v29, %v13414_v46 }
 0x242   : > { %v4210_v57 = vadd.f32 %v10015_v12, %v13323_v48  ;;  %v5309_v49 = vor.u32 %v5308_v55, %v13414_v46  ;;  %v10998_v48 = vld [vmem:[#allocation9 + $0xf8] sm:$0xff]   ;;  %v4942_v12 = vrot.slane %v4940_v5, 7  ;;  %v10126_v3 = vpop.f32.mrb[87].mxu1  ;;  %v517_v55 = vld [vmem:[#allocation3 + $0x10] sm:$0x1] }
 0x243   : > { %10338 = vmatprep.subr.bf16.mxu0 %v10998_v48  ;;  %v10127_v10 = vadd.f32 %v10126_v3, %v10125_v37  ;;  %v13428_v28 = vadd.f32 %v10124_v44, %v4207_v63  ;;  %468 = vst [vmem:[#allocation3 + $0x18] sm:$0x8] %v467_v24  ;;  %v518_v5 = vsel %vm11551_vm8, 0, %v517_v55  ;;  %v4954_v48 = vor.u32 %v4952_v19, %v4951_v38 }
 0x244   : > { %10339 = vmatpush3.bf16.msra.mxu0 %v10999_v17  ;;  %519 = vst [vmem:[#allocation3 + $0x10] sm:$0x1] %v518_v5  ;;  %v4945_v63 = vor.u32 %v4943_v53, %v4942_v12  ;;  %v5310_v9 = vrot.slane %v5309_v49, 4 }
 0x245   : > { %v10016_v1 = vpop.f32.mrb[88].mxu0  ;;  %v13433_v4 = vadd.f32 %v10127_v10, %v4210_v57 }
 0x246   : > { %v10017_v22 = vpop.f32.mrb[89].mxu0 }
 0x247   : > { %v10018_v26 = vadd.f32 %v10017_v22, %v10016_v1  ;;  %v10019_v50 = vpop.f32.mrb[90].mxu0  ;;  %v4947_v22 = vrot.slane %v4942_v12, 4  ;;  %v10128_v34 = vpop.f32.mrb[88].mxu1  ;;  %v10996_v12 = vld [vmem:[#allocation9 + $0x100] sm:$0xff]  }
 0x248   : > { %v10020_v58 = vpop.f32.mrb[91].mxu0  ;;  %v4886_v29 = vld [vmem:[#allocation3 + $0x4] sm:$0x8]  ;;  %v10129_v37 = vpop.f32.mrb[89].mxu1 }
 0x249   : > { %v4215_v39 = vadd.f32 %v10018_v26, %v13327_v45  ;;  %v10021_v1 = vadd.f32 %v10020_v58, %v10019_v50  ;;  %v4935_v44 = vshrl.u32 %v4886_v29, 16  ;;  %v10130_v17 = vadd.f32 %v10129_v37, %v10128_v34  ;;  %v10131_v26 = vpop.f32.mrb[90].mxu1 }
 0x24a   : > { %v10132_v58 = vpop.f32.mrb[91].mxu1  ;;  %v4955_v24 = vsel %vm11561_vm9, %v4947_v22, %v4954_v48 }
 0x24b   : > { %v4218_v35 = vadd.f32 %v10021_v1, %v13331_v56  ;;  %v9387_v57 = vrot.slane %v4935_v44, 11  ;;  %v10133_v19 = vadd.f32 %v10132_v58, %v10131_v26  ;;  %v13440_v10 = vadd.f32 %v10130_v17, %v4215_v39  ;;  %v469_v1 = vld [vmem:[#allocation3 + $0x2c] sm:$0x8]  ;;  %v5286_v5 = vld [vmem:[#allocation3 + $0x10] sm:$0x1] }
 0x24c   : > { %v470_v34 = vsel %vm11545_vm3, 0, %v469_v1  ;;  %v5312_v48 = vshll.u32 %v5286_v5, 16  ;;  %v520_v39 = vld [vmem:[#allocation3 + $0x24] sm:$0x1]  ;;  %v11003_v5 = vld [vmem:[#allocation9 + $0x108] sm:$0xff]  }
 0x24d   : > { %v4946_v53 = vsel %vm11561_vm9, %v9387_v57, %v4945_v63  ;;  %v13447_v22 = vadd.f32 %v10133_v19, %v4218_v35  ;;  %471 = vst [vmem:[#allocation3 + $0x2c] sm:$0x8] %v470_v34  ;;  %v521_v63 = vsel %vm11551_vm8, 0, %v520_v39 }
 0x24e   : > { %v10022_v46 = vpop.f32.mrb[92].mxu0  ;;  %v9435_v29 = vcombine.low %v4946_v53, %v4955_v24  ;;  %v5314_v49 = vrot.slane %v5312_v48, 5  ;;  %522 = vst [vmem:[#allocation3 + $0x24] sm:$0x1] %v521_v63 }
 0x24f   : > { %v10023_v45 = vpop.f32.mrb[93].mxu0 }
 0x250   : > { %v10024_v50 = vadd.f32 %v10023_v45, %v10022_v46  ;;  %v10025_v3 = vpop.f32.mrb[94].mxu0  ;;  %8088 = vmatmul.mubr.bf16.vlgmr.msra.gmra.mrb[128].mxu1 %v9435_v29 }
 0x251   : > { %v10026_v56 = vpop.f32.mrb[95].mxu0  ;;  %v10134_v37 = vpop.f32.mrb[92].mxu1  ;;  %10437 = vmatpush3.bf16.msra.mxu1 %v10996_v12 }
 0x252   : > { %v4223_v38 = vadd.f32 %v10024_v50, %v13335_v60  ;;  %v10027_v55 = vadd.f32 %v10026_v56, %v10025_v3  ;;  %v11001_v60 = vld [vmem:[#allocation9 + $0x148] sm:$0xff]   ;;  %v10135_v44 = vpop.f32.mrb[93].mxu1  ;;  %v5315_v3 = vsel %vm11582_vm10, %v5310_v9, %v5314_v49 }
 0x253   : > { %v10136_v26 = vadd.f32 %v10135_v44, %v10134_v37  ;;  %10438 = vmatprep.subr.bf16.mxu1 %v11001_v60  ;;  %v13453_v57 = vcombine.low %v5307_v30, %v5315_v3  ;;  %v472_v60 = vld [vmem:[#allocation3 + $0x40] sm:$0x8] }
 0x254   : > { %v4226_v46 = vadd.f32 %v10027_v55, %v13339_v20  ;;  %v10137_v20 = vpop.f32.mrb[94].mxu1 }
 0x255   : > { %v10138_v58 = vpop.f32.mrb[95].mxu1  ;;  %v13456_v1 = vadd.f32 %v10136_v26, %v4223_v38  ;;  %10439 = vmatpush3.bf16.msra.mxu1 %v11003_v5 }
 0x256   : > { %v10139_v24 = vadd.f32 %v10138_v58, %v10137_v20 }
 0x258   : > { %v10028_v45 = vpop.f32.mrb[96].mxu0  ;;  %v13459_v12 = vadd.f32 %v10139_v24, %v4226_v46 }
 0x259   : > { %v10029_v17 = vpop.f32.mrb[97].mxu0  ;;  %v10140_v34 = vpop.f32.mrb[96].mxu1 }
 0x25a   : > { %v10030_v50 = vadd.f32 %v10029_v17, %v10028_v45  ;;  %v10031_v35 = vpop.f32.mrb[98].mxu0  ;;  %v10141_v48 = vpop.f32.mrb[97].mxu1  ;;  %v523_v17 = vld [vmem:[#allocation3 + $0x38] sm:$0x1] }
 0x25b   : > { %v10032_v56 = vpop.f32.mrb[99].mxu0  ;;  %v10142_v39 = vadd.f32 %v10141_v48, %v10140_v34  ;;  %v10143_v30 = vpop.f32.mrb[98].mxu1 }
 0x25c   : > { %v4231_v19 = vadd.f32 %v10030_v50, %v13159_v0  ;;  %v10033_v55 = vadd.f32 %v10032_v56, %v10031_v35  ;;  %v473_v0 = vsel %vm11545_vm3, 0, %v472_v60  ;;  %v10144_v38 = vpop.f32.mrb[99].mxu1  ;;  %v524_v50 = vsel %vm11551_vm8, 0, %v523_v17 }
 0x25d   : > { %474 = vst [vmem:[#allocation3 + $0x40] sm:$0x8] %v473_v0  ;;  %525 = vst [vmem:[#allocation3 + $0x38] sm:$0x1] %v524_v50  ;;  %v526_v50 = vld [vmem:[#allocation3 + $0x4c] sm:$0x1] }
 0x25e   : > { %v4234_v53 = vadd.f32 %v10033_v55, %v13165_v52  ;;  %v10145_v52 = vadd.f32 %v10144_v38, %v10143_v30  ;;  %v13464_v44 = vadd.f32 %v10142_v39, %v4231_v19  ;;  %v475_v39 = vld [vmem:[#allocation3 + $0x54] sm:$0x8]  ;;  %v11005_v38 = vld [vmem:[#allocation9 + $0x150] sm:$0xff]  }
 0x25f   : > { %v476_v30 = vsel %vm11545_vm3, 0, %v475_v39  ;;  %10440 = vmatprep.subr.bf16.mxu1 %v11005_v38 }
 0x260   : > { %v10034_v29 = vpop.f32.mrb[100].mxu0  ;;  %v13467_v20 = vadd.f32 %v10145_v52, %v4234_v53  ;;  %477 = vst [vmem:[#allocation3 + $0x54] sm:$0x8] %v476_v30  ;;  %v478_v30 = vld [vmem:[#allocation3 + $0x68] sm:$0x8] }
 0x261   : > { %v10035_v9 = vpop.f32.mrb[101].mxu0 }
 0x262   : > { %v10036_v37 = vadd.f32 %v10035_v9, %v10034_v29  ;;  %v10037_v45 = vpop.f32.mrb[102].mxu0 }
 0x263   : > { %v10038_v49 = vpop.f32.mrb[103].mxu0  ;;  %v10146_v35 = vpop.f32.mrb[100].mxu1 }
 0x264   : > { %v4239_v46 = vadd.f32 %v10036_v37, %v13194_v8  ;;  %v10039_v63 = vadd.f32 %v10038_v49, %v10037_v45  ;;  %v10147_v58 = vpop.f32.mrb[101].mxu1 }
 0x265   : > { %v10148_v24 = vadd.f32 %v10147_v58, %v10146_v35  ;;  %v10149_v55 = vpop.f32.mrb[102].mxu1 }
 0x266   : > { %v4242_v26 = vadd.f32 %v10039_v63, %v13201_v25  ;;  %v10150_v34 = vpop.f32.mrb[103].mxu1 }
 0x267   : > { %v10151_v29 = vadd.f32 %v10150_v34, %v10149_v55  ;;  %v13472_v53 = vadd.f32 %v10148_v24, %v4239_v46 }
 0x269   : > { %v13475_v60 = vadd.f32 %v10151_v29, %v4242_v26 }
 0x26a   : > { %v10040_v3 = vpop.f32.mrb[104].mxu0 }
 0x26b   : > { %v10041_v56 = vpop.f32.mrb[105].mxu0  ;;  %v10152_v37 = vpop.f32.mrb[104].mxu1 }
 0x26c   : > { %v10042_v5 = vadd.f32 %v10041_v56, %v10040_v3  ;;  %v10043_v8 = vpop.f32.mrb[106].mxu0  ;;  %v10153_v45 = vpop.f32.mrb[105].mxu1  ;;  %v527_v3 = vsel %vm11551_vm8, 0, %v526_v50 }
 0x26d   : > { %v10044_v19 = vpop.f32.mrb[107].mxu0  ;;  %v10154_v49 = vadd.f32 %v10153_v45, %v10152_v37  ;;  %v10155_v52 = vpop.f32.mrb[106].mxu1  ;;  %528 = vst [vmem:[#allocation3 + $0x4c] sm:$0x1] %v527_v3 }
 0x26e   : > { %v4247_v48 = vadd.f32 %v10042_v5, %v13232_v15  ;;  %v10045_v25 = vadd.f32 %v10044_v19, %v10043_v8  ;;  %v10156_v15 = vpop.f32.mrb[107].mxu1 }
 0x270   : > { %v4250_v9 = vadd.f32 %v10045_v25, %v13243_v31  ;;  %v10157_v31 = vadd.f32 %v10156_v15, %v10155_v52  ;;  %v13479_v35 = vadd.f32 %v10154_v49, %v4247_v48  ;;  %v11007_v25 = vld [vmem:[#allocation9 + $0x110] sm:$0xff]  }
 0x271   : > { %10441 = vmatpush3.bf16.msra.mxu1 %v11007_v25 }
 0x272   : > { %v13484_v24 = vadd.f32 %v10157_v31, %v4250_v9 }
 0x274   : > { %v10046_v0 = vpop.f32.mrb[108].mxu0 }
 0x275   : > { %v10047_v63 = vpop.f32.mrb[109].mxu0  ;;  %v10158_v5 = vpop.f32.mrb[108].mxu1 }
 0x276   : > { %v10048_v17 = vadd.f32 %v10047_v63, %v10046_v0  ;;  %v10049_v46 = vpop.f32.mrb[110].mxu0  ;;  %v10159_v8 = vpop.f32.mrb[109].mxu1  ;;  %v529_v63 = vld [vmem:[#allocation3 + $0x60] sm:$0x1] }
 0x277   : > { %v10050_v26 = vpop.f32.mrb[111].mxu0  ;;  %v10160_v34 = vadd.f32 %v10159_v8, %v10158_v5  ;;  %v10161_v19 = vpop.f32.mrb[110].mxu1 }
 0x278   : > { %v4255_v58 = vadd.f32 %v10048_v17, %v13288_v11  ;;  %v10051_v56 = vadd.f32 %v10050_v26, %v10049_v46  ;;  %v10162_v39 = vpop.f32.mrb[111].mxu1  ;;  %v479_v11 = vsel %vm11545_vm3, 0, %v478_v30  ;;  %v530_v46 = vsel %vm11551_vm8, 0, %v529_v63 }
 0x279   : > { %v10163_v37 = vadd.f32 %v10162_v39, %v10161_v19  ;;  %480 = vst [vmem:[#allocation3 + $0x68] sm:$0x8] %v479_v11  ;;  %531 = vst [vmem:[#allocation3 + $0x60] sm:$0x1] %v530_v46 }
 0x27a   : > { %v4258_v55 = vadd.f32 %v10051_v56, %v13311_v51  ;;  %v13487_v38 = vadd.f32 %v10160_v34, %v4255_v58  ;;  %v481_v34 = vld [vmem:[#allocation3 + $0x7c] sm:$0x8] }
 0x27c   : > { %v13492_v52 = vadd.f32 %v10163_v37, %v4258_v55  ;;  %v11009_v37 = vld [vmem:[#allocation9 + $0x158] sm:$0xff]  }
 0x27d   : > { %10442 = vmatprep.subr.bf16.mxu1 %v11009_v37 }
 0x27e   : > { %v10052_v29 = vpop.f32.mrb[112].mxu0 }
 0x27f   : > { %v10053_v48 = vpop.f32.mrb[113].mxu0 }
 0x280   : > { %v10054_v45 = vadd.f32 %v10053_v48, %v10052_v29  ;;  %v10055_v0 = vpop.f32.mrb[114].mxu0  ;;  %v535_v48 = vld [vmem:[#allocation3 + $0x88] sm:$0x1] }
 0x281   : > { %v10056_v9 = vpop.f32.mrb[115].mxu0  ;;  %v10164_v15 = vpop.f32.mrb[112].mxu1 }
 0x282   : > { %v4263_v51 = vadd.f32 %v10054_v45, %v13350_v27  ;;  %v10057_v49 = vadd.f32 %v10056_v9, %v10055_v0  ;;  %v10165_v50 = vpop.f32.mrb[113].mxu1  ;;  %v532_v45 = vld [vmem:[#allocation3 + $0x74] sm:$0x1] }
 0x283   : > { %v10166_v31 = vadd.f32 %v10165_v50, %v10164_v15  ;;  %v10167_v26 = vpop.f32.mrb[114].mxu1  ;;  %v533_v9 = vsel %vm11551_vm8, 0, %v532_v45  ;;  %v484_v50 = vld [vmem:[#allocation3 + $0x90] sm:$0x8] }
 0x284   : > { %v4266_v17 = vadd.f32 %v10057_v49, %v13352_v33  ;;  %v10168_v3 = vpop.f32.mrb[115].mxu1  ;;  %v482_v33 = vsel %vm11545_vm3, 0, %v481_v34  ;;  %534 = vst [vmem:[#allocation3 + $0x74] sm:$0x1] %v533_v9  ;;  %v538_v9 = vld [vmem:[#allocation3 + $0x9c] sm:$0x1] }
 0x285   : > { %v10169_v56 = vadd.f32 %v10168_v3, %v10167_v26  ;;  %v13497_v8 = vadd.f32 %v10166_v31, %v4263_v51  ;;  %483 = vst [vmem:[#allocation3 + $0x7c] sm:$0x8] %v482_v33  ;;  %v536_v51 = vsel %vm11551_vm8, 0, %v535_v48  ;;  %v485_v26 = vsel %vm11545_vm3, 0, %v484_v50  ;;  %v541_v50 = vld [vmem:[#allocation3 + $0xb0] sm:$0x1] }
 0x286   : > { %537 = vst [vmem:[#allocation3 + $0x88] sm:$0x1] %v536_v51  ;;  %486 = vst [vmem:[#allocation3 + $0x90] sm:$0x8] %v485_v26  ;;  %v542_v26 = vsel %vm11551_vm8, 0, %v541_v50  ;;  %v11015_v50 = vld [vmem:[#allocation9 + $0x160] sm:$0xff]  }
 0x287   : > { %16527 = vst [vmem:[#allocation26_spill] sm:$0xff] %v13497_v8  ;;  %v13499_v29 = vadd.f32 %v10169_v56, %v4266_v17  ;;  %543 = vst [vmem:[#allocation3 + $0xb0] sm:$0x1] %v542_v26 }
 0x288   : > { %v10058_v58 = vpop.f32.mrb[116].mxu0 }
 0x289   : > { %v10059_v5 = vpop.f32.mrb[117].mxu0  ;;  %16528 = vst [vmem:[#allocation24_spill] sm:$0xff] %v13499_v29  ;;  %v10170_v30 = vpop.f32.mrb[116].mxu1 }
 0x28a   : > { %v10060_v27 = vadd.f32 %v10059_v5, %v10058_v58  ;;  %v10061_v55 = vpop.f32.mrb[118].mxu0  ;;  %v10171_v11 = vpop.f32.mrb[117].mxu1 }
 0x28b   : > { %v10062_v19 = vpop.f32.mrb[119].mxu0  ;;  %v10172_v49 = vadd.f32 %v10171_v11, %v10170_v30  ;;  %v10173_v63 = vpop.f32.mrb[118].mxu1  ;;  %v5526_v30 = vld [vmem:[#allocation3 + $0x18] sm:$0x8]  ;;  %v5529_v11 = vld [vmem:[#allocation3 + $0x2c] sm:$0x8] }
 0x28c   : > { %v4271_v25 = vadd.f32 %v10060_v27, %v13358_v61  ;;  %v10063_v39 = vadd.f32 %v10062_v19, %v10061_v55  ;;  %v10174_v61 = vpop.f32.mrb[119].mxu1  ;;  %v487_v27 = vld [vmem:[#allocation3 + $0xa4] sm:$0x8] }
 0x28d   : > { %v10175_v15 = vadd.f32 %v10174_v61, %v10173_v63  ;;  %v5575_v61 = vshrl.u32 %v5526_v30, 16  ;;  %v5538_v30 = vld [vmem:[#allocation3 + $0x68] sm:$0x8] }
 0x28e   : > { %v4274_v0 = vadd.f32 %v10063_v39, %v13360_v18  ;;  %v13509_v46 = vadd.f32 %v10172_v49, %v4271_v25  ;;  %v4889_v18 = vld [vmem:[#allocation3 + $0x18] sm:$0x8]  ;;  %v11011_v25 = vld [vmem:[#allocation9 + $0x118] sm:$0xff]   ;;  %v488_v39 = vsel %vm11545_vm3, 0, %v487_v27  ;;  %v5294_v42 = vld [vmem:[#allocation3 + $0xb0] sm:$0x1] }
 0x28f   : > { %v4957_v33 = vshrl.u32 %v4889_v18, 16  ;;  %489 = vst [vmem:[#allocation3 + $0xa4] sm:$0x8] %v488_v39  ;;  %10443 = vmatpush3.bf16.msra.mxu1 %v11011_v25  ;;  %v5532_v18 = vld [vmem:[#allocation3 + $0x40] sm:$0x8]  ;;  %v13531_v26 = vrot.slane %v5575_v61, 11 }
 0x290   : > { %v13513_v56 = vadd.f32 %v10175_v15, %v4274_v0  ;;  %v4892_v15 = vld [vmem:[#allocation3 + $0x2c] sm:$0x8]  ;;  %v490_v27 = vld [vmem:[#allocation3 + $0xb8] sm:$0x8]  ;;  %v5619_v39 = vshrl.u32 %v5532_v18, 16  ;;  %10444 = vmatprep.subr.bf16.mxu1 %v11015_v50 }
 0x291   : > { %v13521_v63 = vrot.slane %v4957_v33, 11  ;;  %v4898_v33 = vld [vmem:[#allocation3 + $0x54] sm:$0x8] }
 0x292   : > { %v10064_v17 = vpop.f32.mrb[120].mxu0  ;;  %16529 = vst [vmem:[#allocation29_spill] sm:$0xff] %v13513_v56  ;;  %v13539_v29 = vrot.slane %v5619_v39, 11 }
 0x293   : > { %v10065_v31 = vpop.f32.mrb[121].mxu0  ;;  %v10176_v34 = vpop.f32.mrb[120].mxu1 }
 0x294   : > { %v10066_v3 = vadd.f32 %v10065_v31, %v10064_v17  ;;  %v10067_v58 = vpop.f32.mrb[122].mxu0  ;;  %v10177_v48 = vpop.f32.mrb[121].mxu1  ;;  %v5597_v31 = vshrl.u32 %v5529_v11, 16  ;;  %v4901_v11 = vld [vmem:[#allocation3 + $0x68] sm:$0x8] }
 0x295   : > { %v10068_v5 = vpop.f32.mrb[123].mxu0  ;;  %v10178_v45 = vadd.f32 %v10177_v48, %v10176_v34  ;;  %v10179_v0 = vpop.f32.mrb[122].mxu1  ;;  %v4979_v34 = vshrl.u32 %v4892_v15, 16  ;;  %v5289_v48 = vld [vmem:[#allocation3 + $0x4c] sm:$0x1] }
 0x296   : > { %v4279_v55 = vadd.f32 %v10066_v3, %v13362_v14  ;;  %v10069_v19 = vadd.f32 %v10068_v5, %v10067_v58  ;;  %v10180_v51 = vpop.f32.mrb[123].mxu1  ;;  %v539_v14 = vsel %vm11551_vm8, 0, %v538_v9  ;;  %v4895_v3 = vld [vmem:[#allocation3 + $0x40] sm:$0x8]  ;;  %v5288_v58 = vld [vmem:[#allocation3 + $0x38] sm:$0x1] }
 0x297   : > { %v10181_v49 = vadd.f32 %v10180_v51, %v10179_v0  ;;  %540 = vst [vmem:[#allocation3 + $0x9c] sm:$0x1] %v539_v14  ;;  %v5340_v0 = vshll.u32 %v5288_v58, 16  ;;  %v5290_v9 = vld [vmem:[#allocation3 + $0x60] sm:$0x1] }
 0x298   : > { %v4282_v37 = vadd.f32 %v10069_v19, %v13364_v6  ;;  %v13523_v17 = vadd.f32 %v10178_v45, %v4279_v55  ;;  %v5287_v6 = vld [vmem:[#allocation3 + $0x24] sm:$0x1]  ;;  %v5535_v19 = vld [vmem:[#allocation3 + $0x54] sm:$0x8]  ;;  %v491_v55 = vsel %vm11545_vm3, 0, %v490_v27  ;;  %v5001_v45 = vshrl.u32 %v4895_v3, 16 }
 0x299   : > { %v5326_v25 = vshll.u32 %v5287_v6, 16  ;;  %492 = vst [vmem:[#allocation3 + $0xb8] sm:$0x8] %v491_v55  ;;  %v5641_v51 = vshrl.u32 %v5535_v19, 16  ;;  %v5541_v14 = vld [vmem:[#allocation3 + $0x7c] sm:$0x8] }
 0x29a   : > { %16530 = vst [vmem:[#allocation30_spill] sm:$0xff] %v13523_v17  ;;  %v13527_v5 = vadd.f32 %v10181_v49, %v4282_v37  ;;  %v5023_v37 = vshrl.u32 %v4898_v33, 16  ;;  %v11013_v49 = vld [vmem:[#allocation9 + $0x1c0] sm:$0xff]   ;;  %v5354_v27 = vshll.u32 %v5289_v48, 16  ;;  %v5663_v6 = vshrl.u32 %v5538_v30, 16 }
 0x29b   : > { %v13535_v17 = vrot.slane %v4979_v34, 11  ;;  %v13537_v55 = vrot.slane %v5326_v25, 5  ;;  %v5045_v3 = vshrl.u32 %v4901_v11, 16  ;;  %v5368_v58 = vshll.u32 %v5290_v9, 16  ;;  %10548 = vmatprep.subr.bf16.mxu0 %v11013_v49  ;;  %v5291_v25 = vld [vmem:[#allocation3 + $0x74] sm:$0x1] }
 0x29c   : > { %16531 = vst [vmem:[#allocation28_spill] sm:$0xff] %v13527_v5  ;;  %v13533_v5 = vrot.slane %v5597_v31, 11  ;;  %v13541_v56 = vrot.slane %v5001_v45, 11  ;;  %v5685_v61 = vshrl.u32 %v5541_v14, 16  ;;  %v4904_v31 = vld [vmem:[#allocation3 + $0x7c] sm:$0x8] }
 0x29d   : > { %v13543_v48 = vrot.slane %v5340_v0, 5  ;;  %v13545_v30 = vrot.slane %v5641_v51, 11  ;;  %v13547_v34 = vrot.slane %v5023_v37, 11  ;;  %v13550_v49 = vrot.slane %v5354_v27, 5  ;;  %v493_v0 = vld [vmem:[#allocation3 + $0xcc] sm:$0x8] }
 0x29e   : > { %v13552_v50 = vrot.slane %v5663_v6, 11  ;;  %v13554_v45 = vrot.slane %v5045_v3, 11  ;;  %v13556_v14 = vrot.slane %v5368_v58, 5  ;;  %v13562_v37 = vld [vmem:[%s16005_s3] ss:$0 sm:$0xff]  ;;  %v494_v6 = vsel %vm11545_vm3, 0, %v493_v0 }
 0x29f   : > { %16532 = vst [vmem:[#allocation27_spill] sm:$0xff] %v13545_v30  ;;  %16533 = vst [vmem:[#allocation31_spill] sm:$0xff] %v13550_v49  ;;  %v5292_v27 = vld [vmem:[#allocation3 + $0x88] sm:$0x1] }
 0x2a0   : > { %16534 = vst [vmem:[#allocation33_spill] sm:$0xff] %v13552_v50  ;;  %16535 = vst [vmem:[#allocation34_spill] sm:$0xff] %v13554_v45  ;;  %v544_v45 = vld [vmem:[#allocation3 + $0xc4] sm:$0x1] }
 0x2a1   : > { %v10070_v15 = vpop.f32.mrb[124].mxu0  ;;  %16536 = vst [vmem:[#allocation32_spill] sm:$0xff] %v13556_v14  ;;  %495 = vst [vmem:[#allocation3 + $0xcc] sm:$0x8] %v494_v6  ;;  %v5547_v14 = vld [vmem:[#allocation3 + $0xa4] sm:$0x8] }
 0x2a2   : > { %v10071_v18 = vpop.f32.mrb[125].mxu0 }
 0x2a3   : > { %v10072_v19 = vadd.f32 %v10071_v18, %v10070_v15  ;;  %v10073_v33 = vpop.f32.mrb[126].mxu0  ;;  %v5067_v15 = vshrl.u32 %v4904_v31, 16  ;;  %v11017_v31 = vld [vmem:[#allocation9 + $0x120] sm:$0xff]  }
 0x2a4   : > { %v10074_v8 = vpop.f32.mrb[127].mxu0  ;;  %10445 = vmatpush3.bf16.msra.mxu1 %v11017_v31  ;;  %v5729_v31 = vshrl.u32 %v5547_v14, 16  ;;  %v5293_v14 = vld [vmem:[#allocation3 + $0x9c] sm:$0x1] }
 0x2a5   : > { %v4287_v11 = vadd.f32 %v10072_v19, %v13368_v40  ;;  %v10075_v9 = vadd.f32 %v10074_v8, %v10073_v33  ;;  %v13564_v40 = vrot.slane %v5685_v61, 11  ;;  %v5382_v8 = vshll.u32 %v5291_v25, 16  ;;  %v5544_v19 = vld [vmem:[#allocation3 + $0x90] sm:$0x8] }
 0x2a6   : > { %v4907_v33 = vld [vmem:[#allocation3 + $0x90] sm:$0x8]  ;;  %v5396_v25 = vshll.u32 %v5292_v27, 16  ;;  %v5707_v6 = vshrl.u32 %v5544_v19, 16  ;;  %v4910_v19 = vld [vmem:[#allocation3 + $0xa4] sm:$0x8] }
 0x2a7   : > { %v10182_v39 = vpop.f32.mrb[124].mxu1  ;;  %v4290_v51 = vadd.f32 %v10075_v9, %v13370_v62  ;;  %16537 = vst [vmem:[#allocation35_spill] sm:$0xff] %v13564_v40  ;;  %v5089_v30 = vshrl.u32 %v4907_v33, 16  ;;  %v496_v33 = vld [vmem:[#allocation3 + $0xe0] sm:$0x8] }
 0x2a8   : > { %v10183_v18 = vpop.f32.mrb[125].mxu1 }
 0x2a9   : > { %v10184_v3 = vadd.f32 %v10183_v18, %v10182_v39  ;;  %v10185_v58 = vpop.f32.mrb[126].mxu1  ;;  %v10702_v9 = vpop.f32.mrb[128].mxu0  ;;  %v13574_v39 = vld [vmem:[%s16006_s4] ss:$0 sm:$0xff] }
 0x2aa   : > { %v10186_v62 = vpop.f32.mrb[127].mxu1  ;;  %v4497_v49 = vadd.f32 %v10702_v9, %v13379_v43  ;;  %v4488_v61 = vpop.f32.mrb[129].mxu0 }
 0x2ab   : > { %v10187_v50 = vadd.f32 %v10186_v62, %v10185_v58  ;;  %v13569_v40 = vadd.f32 %v10184_v3, %v4287_v11  ;;  %v4489_v0 = vadd.f32 %v4488_v61, %v13374_v2  ;;  %v10703_v18 = vpop.f32.mrb[130].mxu0  ;;  %v545_v58 = vsel %vm11551_vm8, 0, %v544_v45  ;;  %v547_v62 = vld [vmem:[#allocation3 + $0xd8] sm:$0x1] }
 0x2ac   : > { %v4624_v43 = vmul.f32 %v13562_v37, %v4497_v49  ;;  %v4500_v11 = vadd.f32 %v10703_v18, %v13382_v36  ;;  %v4491_v3 = vpop.f32.mrb[131].mxu0  ;;  %546 = vst [vmem:[#allocation3 + $0xc4] sm:$0x1] %v545_v58  ;;  %v13585_v61 = vrot.slane %v5067_v15, 11  ;;  %v548_v45 = vsel %vm11551_vm8, 0, %v547_v62 }
 0x2ad   : > { %v13581_v27 = vadd.f32 %v10187_v50, %v4290_v51  ;;  %v4622_v9 = vmul.f32 %v13562_v37, %v4489_v0  ;;  %v4492_v2 = vadd.f32 %v4491_v3, %v13376_v21  ;;  %v13591_v50 = vrot.slane %v5382_v8, 5  ;;  %v5550_v51 = vld [vmem:[#allocation3 + $0xb8] sm:$0x8]  ;;  %549 = vst [vmem:[#allocation3 + $0xd8] sm:$0x1] %v548_v45 }
 0x2ae   : > { %16539 = vst [vmem:[#allocation38_spill] sm:$0xff] %v13585_v61  ;;  %v4663_v49 = vadd.f32 %v13574_v39, %v4624_v43  ;;  %v4625_v36 = vmul.f32 %v13562_v37, %v4500_v11  ;;  %v497_v0 = vsel %vm11545_vm3, 0, %v496_v33  ;;  %v13597_v18 = vrot.slane %v5707_v6, 11  ;;  %v4913_v3 = vld [vmem:[#allocation3 + $0xb8] sm:$0x8] }
 0x2af   : > { %16538 = vst [vmem:[#allocation37_spill] sm:$0xff] %v13581_v27  ;;  %16540 = vst [vmem:[#allocation36_spill] sm:$0xff] %v13591_v50  ;;  %v4661_v21 = vadd.f32 %v13574_v39, %v4622_v9  ;;  %v4623_v15 = vmul.f32 %v13562_v37, %v4492_v2  ;;  %v13599_v58 = vrot.slane %v5396_v25, 5  ;;  %v13602_v8 = vrot.slane %v5089_v30, 11  ;;  %v5553_v6 = vld [vmem:[#allocation3 + $0xcc] sm:$0x8] }
 0x2b0   : > { %16541 = vst [vmem:[#allocation41_spill] sm:$0xff] %v13597_v18  ;;  %498 = vst [vmem:[#allocation3 + $0xe0] sm:$0x8] %v497_v0  ;;  %v4664_v43 = vadd.f32 %v13574_v39, %v4625_v36  ;;  %v13604_v11 = vrot.slane %v5729_v31, 11  ;;  %v5111_v62 = vshrl.u32 %v4910_v19, 16  ;;  %v5410_v50 = vshll.u32 %v5293_v14, 16 }
 0x2b1   : > { %16542 = vst [vmem:[#allocation42_spill] sm:$0xff] %v13599_v58  ;;  %16543 = vst [vmem:[#allocation40_spill] sm:$0xff] %v13602_v8  ;;  %v4693_v33 = vmax.f32 %v4661_v21, 0.0  ;;  %v4662_v45 = vadd.f32 %v13574_v39, %v4623_v15  ;;  %v10706_v9 = vpop.f32.mrb[132].mxu0  ;;  %v5751_v2 = vshrl.u32 %v5550_v51, 16  ;;  %v4695_v18 = vmax.f32 %v4663_v49, 0.0 }
 0x2b2   : > { %16544 = vst [vmem:[#allocation39_spill] sm:$0xff] %v13604_v11  ;;  %v4696_v25 = vmax.f32 %v4664_v43, 0.0  ;;  %v4513_v58 = vadd.f32 %v10706_v9, %v13391_v23  ;;  %v4504_v0 = vpop.f32.mrb[133].mxu0  ;;  %v5133_v61 = vshrl.u32 %v4913_v3, 16  ;;  %v5424_v19 = vshll.u32 %v5294_v42, 16  ;;  %v11021_v8 = vld [vmem:[#allocation9 + $0x168] sm:$0xff]  }
 0x2b3   : > { %v9659_v36 = vpack.c.bf16 %v4693_v33, %v4693_v33  ;;  %v4694_v30 = vmax.f32 %v4662_v45, 0.0  ;;  %v4505_v31 = vadd.f32 %v4504_v0, %v13385_v32  ;;  %v10707_v11 = vpop.f32.mrb[134].mxu0  ;;  %v5773_v27 = vshrl.u32 %v5553_v6, 16  ;;  %v4916_v49 = vld [vmem:[#allocation3 + $0xcc] sm:$0x8]  ;;  %10446 = vmatprep.subr.bf16.mxu1 %v11021_v8 }
 0x2b4   : > { %v9695_v21 = vpack.c.bf16 %v4696_v25, %v4695_v18  ;;  %v4628_v15 = vmul.f32 %v13562_v37, %v4513_v58  ;;  %v4516_v14 = vadd.f32 %v10707_v11, %v13394_v13  ;;  %v4507_v51 = vpop.f32.mrb[135].mxu0  ;;  %v13613_v33 = vrot.slane %v5111_v62, 11  ;;  %v5295_v32 = vld [vmem:[#allocation3 + $0xc4] sm:$0x1] }
 0x2b5   : > { %4854 = vst [vmem:[#allocation3 + $0x1c] sm:$0xf] %v9659_v36  ;;  %v9660_v43 = vpack.c.bf16 %v4694_v30, %v4694_v30  ;;  %v4626_v23 = vmul.f32 %v13562_v37, %v4505_v31  ;;  %v4508_v3 = vadd.f32 %v4507_v51, %v13388_v41  ;;  %v13617_v58 = vrot.slane %v5410_v50, 5  ;;  %v499_v36 = vld [vmem:[#allocation3 + $0xf4] sm:$0x8] }
 0x2b6   : > { %9732 = vst [vmem:[#allocation3 + $0x30] sm:$0xff] %v9695_v21   ;;  %v4667_v42 = vadd.f32 %v13574_v39, %v4628_v15  ;;  %v4629_v18 = vmul.f32 %v13562_v37, %v4516_v14  ;;  %v13619_v13 = vrot.slane %v5751_v2, 11  ;;  %v13623_v62 = vrot.slane %v5133_v61, 11 }
 0x2b7   : > { %v5556_v11 = vld [vmem:[#allocation3 + $0xe0] sm:$0x8]  ;;  %4855 = vst [vmem:[#allocation3 + $0x20] sm:$0xf] %v9660_v43  ;;  %v4665_v9 = vadd.f32 %v13574_v39, %v4626_v23  ;;  %v4627_v41 = vmul.f32 %v13562_v37, %v4508_v3  ;;  %v5155_v8 = vshrl.u32 %v4916_v49, 16  ;;  %v13626_v25 = vrot.slane %v5424_v19, 5 }
 0x2b8   : > { %v4919_v45 = vld [vmem:[#allocation3 + $0xe0] sm:$0x8]  ;;  %v4668_v6 = vadd.f32 %v13574_v39, %v4629_v18  ;;  %v13628_v0 = vrot.slane %v5773_v27, 11  ;;  %v5438_v50 = vshll.u32 %v5295_v32, 16  ;;  %v5795_v21 = vshrl.u32 %v5556_v11, 16  ;;  %v11023_v49 = vld [vmem:[#allocation9 + $0x128] sm:$0xff]  }
 0x2b9   : > { %v4697_v2 = vmax.f32 %v4665_v9, 0.0  ;;  %v4666_v30 = vadd.f32 %v13574_v39, %v4627_v41  ;;  %v10710_v31 = vpop.f32.mrb[136].mxu0  ;;  %v5177_v15 = vshrl.u32 %v4919_v45, 16  ;;  %v4699_v14 = vmax.f32 %v4667_v42, 0.0  ;;  %10447 = vmatpush3.bf16.msra.mxu1 %v11023_v49 }
 0x2ba   : > { %v4700_v51 = vmax.f32 %v4668_v6, 0.0  ;;  %v4529_v61 = vadd.f32 %v10710_v31, %v13428_v28  ;;  %v4520_v43 = vpop.f32.mrb[137].mxu0  ;;  %v500_v19 = vsel %vm11545_vm3, 0, %v499_v36  ;;  %v13635_v18 = vrot.slane %v5155_v8, 11  ;;  %v13643_v6 = vld [vmem:[#allocation3 + $0xd8] sm:$0x1] }
 0x2bb   : > { %v9663_v23 = vpack.c.bf16 %v4697_v2, %v4697_v2  ;;  %v4698_v27 = vmax.f32 %v4666_v30, 0.0  ;;  %v4521_v3 = vadd.f32 %v4520_v43, %v13407_v59  ;;  %v10711_v32 = vpop.f32.mrb[138].mxu0  ;;  %501 = vst [vmem:[#allocation3 + $0xf4] sm:$0x8] %v500_v19  ;;  %v13641_v41 = vrot.slane %v5438_v50, 5 }
 0x2bc   : > { %v9700_v9 = vpack.c.bf16 %v4700_v51, %v4699_v14  ;;  %v4632_v11 = vmul.f32 %v13562_v37, %v4529_v61  ;;  %v4532_v42 = vadd.f32 %v10711_v32, %v13433_v4  ;;  %v4523_v45 = vpop.f32.mrb[139].mxu0  ;;  %v13639_v28 = vld [vmem:[#allocation3 + $0x1c] sm:$0xf]  ;;  %v13654_v14 = vrot.slane %v5795_v21, 11 }
 0x2bd   : > { %4858 = vst [vmem:[#allocation3 + $0x44] sm:$0xf] %v9663_v23  ;;  %v9664_v36 = vpack.c.bf16 %v4698_v27, %v4698_v27  ;;  %v4630_v59 = vmul.f32 %v13562_v37, %v4521_v3  ;;  %v4524_v8 = vadd.f32 %v4523_v45, %v13412_v47  ;;  %v4962_v2 = vshrl.u32 %v13639_v28, 16  ;;  %v13648_v30 = vld [vmem:[#allocation3 + $0x1c] sm:$0xf] }
 0x2be   : > { %9733 = vst [vmem:[#allocation3 + $0x58] sm:$0xff] %v9700_v9   ;;  %v4671_v4 = vadd.f32 %v13574_v39, %v4632_v11  ;;  %v4633_v31 = vmul.f32 %v13562_v37, %v4532_v42  ;;  %v13652_v50 = vld [vmem:[#allocation3 + $0x20] sm:$0xf]  ;;  %v13656_v51 = vrot.slane %v5177_v15, 11  ;;  %v4965_v27 = vshll.u32 %v13639_v28, 16 }
 0x2bf   : > { %4859 = vst [vmem:[#allocation3 + $0x48] sm:$0xf] %v9664_v36  ;;  %v4669_v61 = vadd.f32 %v13574_v39, %v4630_v59  ;;  %v4631_v47 = vmul.f32 %v13562_v37, %v4524_v8  ;;  %v16109_v43 = vshrl.u32 %v13652_v50, 16  ;;  %v4964_v23 = vrot.slane %v4962_v2, 7 }
 0x2c0   : > { %v4672_v19 = vadd.f32 %v13574_v39, %v4633_v31  ;;  %v4703_v21 = vmax.f32 %v4671_v4, 0.0  ;;  %v9452_v59 = vcombine.low %v13639_v28, %v13652_v50  ;;  %v13672_v3 = vrot.slane %v4962_v2, 4 }
 0x2c1   : > { %v4701_v32 = vmax.f32 %v4669_v61, 0.0  ;;  %v4670_v15 = vadd.f32 %v13574_v39, %v4631_v47  ;;  %v10714_v9 = vpop.f32.mrb[140].mxu0  ;;  %v4973_v36 = vrot.slane %v16109_v43, 7  ;;  %v13677_v43 = vld [vmem:[#allocation3 + $0x20] sm:$0xf] }
 0x2c2   : > { %v4704_v42 = vmax.f32 %v4672_v19, 0.0  ;;  %v4545_v45 = vadd.f32 %v10714_v9, %v13456_v1  ;;  %v4536_v8 = vpop.f32.mrb[141].mxu0  ;;  %8095 = vmatprep.mubr.bf16.mxu1 %v9452_v59  ;;  %v4967_v9 = vor.u32 %v4965_v27, %v4964_v23  ;;  %16545 = vst [vmem:[#allocation43_spill] sm:$0xff] %v13677_v43 }
 0x2c3   : > { %v9667_v31 = vpack.c.bf16 %v4701_v32, %v4701_v32  ;;  %v4702_v49 = vmax.f32 %v4670_v15, 0.0  ;;  %v4537_v4 = vadd.f32 %v4536_v8, %v13440_v10  ;;  %v10715_v61 = vpop.f32.mrb[142].mxu0  ;;  %v4969_v15 = vrot.slane %v4964_v23, 4  ;;  %v11027_v23 = vld [vmem:[#allocation9 + $0x170] sm:$0xff]  }
 0x2c4   : > { %v9705_v47 = vpack.c.bf16 %v4704_v42, %v4703_v21  ;;  %v4636_v11 = vmul.f32 %v13562_v37, %v4545_v45  ;;  %v4548_v1 = vadd.f32 %v10715_v61, %v13459_v12  ;;  %v4539_v19 = vpop.f32.mrb[143].mxu0  ;;  %v16546_v42 = vshll.u32 %v13652_v50, 16  ;;  %10448 = vmatprep.subr.bf16.mxu1 %v11027_v23 }
 0x2c5   : > { %4862 = vst [vmem:[#allocation3 + $0x6c] sm:$0xf] %v9667_v31  ;;  %v9668_v28 = vpack.c.bf16 %v4702_v49, %v4702_v49  ;;  %v4634_v32 = vmul.f32 %v13562_v37, %v4537_v4  ;;  %v4540_v2 = vadd.f32 %v4539_v19, %v13447_v22  ;;  %v16547_v12 = vshrl.u32 %v13648_v30, 16 }
 0x2c6   : > { %9734 = vst [vmem:[#allocation3 + $0x80] sm:$0xff] %v9705_v47   ;;  %v4675_v10 = vadd.f32 %v13574_v39, %v4636_v11  ;;  %v4637_v21 = vmul.f32 %v13562_v37, %v4548_v1  ;;  %v4976_v45 = vor.u32 %v16546_v42, %v4973_v36  ;;  %v16111_v31 = vshll.u32 %v13648_v30, 16  ;;  %v13697_v47 = vld [vmem:[#allocation3 + $0x30] sm:$0xf] }
 0x2c7   : > { %v5582_v59 = vrot.slane %v16547_v12, 7  ;;  %4863 = vst [vmem:[#allocation3 + $0x70] sm:$0xf] %v9668_v28  ;;  %v4673_v8 = vadd.f32 %v13574_v39, %v4634_v32  ;;  %v4635_v49 = vmul.f32 %v13562_v37, %v4540_v2  ;;  %v16110_v22 = vshrl.u32 %v13677_v43, 16 }
 0x2c8   : > { %v4707_v4 = vmax.f32 %v4675_v10, 0.0  ;;  %v4676_v11 = vadd.f32 %v13574_v39, %v4637_v21  ;;  %v4968_v36 = vsel %vm11561_vm9, %v13521_v63, %v4967_v9  ;;  %v4977_v61 = vsel %vm11561_vm9, %v4969_v15, %v4976_v45  ;;  %v13706_v15 = vld [vmem:[#allocation3 + $0x34] sm:$0xf] }
 0x2c9   : > { %v4705_v1 = vmax.f32 %v4673_v8, 0.0  ;;  %v4674_v19 = vadd.f32 %v13574_v39, %v4635_v49  ;;  %v9436_v28 = vcombine.low %v4968_v36, %v4977_v61  ;;  %v5585_v32 = vor.u32 %v16111_v31, %v5582_v59  ;;  %v10718_v2 = vpop.f32.mrb[144].mxu0 }
 0x2ca   : > { %v4708_v10 = vmax.f32 %v4676_v11, 0.0  ;;  %v5591_v21 = vrot.slane %v16110_v22, 7  ;;  %v16112_v63 = vshll.u32 %v13677_v43, 16  ;;  %v4561_v9 = vadd.f32 %v10718_v2, %v13472_v53  ;;  %v4552_v42 = vpop.f32.mrb[145].mxu0  ;;  %v11029_v43 = vld [vmem:[#allocation9 + $0x130] sm:$0xff]  }
 0x2cb   : > { %v13708_v45 = vrot.slane %v4965_v27, 5  ;;  %v9671_v12 = vpack.c.bf16 %v4705_v1, %v4705_v1  ;;  %v4706_v8 = vmax.f32 %v4674_v19, 0.0  ;;  %8096 = vmatmul.mubr.bf16.gmra.mrb[132].mxu1 %v9436_v28  ;;  %v16114_v49 = vshrl.u32 %v13697_v47, 16  ;;  %v10719_v36 = vpop.f32.mrb[146].mxu0 }
 0x2cc   : > { %v9710_v23 = vpack.c.bf16 %v4708_v10, %v4707_v4  ;;  %v5587_v11 = vrot.slane %v5582_v59, 4  ;;  %v5594_v61 = vor.u32 %v16112_v63, %v5591_v21  ;;  %v4640_v22 = vmul.f32 %v13562_v37, %v4561_v9  ;;  %v4555_v31 = vpop.f32.mrb[147].mxu0  ;;  %v13722_v4 = vld [vmem:[#allocation3 + $0x30] sm:$0xf]  ;;  %v13732_v9 = vld [vmem:[#allocation3 + $0x34] sm:$0xf]  ;;  %10449 = vmatpush3.bf16.msra.mxu1 %v11029_v43 }
 0x2cd   : > { %v16548_v53 = vshrl.u32 %v13652_v50, 16  ;;  %4866 = vst [vmem:[#allocation3 + $0x94] sm:$0xf] %v9671_v12  ;;  %v9672_v27 = vpack.c.bf16 %v4706_v8, %v4706_v8  ;;  %v5586_v1 = vsel %vm11561_vm9, %v13531_v26, %v5585_v32  ;;  %v16113_v19 = vshrl.u32 %v13706_v15, 16  ;;  %16549 = vst [vmem:[#allocation45_spill] sm:$0xff] %v13722_v4  ;;  %v11019_v63 = vld [vmem:[#allocation9 + $0x1c8] sm:$0xff]  }
 0x2ce   : > { %9735 = vst [vmem:[#allocation3 + $0xa8] sm:$0xff] %v9710_v23   ;;  %v5595_v59 = vsel %vm11561_vm9, %v5587_v11, %v5594_v61  ;;  %v13727_v28 = vadd.f32 %v13574_v39, %v4640_v22  ;;  %v4986_v10 = vrot.slane %v16114_v49, 7  ;;  %v16118_v21 = vshll.u32 %v13697_v47, 16  ;;  %16550 = vst [vmem:[#allocation46_spill] sm:$0xff] %v13732_v9  ;;  %v11014_v23 = vld [vmem:[#allocation9 + $0x180] sm:$0xff]  }
 0x2cf   : > { %v13716_v2 = vrot.slane %v16548_v53, 4  ;;  %4867 = vst [vmem:[#allocation3 + $0x98] sm:$0xf] %v9672_v27  ;;  %v9483_v26 = vcombine.low %v5586_v1, %v5595_v59  ;;  %v4995_v32 = vrot.slane %v16113_v19, 7  ;;  %v16117_v12 = vshll.u32 %v13706_v15, 16 }
 0x2d0   : > { %v9453_v8 = vcombine.low %v13697_v47, %v13706_v15  ;;  %v4711_v22 = vmax.f32 %v13727_v28, 0.0  ;;  %v4553_v11 = vadd.f32 %v4552_v42, %v13464_v44  ;;  %v16115_v61 = vshrl.u32 %v13722_v4, 16 }
 0x2d1   : > { %v16119_v53 = vshll.u32 %v13722_v4, 16  ;;  %8248 = vmatprep.mubr.bf16.mxu0 %v9483_v26  ;;  %v16116_v27 = vshrl.u32 %v13732_v9, 16  ;;  %v4564_v59 = vadd.f32 %v10719_v36, %v13475_v60  ;;  %v4556_v19 = vadd.f32 %v4555_v31, %v13467_v20  ;;  %v10722_v49 = vpop.f32.mrb[148].mxu0  ;;  %v11020_v36 = vld [vmem:[#allocation9 + $0x188] sm:$0xff]  }
 0x2d2   : > { %8103 = vmatprep.mubr.bf16.mxu1 %v9453_v8  ;;  %8249 = vmatmul.mubr.bf16.vlgmr.msra.gmra.mrb[160].mxu0 %v13453_v57  ;;  %v4638_v44 = vmul.f32 %v13562_v37, %v4553_v11  ;;  %v5604_v42 = vrot.slane %v16115_v61, 7  ;;  %v4989_v28 = vor.u32 %v16118_v21, %v4986_v10  ;;  %v4991_v26 = vrot.slane %v4986_v10, 4  ;;  %v13753_v8 = vpop.f32.mrb[149].mxu0 }
 0x2d3   : > { %v5613_v1 = vrot.slane %v16116_v27, 7  ;;  %v4641_v60 = vmul.f32 %v13562_v37, %v4564_v59  ;;  %v4639_v20 = vmul.f32 %v13562_v37, %v4556_v19  ;;  %v4998_v57 = vor.u32 %v16117_v12, %v4995_v32  ;;  %v13761_v31 = vpop.f32.mrb[150].mxu0  ;;  %10549 = vmatpush3.bf16.msra.mxu0 %v11014_v23  ;;  %v13769_v59 = vld [vmem:[#allocation3 + $0x44] sm:$0xf]  ;;  %v11025_v32 = vld [vmem:[#allocation9 + $0x1d0] sm:$0xff]  }
 0x2d4   : > { %v4677_v11 = vadd.f32 %v13574_v39, %v4638_v44  ;;  %v5607_v10 = vor.u32 %v16119_v53, %v5604_v42  ;;  %v5609_v61 = vrot.slane %v5604_v42, 4  ;;  %v4990_v27 = vsel %vm11561_vm9, %v13535_v17, %v4989_v28  ;;  %v13771_v19 = vpop.f32.mrb[151].mxu0  ;;  %10550 = vmatprep.subr.bf16.mxu0 %v11019_v63  ;;  %v13783_v63 = vld [vmem:[#allocation3 + $0x48] sm:$0xf] }
 0x2d5   : > { %v16551_v12 = vshll.u32 %v13732_v9, 16  ;;  %v4680_v21 = vadd.f32 %v13574_v39, %v4641_v60  ;;  %v4678_v44 = vadd.f32 %v13574_v39, %v4639_v20  ;;  %v4999_v42 = vsel %vm11561_vm9, %v4991_v26, %v4998_v57  ;;  %v11026_v26 = vld [vmem:[#allocation9 + $0x190] sm:$0xff]  }
 0x2d6   : > { %v4709_v53 = vmax.f32 %v4677_v11, 0.0  ;;  %v5608_v17 = vsel %vm11561_vm9, %v13533_v5, %v5607_v10  ;;  %v9437_v28 = vcombine.low %v4990_v27, %v4999_v42  ;;  %v4577_v4 = vadd.f32 %v10722_v49, %v13487_v38 }
 0x2d7   : > { %v5616_v23 = vor.u32 %v16551_v12, %v5613_v1  ;;  %v4712_v1 = vmax.f32 %v4680_v21, 0.0  ;;  %v4710_v60 = vmax.f32 %v4678_v44, 0.0  ;;  %v5006_v20 = vshrl.u32 %v13769_v59, 16  ;;  %10551 = vmatpush3.bf16.msra.mxu0 %v11020_v36 }
 0x2d8   : > { %v9675_v57 = vpack.c.bf16 %v4709_v53, %v4709_v53  ;;  %8104 = vmatmul.mubr.bf16.gmra.mrb[136].mxu1 %v9437_v28  ;;  %v4644_v5 = vmul.f32 %v13562_v37, %v4577_v4  ;;  %v5009_v27 = vshll.u32 %v13769_v59, 16  ;;  %10552 = vmatprep.subr.bf16.mxu0 %v11025_v32  ;;  %v16552_v38 = vshrl.u32 %v13697_v47, 16 }
 0x2d9   : > { %v5617_v12 = vsel %vm11561_vm9, %v5609_v61, %v5616_v23  ;;  %v9715_v10 = vpack.c.bf16 %v4712_v1, %v4711_v22  ;;  %v9676_v61 = vpack.c.bf16 %v4710_v60, %v4710_v60  ;;  %v16124_v21 = vshrl.u32 %v13783_v63, 16  ;;  %v13795_v23 = vld [vmem:[#allocation3 + $0x44] sm:$0xf]  ;;  %v13797_v36 = vpop.f32.mrb[152].mxu0 }
 0x2da   : > { %v9484_v11 = vcombine.low %v5608_v17, %v5617_v12  ;;  %v13792_v49 = vrot.slane %v16552_v38, 4  ;;  %v16553_v53 = vshll.u32 %v13697_v47, 16  ;;  %v16554_v4 = vshrl.u32 %v13706_v15, 16  ;;  %4870 = vst [vmem:[#allocation3 + $0xbc] sm:$0xf] %v9675_v57  ;;  %v13814_v28 = vpop.f32.mrb[153].mxu0 }
 0x2db   : > { %v13808_v22 = vadd.f32 %v13574_v39, %v4644_v5  ;;  %v13810_v42 = vrot.slane %v5006_v20, 7  ;;  %v13812_v17 = vld [vmem:[#allocation3 + $0x48] sm:$0xf]  ;;  %9736 = vst [vmem:[#allocation3 + $0xd0] sm:$0xff] %v9715_v10   ;;  %4871 = vst [vmem:[#allocation3 + $0xc0] sm:$0xf] %v9676_v61  ;;  %v9454_v12 = vcombine.low %v13769_v59, %v13783_v63  ;;  %v5318_v1 = vor.u32 %v13708_v45, %v13672_v3 }
 0x2dc   : > { %v13801_v44 = vrot.slane %v16553_v53, 5  ;;  %v13805_v32 = vrot.slane %v16554_v4, 4  ;;  %8256 = vmatprep.mubr.bf16.mxu0 %v9484_v11  ;;  %v13817_v47 = vrot.slane %v5006_v20, 4  ;;  %v13823_v60 = vpop.f32.mrb[154].mxu0  ;;  %10553 = vmatpush3.bf16.msra.mxu0 %v11026_v26  ;;  %v13825_v57 = vrot.slane %v5009_v27, 5  ;;  %v11031_v53 = vld [vmem:[#allocation9 + $0x1d8] sm:$0xff]  }
 0x2dd   : > { %v16555_v11 = vshll.u32 %v13652_v50, 16  ;;  %v4569_v38 = vadd.f32 %v13753_v8, %v13479_v35  ;;  %v16125_v20 = vshrl.u32 %v13795_v23, 16  ;;  %v13832_v10 = vpop.f32.mrb[155].mxu0  ;;  %v5017_v59 = vrot.slane %v16124_v21, 7  ;;  %8111 = vmatprep.mubr.bf16.mxu1 %v9454_v12  ;;  %v11032_v4 = vld [vmem:[#allocation9 + $0x198] sm:$0xff]   ;;  %10554 = vmatprep.subr.bf16.mxu0 %v11031_v53 }
 0x2de   : > { %v5319_v3 = vrot.slane %v5318_v1, 4  ;;  %v16168_v45 = vshll.u32 %v13795_v23, 16  ;;  %v16126_v26 = vshrl.u32 %v13812_v17, 16  ;;  %v4580_v8 = vadd.f32 %v13761_v31, %v13492_v52 }
 0x2df   : > { %v5320_v5 = vrot.slane %v16555_v11, 5  ;;  %v4642_v50 = vmul.f32 %v13562_v37, %v4569_v38  ;;  %v5626_v35 = vrot.slane %v16125_v20, 7  ;;  %v11033_v11 = vld [vmem:[#allocation9 + $0x178] sm:$0xff]   ;;  %v16167_v21 = vshll.u32 %v13812_v17, 16 }
 0x2e0   : > { %v5635_v1 = vrot.slane %v16126_v26, 7  ;;  %v5011_v31 = vor.u32 %v5009_v27, %v13810_v42  ;;  %10450 = vmatprep.subr.bf16.mxu1 %v11033_v11  ;;  %10555 = vmatpush3.bf16.msra.mxu0 %v11032_v4 }
 0x2e1   : > { %v5323_v61 = vor.u32 %v13716_v2, %v5320_v5  ;;  %v5321_v12 = vsel %vm11582_vm10, %v5319_v3, %v5320_v5  ;;  %v4572_v2 = vadd.f32 %v13771_v19, %v13484_v24  ;;  %v4681_v20 = vadd.f32 %v13574_v39, %v4642_v50  ;;  %v13859_v9 = vpop.f32.mrb[156].mxu0  ;;  %v13868_v50 = vld [vmem:[#allocation3 + $0x58] sm:$0xf] }
 0x2e2   : > { %v5629_v52 = vor.u32 %v16168_v45, %v5626_v35  ;;  %v5631_v43 = vrot.slane %v5626_v35, 4  ;;  %v5638_v5 = vor.u32 %v16167_v21, %v5635_v1  ;;  %v4645_v3 = vmul.f32 %v13562_v37, %v4580_v8  ;;  %v13870_v35 = vpop.f32.mrb[157].mxu0 }
 0x2e3   : > { %v5324_v38 = vrot.slane %v5323_v61, 4  ;;  %v4643_v26 = vmul.f32 %v13562_v37, %v4572_v2  ;;  %v4713_v19 = vmax.f32 %v4681_v20, 0.0  ;;  %v5013_v61 = vrot.slane %v13810_v42, 4  ;;  %v13878_v20 = vpop.f32.mrb[158].mxu0 }
 0x2e4   : > { %v5630_v27 = vsel %vm11561_vm9, %v13539_v29, %v5629_v52  ;;  %v5639_v53 = vsel %vm11561_vm9, %v5631_v43, %v5638_v5  ;;  %v4684_v4 = vadd.f32 %v13574_v39, %v4645_v3  ;;  %v16556_v42 = vshll.u32 %v13783_v63, 16 }
 0x2e5   : > { %v5329_v24 = vsel %vm11582_vm10, %v5324_v38, %v13537_v55  ;;  %v4682_v11 = vadd.f32 %v13574_v39, %v4643_v26  ;;  %v13876_v55 = vld [vmem:[#allocation3 + $0x5c] sm:$0xf]  ;;  %v9679_v1 = vpack.c.bf16 %v4713_v19, %v4713_v19  ;;  %v9485_v29 = vcombine.low %v5630_v27, %v5639_v53 }
 0x2e6   : > { %v9468_v8 = vcombine.low %v5321_v12, %v5329_v24  ;;  %v5020_v2 = vor.u32 %v16556_v42, %v5017_v59  ;;  %v4593_v38 = vadd.f32 %v13797_v36, %v13509_v46  ;;  %v13884_v12 = vpop.f32.mrb[159].mxu0  ;;  %v4715_v43 = vmax.f32 %v13808_v22, 0.0  ;;  %v11035_v24 = vld [vmem:[#allocation9 + $0x138] sm:$0xff]  }
 0x2e7   : > { %v4716_v52 = vmax.f32 %v4684_v4, 0.0  ;;  %v4714_v5 = vmax.f32 %v4682_v11, 0.0  ;;  %v5028_v26 = vshrl.u32 %v13868_v50, 16  ;;  %4874 = vst [vmem:[#allocation3 + $0xe4] sm:$0xf] %v9679_v1  ;;  %v5012_v3 = vsel %vm11561_vm9, %v13541_v56, %v5011_v31  ;;  %10451 = vmatpush3.bf16.msra.mxu1 %v11035_v24 }
 0x2e8   : > { %8257 = vmatmul.mubr.bf16.gmra.mrb[164].mxu0 %v9468_v8  ;;  %v5021_v59 = vsel %vm11561_vm9, %v5013_v61, %v5020_v2  ;;  %v4648_v46 = vmul.f32 %v13562_v37, %v4593_v38  ;;  %v5037_v36 = vshrl.u32 %v13876_v55, 16  ;;  %v16557_v22 = vshrl.u32 %v13783_v63, 16  ;;  %v13899_v4 = vld [vmem:[#allocation3 + $0x58] sm:$0xf]  ;;  %v13906_v1 = vld [vmem:[#allocation3 + $0x5c] sm:$0xf] }
 0x2e9   : > { %8264 = vmatprep.mubr.bf16.mxu0 %v9485_v29  ;;  %v9720_v27 = vpack.c.bf16 %v4716_v52, %v4715_v43  ;;  %v9680_v8 = vpack.c.bf16 %v4714_v5, %v4714_v5  ;;  %v9438_v53 = vcombine.low %v5012_v3, %v5021_v59  ;;  %v5030_v56 = vrot.slane %v5028_v26, 7  ;;  %v16559_v5 = vld [vmem:[#allocation26_spill] sm:$0xff] }
 0x2ea   : > { %v13897_v19 = vrot.slane %v16557_v22, 4  ;;  %v4687_v11 = vadd.f32 %v13574_v39, %v4648_v46  ;;  %v5031_v31 = vshll.u32 %v13868_v50, 16  ;;  %v5040_v61 = vshll.u32 %v13876_v55, 16 }
 0x2eb   : > { %9737 = vst [vmem:[#allocation3 + $0xf8] sm:$0xff] %v9720_v27   ;;  %4875 = vst [vmem:[#allocation3 + $0xe8] sm:$0xf] %v9680_v8  ;;  %8112 = vmatmul.mubr.bf16.gmra.mrb[140].mxu1 %v9438_v53  ;;  %v5039_v29 = vrot.slane %v5037_v36, 7  ;;  %v9455_v42 = vcombine.low %v13868_v50, %v13876_v55  ;;  %v5332_v2 = vor.u32 %v13801_v44, %v13792_v49  ;;  %v16558_v38 = vshll.u32 %v13706_v15, 16  ;;  %v16560_v44 = vld [vmem:[#allocation29_spill] sm:$0xff] }
 0x2ec   : > { %v4719_v52 = vmax.f32 %v4687_v11, 0.0  ;;  %v4585_v3 = vadd.f32 %v13814_v28, %v16559_v5  ;;  %v16129_v59 = vshrl.u32 %v13899_v4, 16  ;;  %v16131_v46 = vshll.u32 %v13899_v4, 16  ;;  %v16561_v53 = vld [vmem:[#allocation24_spill] sm:$0xff] }
 0x2ed   : > { %v5334_v43 = vrot.slane %v16558_v38, 5  ;;  %8119 = vmatprep.mubr.bf16.mxu1 %v9455_v42  ;;  %v5333_v24 = vrot.slane %v5332_v2, 4  ;;  %v16130_v27 = vshrl.u32 %v13906_v1, 16  ;;  %v16166_v8 = vshll.u32 %v13906_v1, 16 }
 0x2ee   : > { %v4646_v49 = vmul.f32 %v13562_v37, %v4585_v3  ;;  %v5648_v15 = vrot.slane %v16129_v59, 7  ;;  %v4596_v28 = vadd.f32 %v13823_v60, %v16560_v44  ;;  %v4588_v11 = vadd.f32 %v13832_v10, %v16561_v53 }
 0x2ef   : > { %v5337_v22 = vor.u32 %v13805_v32, %v5334_v43  ;;  %v5335_v42 = vsel %vm11582_vm10, %v5333_v24, %v5334_v43  ;;  %v5657_v32 = vrot.slane %v16130_v27, 7  ;;  %v5033_v38 = vor.u32 %v5031_v31, %v5030_v56  ;;  %v16562_v27 = vld [vmem:[#allocation27_spill] sm:$0xff] }
 0x2f0   : > { %v4685_v5 = vadd.f32 %v13574_v39, %v4646_v49  ;;  %v5651_v3 = vor.u32 %v16131_v46, %v5648_v15  ;;  %v5653_v59 = vrot.slane %v5648_v15, 4  ;;  %v4649_v60 = vmul.f32 %v13562_v37, %v4596_v28  ;;  %v11036_v49 = vld [vmem:[#allocation9 + $0x1e0] sm:$0xff]  }
 0x2f1   : > { %v5338_v2 = vrot.slane %v5337_v22, 4  ;;  %v5660_v43 = vor.u32 %v16166_v8, %v5657_v32  ;;  %v4647_v24 = vmul.f32 %v13562_v37, %v4588_v11  ;;  %v5034_v22 = vsel %vm11561_vm9, %v13547_v34, %v5033_v38  ;;  %v13953_v46 = vld [vmem:[#allocation3 + $0x6c] sm:$0xf]  ;;  %v13960_v32 = vld [vmem:[#allocation3 + $0x70] sm:$0xf]  ;;  %10556 = vmatprep.subr.bf16.mxu0 %v11036_v49 }
 0x2f2   : > { %v4717_v53 = vmax.f32 %v4685_v5, 0.0  ;;  %v5652_v15 = vsel %vm11561_vm9, %v16562_v27, %v5651_v3  ;;  %v4688_v28 = vadd.f32 %v13574_v39, %v4649_v60  ;;  %v5042_v34 = vor.u32 %v5040_v61, %v5039_v29  ;;  %v13973_v49 = vld [vmem:[#allocation3 + $0x6c] sm:$0xf] }
 0x2f3   : > { %v5343_v10 = vsel %vm11582_vm10, %v5338_v2, %v13543_v48  ;;  %v5661_v48 = vsel %vm11561_vm9, %v5653_v59, %v5660_v43  ;;  %v4686_v11 = vadd.f32 %v13574_v39, %v4647_v24  ;;  %v5035_v2 = vrot.slane %v5030_v56, 4 }
 0x2f4   : > { %v9469_v44 = vcombine.low %v5335_v42, %v5343_v10  ;;  %v9683_v42 = vpack.c.bf16 %v4717_v53, %v4717_v53  ;;  %v9486_v38 = vcombine.low %v5652_v15, %v5661_v48  ;;  %v4720_v27 = vmax.f32 %v4688_v28, 0.0  ;;  %v13984_v53 = vld [vmem:[#allocation3 + $0x70] sm:$0xf]  ;;  %v11037_v15 = vld [vmem:[#allocation9 + $0x1a0] sm:$0xff]  }
 0x2f5   : > { %v4609_v5 = vadd.f32 %v13859_v9, %v13569_v40  ;;  %v13966_v3 = vrot.slane %v5028_v26, 4  ;;  %v4718_v59 = vmax.f32 %v4686_v11, 0.0  ;;  %v5043_v56 = vsel %vm11561_vm9, %v5035_v2, %v5042_v34  ;;  %v11038_v28 = vld [vmem:[#allocation9 + $0x1e8] sm:$0xff]   ;;  %v16564_v34 = vld [vmem:[#allocation30_spill] sm:$0xff]  ;;  %10557 = vmatpush3.bf16.msra.mxu0 %v11037_v15 }
 0x2f6   : > { %8265 = vmatmul.mubr.bf16.gmra.mrb[168].mxu0 %v9469_v44  ;;  %v5050_v29 = vshrl.u32 %v13953_v46, 16  ;;  %4878 = vst [vmem:[#allocation3 + $0x10c] sm:$0xf] %v9683_v42  ;;  %v9725_v60 = vpack.c.bf16 %v4720_v27, %v4719_v52  ;;  %v9439_v10 = vcombine.low %v5034_v22, %v5043_v56  ;;  %v5059_v24 = vshrl.u32 %v13960_v32, 16  ;;  %10558 = vmatprep.subr.bf16.mxu0 %v11038_v28 }
 0x2f7   : > { %8272 = vmatprep.mubr.bf16.mxu0 %v9486_v38  ;;  %v4652_v43 = vmul.f32 %v13562_v37, %v4609_v5  ;;  %v13977_v40 = vrot.slane %v5031_v31, 5  ;;  %v13981_v9 = vrot.slane %v5037_v36, 4  ;;  %v9684_v26 = vpack.c.bf16 %v4718_v59, %v4718_v59  ;;  %v11040_v38 = vld [vmem:[#allocation9 + $0x200] sm:$0xff]  }
 0x2f8   : > { %v5053_v44 = vshll.u32 %v13953_v46, 16  ;;  %9738 = vst [vmem:[#allocation3 + $0x120] sm:$0xff] %v9725_v60   ;;  %8120 = vmatmul.mubr.bf16.gmra.mrb[144].mxu1 %v9439_v10  ;;  %v13989_v22 = vrot.slane %v5050_v29, 7  ;;  %v5062_v50 = vshll.u32 %v13960_v32, 16  ;;  %v13992_v31 = vrot.slane %v5050_v29, 4  ;;  %v16565_v10 = vld [vmem:[#allocation37_spill] sm:$0xff]  ;;  %10732 = vmatprep.subr.bf16.mxu1 %v11040_v38 }
 0x2f9   : > { %v13987_v52 = vadd.f32 %v13574_v39, %v4652_v43  ;;  %4879 = vst [vmem:[#allocation3 + $0x110] sm:$0xf] %v9684_v26  ;;  %v9456_v36 = vcombine.low %v13953_v46, %v13960_v32  ;;  %v5346_v48 = vor.u32 %v13825_v57, %v13817_v47  ;;  %v16563_v11 = vshll.u32 %v13783_v63, 16  ;;  %v11039_v46 = vld [vmem:[#allocation9 + $0x1a8] sm:$0xff]   ;;  %v16566_v26 = vld [vmem:[#allocation28_spill] sm:$0xff] }
 0x2fa   : > { %v4601_v42 = vadd.f32 %v13870_v35, %v16564_v34  ;;  %v5061_v27 = vrot.slane %v5059_v24, 7  ;;  %v16150_v5 = vshrl.u32 %v13973_v49, 16  ;;  %v16141_v59 = vshll.u32 %v13973_v49, 16  ;;  %10559 = vmatpush3.bf16.msra.mxu0 %v11039_v46 }
 0x2fb   : > { %v5348_v2 = vrot.slane %v16563_v11, 5  ;;  %v16132_v56 = vshrl.u32 %v13984_v53, 16  ;;  %8127 = vmatprep.mubr.bf16.mxu1 %v9456_v36  ;;  %v5347_v47 = vrot.slane %v5346_v48, 4  ;;  %v16140_v35 = vshll.u32 %v13984_v53, 16  ;;  %v11041_v11 = vld [vmem:[#allocation9 + $0x1f0] sm:$0xff]  }
 0x2fc   : > { %v4650_v57 = vmul.f32 %v13562_v37, %v4601_v42  ;;  %v5670_v29 = vrot.slane %v16150_v5, 7  ;;  %v4612_v43 = vadd.f32 %v13878_v20, %v16565_v10  ;;  %v4604_v15 = vadd.f32 %v13884_v12, %v16566_v26  ;;  %v16567_v12 = vld [vmem:[#allocation31_spill] sm:$0xff]  ;;  %10560 = vmatprep.subr.bf16.mxu0 %v11041_v11 }
 0x2fd   : > { %v5351_v63 = vor.u32 %v13897_v19, %v5348_v2  ;;  %v5679_v60 = vrot.slane %v16132_v56, 7  ;;  %v14018_v36 = vrot.slane %v5053_v44, 5  ;;  %v5349_v19 = vsel %vm11582_vm10, %v5347_v47, %v5348_v2  ;;  %v16568_v56 = vld [vmem:[#allocation33_spill] sm:$0xff]  ;;  %v14258_v5 = vld [vmem:[#allocation3 + $0xd0] sm:$0xf] }
 0x2fe   : > { %v4689_v28 = vadd.f32 %v13574_v39, %v4650_v57  ;;  %v5673_v34 = vor.u32 %v16141_v59, %v5670_v29  ;;  %v5675_v42 = vrot.slane %v5670_v29, 4  ;;  %v4653_v10 = vmul.f32 %v13562_v37, %v4612_v43  ;;  %v11042_v57 = vld [vmem:[#allocation9 + $0x1b0] sm:$0xff]   ;;  %v14155_v59 = vld [vmem:[#allocation3 + $0xa8] sm:$0xf] }
 0x2ff   : > { %v5352_v48 = vrot.slane %v5351_v63, 4  ;;  %v5682_v20 = vor.u32 %v16140_v35, %v5679_v60  ;;  %v4651_v2 = vmul.f32 %v13562_v37, %v4604_v15  ;;  %v5055_v47 = vor.u32 %v5053_v44, %v13989_v22  ;;  %v14033_v63 = vld [vmem:[#allocation3 + $0x80] sm:$0xf]  ;;  %10561 = vmatpush3.bf16.msra.mxu0 %v11042_v57 }
 0x300   : > { %v4721_v26 = vmax.f32 %v4689_v28, 0.0  ;;  %v5674_v60 = vsel %vm11561_vm9, %v16568_v56, %v5673_v34  ;;  %v4692_v43 = vadd.f32 %v13574_v39, %v4653_v10  ;;  %v11044_v28 = vld [vmem:[#allocation9 + $0x1f8] sm:$0xff]   ;;  %v4723_v37 = vmax.f32 %v13987_v52, 0.0 }
 0x301   : > { %v5357_v38 = vsel %vm11582_vm10, %v5352_v48, %v16567_v12  ;;  %v5683_v46 = vsel %vm11561_vm9, %v5675_v42, %v5682_v20  ;;  %v14041_v48 = vld [vmem:[#allocation3 + $0x84] sm:$0xf]  ;;  %v4690_v11 = vadd.f32 %v13574_v39, %v4651_v2  ;;  %v5057_v12 = vrot.slane %v13989_v22, 4  ;;  %v16569_v20 = vld [vmem:[#allocation34_spill] sm:$0xff]  ;;  %10562 = vmatprep.subr.bf16.mxu0 %v11044_v28  ;;  %v14466_v8 = vld [vmem:[#allocation3 + $0x120] sm:$0xf] }
 0x302   : > { %v9470_v29 = vcombine.low %v5349_v19, %v5357_v38  ;;  %v9687_v44 = vpack.c.bf16 %v4721_v26, %v4721_v26  ;;  %v9487_v15 = vcombine.low %v5674_v60, %v5683_v46  ;;  %v4724_v19 = vmax.f32 %v4692_v43, 0.0  ;;  %v14057_v38 = vld [vmem:[#allocation3 + $0x80] sm:$0xf]  ;;  %16582 = vst [vmem:[#allocation49_spill] sm:$0xff] %v14466_v8 }
 0x303   : > { %v5064_v56 = vor.u32 %v5062_v50, %v5061_v27  ;;  %v5072_v34 = vshrl.u32 %v14033_v63, 16  ;;  %v14051_v42 = vrot.slane %v5059_v24, 4  ;;  %v4722_v52 = vmax.f32 %v4690_v11, 0.0  ;;  %v11045_v22 = vld [vmem:[#allocation9 + $0x1b8] sm:$0xff]   ;;  %v4908_v11 = vld [vmem:[#allocation3 + $0x94] sm:$0xf] }
 0x304   : > { %8273 = vmatmul.mubr.bf16.gmra.mrb[172].mxu0 %v9470_v29  ;;  %4882 = vst [vmem:[#allocation3 + $0x134] sm:$0xf] %v9687_v44  ;;  %v5056_v39 = vsel %vm11561_vm9, %v16569_v20, %v5055_v47  ;;  %v5081_v10 = vshrl.u32 %v14041_v48, 16  ;;  %v9730_v27 = vpack.c.bf16 %v4724_v19, %v4723_v37  ;;  %v5075_v24 = vshll.u32 %v14033_v63, 16  ;;  %v14062_v29 = vld [vmem:[#allocation3 + $0x84] sm:$0xf] }
 0x305   : > { %8280 = vmatprep.mubr.bf16.mxu0 %v9487_v15  ;;  %v5065_v26 = vsel %vm11561_vm9, %v5057_v12, %v5064_v56  ;;  %v5074_v2 = vrot.slane %v5072_v34, 7  ;;  %v9688_v60 = vpack.c.bf16 %v4722_v52, %v4722_v52  ;;  %v5084_v47 = vshll.u32 %v14041_v48, 16  ;;  %10563 = vmatpush3.bf16.msra.mxu0 %v11045_v22  ;;  %v16570_v52 = vld [vmem:[#allocation38_spill] sm:$0xff] }
 0x306   : > { %v9440_v46 = vcombine.low %v5056_v39, %v5065_v26  ;;  %v5083_v43 = vrot.slane %v5081_v10, 7  ;;  %9739 = vst [vmem:[#allocation3 + $0x148] sm:$0xff] %v9730_v27   ;;  %v9457_v57 = vcombine.low %v14033_v63, %v14041_v48  ;;  %v5360_v37 = vor.u32 %v13977_v40, %v13966_v3  ;;  %v14085_v27 = vld [vmem:[#allocation3 + $0x98] sm:$0xf] }
 0x307   : > { %v5362_v44 = vrot.slane %v5040_v61, 5  ;;  %v16138_v15 = vshrl.u32 %v14057_v38, 16  ;;  %4883 = vst [vmem:[#allocation3 + $0x138] sm:$0xf] %v9688_v60  ;;  %v16135_v28 = vshll.u32 %v14057_v38, 16  ;;  %v16133_v19 = vshrl.u32 %v14062_v29, 16 }
 0x308   : > { %8128 = vmatmul.mubr.bf16.gmra.mrb[148].mxu1 %v9440_v46  ;;  %v16134_v12 = vshll.u32 %v14062_v29, 16  ;;  %v5077_v56 = vor.u32 %v5075_v24, %v5074_v2  ;;  %v5361_v63 = vrot.slane %v5360_v37, 4  ;;  %v5079_v61 = vrot.slane %v5074_v2, 4 }
 0x309   : > { %8135 = vmatprep.mubr.bf16.mxu1 %v9457_v57  ;;  %v5365_v3 = vor.u32 %v13981_v9, %v5362_v44  ;;  %v5692_v55 = vrot.slane %v16138_v15, 7  ;;  %v5701_v40 = vrot.slane %v16133_v19, 7  ;;  %v5086_v39 = vor.u32 %v5084_v47, %v5083_v43 }
 0x30a   : > { %v5078_v20 = vsel %vm11561_vm9, %v16570_v52, %v5077_v56  ;;  %v5094_v22 = vshrl.u32 %v4908_v11, 16  ;;  %v5363_v9 = vsel %vm11582_vm10, %v5361_v63, %v5362_v44  ;;  %v14091_v46 = vrot.slane %v5072_v34, 4  ;;  %v16571_v56 = vld [vmem:[#allocation32_spill] sm:$0xff]  ;;  %v16572_v44 = vld [vmem:[#allocation35_spill] sm:$0xff] }
 0x30b   : > { %v5366_v26 = vrot.slane %v5365_v3, 4  ;;  %v5695_v2 = vor.u32 %v16135_v28, %v5692_v55  ;;  %v5697_v60 = vrot.slane %v5692_v55, 4  ;;  %v14093_v57 = vrot.slane %v5075_v24, 5  ;;  %v14106_v55 = vld [vmem:[#allocation3 + $0x94] sm:$0xf] }
 0x30c   : > { %v5704_v37 = vor.u32 %v16134_v12, %v5701_v40  ;;  %v5087_v43 = vsel %vm11561_vm9, %v5079_v61, %v5086_v39  ;;  %v5096_v3 = vrot.slane %v5094_v22, 7  ;;  %v5103_v34 = vshrl.u32 %v14085_v27, 16  ;;  %v14112_v39 = vld [vmem:[#allocation3 + $0x98] sm:$0xf] }
 0x30d   : > { %v5371_v52 = vsel %vm11582_vm10, %v5366_v26, %v16571_v56  ;;  %v5696_v63 = vsel %vm11561_vm9, %v16572_v44, %v5695_v2  ;;  %v14108_v24 = vrot.slane %v5081_v10, 4  ;;  %v9441_v61 = vcombine.low %v5078_v20, %v5087_v43  ;;  %v14121_v20 = vld [vmem:[#allocation3 + $0xa8] sm:$0xf] }
 0x30e   : > { %v9471_v19 = vcombine.low %v5363_v9, %v5371_v52  ;;  %v5705_v40 = vsel %vm11561_vm9, %v5697_v60, %v5704_v37  ;;  %v5097_v26 = vshll.u32 %v4908_v11, 16  ;;  %v5105_v56 = vrot.slane %v5103_v34, 7 }
 0x30f   : > { %v9488_v12 = vcombine.low %v5696_v63, %v5705_v40  ;;  %v5106_v28 = vshll.u32 %v14085_v27, 16  ;;  %v9458_v2 = vcombine.low %v4908_v11, %v14085_v27  ;;  %v5374_v10 = vor.u32 %v14018_v36, %v13992_v31 }
 0x310   : > { %8281 = vmatmul.mubr.bf16.gmra.mrb[176].mxu0 %v9471_v19  ;;  %8136 = vmatmul.mubr.bf16.gmra.mrb[152].mxu1 %v9441_v61  ;;  %v5376_v9 = vrot.slane %v5062_v50, 5  ;;  %v16137_v60 = vshrl.u32 %v14106_v55, 16  ;;  %v14123_v37 = vrot.slane %v5094_v22, 4  ;;  %v16139_v43 = vshll.u32 %v14106_v55, 16  ;;  %v14135_v22 = vld [vmem:[#allocation3 + $0xac] sm:$0xf] }
 0x311   : > { %8288 = vmatprep.mubr.bf16.mxu0 %v9488_v12  ;;  %v16136_v19 = vshrl.u32 %v14112_v39, 16  ;;  %v5099_v52 = vor.u32 %v5097_v26, %v5096_v3  ;;  %8143 = vmatprep.mubr.bf16.mxu1 %v9458_v2  ;;  %v5375_v11 = vrot.slane %v5374_v10, 4  ;;  %v16144_v50 = vshll.u32 %v14112_v39, 16  ;;  %v16573_v2 = vld [vmem:[#allocation40_spill] sm:$0xff] }
 0x312   : > { %v5379_v44 = vor.u32 %v14051_v42, %v5376_v9  ;;  %v5714_v32 = vrot.slane %v16137_v60, 7  ;;  %v5101_v36 = vrot.slane %v5096_v3, 4  ;;  %v5108_v12 = vor.u32 %v5106_v28, %v5105_v56 }
 0x313   : > { %v5723_v31 = vrot.slane %v16136_v19, 7  ;;  %v5116_v63 = vshrl.u32 %v14121_v20, 16  ;;  %v14138_v40 = vrot.slane %v5097_v26, 5  ;;  %v5100_v10 = vsel %vm11561_vm9, %v16573_v2, %v5099_v52  ;;  %v16574_v26 = vld [vmem:[#allocation36_spill] sm:$0xff] }
 0x314   : > { %v5380_v61 = vrot.slane %v5379_v44, 4  ;;  %v5717_v42 = vor.u32 %v16139_v43, %v5714_v32  ;;  %v5377_v3 = vsel %vm11582_vm10, %v5375_v11, %v5376_v9  ;;  %v5719_v19 = vrot.slane %v5714_v32, 4  ;;  %v16575_v11 = vld [vmem:[#allocation41_spill] sm:$0xff] }
 0x315   : > { %v5726_v56 = vor.u32 %v16144_v50, %v5723_v31  ;;  %v5109_v60 = vsel %vm11561_vm9, %v5101_v36, %v5108_v12  ;;  %v5118_v43 = vrot.slane %v5116_v63, 7  ;;  %v5125_v35 = vshrl.u32 %v14135_v22, 16  ;;  %v14164_v36 = vld [vmem:[#allocation3 + $0xac] sm:$0xf]  ;;  %v16577_v50 = vld [vmem:[#allocation39_spill] sm:$0xff] }
 0x316   : > { %v5385_v44 = vsel %vm11582_vm10, %v5380_v61, %v16574_v26  ;;  %v9442_v15 = vcombine.low %v5100_v10, %v5109_v60  ;;  %v14157_v52 = vrot.slane %v5103_v34, 4  ;;  %v5718_v32 = vsel %vm11561_vm9, %v16575_v11, %v5717_v42 }
 0x317   : > { %v9472_v9 = vcombine.low %v5377_v3, %v5385_v44  ;;  %v5727_v31 = vsel %vm11561_vm9, %v5719_v19, %v5726_v56  ;;  %v5119_v60 = vshll.u32 %v14121_v20, 16  ;;  %v5127_v61 = vrot.slane %v5125_v35, 7  ;;  %v4914_v3 = vld [vmem:[#allocation3 + $0xbc] sm:$0xf] }
 0x318   : > { %v9489_v12 = vcombine.low %v5718_v32, %v5727_v31  ;;  %8144 = vmatmul.mubr.bf16.gmra.mrb[156].mxu1 %v9442_v15  ;;  %v5128_v2 = vshll.u32 %v14135_v22, 16  ;;  %v9459_v34 = vcombine.low %v14121_v20, %v14135_v22  ;;  %v5388_v10 = vor.u32 %v14093_v57, %v14091_v46  ;;  %v14188_v32 = vld [vmem:[#allocation3 + $0xc0] sm:$0xf] }
 0x319   : > { %8289 = vmatmul.mubr.bf16.gmra.mrb[180].mxu0 %v9472_v9  ;;  %v5390_v42 = vrot.slane %v5084_v47, 5  ;;  %v16143_v19 = vshrl.u32 %v14155_v59, 16  ;;  %v16146_v15 = vshll.u32 %v14155_v59, 16  ;;  %v16142_v56 = vshrl.u32 %v14164_v36, 16 }
 0x31a   : > { %8296 = vmatprep.mubr.bf16.mxu0 %v9489_v12  ;;  %v16145_v26 = vshll.u32 %v14164_v36, 16  ;;  %v5121_v44 = vor.u32 %v5119_v60, %v5118_v43  ;;  %8151 = vmatprep.mubr.bf16.mxu1 %v9459_v34  ;;  %v5389_v9 = vrot.slane %v5388_v10, 4  ;;  %v5123_v48 = vrot.slane %v5118_v43, 4 }
 0x31b   : > { %v5393_v20 = vor.u32 %v14108_v24, %v5390_v42  ;;  %v5736_v46 = vrot.slane %v16143_v19, 7  ;;  %v5745_v47 = vrot.slane %v16142_v56, 7  ;;  %v5130_v11 = vor.u32 %v5128_v2, %v5127_v61 }
 0x31c   : > { %v5122_v57 = vsel %vm11561_vm9, %v13613_v33, %v5121_v44  ;;  %v5138_v31 = vshrl.u32 %v4914_v3, 16  ;;  %v5391_v24 = vsel %vm11582_vm10, %v5389_v9, %v5390_v42  ;;  %v14194_v10 = vrot.slane %v5116_v63, 4  ;;  %v16576_v44 = vld [vmem:[#allocation42_spill] sm:$0xff]  ;;  %v14207_v63 = vld [vmem:[#allocation3 + $0xbc] sm:$0xf] }
 0x31d   : > { %v5394_v12 = vrot.slane %v5393_v20, 4  ;;  %v5739_v43 = vor.u32 %v16146_v15, %v5736_v46  ;;  %v5741_v34 = vrot.slane %v5736_v46, 4  ;;  %v5748_v56 = vor.u32 %v16145_v26, %v5745_v47 }
 0x31e   : > { %v5131_v33 = vsel %vm11561_vm9, %v5123_v48, %v5130_v11  ;;  %v5140_v61 = vrot.slane %v5138_v31, 7  ;;  %v5147_v20 = vshrl.u32 %v14188_v32, 16  ;;  %v14209_v46 = vrot.slane %v5119_v60, 5  ;;  %v14215_v11 = vld [vmem:[#allocation3 + $0xc0] sm:$0xf] }
 0x31f   : > { %v5399_v19 = vsel %vm11582_vm10, %v5394_v12, %v16576_v44  ;;  %v5740_v42 = vsel %vm11561_vm9, %v16577_v50, %v5739_v43  ;;  %v9443_v9 = vcombine.low %v5122_v57, %v5131_v33  ;;  %v14211_v47 = vrot.slane %v5125_v35, 4 }
 0x320   : > { %v9473_v26 = vcombine.low %v5391_v24, %v5399_v19  ;;  %v5749_v48 = vsel %vm11561_vm9, %v5741_v34, %v5748_v56  ;;  %v5141_v44 = vshll.u32 %v4914_v3, 16  ;;  %v5149_v15 = vrot.slane %v5147_v20, 7  ;;  %v14224_v56 = vld [vmem:[#allocation3 + $0xd0] sm:$0xf] }
 0x321   : > { %v9490_v12 = vcombine.low %v5740_v42, %v5749_v48  ;;  %8152 = vmatmul.mubr.bf16.gmra.mrb[160].mxu1 %v9443_v9  ;;  %v5150_v50 = vshll.u32 %v14188_v32, 16  ;;  %v9460_v57 = vcombine.low %v4914_v3, %v14188_v32  ;;  %v5402_v60 = vor.u32 %v14138_v40, %v14123_v37  ;;  %v14238_v42 = vld [vmem:[#allocation3 + $0xd4] sm:$0xf] }
 0x322   : > { %8297 = vmatmul.mubr.bf16.gmra.mrb[184].mxu0 %v9473_v26  ;;  %v5404_v35 = vrot.slane %v5106_v28, 5  ;;  %v16149_v19 = vshrl.u32 %v14207_v63, 16  ;;  %v14226_v24 = vrot.slane %v5138_v31, 4  ;;  %v16148_v43 = vshll.u32 %v14207_v63, 16 }
 0x323   : > { %8304 = vmatprep.mubr.bf16.mxu0 %v9490_v12  ;;  %v16147_v34 = vshrl.u32 %v14215_v11, 16  ;;  %v5143_v26 = vor.u32 %v5141_v44, %v5140_v61  ;;  %8159 = vmatprep.mubr.bf16.mxu1 %v9460_v57  ;;  %v5403_v3 = vrot.slane %v5402_v60, 4  ;;  %v16165_v28 = vshll.u32 %v14215_v11, 16 }
 0x324   : > { %v5407_v33 = vor.u32 %v14157_v52, %v5404_v35  ;;  %v5758_v27 = vrot.slane %v16149_v19, 7  ;;  %v5145_v40 = vrot.slane %v5140_v61, 4  ;;  %v5152_v31 = vor.u32 %v5150_v50, %v5149_v15 }
 0x325   : > { %v5767_v37 = vrot.slane %v16147_v34, 7  ;;  %v5160_v9 = vshrl.u32 %v14224_v56, 16  ;;  %v14241_v48 = vrot.slane %v5141_v44, 5  ;;  %v5144_v57 = vsel %vm11561_vm9, %v13623_v62, %v5143_v26 }
 0x326   : > { %v5408_v12 = vrot.slane %v5407_v33, 4  ;;  %v5761_v52 = vor.u32 %v16148_v43, %v5758_v27  ;;  %v5405_v61 = vsel %vm11582_vm10, %v5403_v3, %v5404_v35  ;;  %v5763_v60 = vrot.slane %v5758_v27, 4  ;;  %v14267_v27 = vld [vmem:[#allocation3 + $0xd4] sm:$0xf] }
 0x327   : > { %v5770_v15 = vor.u32 %v16165_v28, %v5767_v37  ;;  %v5153_v34 = vsel %vm11561_vm9, %v5145_v40, %v5152_v31  ;;  %v5162_v43 = vrot.slane %v5160_v9, 7  ;;  %v5169_v19 = vshrl.u32 %v14238_v42, 16  ;;  %v505_v28 = vld [vmem:[#allocation3 + $0x11c] sm:$0x8] }
 0x328   : > { %v5413_v44 = vsel %vm11582_vm10, %v5408_v12, %v13617_v58  ;;  %v9444_v33 = vcombine.low %v5144_v57, %v5153_v34  ;;  %v14260_v62 = vrot.slane %v5147_v20, 4  ;;  %v5762_v26 = vsel %vm11561_vm9, %v13619_v13, %v5761_v52  ;;  %v4920_v52 = vld [vmem:[#allocation3 + $0xe4] sm:$0xf] }
 0x329   : > { %v9474_v35 = vcombine.low %v5405_v61, %v5413_v44  ;;  %v5771_v3 = vsel %vm11561_vm9, %v5763_v60, %v5770_v15  ;;  %v5163_v58 = vshll.u32 %v14224_v56, 16  ;;  %v5171_v34 = vrot.slane %v5169_v19, 7 }
 0x32a   : > { %v9491_v37 = vcombine.low %v5762_v26, %v5771_v3  ;;  %8160 = vmatmul.mubr.bf16.gmra.mrb[164].mxu1 %v9444_v33  ;;  %v5172_v40 = vshll.u32 %v14238_v42, 16  ;;  %v9461_v20 = vcombine.low %v14224_v56, %v14238_v42  ;;  %v5416_v31 = vor.u32 %v14209_v46, %v14194_v10 }
 0x32b   : > { %8305 = vmatmul.mubr.bf16.gmra.mrb[188].mxu0 %v9474_v35  ;;  %v5418_v13 = vrot.slane %v5128_v2, 5  ;;  %v16164_v12 = vshrl.u32 %v14258_v5, 16  ;;  %v16161_v57 = vshll.u32 %v14258_v5, 16  ;;  %v16151_v61 = vshrl.u32 %v14267_v27, 16  ;;  %v14291_v35 = vld [vmem:[#allocation3 + $0xe8] sm:$0xf] }
 0x32c   : > { %8312 = vmatprep.mubr.bf16.mxu0 %v9491_v37  ;;  %v16152_v60 = vshll.u32 %v14267_v27, 16  ;;  %v5165_v15 = vor.u32 %v5163_v58, %v5162_v43  ;;  %8167 = vmatprep.mubr.bf16.mxu1 %v9461_v20  ;;  %v5417_v44 = vrot.slane %v5416_v31, 4  ;;  %v5167_v22 = vrot.slane %v5162_v43, 4 }
 0x32d   : > { %v5421_v56 = vor.u32 %v14211_v47, %v5418_v13  ;;  %v5780_v10 = vrot.slane %v16164_v12, 7  ;;  %v5789_v2 = vrot.slane %v16151_v61, 7  ;;  %v5174_v33 = vor.u32 %v5172_v40, %v5171_v34 }
 0x32e   : > { %v5166_v46 = vsel %vm11561_vm9, %v13635_v18, %v5165_v15  ;;  %v5182_v26 = vshrl.u32 %v4920_v52, 16  ;;  %v5419_v47 = vsel %vm11582_vm10, %v5417_v44, %v5418_v13  ;;  %v14297_v20 = vrot.slane %v5160_v9, 4  ;;  %v14310_v9 = vld [vmem:[#allocation3 + $0xe4] sm:$0xf] }
 0x32f   : > { %v5422_v3 = vrot.slane %v5421_v56, 4  ;;  %v5783_v43 = vor.u32 %v16161_v57, %v5780_v10  ;;  %v5785_v37 = vrot.slane %v5780_v10, 4  ;;  %v5792_v31 = vor.u32 %v16152_v60, %v5789_v2  ;;  %v14414_v57 = vld [vmem:[#allocation3 + $0x10c] sm:$0xf] }
 0x330   : > { %v5175_v18 = vsel %vm11561_vm9, %v5167_v22, %v5174_v33  ;;  %v5184_v34 = vrot.slane %v5182_v26, 7  ;;  %v5191_v56 = vshrl.u32 %v14291_v35, 16  ;;  %v14312_v10 = vrot.slane %v5163_v58, 5  ;;  %v14318_v33 = vld [vmem:[#allocation3 + $0xe8] sm:$0xf]  ;;  %16579 = vst [vmem:[#allocation44_spill] sm:$0xff] %v14414_v57 }
 0x331   : > { %v5427_v15 = vsel %vm11582_vm10, %v5422_v3, %v13626_v25  ;;  %v5784_v13 = vsel %vm11561_vm9, %v13628_v0, %v5783_v43  ;;  %v9445_v44 = vcombine.low %v5166_v46, %v5175_v18  ;;  %v14314_v2 = vrot.slane %v5169_v19, 4  ;;  %v14327_v43 = vld [vmem:[#allocation3 + $0xf8] sm:$0xf] }
 0x332   : > { %v9475_v61 = vcombine.low %v5419_v47, %v5427_v15  ;;  %v5793_v22 = vsel %vm11561_vm9, %v5785_v37, %v5792_v31  ;;  %v5185_v3 = vshll.u32 %v4920_v52, 16  ;;  %v5193_v60 = vrot.slane %v5191_v56, 7 }
 0x333   : > { %v9492_v25 = vcombine.low %v5784_v13, %v5793_v22  ;;  %8168 = vmatmul.mubr.bf16.gmra.mrb[168].mxu1 %v9445_v44  ;;  %v5194_v0 = vshll.u32 %v14291_v35, 16  ;;  %v9462_v46 = vcombine.low %v4920_v52, %v14291_v35  ;;  %v5430_v58 = vor.u32 %v14241_v48, %v14226_v24  ;;  %v14341_v13 = vld [vmem:[#allocation3 + $0xfc] sm:$0xf] }
 0x334   : > { %8313 = vmatmul.mubr.bf16.gmra.mrb[192].mxu0 %v9475_v61  ;;  %v5432_v19 = vrot.slane %v5150_v50, 5  ;;  %v16155_v47 = vshrl.u32 %v14310_v9, 16  ;;  %v14329_v37 = vrot.slane %v5182_v26, 4  ;;  %v16154_v31 = vshll.u32 %v14310_v9, 16 }
 0x335   : > { %8320 = vmatprep.mubr.bf16.mxu0 %v9492_v25  ;;  %v16153_v18 = vshrl.u32 %v14318_v33, 16  ;;  %v5187_v61 = vor.u32 %v5185_v3, %v5184_v34  ;;  %8175 = vmatprep.mubr.bf16.mxu1 %v9462_v46  ;;  %v5431_v52 = vrot.slane %v5430_v58, 4  ;;  %v16156_v50 = vshll.u32 %v14318_v33, 16 }
 0x336   : > { %v5435_v15 = vor.u32 %v14260_v62, %v5432_v19  ;;  %v5802_v32 = vrot.slane %v16155_v47, 7  ;;  %v5189_v48 = vrot.slane %v5184_v34, 4  ;;  %v5196_v26 = vor.u32 %v5194_v0, %v5193_v60 }
 0x337   : > { %v5811_v24 = vrot.slane %v16153_v18, 7  ;;  %v5204_v44 = vshrl.u32 %v14327_v43, 16  ;;  %v14344_v22 = vrot.slane %v5185_v3, 5  ;;  %v14346_v25 = vrot.slane %v5191_v56, 4 }
 0x338   : > { %v5436_v62 = vrot.slane %v5435_v15, 4  ;;  %v5805_v46 = vor.u32 %v16154_v31, %v5802_v32  ;;  %v5807_v58 = vrot.slane %v5802_v32, 4  ;;  %v5188_v60 = vsel %vm11561_vm9, %v13656_v51, %v5187_v61  ;;  %v5559_v31 = vld [vmem:[#allocation3 + $0xf4] sm:$0x8] }
 0x339   : > { %v5814_v18 = vor.u32 %v16156_v50, %v5811_v24  ;;  %v5197_v34 = vsel %vm11561_vm9, %v5189_v48, %v5196_v26  ;;  %v5433_v3 = vsel %vm11582_vm10, %v5431_v52, %v5432_v19  ;;  %v5213_v32 = vshrl.u32 %v14341_v13, 16  ;;  %v14368_v48 = vld [vmem:[#allocation3 + $0xf8] sm:$0xf]  ;;  %v14370_v19 = vld [vmem:[#allocation3 + $0xfc] sm:$0xf] }
 0x33a   : > { %v5441_v56 = vsel %vm11582_vm10, %v5436_v62, %v13641_v41  ;;  %v9446_v15 = vcombine.low %v5188_v60, %v5197_v34  ;;  %v5806_v24 = vsel %vm11561_vm9, %v13654_v14, %v5805_v46  ;;  %v5206_v61 = vrot.slane %v5204_v44, 7  ;;  %v4922_v60 = vld [vmem:[#allocation3 + $0xf4] sm:$0x8] }
 0x33b   : > { %v9476_v47 = vcombine.low %v5433_v3, %v5441_v56  ;;  %v5815_v51 = vsel %vm11561_vm9, %v5807_v58, %v5814_v18  ;;  %v5207_v41 = vshll.u32 %v14327_v43, 16  ;;  %v5215_v26 = vrot.slane %v5213_v32, 7 }
 0x33c   : > { %v9493_v52 = vcombine.low %v5806_v24, %v5815_v51  ;;  %8176 = vmatmul.mubr.bf16.gmra.mrb[172].mxu1 %v9446_v15  ;;  %v5216_v62 = vshll.u32 %v14341_v13, 16  ;;  %v9463_v14 = vcombine.low %v14327_v43, %v14341_v13  ;;  %v5444_v18 = vor.u32 %v14312_v10, %v14297_v20  ;;  %v4926_v51 = vld [vmem:[#allocation3 + $0x10c] sm:$0xf]  ;;  %v14501_v13 = vpop.f32.mrb[128].mxu1 }
 0x33d   : > { %8321 = vmatmul.mubr.bf16.gmra.mrb[196].mxu0 %v9476_v47  ;;  %v5446_v46 = vrot.slane %v5172_v40, 5  ;;  %v16578_v58 = vshll.u32 %v13643_v6, 16  ;;  %v5817_v3 = vshrl.u32 %v5559_v31, 16  ;;  %v16157_v56 = vshrl.u32 %v14368_v48, 16  ;;  %16584 = vst [vmem:[#allocation48_spill] sm:$0xff] %v14501_v13 }
 0x33e   : > { %8328 = vmatprep.mubr.bf16.mxu0 %v9493_v52  ;;  %v16160_v15 = vshll.u32 %v14368_v48, 16  ;;  %v16158_v47 = vshrl.u32 %v14370_v19, 16  ;;  %8183 = vmatprep.mubr.bf16.mxu1 %v9463_v14  ;;  %v5445_v24 = vrot.slane %v5444_v18, 4  ;;  %v16159_v20 = vshll.u32 %v14370_v19, 16 }
 0x33f   : > { %v5454_v34 = vrot.slane %v16578_v58, 5  ;;  %v5449_v43 = vor.u32 %v14314_v2, %v5446_v46  ;;  %v5199_v10 = vshrl.u32 %v4922_v60, 16  ;;  %v9414_v42 = vrot.slane %v5817_v3, 11 }
 0x340   : > { %v5824_v6 = vrot.slane %v16157_v56, 7  ;;  %v5833_v40 = vrot.slane %v16158_v47, 7  ;;  %v5209_v31 = vor.u32 %v5207_v41, %v5206_v61  ;;  %v5447_v52 = vsel %vm11582_vm10, %v5445_v24, %v5446_v46  ;;  %v14399_v56 = vld [vmem:[#allocation3 + $0x110] sm:$0xf] }
 0x341   : > { %v5450_v58 = vrot.slane %v5449_v43, 4  ;;  %v9399_v14 = vrot.slane %v5199_v10, 11  ;;  %v5211_v18 = vrot.slane %v5206_v61, 4  ;;  %v5218_v3 = vor.u32 %v5216_v62, %v5215_v26 }
 0x342   : > { %v5827_v2 = vor.u32 %v16160_v15, %v5824_v6  ;;  %v5829_v50 = vrot.slane %v5824_v6, 4  ;;  %v5836_v60 = vor.u32 %v16159_v20, %v5833_v40  ;;  %v14401_v47 = vrot.slane %v5204_v44, 4  ;;  %v550_v40 = vld [vmem:[#allocation3 + $0xec] sm:$0x1] }
 0x343   : > { %v5455_v46 = vsel %vm11582_vm10, %v5450_v58, %v5454_v34  ;;  %v5210_v61 = vsel %vm11561_vm9, %v9399_v14, %v5209_v31  ;;  %v5226_v24 = vshrl.u32 %v4926_v51, 16  ;;  %v5219_v26 = vsel %vm11561_vm9, %v5211_v18, %v5218_v3  ;;  %v502_v58 = vld [vmem:[#allocation3 + $0x108] sm:$0x8]  ;;  %v14421_v14 = vld [vmem:[#allocation3 + $0x110] sm:$0xf] }
 0x344   : > { %v9477_v43 = vcombine.low %v5447_v52, %v5455_v46  ;;  %v5828_v10 = vsel %vm11561_vm9, %v9414_v42, %v5827_v2  ;;  %v5837_v6 = vsel %vm11561_vm9, %v5829_v50, %v5836_v60  ;;  %v9447_v20 = vcombine.low %v5210_v61, %v5219_v26  ;;  %16580 = vst [vmem:[#allocation47_spill] sm:$0xff] %v14421_v14  ;;  %v14437_v61 = vld [vmem:[#allocation3 + $0x120] sm:$0xf]  ;;  %v14451_v26 = vld [vmem:[#allocation3 + $0x124] sm:$0xf] }
 0x345   : > { %v9494_v44 = vcombine.low %v5828_v10, %v5837_v6  ;;  %v5229_v15 = vshll.u32 %v4926_v51, 16  ;;  %v5235_v34 = vshrl.u32 %v14399_v56, 16  ;;  %v14416_v31 = vrot.slane %v5207_v41, 5 }
 0x346   : > { %v14418_v52 = vrot.slane %v5213_v32, 4  ;;  %8329 = vmatmul.mubr.bf16.gmra.mrb[200].mxu0 %v9477_v43  ;;  %v5228_v42 = vrot.slane %v5226_v24, 7  ;;  %v9464_v50 = vcombine.low %v4926_v51, %v14399_v56  ;;  %8184 = vmatmul.mubr.bf16.gmra.mrb[176].mxu1 %v9447_v20  ;;  %v16171_v2 = vshll.u32 %v14399_v56, 16 }
 0x347   : > { %8336 = vmatprep.mubr.bf16.mxu0 %v9494_v44  ;;  %v5237_v18 = vrot.slane %v5235_v34, 7  ;;  %v551_v3 = vsel %vm11551_vm8, 0, %v550_v40  ;;  %v5458_v41 = vor.u32 %v14344_v22, %v14329_v37  ;;  %v14428_v46 = vrot.slane %v5226_v24, 4 }
 0x348   : > { %8191 = vmatprep.mubr.bf16.mxu1 %v9464_v50  ;;  %552 = vst [vmem:[#allocation3 + $0xec] sm:$0x1] %v551_v3  ;;  %v14432_v32 = vrot.slane %v5194_v0, 5  ;;  %v503_v20 = vsel %vm11545_vm3, 0, %v502_v58  ;;  %v16162_v51 = vshrl.u32 %v14414_v57, 16  ;;  %v14439_v43 = vrot.slane %v5229_v15, 5 }
 0x349   : > { %v14441_v10 = vrot.slane %v5235_v34, 4  ;;  %v5459_v37 = vrot.slane %v5458_v41, 4  ;;  %504 = vst [vmem:[#allocation3 + $0x108] sm:$0x8] %v503_v20  ;;  %v16163_v22 = vshrl.u32 %v14421_v14, 16  ;;  %v16170_v24 = vshll.u32 %v14414_v57, 16 }
 0x34a   : > { %v5463_v35 = vor.u32 %v14346_v25, %v14432_v32  ;;  %v5846_v0 = vrot.slane %v16162_v51, 7  ;;  %v5240_v6 = vor.u32 %v16171_v2, %v5237_v18  ;;  %v16169_v44 = vshll.u32 %v14421_v14, 16  ;;  %v553_v25 = vld [vmem:[#allocation3 + $0x100] sm:$0x1] }
 0x34b   : > { %v5855_v40 = vrot.slane %v16163_v22, 7  ;;  %v5248_v34 = vshrl.u32 %v14437_v61, 16  ;;  %v5251_v58 = vshll.u32 %v14437_v61, 16  ;;  %v5461_v50 = vsel %vm11582_vm10, %v5459_v37, %v14432_v32  ;;  %v14475_v32 = vld [vmem:[#allocation3 + $0x124] sm:$0xf] }
 0x34c   : > { %v5464_v3 = vrot.slane %v5463_v35, 4  ;;  %v5231_v41 = vor.u32 %v5229_v15, %v5228_v42  ;;  %v5233_v20 = vrot.slane %v5228_v42, 4  ;;  %v5849_v18 = vor.u32 %v16170_v24, %v5846_v0  ;;  %16583 = vst [vmem:[#allocation50_spill] sm:$0xff] %v14475_v32 }
 0x34d   : > { %v5851_v51 = vrot.slane %v5846_v0, 4  ;;  %v5858_v22 = vor.u32 %v16169_v44, %v5855_v40  ;;  %v5257_v12 = vshrl.u32 %v14451_v26, 16  ;;  %v14470_v45 = vrot.slane %v5248_v34, 7 }
 0x34e   : > { %v5241_v21 = vsel %vm11561_vm9, %v5233_v20, %v5240_v6  ;;  %v554_v42 = vsel %vm11551_vm8, 0, %v553_v25  ;;  %v14477_v0 = vrot.slane %v5248_v34, 4  ;;  %v14479_v40 = vrot.slane %v5251_v58, 5 }
 0x34f   : > { %v5297_v37 = vld [vmem:[#allocation3 + $0xec] sm:$0x1]  ;;  %v5259_v35 = vrot.slane %v5257_v12, 7  ;;  %555 = vst [vmem:[#allocation3 + $0x100] sm:$0x1] %v554_v42  ;;  %v5472_v44 = vor.u32 %v14416_v31, %v14401_v47  ;;  %v5859_v24 = vsel %vm11561_vm9, %v5851_v51, %v5858_v22  ;;  %v9465_v25 = vcombine.low %v14437_v61, %v14451_v26 }
 0x350   : > { %v5466_v6 = vshll.u32 %v5297_v37, 16  ;;  %v5562_v20 = vld [vmem:[#allocation3 + $0x108] sm:$0x8]  ;;  %v14489_v15 = vrot.slane %v5216_v62, 5  ;;  %v14491_v57 = vrot.slane %v5257_v12, 4  ;;  %v506_v47 = vsel %vm11545_vm3, 0, %v505_v28 }
 0x351   : > { %v4925_v2 = vld [vmem:[#allocation3 + $0x108] sm:$0x8]  ;;  %v5839_v34 = vshrl.u32 %v5562_v20, 16  ;;  %507 = vst [vmem:[#allocation3 + $0x11c] sm:$0x8] %v506_v47  ;;  %v16176_v51 = vshrl.u32 %v14466_v8, 16  ;;  %v14499_v61 = vor.u32 %v5251_v58, %v14470_v45 }
 0x352   : > { %v5221_v14 = vshrl.u32 %v4925_v2, 16  ;;  %v5468_v31 = vrot.slane %v5466_v6, 5  ;;  %v5477_v42 = vor.u32 %v14418_v52, %v14489_v15  ;;  %v5473_v2 = vrot.slane %v5472_v44, 4  ;;  %v556_v6 = vld [vmem:[#allocation3 + $0x114] sm:$0x1] }
 0x353   : > { %v9415_v62 = vrot.slane %v5839_v34, 11  ;;  %v16177_v12 = vshrl.u32 %v14475_v32, 16  ;;  %v5868_v37 = vrot.slane %v16176_v51, 7  ;;  %v14516_v34 = vld [vmem:[#allocation3 + $0x134] sm:$0xf] }
 0x354   : > { %v9400_v22 = vrot.slane %v5221_v14, 11  ;;  %v5469_v28 = vsel %vm11582_vm10, %v5464_v3, %v5468_v31  ;;  %v14518_v3 = vld [vmem:[#allocation3 + $0x138] sm:$0xf]  ;;  %v5478_v52 = vrot.slane %v5477_v42, 4 }
 0x355   : > { %v9478_v20 = vcombine.low %v5461_v50, %v5469_v28  ;;  %v5850_v58 = vsel %vm11561_vm9, %v9415_v62, %v5849_v18  ;;  %v5877_v44 = vrot.slane %v16177_v12, 7  ;;  %v5873_v13 = vrot.slane %v5868_v37, 4 }
 0x356   : > { %v5232_v14 = vsel %vm11561_vm9, %v9400_v22, %v5231_v41  ;;  %v9495_v47 = vcombine.low %v5850_v58, %v5859_v24  ;;  %v5298_v51 = vld [vmem:[#allocation3 + $0x100] sm:$0x1]  ;;  %v16585_v18 = vshll.u32 %v14475_v32, 16  ;;  %v5255_v41 = vrot.slane %v14470_v45, 4  ;;  %v14542_v32 = vld [vmem:[#allocation3 + $0x134] sm:$0xf] }
 0x357   : > { %v9448_v31 = vcombine.low %v5232_v14, %v5241_v21  ;;  %8337 = vmatmul.mubr.bf16.gmra.mrb[204].mxu0 %v9478_v20  ;;  %v5480_v50 = vshll.u32 %v5298_v51, 16  ;;  %v16586_v22 = vshll.u32 %v14451_v26, 16  ;;  %v5270_v12 = vshrl.u32 %v14516_v34, 16  ;;  %v508_v51 = vld [vmem:[#allocation3 + $0x130] sm:$0x8]  ;;  %v14530_v20 = vpop.f32.mrb[129].mxu1 }
 0x358   : > { %v5880_v62 = vor.u32 %v16585_v18, %v5877_v44  ;;  %8344 = vmatprep.mubr.bf16.mxu0 %v9495_v47  ;;  %v5273_v21 = vshll.u32 %v14516_v34, 16  ;;  %v5279_v24 = vshrl.u32 %v14518_v3, 16  ;;  %v9466_v42 = vcombine.low %v14516_v34, %v14518_v3  ;;  %v5565_v58 = vld [vmem:[#allocation3 + $0x11c] sm:$0x8]  ;;  %16588 = vst [vmem:[#allocation52_spill] sm:$0xff] %v14542_v32 }
 0x359   : > { %v5262_v28 = vor.u32 %v16586_v22, %v5259_v35  ;;  %8192 = vmatmul.mubr.bf16.gmra.mrb[180].mxu1 %v9448_v31  ;;  %v5475_v45 = vsel %vm11582_vm10, %v5473_v2, %v14489_v15  ;;  %v5482_v35 = vrot.slane %v5480_v50, 5  ;;  %v16587_v14 = vshll.u32 %v14466_v8, 16  ;;  %v4928_v47 = vld [vmem:[#allocation3 + $0x11c] sm:$0x8]  ;;  %v14544_v15 = vpop.f32.mrb[130].mxu1 }
 0x35a   : > { %8199 = vmatprep.mubr.bf16.mxu1 %v9465_v25  ;;  %v557_v31 = vsel %vm11551_vm8, 0, %v556_v6  ;;  %v5861_v18 = vshrl.u32 %v5565_v58, 16  ;;  %v5881_v34 = vsel %vm11561_vm9, %v5873_v13, %v5880_v62  ;;  %v5243_v22 = vshrl.u32 %v4928_v47, 16  ;;  %v14552_v58 = vld [vmem:[#allocation3 + $0x138] sm:$0xf]  ;;  %v14554_v13 = vpop.f32.mrb[131].mxu1 }
 0x35b   : > { %v5871_v44 = vor.u32 %v16587_v14, %v5868_v37  ;;  %558 = vst [vmem:[#allocation3 + $0x114] sm:$0x1] %v557_v31  ;;  %v5483_v2 = vsel %vm11582_vm10, %v5478_v52, %v5482_v35  ;;  %v5263_v37 = vsel %vm11561_vm9, %v5255_v41, %v5262_v28  ;;  %v14550_v50 = vrot.slane %v5270_v12, 7  ;;  %16589 = vst [vmem:[#allocation53_spill] sm:$0xff] %v14552_v58 }
 0x35c   : > { %v5281_v6 = vrot.slane %v5279_v24, 7  ;;  %v9416_v62 = vrot.slane %v5861_v18, 11  ;;  %v9401_v14 = vrot.slane %v5243_v22, 11  ;;  %v14556_v47 = vrot.slane %v5270_v12, 4  ;;  %v559_v22 = vld [vmem:[#allocation3 + $0x128] sm:$0x1] }
 0x35d   : > { %v5486_v31 = vor.u32 %v14439_v43, %v14428_v46  ;;  %v9479_v25 = vcombine.low %v5475_v45, %v5483_v2  ;;  %v16590_v52 = vshll.u32 %v14399_v56, 16  ;;  %v509_v41 = vsel %vm11545_vm3, 0, %v508_v51 }
 0x35e   : > { %v16185_v28 = vshrl.u32 %v14542_v32, 16  ;;  %v5872_v8 = vsel %vm11561_vm9, %v9416_v62, %v5871_v44  ;;  %v5254_v12 = vsel %vm11561_vm9, %v9401_v14, %v14499_v61  ;;  %510 = vst [vmem:[#allocation3 + $0x130] sm:$0x8] %v509_v41  ;;  %v16182_v46 = vshrl.u32 %v14552_v58, 16 }
 0x35f   : > { %v5488_v35 = vrot.slane %v16590_v52, 5  ;;  %v5487_v18 = vrot.slane %v5486_v31, 4  ;;  %8345 = vmatmul.mubr.bf16.gmra.mrb[208].mxu0 %v9479_v25  ;;  %v9496_v43 = vcombine.low %v5872_v8, %v5881_v34  ;;  %v9449_v56 = vcombine.low %v5254_v12, %v5263_v37 }
 0x360   : > { %v5890_v51 = vrot.slane %v16185_v28, 7  ;;  %v14574_v2 = vrot.slane %v5273_v21, 5  ;;  %v16184_v44 = vshll.u32 %v14542_v32, 16  ;;  %v5899_v61 = vrot.slane %v16182_v46, 7 }
 0x361   : > { %v5491_v45 = vor.u32 %v14441_v10, %v5488_v35  ;;  %v16183_v62 = vshll.u32 %v14552_v58, 16  ;;  %8352 = vmatprep.mubr.bf16.mxu0 %v9496_v43  ;;  %8200 = vmatmul.mubr.bf16.gmra.mrb[184].mxu1 %v9449_v56  ;;  %v14580_v25 = vrot.slane %v5279_v24, 4  ;;  %v5489_v10 = vsel %vm11582_vm10, %v5487_v18, %v5488_v35 }
 0x362   : > { %v5299_v8 = vld [vmem:[#allocation3 + $0x114] sm:$0x1]  ;;  %v5275_v37 = vor.u32 %v5273_v21, %v14550_v50  ;;  %8207 = vmatprep.mubr.bf16.mxu1 %v9466_v42  ;;  %v5893_v31 = vor.u32 %v16184_v44, %v5890_v51  ;;  %v560_v41 = vsel %vm11551_vm8, 0, %v559_v22  ;;  %v16591_v24 = vshll.u32 %v14518_v3, 16  ;;  %v5926_v21 = vld [vmem:[#allocation3 + $0x24] sm:$0x1] }
 0x363   : > { %v5492_v34 = vrot.slane %v5491_v45, 4  ;;  %v5494_v14 = vshll.u32 %v5299_v8, 16  ;;  %v5902_v52 = vor.u32 %v16183_v62, %v5899_v61  ;;  %561 = vst [vmem:[#allocation3 + $0x128] sm:$0x1] %v560_v41  ;;  %v16592_v35 = vshll.u32 %v14451_v26, 16  ;;  %v16595_v22 = vld [vmem:[#allocation43_spill] sm:$0xff] }
 0x364   : > { %v5284_v12 = vor.u32 %v16591_v24, %v5281_v6  ;;  %v16593_v42 = vshrl.u32 %v13648_v30, 16  ;;  %v16594_v56 = vshll.u32 %v13648_v30, 16  ;;  %v5895_v61 = vrot.slane %v5890_v51, 4  ;;  %v511_v6 = vld [vmem:[#allocation3 + $0x144] sm:$0x8] }
 0x365   : > { %v14595_v18 = vrot.slane %v16592_v35, 5  ;;  %v5496_v8 = vrot.slane %v5494_v14, 5  ;;  %v5277_v46 = vrot.slane %v14550_v50, 4  ;;  %v16596_v62 = vshll.u32 %v16595_v22, 16  ;;  %v5568_v41 = vld [vmem:[#allocation3 + $0x130] sm:$0x8] }
 0x366   : > { %v5942_v43 = vrot.slane %v16593_v42, 4  ;;  %v5943_v45 = vrot.slane %v16594_v56, 5  ;;  %v4931_v24 = vld [vmem:[#allocation3 + $0x130] sm:$0x8]  ;;  %v5500_v26 = vor.u32 %v14479_v40, %v14477_v0  ;;  %v16597_v30 = vshrl.u32 %v16595_v22, 16 }
 0x367   : > { %v5946_v44 = vrot.slane %v16596_v62, 5  ;;  %v5505_v35 = vor.u32 %v14491_v57, %v14595_v18  ;;  %v5497_v51 = vsel %vm11582_vm10, %v5492_v34, %v5496_v8  ;;  %v5883_v50 = vshrl.u32 %v5568_v41, 16  ;;  %v14612_v62 = vld [vmem:[#allocation3 + $0x148] sm:$0xf]  ;;  %v14618_v40 = vld [vmem:[#allocation3 + $0x14c] sm:$0xf] }
 0x368   : > { %v5944_v42 = vor.u32 %v5943_v45, %v5942_v43  ;;  %v5948_v56 = vrot.slane %v16597_v30, 4  ;;  %v5265_v14 = vshrl.u32 %v4931_v24, 16  ;;  %v5952_v28 = vshll.u32 %v5926_v21, 16 }
 0x369   : > { %v9480_v58 = vcombine.low %v5489_v10, %v5497_v51  ;;  %v5903_v32 = vsel %vm11561_vm9, %v5895_v61, %v5902_v52  ;;  %v5285_v0 = vsel %vm11561_vm9, %v5277_v46, %v5284_v12  ;;  %v9417_v43 = vrot.slane %v5883_v50, 11 }
 0x36a   : > { %v5945_v57 = vrot.slane %v5944_v42, 4  ;;  %v9402_v45 = vrot.slane %v5265_v14, 11  ;;  %v5949_v22 = vor.u32 %v5948_v56, %v5946_v44  ;;  %v5954_v30 = vrot.slane %v5952_v28, 5  ;;  %v5300_v12 = vld [vmem:[#allocation3 + $0x128] sm:$0x1] }
 0x36b   : > { %8353 = vmatmul.mubr.bf16.gmra.mrb[212].mxu0 %v9480_v58  ;;  %v5501_v34 = vrot.slane %v5500_v26, 4  ;;  %v5506_v8 = vrot.slane %v5505_v35, 4  ;;  %v512_v21 = vsel %vm11545_vm3, 0, %v511_v6  ;;  %v16196_v10 = vshrl.u32 %v14612_v62, 16  ;;  %v562_v6 = vld [vmem:[#allocation3 + $0x13c] sm:$0x1] }
 0x36c   : > { %v5894_v52 = vsel %vm11561_vm9, %v9417_v43, %v5893_v31  ;;  %v5276_v46 = vsel %vm11561_vm9, %v9402_v45, %v5275_v37  ;;  %v5950_v61 = vrot.slane %v5949_v22, 4  ;;  %513 = vst [vmem:[#allocation3 + $0x144] sm:$0x8] %v512_v21  ;;  %v16190_v41 = vshrl.u32 %v14618_v40, 16  ;;  %v5927_v45 = vld [vmem:[#allocation3 + $0x38] sm:$0x1] }
 0x36d   : > { %v9497_v28 = vcombine.low %v5894_v52, %v5903_v32  ;;  %v9450_v58 = vcombine.low %v5276_v46, %v5285_v0  ;;  %v5508_v24 = vshll.u32 %v5300_v12, 16  ;;  %v5912_v26 = vrot.slane %v16196_v10, 7  ;;  %v14650_v22 = vld [vmem:[#allocation3 + $0x30] sm:$0xf]  ;;  %v16602_v12 = vld [vmem:[#allocation46_spill] sm:$0xff] }
 0x36e   : > { %v5947_v35 = vsel %vm11582_vm10, %v5945_v57, %v5946_v44  ;;  %v5955_v31 = vsel %vm11582_vm10, %v5950_v61, %v5954_v30  ;;  %v5921_v37 = vrot.slane %v16190_v41, 7  ;;  %v16191_v42 = vshll.u32 %v14618_v40, 16  ;;  %v16599_v30 = vld [vmem:[#allocation45_spill] sm:$0xff] }
 0x36f   : > { %8360 = vmatprep.mubr.bf16.mxu0 %v9497_v28  ;;  %8208 = vmatmul.mubr.bf16.gmra.mrb[188].mxu1 %v9450_v58  ;;  %v5503_v32 = vsel %vm11582_vm10, %v5501_v34, %v14595_v18  ;;  %v5510_v56 = vrot.slane %v5508_v24, 5  ;;  %v9515_v51 = vcombine.low %v5947_v35, %v5955_v31  ;;  %v5917_v50 = vrot.slane %v5912_v26, 4 }
 0x370   : > { %v5924_v44 = vor.u32 %v16191_v42, %v5921_v37  ;;  %v563_v14 = vsel %vm11551_vm8, 0, %v562_v6  ;;  %v5514_v0 = vor.u32 %v14574_v2, %v14556_v47  ;;  %v16598_v57 = vshll.u32 %v14518_v3, 16 }
 0x371   : > { %v5511_v18 = vsel %vm11582_vm10, %v5506_v8, %v5510_v56  ;;  %8409 = vmatprep.mubr.bf16.mxu1 %v9515_v51  ;;  %564 = vst [vmem:[#allocation3 + $0x13c] sm:$0x1] %v563_v14  ;;  %v16600_v34 = vshrl.u32 %v16599_v30, 16  ;;  %v16601_v52 = vshll.u32 %v16599_v30, 16  ;;  %v16603_v47 = vshll.u32 %v16602_v12, 16 }
 0x372   : > { %v14648_v43 = vrot.slane %v16598_v57, 5  ;;  %v9481_v3 = vcombine.low %v5503_v32, %v5511_v18  ;;  %v16192_v61 = vshll.u32 %v14612_v62, 16  ;;  %v14661_v28 = vrot.slane %v5514_v0, 4  ;;  %v14665_v8 = vld [vmem:[#allocation3 + $0x34] sm:$0xf] }
 0x373   : > { %v5956_v21 = vrot.slane %v16600_v34, 4  ;;  %v5957_v46 = vrot.slane %v16601_v52, 5  ;;  %v5960_v2 = vrot.slane %v16603_v47, 5  ;;  %v5571_v24 = vld [vmem:[#allocation3 + $0x144] sm:$0x8]  ;;  %v16604_v35 = vshrl.u32 %v16602_v12, 16 }
 0x374   : > { %v5519_v58 = vor.u32 %v14580_v25, %v14648_v43  ;;  %v5966_v37 = vshll.u32 %v5927_v45, 16  ;;  %v16209_v56 = vshrl.u32 %v14650_v22, 16  ;;  %8361 = vmatmul.mubr.bf16.gmra.mrb[216].mxu0 %v9481_v3  ;;  %v5905_v51 = vshrl.u32 %v5571_v24, 16  ;;  %v11109_v0 = vld [vmem:[#allocation3 + $0x1c] sm:$0xf]  ;;  %v11048_v45 = vld [vmem:[#allocation9 + $0x208] sm:$0xff]  }
 0x375   : > { %v5958_v6 = vor.u32 %v5957_v46, %v5956_v21  ;;  %v5962_v31 = vrot.slane %v16604_v35, 4  ;;  %v5915_v32 = vor.u32 %v16192_v61, %v5912_v26  ;;  %v5925_v14 = vsel %vm11561_vm9, %v5917_v50, %v5924_v44  ;;  %v11110_v25 = vld [vmem:[#allocation3 + $0x20] sm:$0xf]  ;;  %v11111_v35 = vld [vmem:[#allocation9 + $0x200] sm:$0xff]  }
 0x376   : > { %v9499_v57 = vcombine.low %v11109_v0, %v11110_v25  ;;  %v5968_v34 = vrot.slane %v5966_v37, 5  ;;  %v6223_v21 = vrot.slane %v16209_v56, 7  ;;  %v9418_v52 = vrot.slane %v5905_v51, 11  ;;  %v14695_v25 = vld [vmem:[#allocation3 + $0x44] sm:$0xf] }
 0x377   : > { %v5959_v18 = vrot.slane %v5958_v6, 4  ;;  %v5963_v30 = vor.u32 %v5962_v31, %v5960_v2  ;;  %v5517_v46 = vsel %vm11582_vm10, %v14661_v28, %v14648_v43  ;;  %v16207_v26 = vshll.u32 %v14650_v22, 16 }
 0x378   : > { %v16206_v50 = vshrl.u32 %v14665_v8, 16  ;;  %8410 = vmatmul.mubr.bf16.vlgmr.msra.gmra.mrb[192].mxu1 %v9499_v57  ;;  %v5520_v44 = vrot.slane %v5519_v58, 4  ;;  %v16193_v3 = vshll.u32 %v14665_v8, 16  ;;  %v5916_v24 = vsel %vm11561_vm9, %v9418_v52, %v5915_v32  ;;  %v5301_v6 = vld [vmem:[#allocation3 + $0x13c] sm:$0x1] }
 0x379   : > { %v5961_v12 = vsel %vm11582_vm10, %v5959_v18, %v5960_v2  ;;  %v5964_v47 = vrot.slane %v5963_v30, 4  ;;  %10733 = vmatpush3.bf16.msra.mxu1 %v11111_v35  ;;  %v6226_v43 = vor.u32 %v16207_v26, %v6223_v21  ;;  %v6228_v28 = vrot.slane %v6223_v21, 4  ;;  %v6167_v58 = vld [vmem:[#allocation3 + $0x2c] sm:$0x8]  ;;  %v5928_v32 = vld [vmem:[#allocation3 + $0x4c] sm:$0x1] }
 0x37a   : > { %v6232_v31 = vrot.slane %v16206_v50, 7  ;;  %v9498_v37 = vcombine.low %v5916_v24, %v5925_v14  ;;  %v5522_v51 = vshll.u32 %v5301_v6, 16  ;;  %v9547_v0 = vcombine.low %v14650_v22, %v14665_v8  ;;  %10734 = vmatprep.subr.bf16.mxu1 %v11048_v45  ;;  %v11052_v57 = vld [vmem:[#allocation9 + $0x210] sm:$0xff]   ;;  %v11112_v21 = vld [vmem:[#allocation3 + $0x30] sm:$0xf] }
 0x37b   : > { %v5969_v2 = vsel %vm11582_vm10, %v5964_v47, %v5968_v34  ;;  %v11113_v52 = vld [vmem:[#allocation3 + $0x34] sm:$0xf]  ;;  %v16605_v14 = vshrl.u32 %v13795_v23, 16  ;;  %v16606_v47 = vshll.u32 %v13795_v23, 16  ;;  %v16607_v41 = vshll.u32 %v13812_v17, 16 }
 0x37c   : > { %v9516_v18 = vcombine.low %v5961_v12, %v5969_v2  ;;  %v6235_v30 = vor.u32 %v16193_v3, %v6232_v31  ;;  %v9500_v35 = vcombine.low %v11112_v21, %v11113_v52  ;;  %8368 = vmatprep.mubr.bf16.mxu0 %v9498_v37  ;;  %v5524_v34 = vrot.slane %v5522_v51, 5  ;;  %v14709_v52 = vld [vmem:[#allocation3 + $0x48] sm:$0xf] }
 0x37d   : > { %v5970_v24 = vrot.slane %v16605_v14, 4  ;;  %v5971_v6 = vrot.slane %v16606_v47, 5  ;;  %v5974_v42 = vrot.slane %v16607_v41, 5  ;;  %v16608_v61 = vshrl.u32 %v13812_v17, 16  ;;  %10735 = vmatpush3.bf16.msra.mxu1 %v11048_v45  ;;  %v6568_v17 = vld [vmem:[#allocation3 + $0x4c] sm:$0x1] }
 0x37e   : > { %8417 = vmatprep.mubr.bf16.mxu1 %v9516_v18  ;;  %v5980_v2 = vshll.u32 %v5928_v32, 16  ;;  %v6216_v31 = vshrl.u32 %v6167_v58, 16  ;;  %v6236_v21 = vsel %vm11561_vm9, %v6228_v28, %v6235_v30  ;;  %v6243_v37 = vshrl.u32 %v14695_v25, 16  ;;  %10736 = vmatprep.subr.bf16.mxu1 %v11052_v57 }
 0x37f   : > { %v5976_v12 = vrot.slane %v16608_v61, 4  ;;  %v5525_v23 = vsel %vm11582_vm10, %v5520_v44, %v5524_v34  ;;  %v5972_v51 = vor.u32 %v5971_v6, %v5970_v24  ;;  %v6246_v41 = vshll.u32 %v14695_v25, 16  ;;  %v11056_v61 = vld [vmem:[#allocation9 + $0x218] sm:$0xff]  }
 0x380   : > { %v9482_v32 = vcombine.low %v5517_v46, %v5525_v23  ;;  %v5982_v58 = vrot.slane %v5980_v2, 5  ;;  %v9419_v18 = vrot.slane %v6216_v31, 11  ;;  %v14715_v47 = vrot.slane %v6243_v37, 7  ;;  %8418 = vmatmul.mubr.bf16.gmra.mrb[196].mxu1 %v9500_v35  ;;  %v11060_v31 = vld [vmem:[#allocation9 + $0x220] sm:$0xff]  }
 0x381   : > { %v5977_v14 = vor.u32 %v5976_v12, %v5974_v42  ;;  %v5973_v28 = vrot.slane %v5972_v51, 4  ;;  %v6252_v45 = vshrl.u32 %v14709_v52, 16  ;;  %v6255_v3 = vshll.u32 %v14709_v52, 16  ;;  %10737 = vmatpush3.bf16.msra.mxu1 %v11052_v57  ;;  %v11114_v57 = vld [vmem:[#allocation3 + $0x44] sm:$0xf] }
 0x382   : > { %8369 = vmatmul.mubr.bf16.gmra.mrb[220].mxu0 %v9482_v32  ;;  %v6227_v44 = vsel %vm11561_vm9, %v9419_v18, %v6226_v43  ;;  %v6597_v24 = vrot.slane %v6243_v37, 4  ;;  %v6598_v34 = vrot.slane %v6246_v41, 5  ;;  %v6607_v6 = vshll.u32 %v6568_v17, 16  ;;  %10738 = vmatprep.subr.bf16.mxu1 %v11056_v61  ;;  %v5929_v43 = vld [vmem:[#allocation3 + $0x60] sm:$0x1] }
 0x383   : > { %v5978_v30 = vrot.slane %v5977_v14, 4  ;;  %8570 = vmatprep.mubr.bf16.mxu0 %v9547_v0  ;;  %v5975_v46 = vsel %vm11582_vm10, %v5973_v28, %v5974_v42  ;;  %v9531_v12 = vcombine.low %v6227_v44, %v6236_v21  ;;  %v6254_v2 = vrot.slane %v6252_v45, 7  ;;  %v6170_v37 = vld [vmem:[#allocation3 + $0x40] sm:$0x8]  ;;  %v11115_v17 = vld [vmem:[#allocation3 + $0x48] sm:$0xf] }
 0x384   : > { %v6599_v51 = vor.u32 %v6598_v34, %v6597_v24  ;;  %v6601_v14 = vrot.slane %v6255_v3, 5  ;;  %v6603_v32 = vrot.slane %v6252_v45, 4  ;;  %v6609_v18 = vrot.slane %v6607_v6, 5 }
 0x385   : > { %v5983_v35 = vsel %vm11582_vm10, %v5978_v30, %v5982_v58  ;;  %v9548_v0 = vcombine.low %v14695_v25, %v14709_v52  ;;  %v9501_v42 = vcombine.low %v11114_v57, %v11115_v17  ;;  %v16609_v28 = vshrl.u32 %v13899_v4, 16  ;;  %10739 = vmatpush3.bf16.msra.mxu1 %v11056_v61  ;;  %v14736_v57 = vld [vmem:[#allocation3 + $0x58] sm:$0xf] }
 0x386   : > { %v9517_v23 = vcombine.low %v5975_v46, %v5983_v35  ;;  %v6600_v21 = vrot.slane %v6599_v51, 4  ;;  %v6604_v30 = vor.u32 %v6603_v32, %v6601_v14  ;;  %v16610_v44 = vshll.u32 %v13899_v4, 16  ;;  %10740 = vmatprep.subr.bf16.mxu1 %v11060_v31 }
 0x387   : > { %v5984_v58 = vrot.slane %v16609_v28, 4  ;;  %v16611_v45 = vshll.u32 %v13906_v1, 16  ;;  %v16612_v6 = vshrl.u32 %v13906_v1, 16  ;;  %v5994_v25 = vshll.u32 %v5929_v43, 16  ;;  %v14741_v43 = vld [vmem:[#allocation3 + $0x5c] sm:$0xf] }
 0x388   : > { %8425 = vmatprep.mubr.bf16.mxu1 %v9517_v23  ;;  %v5985_v24 = vrot.slane %v16610_v44, 5  ;;  %v6238_v52 = vshrl.u32 %v6170_v37, 16  ;;  %v6248_v35 = vor.u32 %v6246_v41, %v14715_v47  ;;  %v11064_v23 = vld [vmem:[#allocation9 + $0x228] sm:$0xff]   ;;  %v6602_v51 = vsel %vm11582_vm10, %v6600_v21, %v6601_v14  ;;  %16613 = vst [vmem:[#allocation54_spill] sm:$0xff] %v14741_v43 }
 0x389   : > { %v5988_v34 = vrot.slane %v16611_v45, 5  ;;  %v5990_v46 = vrot.slane %v16612_v6, 4  ;;  %v6605_v4 = vrot.slane %v6604_v30, 4  ;;  %v6250_v17 = vrot.slane %v14715_v47, 4  ;;  %8426 = vmatmul.mubr.bf16.gmra.mrb[200].mxu1 %v9501_v42  ;;  %v11068_v42 = vld [vmem:[#allocation9 + $0x230] sm:$0xff]  }
 0x38a   : > { %v5986_v32 = vor.u32 %v5985_v24, %v5984_v58  ;;  %v5996_v28 = vrot.slane %v5994_v25, 5  ;;  %v9420_v1 = vrot.slane %v6238_v52, 11  ;;  %v6257_v44 = vor.u32 %v6255_v3, %v6254_v2  ;;  %8571 = vmatmul.mubr.bf16.vlgmr.msra.gmra.mrb[224].mxu0 %v9531_v12  ;;  %10741 = vmatpush3.bf16.msra.mxu1 %v11060_v31  ;;  %v5930_v30 = vld [vmem:[#allocation3 + $0x74] sm:$0x1]  ;;  %v6173_v24 = vld [vmem:[#allocation3 + $0x54] sm:$0x8] }
 0x38b   : > { %v5991_v61 = vor.u32 %v5990_v46, %v5988_v34  ;;  %v6610_v41 = vsel %vm11582_vm10, %v6605_v4, %v6609_v18  ;;  %v16204_v45 = vshrl.u32 %v14736_v57, 16  ;;  %8578 = vmatprep.mubr.bf16.mxu0 %v9548_v0  ;;  %10742 = vmatprep.subr.bf16.mxu1 %v11064_v23  ;;  %v16195_v31 = vshrl.u32 %v14741_v43, 16  ;;  %v14765_v52 = vld [vmem:[#allocation3 + $0x6c] sm:$0xf] }
 0x38c   : > { %v5987_v37 = vrot.slane %v5986_v32, 4  ;;  %v14746_v14 = vcombine.low %v6602_v51, %v6610_v41  ;;  %v6258_v47 = vsel %vm11561_vm9, %v6250_v17, %v6257_v44  ;;  %v6249_v12 = vsel %vm11561_vm9, %v9420_v1, %v6248_v35  ;;  %v11116_v35 = vld [vmem:[#allocation3 + $0x58] sm:$0xf]  ;;  %v11117_v51 = vld [vmem:[#allocation3 + $0x5c] sm:$0xf]  ;;  %v11072_v41 = vld [vmem:[#allocation9 + $0x238] sm:$0xff]  }
 0x38d   : > { %v5992_v58 = vrot.slane %v5991_v61, 4  ;;  %v6267_v2 = vrot.slane %v16204_v45, 7  ;;  %v9532_v0 = vcombine.low %v6249_v12, %v6258_v47  ;;  %v16201_v21 = vshll.u32 %v14736_v57, 16  ;;  %v14777_v12 = vld [vmem:[#allocation3 + $0x70] sm:$0xf] }
 0x38e   : > { %16614 = vst [vmem:[#allocation51_spill] sm:$0xff] %v14746_v14  ;;  %v5989_v3 = vsel %vm11582_vm10, %v5987_v37, %v5988_v34  ;;  %v6276_v34 = vrot.slane %v16195_v31, 7  ;;  %v16194_v46 = vshll.u32 %v14741_v43, 16  ;;  %v9549_v25 = vcombine.low %v14736_v57, %v14741_v43  ;;  %10743 = vmatpush3.bf16.msra.mxu1 %v11064_v23  ;;  %v11131_v43 = vld [vmem:[#allocation3 + $0xe8] sm:$0xf] }
 0x38f   : > { %v5997_v18 = vsel %vm11582_vm10, %v5992_v58, %v5996_v28  ;;  %v9502_v4 = vcombine.low %v11116_v35, %v11117_v51  ;;  %v16615_v32 = vshrl.u32 %v13973_v49, 16  ;;  %v16616_v61 = vshll.u32 %v13973_v49, 16  ;;  %10744 = vmatprep.subr.bf16.mxu1 %v11068_v42 }
 0x390   : > { %v9518_v6 = vcombine.low %v5989_v3, %v5997_v18  ;;  %v16617_v1 = vshll.u32 %v13984_v53, 16  ;;  %v16618_v37 = vshrl.u32 %v13984_v53, 16  ;;  %v6008_v47 = vshll.u32 %v5930_v30, 16 }
 0x391   : > { %v5998_v17 = vrot.slane %v16615_v32, 4  ;;  %v5999_v28 = vrot.slane %v16616_v61, 5  ;;  %v6260_v23 = vshrl.u32 %v6173_v24, 16  ;;  %v6270_v3 = vor.u32 %v16201_v21, %v6267_v2  ;;  %v11123_v21 = vld [vmem:[#allocation3 + $0x98] sm:$0xf] }
 0x392   : > { %v6002_v44 = vrot.slane %v16617_v1, 5  ;;  %8433 = vmatprep.mubr.bf16.mxu1 %v9518_v6  ;;  %v6004_v58 = vrot.slane %v16618_v37, 4  ;;  %v6272_v49 = vrot.slane %v6267_v2, 4  ;;  %v6279_v35 = vor.u32 %v16194_v46, %v6276_v34  ;;  %8579 = vmatmul.mubr.bf16.gmra.mrb[228].mxu0 %v9532_v0 }
 0x393   : > { %8434 = vmatmul.mubr.bf16.gmra.mrb[204].mxu1 %v9502_v4  ;;  %v6000_v18 = vor.u32 %v5999_v28, %v5998_v17  ;;  %v6287_v51 = vshrl.u32 %v14765_v52, 16  ;;  %v6010_v32 = vrot.slane %v6008_v47, 5  ;;  %v9421_v53 = vrot.slane %v6260_v23, 11  ;;  %8586 = vmatprep.mubr.bf16.mxu0 %v9549_v25  ;;  %v6570_v17 = vld [vmem:[#allocation3 + $0x74] sm:$0x1] }
 0x394   : > { %v6005_v6 = vor.u32 %v6004_v58, %v6002_v44  ;;  %v6290_v30 = vshll.u32 %v14765_v52, 16  ;;  %10745 = vmatpush3.bf16.msra.mxu1 %v11068_v42  ;;  %v6280_v61 = vsel %vm11561_vm9, %v6272_v49, %v6279_v35  ;;  %v6296_v2 = vshrl.u32 %v14777_v12, 16  ;;  %v5931_v35 = vld [vmem:[#allocation3 + $0x88] sm:$0x1] }
 0x395   : > { %v6001_v24 = vrot.slane %v6000_v18, 4  ;;  %v6289_v4 = vrot.slane %v6287_v51, 7  ;;  %10746 = vmatprep.subr.bf16.mxu1 %v11072_v41  ;;  %v6271_v0 = vsel %vm11561_vm9, %v9421_v53, %v6270_v3  ;;  %v6299_v28 = vshll.u32 %v14777_v12, 16  ;;  %v11119_v53 = vld [vmem:[#allocation3 + $0x70] sm:$0xf] }
 0x396   : > { %v6006_v34 = vrot.slane %v6005_v6, 4  ;;  %v6625_v1 = vrot.slane %v6287_v51, 4  ;;  %v9533_v25 = vcombine.low %v6271_v0, %v6280_v61  ;;  %v6298_v37 = vrot.slane %v6296_v2, 7  ;;  %v11118_v51 = vld [vmem:[#allocation3 + $0x6c] sm:$0xf] }
 0x397   : > { %v6003_v42 = vsel %vm11582_vm10, %v6001_v24, %v6002_v44  ;;  %v6626_v58 = vrot.slane %v6290_v30, 5  ;;  %v6629_v23 = vrot.slane %v6299_v28, 5  ;;  %v6631_v18 = vrot.slane %v6296_v2, 4  ;;  %v6176_v44 = vld [vmem:[#allocation3 + $0x68] sm:$0x8] }
 0x398   : > { %v6011_v47 = vsel %vm11582_vm10, %v6006_v34, %v6010_v32  ;;  %v6635_v49 = vshll.u32 %v6570_v17, 16  ;;  %10747 = vmatpush3.bf16.msra.mxu1 %v11072_v41  ;;  %v9550_v3 = vcombine.low %v14765_v52, %v14777_v12  ;;  %v9503_v31 = vcombine.low %v11118_v51, %v11119_v53  ;;  %v14807_v53 = vld [vmem:[#allocation3 + $0x84] sm:$0xf] }
 0x399   : > { %v9519_v6 = vcombine.low %v6003_v42, %v6011_v47  ;;  %v6627_v46 = vor.u32 %v6626_v58, %v6625_v1  ;;  %v6632_v24 = vor.u32 %v6631_v18, %v6629_v23  ;;  %v16619_v0 = vshrl.u32 %v14057_v38, 16  ;;  %16624 = vst [vmem:[#allocation57_spill] sm:$0xff] %v14807_v53 }
 0x39a   : > { %v6637_v61 = vrot.slane %v6635_v49, 5  ;;  %v16620_v32 = vshll.u32 %v14057_v38, 16  ;;  %v16621_v41 = vshll.u32 %v14062_v29, 16  ;;  %v16622_v1 = vshrl.u32 %v14062_v29, 16  ;;  %8587 = vmatmul.mubr.bf16.gmra.mrb[232].mxu0 %v9533_v25  ;;  %v14803_v49 = vld [vmem:[#allocation3 + $0x80] sm:$0xf] }
 0x39b   : > { %v6012_v10 = vrot.slane %v16619_v0, 4  ;;  %8441 = vmatprep.mubr.bf16.mxu1 %v9519_v6  ;;  %v6628_v17 = vrot.slane %v6627_v46, 4  ;;  %v6022_v12 = vshll.u32 %v5931_v35, 16  ;;  %v6633_v42 = vrot.slane %v6632_v24, 4  ;;  %16623 = vst [vmem:[#allocation56_spill] sm:$0xff] %v14803_v49  ;;  %8594 = vmatprep.mubr.bf16.mxu0 %v9550_v3 }
 0x39c   : > { %v6013_v2 = vrot.slane %v16620_v32, 5  ;;  %v6016_v34 = vrot.slane %v16621_v41, 5  ;;  %v6018_v52 = vrot.slane %v16622_v1, 4  ;;  %8442 = vmatmul.mubr.bf16.gmra.mrb[208].mxu1 %v9503_v31  ;;  %v6282_v47 = vshrl.u32 %v6176_v44, 16  ;;  %v6179_v41 = vld [vmem:[#allocation3 + $0x7c] sm:$0x8] }
 0x39d   : > { %v6292_v18 = vor.u32 %v6290_v30, %v6289_v4  ;;  %v6630_v38 = vsel %vm11582_vm10, %v6628_v17, %v6629_v23  ;;  %v6024_v6 = vrot.slane %v6022_v12, 5  ;;  %v6294_v51 = vrot.slane %v6289_v4, 4  ;;  %v11121_v12 = vld [vmem:[#allocation3 + $0x84] sm:$0xf] }
 0x39e   : > { %v6014_v58 = vor.u32 %v6013_v2, %v6012_v10  ;;  %v6019_v46 = vor.u32 %v6018_v52, %v6016_v34  ;;  %v6638_v29 = vsel %vm11582_vm10, %v6633_v42, %v6637_v61  ;;  %v9422_v35 = vrot.slane %v6282_v47, 11  ;;  %v11120_v52 = vld [vmem:[#allocation3 + $0x80] sm:$0xf] }
 0x39f   : > { %v6301_v31 = vor.u32 %v6299_v28, %v6298_v37  ;;  %v14811_v10 = vcombine.low %v6630_v38, %v6638_v29  ;;  %v16200_v44 = vshrl.u32 %v14803_v49, 16  ;;  %v16198_v4 = vshrl.u32 %v14807_v53, 16  ;;  %v5932_v37 = vld [vmem:[#allocation3 + $0x9c] sm:$0x1] }
 0x3a0   : > { %v6015_v25 = vrot.slane %v6014_v58, 4  ;;  %v6020_v30 = vrot.slane %v6019_v46, 4  ;;  %v6293_v61 = vsel %vm11561_vm9, %v9422_v35, %v6292_v18  ;;  %v16199_v2 = vshll.u32 %v14803_v49, 16  ;;  %v14833_v18 = vld [vmem:[#allocation3 + $0x94] sm:$0xf] }
 0x3a1   : > { %16625 = vst [vmem:[#allocation58_spill] sm:$0xff] %v14811_v10  ;;  %v6302_v3 = vsel %vm11561_vm9, %v6294_v51, %v6301_v31  ;;  %v6311_v28 = vrot.slane %v16200_v44, 7  ;;  %v6320_v17 = vrot.slane %v16198_v4, 7  ;;  %v9551_v1 = vcombine.low %v14803_v49, %v14807_v53  ;;  %v14841_v31 = vld [vmem:[#allocation3 + $0x98] sm:$0xf] }
 0x3a2   : > { %v6017_v23 = vsel %vm11582_vm10, %v6015_v25, %v6016_v34  ;;  %v6025_v24 = vsel %vm11582_vm10, %v6020_v30, %v6024_v6  ;;  %v9534_v32 = vcombine.low %v6293_v61, %v6302_v3  ;;  %v16197_v34 = vshll.u32 %v14807_v53, 16  ;;  %v11122_v44 = vld [vmem:[#allocation3 + $0x94] sm:$0xf] }
 0x3a3   : > { %v9520_v0 = vcombine.low %v6017_v23, %v6025_v24  ;;  %v9504_v42 = vcombine.low %v11120_v52, %v11121_v12  ;;  %v16626_v58 = vshrl.u32 %v14106_v55, 16  ;;  %v16627_v38 = vshll.u32 %v14106_v55, 16  ;;  %v6572_v52 = vld [vmem:[#allocation3 + $0x9c] sm:$0x1]  ;;  %v14852_v12 = vpop.f32.mrb[132].mxu1 }
 0x3a4   : > { %8595 = vmatmul.mubr.bf16.gmra.mrb[236].mxu0 %v9534_v32  ;;  %v16628_v6 = vshll.u32 %v14112_v39, 16  ;;  %v16629_v29 = vshrl.u32 %v14112_v39, 16  ;;  %v6036_v35 = vshll.u32 %v5932_v37, 16  ;;  %v6304_v30 = vshrl.u32 %v6179_v41, 16 }
 0x3a5   : > { %v6026_v47 = vrot.slane %v16626_v58, 4  ;;  %8449 = vmatprep.mubr.bf16.mxu1 %v9520_v0  ;;  %v6027_v46 = vrot.slane %v16627_v38, 5  ;;  %8602 = vmatprep.mubr.bf16.mxu0 %v9551_v1  ;;  %v6314_v23 = vor.u32 %v16199_v2, %v6311_v28  ;;  %v6316_v3 = vrot.slane %v6311_v28, 4 }
 0x3a6   : > { %v6030_v51 = vrot.slane %v16628_v6, 5  ;;  %v6032_v25 = vrot.slane %v16629_v29, 4  ;;  %8450 = vmatmul.mubr.bf16.gmra.mrb[212].mxu1 %v9504_v42  ;;  %v6323_v55 = vor.u32 %v16197_v34, %v6320_v17  ;;  %v6038_v0 = vrot.slane %v6036_v35, 5 }
 0x3a7   : > { %v6028_v24 = vor.u32 %v6027_v46, %v6026_v47  ;;  %v6331_v32 = vshrl.u32 %v14833_v18, 16  ;;  %v9423_v39 = vrot.slane %v6304_v30, 11  ;;  %v6334_v1 = vshll.u32 %v14833_v18, 16  ;;  %v14855_v47 = vpop.f32.mrb[133].mxu1 }
 0x3a8   : > { %v6033_v61 = vor.u32 %v6032_v25, %v6030_v51  ;;  %v6324_v37 = vsel %vm11561_vm9, %v6316_v3, %v6323_v55  ;;  %v6340_v41 = vshrl.u32 %v14841_v31, 16  ;;  %v6343_v17 = vshll.u32 %v14841_v31, 16  ;;  %v14859_v25 = vpop.f32.mrb[134].mxu1 }
 0x3a9   : > { %v6029_v28 = vrot.slane %v6028_v24, 4  ;;  %v6333_v58 = vrot.slane %v6331_v32, 7  ;;  %v6315_v38 = vsel %vm11561_vm9, %v9423_v39, %v6314_v23  ;;  %v6653_v6 = vrot.slane %v6331_v32, 4  ;;  %v14865_v24 = vpop.f32.mrb[135].mxu1  ;;  %v5933_v23 = vld [vmem:[#allocation3 + $0xb0] sm:$0x1] }
 0x3aa   : > { %v6034_v42 = vrot.slane %v6033_v61, 4  ;;  %v6342_v46 = vrot.slane %v6340_v41, 7  ;;  %v6654_v29 = vrot.slane %v6334_v1, 5  ;;  %v9535_v3 = vcombine.low %v6315_v38, %v6324_v37  ;;  %v6182_v39 = vld [vmem:[#allocation3 + $0x90] sm:$0x8] }
 0x3ab   : > { %v6031_v35 = vsel %vm11582_vm10, %v6029_v28, %v6030_v51  ;;  %v6657_v55 = vrot.slane %v6343_v17, 5  ;;  %v6659_v4 = vrot.slane %v6340_v41, 4  ;;  %v6663_v2 = vshll.u32 %v6572_v52, 16 }
 0x3ac   : > { %v6039_v30 = vsel %vm11582_vm10, %v6034_v42, %v6038_v0  ;;  %v6655_v34 = vor.u32 %v6654_v29, %v6653_v6  ;;  %8603 = vmatmul.mubr.bf16.gmra.mrb[240].mxu0 %v9535_v3  ;;  %v9552_v32 = vcombine.low %v14833_v18, %v14841_v31  ;;  %v9505_v51 = vcombine.low %v11122_v44, %v11123_v21  ;;  %v14879_v3 = vpop.f32.mrb[160].mxu0 }
 0x3ad   : > { %v9521_v61 = vcombine.low %v6031_v35, %v6039_v30  ;;  %v16630_v28 = vshrl.u32 %v14155_v59, 16  ;;  %v16631_v37 = vshll.u32 %v14155_v59, 16  ;;  %v6660_v6 = vor.u32 %v6659_v4, %v6657_v55  ;;  %v14877_v30 = vld [vmem:[#allocation3 + $0xa8] sm:$0xf] }
 0x3ae   : > { %v6656_v38 = vrot.slane %v6655_v34, 4  ;;  %v6665_v41 = vrot.slane %v6663_v2, 5  ;;  %v16632_v52 = vshll.u32 %v14164_v36, 16  ;;  %8610 = vmatprep.mubr.bf16.mxu0 %v9552_v32  ;;  %v16633_v18 = vshrl.u32 %v14164_v36, 16  ;;  %16634 = vst [vmem:[#allocation55_spill] sm:$0xff] %v14877_v30  ;;  %v14883_v34 = vpop.f32.mrb[161].mxu0 }
 0x3af   : > { %v6040_v0 = vrot.slane %v16630_v28, 4  ;;  %v6041_v42 = vrot.slane %v16631_v37, 5  ;;  %8457 = vmatprep.mubr.bf16.mxu1 %v9521_v61  ;;  %v6050_v21 = vshll.u32 %v5933_v23, 16  ;;  %v6326_v44 = vshrl.u32 %v6182_v39, 16  ;;  %v14887_v36 = vpop.f32.mrb[162].mxu0 }
 0x3b0   : > { %v6044_v29 = vrot.slane %v16632_v52, 5  ;;  %8458 = vmatmul.mubr.bf16.gmra.mrb[216].mxu1 %v9505_v51  ;;  %v6046_v31 = vrot.slane %v16633_v18, 4  ;;  %v6658_v59 = vsel %vm11582_vm10, %v6656_v38, %v6657_v55  ;;  %v6661_v4 = vrot.slane %v6660_v6, 4  ;;  %v14892_v55 = vpop.f32.mrb[163].mxu0 }
 0x3b1   : > { %v6042_v35 = vor.u32 %v6041_v42, %v6040_v0  ;;  %v6336_v2 = vor.u32 %v6334_v1, %v6333_v58  ;;  %v6052_v51 = vrot.slane %v6050_v21, 5  ;;  %v9424_v28 = vrot.slane %v6326_v44, 11  ;;  %v14885_v0 = vld [vmem:[#allocation3 + $0xac] sm:$0xf]  ;;  %v14908_v21 = vpop.f32.mrb[136].mxu1 }
 0x3b2   : > { %v6047_v32 = vor.u32 %v6046_v31, %v6044_v29  ;;  %16635 = vst [vmem:[#allocation59_spill] sm:$0xff] %v14885_v0  ;;  %v6666_v23 = vsel %vm11582_vm10, %v6661_v4, %v6665_v41  ;;  %v6338_v39 = vrot.slane %v6333_v58, 4  ;;  %v6345_v37 = vor.u32 %v6343_v17, %v6342_v46  ;;  %v5934_v31 = vld [vmem:[#allocation3 + $0xc4] sm:$0x1] }
 0x3b3   : > { %v6043_v61 = vrot.slane %v6042_v35, 4  ;;  %v16203_v42 = vshrl.u32 %v14877_v30, 16  ;;  %v14894_v1 = vcombine.low %v6658_v59, %v6666_v23  ;;  %v6337_v52 = vsel %vm11561_vm9, %v9424_v28, %v6336_v2  ;;  %v11125_v28 = vld [vmem:[#allocation3 + $0xac] sm:$0xf] }
 0x3b4   : > { %v6048_v6 = vrot.slane %v6047_v32, 4  ;;  %v6346_v35 = vsel %vm11561_vm9, %v6338_v39, %v6345_v37  ;;  %v16202_v17 = vshrl.u32 %v14885_v0, 16  ;;  %v16205_v18 = vshll.u32 %v14877_v30, 16  ;;  %v14917_v32 = vpop.f32.mrb[137].mxu1 }
 0x3b5   : > { %16636 = vst [vmem:[#allocation64_spill] sm:$0xff] %v14894_v1  ;;  %v6045_v38 = vsel %vm11582_vm10, %v6043_v61, %v6044_v29  ;;  %v6355_v58 = vrot.slane %v16203_v42, 7  ;;  %v9536_v41 = vcombine.low %v6337_v52, %v6346_v35  ;;  %v6185_v29 = vld [vmem:[#allocation3 + $0xa4] sm:$0x8]  ;;  %v16208_v4 = vshll.u32 %v14885_v0, 16 }
 0x3b6   : > { %v6053_v46 = vsel %vm11582_vm10, %v6048_v6, %v6052_v51  ;;  %v6364_v59 = vrot.slane %v16202_v17, 7  ;;  %v9553_v2 = vcombine.low %v14877_v30, %v14885_v0  ;;  %v14915_v61 = vld [vmem:[#allocation3 + $0xbc] sm:$0xf]  ;;  %v11124_v51 = vld [vmem:[#allocation3 + $0xa8] sm:$0xf]  ;;  %v16637_v39 = vshrl.u32 %v14207_v63, 16 }
 0x3b7   : > { %v9522_v44 = vcombine.low %v6045_v38, %v6053_v46  ;;  %8611 = vmatmul.mubr.bf16.gmra.mrb[244].mxu0 %v9536_v41  ;;  %v9506_v23 = vcombine.low %v11124_v51, %v11125_v28  ;;  %v16638_v38 = vshll.u32 %v14207_v63, 16  ;;  %v16639_v52 = vshll.u32 %v14215_v11, 16  ;;  %v14925_v46 = vpop.f32.mrb[138].mxu1  ;;  %v14931_v28 = vld [vmem:[#allocation3 + $0xc0] sm:$0xf] }
 0x3b8   : > { %v6054_v37 = vrot.slane %v16637_v39, 4  ;;  %8618 = vmatprep.mubr.bf16.mxu0 %v9553_v2  ;;  %v16640_v17 = vshrl.u32 %v14215_v11, 16  ;;  %v6064_v41 = vshll.u32 %v5934_v31, 16  ;;  %v6348_v45 = vshrl.u32 %v6185_v29, 16  ;;  %v14933_v39 = vpop.f32.mrb[139].mxu1 }
 0x3b9   : > { %v6055_v6 = vrot.slane %v16638_v38, 5  ;;  %v6058_v35 = vrot.slane %v16639_v52, 5  ;;  %8465 = vmatprep.mubr.bf16.mxu1 %v9522_v44  ;;  %v6358_v51 = vor.u32 %v16205_v18, %v6355_v58  ;;  %v6360_v38 = vrot.slane %v6355_v58, 4  ;;  %v5935_v1 = vld [vmem:[#allocation3 + $0xd8] sm:$0x1] }
 0x3ba   : > { %v6060_v42 = vrot.slane %v16640_v17, 4  ;;  %8466 = vmatmul.mubr.bf16.gmra.mrb[220].mxu1 %v9506_v23  ;;  %v6367_v52 = vor.u32 %v16208_v4, %v6364_v59  ;;  %v6375_v44 = vshrl.u32 %v14915_v61, 16  ;;  %v6066_v11 = vrot.slane %v6064_v41, 5  ;;  %v6574_v23 = vld [vmem:[#allocation3 + $0xc4] sm:$0x1] }
 0x3bb   : > { %v6056_v63 = vor.u32 %v6055_v6, %v6054_v37  ;;  %v9425_v17 = vrot.slane %v6348_v45, 11  ;;  %v6378_v31 = vshll.u32 %v14915_v61, 16  ;;  %v6384_v26 = vshrl.u32 %v14931_v28, 16 }
 0x3bc   : > { %v6061_v2 = vor.u32 %v6060_v42, %v6058_v35  ;;  %v6368_v18 = vsel %vm11561_vm9, %v6360_v38, %v6367_v52  ;;  %v6377_v50 = vrot.slane %v6375_v44, 7  ;;  %v6387_v59 = vshll.u32 %v14931_v28, 16 }
 0x3bd   : > { %v6057_v29 = vrot.slane %v6056_v63, 4  ;;  %v6359_v58 = vsel %vm11561_vm9, %v9425_v17, %v6358_v51  ;;  %v6681_v6 = vrot.slane %v6375_v44, 4  ;;  %v6386_v41 = vrot.slane %v6384_v26, 7  ;;  %v11126_v44 = vld [vmem:[#allocation3 + $0xbc] sm:$0xf] }
 0x3be   : > { %v6062_v37 = vrot.slane %v6061_v2, 4  ;;  %v9537_v42 = vcombine.low %v6359_v58, %v6368_v18  ;;  %v6682_v63 = vrot.slane %v6378_v31, 5  ;;  %v6685_v52 = vrot.slane %v6387_v59, 5  ;;  %v11127_v17 = vld [vmem:[#allocation3 + $0xc0] sm:$0xf] }
 0x3bf   : > { %v6059_v45 = vsel %vm11582_vm10, %v6057_v29, %v6058_v35  ;;  %v6687_v4 = vrot.slane %v6384_v26, 4  ;;  %v6691_v56 = vshll.u32 %v6574_v23, 16  ;;  %v9554_v51 = vcombine.low %v14915_v61, %v14931_v28  ;;  %v6188_v35 = vld [vmem:[#allocation3 + $0xb8] sm:$0x8] }
 0x3c0   : > { %v6067_v38 = vsel %vm11582_vm10, %v6062_v37, %v6066_v11  ;;  %8619 = vmatmul.mubr.bf16.gmra.mrb[248].mxu0 %v9537_v42  ;;  %v6683_v10 = vor.u32 %v6682_v63, %v6681_v6  ;;  %v9507_v14 = vcombine.low %v11126_v44, %v11127_v17  ;;  %v16641_v58 = vshrl.u32 %v14258_v5, 16  ;;  %v14959_v42 = vld [vmem:[#allocation3 + $0xd0] sm:$0xf]  ;;  %v6191_v44 = vld [vmem:[#allocation3 + $0xcc] sm:$0x8] }
 0x3c1   : > { %v9523_v2 = vcombine.low %v6059_v45, %v6067_v38  ;;  %v6688_v18 = vor.u32 %v6687_v4, %v6685_v52  ;;  %v6693_v29 = vrot.slane %v6691_v56, 5  ;;  %v16642_v11 = vshll.u32 %v14258_v5, 16  ;;  %8626 = vmatprep.mubr.bf16.mxu0 %v9554_v51  ;;  %16645 = vst [vmem:[#allocation69_spill] sm:$0xff] %v14959_v42  ;;  %v14961_v5 = vpop.f32.mrb[164].mxu0 }
 0x3c2   : > { %v6068_v0 = vrot.slane %v16641_v58, 4  ;;  %v6684_v23 = vrot.slane %v6683_v10, 4  ;;  %v16643_v37 = vshll.u32 %v14267_v27, 16  ;;  %v16644_v61 = vshrl.u32 %v14267_v27, 16  ;;  %v14965_v58 = vpop.f32.mrb[165].mxu0 }
 0x3c3   : > { %v6069_v26 = vrot.slane %v16642_v11, 5  ;;  %8473 = vmatprep.mubr.bf16.mxu1 %v9523_v2  ;;  %v6078_v45 = vshll.u32 %v5935_v1, 16  ;;  %v6689_v4 = vrot.slane %v6688_v18, 4  ;;  %v6370_v63 = vshrl.u32 %v6188_v35, 16  ;;  %v14973_v11 = vld [vmem:[#allocation3 + $0xd4] sm:$0xf] }
 0x3c4   : > { %v6072_v6 = vrot.slane %v16643_v37, 5  ;;  %v6074_v28 = vrot.slane %v16644_v61, 4  ;;  %8474 = vmatmul.mubr.bf16.gmra.mrb[224].mxu1 %v9507_v14  ;;  %v6380_v38 = vor.u32 %v6378_v31, %v6377_v50  ;;  %v6686_v10 = vsel %vm11582_vm10, %v6684_v23, %v6685_v52  ;;  %16647 = vst [vmem:[#allocation16_spill] sm:$0xff] %v14973_v11  ;;  %v14985_v37 = vpop.f32.mrb[140].mxu1 }
 0x3c5   : > { %v6070_v56 = vor.u32 %v6069_v26, %v6068_v0  ;;  %v6080_v51 = vrot.slane %v6078_v45, 5  ;;  %v6382_v17 = vrot.slane %v6377_v50, 4  ;;  %v6694_v27 = vsel %vm11582_vm10, %v6689_v4, %v6693_v29  ;;  %v14969_v0 = vpop.f32.mrb[166].mxu0 }
 0x3c6   : > { %v6075_v2 = vor.u32 %v6074_v28, %v6072_v6  ;;  %v9426_v18 = vrot.slane %v6370_v63, 11  ;;  %v6389_v14 = vor.u32 %v6387_v59, %v6386_v41  ;;  %v14971_v31 = vcombine.low %v6686_v10, %v6694_v27  ;;  %v14976_v23 = vpop.f32.mrb[167].mxu0  ;;  %v6194_v27 = vld [vmem:[#allocation3 + $0xe0] sm:$0x8] }
 0x3c7   : > { %v6071_v1 = vrot.slane %v6070_v56, 4  ;;  %v6392_v26 = vshrl.u32 %v6191_v44, 16  ;;  %v16213_v52 = vshrl.u32 %v14959_v42, 16  ;;  %v16212_v41 = vshll.u32 %v14959_v42, 16  ;;  %v14991_v56 = vpop.f32.mrb[141].mxu1 }
 0x3c8   : > { %16646 = vst [vmem:[#allocation70_spill] sm:$0xff] %v14971_v31  ;;  %v6076_v35 = vrot.slane %v6075_v2, 4  ;;  %v6381_v29 = vsel %vm11561_vm9, %v9426_v18, %v6380_v38  ;;  %v6390_v59 = vsel %vm11561_vm9, %v6382_v17, %v6389_v14  ;;  %v16214_v63 = vshrl.u32 %v14973_v11, 16  ;;  %v14994_v38 = vld [vmem:[#allocation3 + $0xe4] sm:$0xf]  ;;  %v14996_v44 = vpop.f32.mrb[142].mxu1 }
 0x3c9   : > { %v6073_v50 = vsel %vm11582_vm10, %v6071_v1, %v6072_v6  ;;  %v9538_v28 = vcombine.low %v6381_v29, %v6390_v59  ;;  %v9427_v45 = vrot.slane %v6392_v26, 11  ;;  %v6399_v4 = vrot.slane %v16213_v52, 7  ;;  %v5936_v17 = vld [vmem:[#allocation3 + $0xec] sm:$0x1]  ;;  %v15003_v1 = vpop.f32.mrb[143].mxu1 }
 0x3ca   : > { %v6081_v61 = vsel %vm11582_vm10, %v6076_v35, %v6080_v51  ;;  %v9555_v51 = vcombine.low %v14959_v42, %v14973_v11  ;;  %v6408_v14 = vrot.slane %v16214_v63, 7  ;;  %v11128_v35 = vld [vmem:[#allocation3 + $0xd0] sm:$0xf]  ;;  %v11129_v26 = vld [vmem:[#allocation3 + $0xd4] sm:$0xf]  ;;  %v16648_v29 = vshrl.u32 %v14310_v9, 16 }
 0x3cb   : > { %v9524_v6 = vcombine.low %v6073_v50, %v6081_v61  ;;  %8627 = vmatmul.mubr.bf16.gmra.mrb[252].mxu0 %v9538_v28  ;;  %v6402_v10 = vor.u32 %v16212_v41, %v6399_v4  ;;  %v6404_v18 = vrot.slane %v6399_v4, 4  ;;  %v9508_v50 = vcombine.low %v11128_v35, %v11129_v26  ;;  %v6196_v61 = vld [vmem:[#allocation3 + $0xe8] sm:$0xf] }
 0x3cc   : > { %v6082_v59 = vrot.slane %v16648_v29, 4  ;;  %8634 = vmatprep.mubr.bf16.mxu0 %v9555_v51  ;;  %v16649_v41 = vshll.u32 %v14310_v9, 16  ;;  %v16651_v2 = vshrl.u32 %v14318_v33, 16  ;;  %v16652_v31 = vshll.u32 %v14973_v11, 16 }
 0x3cd   : > { %8481 = vmatprep.mubr.bf16.mxu1 %v9524_v6  ;;  %v6403_v28 = vsel %vm11561_vm9, %v9427_v45, %v6402_v10  ;;  %v16650_v6 = vshll.u32 %v14318_v33, 16  ;;  %v6092_v26 = vshll.u32 %v5936_v17, 16  ;;  %v6414_v29 = vshrl.u32 %v6194_v27, 16 }
 0x3ce   : > { %v6083_v52 = vrot.slane %v16649_v41, 5  ;;  %v6088_v63 = vrot.slane %v16651_v2, 4  ;;  %v6411_v35 = vor.u32 %v16652_v31, %v6408_v14  ;;  %8482 = vmatmul.mubr.bf16.gmra.mrb[228].mxu1 %v9508_v50  ;;  %v6419_v42 = vshrl.u32 %v14994_v38, 16  ;;  %v15023_v14 = vpop.f32.mrb[168].mxu0 }
 0x3cf   : > { %v6086_v4 = vrot.slane %v16650_v6, 5  ;;  %v6422_v10 = vshll.u32 %v14994_v38, 16  ;;  %v6428_v9 = vshrl.u32 %v6196_v61, 16  ;;  %v6094_v51 = vrot.slane %v6092_v26, 5 }
 0x3d0   : > { %v6084_v30 = vor.u32 %v6083_v52, %v6082_v59  ;;  %v6412_v41 = vsel %vm11561_vm9, %v6404_v18, %v6411_v35  ;;  %v9428_v6 = vrot.slane %v6414_v29, 11  ;;  %v6421_v33 = vrot.slane %v6419_v42, 7  ;;  %v6576_v52 = vld [vmem:[#allocation3 + $0xec] sm:$0x1]  ;;  %v15025_v59 = vpop.f32.mrb[169].mxu0 }
 0x3d1   : > { %v6089_v45 = vor.u32 %v6088_v63, %v6086_v4  ;;  %v9539_v2 = vcombine.low %v6403_v28, %v6412_v41  ;;  %v6430_v31 = vrot.slane %v6428_v9, 7  ;;  %v6431_v50 = vshll.u32 %v6196_v61, 16  ;;  %v15031_v35 = vpop.f32.mrb[170].mxu0 }
 0x3d2   : > { %v6085_v16 = vrot.slane %v6084_v30, 4  ;;  %v6424_v17 = vor.u32 %v6422_v10, %v6421_v33  ;;  %v6426_v27 = vrot.slane %v6421_v33, 4  ;;  %v6709_v63 = vrot.slane %v6419_v42, 4  ;;  %v15035_v42 = vpop.f32.mrb[171].mxu0 }
 0x3d3   : > { %v6090_v11 = vrot.slane %v6089_v45, 4  ;;  %8635 = vmatmul.mubr.bf16.gmra.mrb[0].mxu0 %v9539_v2  ;;  %v6710_v28 = vrot.slane %v6422_v10, 5  ;;  %v6715_v30 = vrot.slane %v6428_v9, 4  ;;  %v6433_v45 = vor.u32 %v6431_v50, %v6430_v31  ;;  %v15038_v10 = vld [vmem:[#allocation3 + $0xf8] sm:$0xf]  ;;  %v15040_v9 = vpop.f32.mrb[144].mxu1 }
 0x3d4   : > { %v6087_v53 = vsel %vm11582_vm10, %v6085_v16, %v6086_v4  ;;  %v6425_v29 = vsel %vm11561_vm9, %v9428_v6, %v6424_v17  ;;  %v6713_v41 = vrot.slane %v6431_v50, 5  ;;  %v6719_v49 = vshll.u32 %v6576_v52, 16  ;;  %v11130_v4 = vld [vmem:[#allocation3 + $0xe4] sm:$0xf]  ;;  %16653 = vst [vmem:[#allocation19_spill] sm:$0xff] %v15038_v10 }
 0x3d5   : > { %v6095_v18 = vsel %vm11582_vm10, %v6090_v11, %v6094_v51  ;;  %v6711_v33 = vor.u32 %v6710_v28, %v6709_v63  ;;  %v9556_v16 = vcombine.low %v14994_v38, %v6196_v61  ;;  %v9509_v11 = vcombine.low %v11130_v4, %v11131_v43  ;;  %v5937_v51 = vld [vmem:[#allocation3 + $0x100] sm:$0x1]  ;;  %v6197_v38 = vld [vmem:[#allocation3 + $0xf4] sm:$0x8]  ;;  %v15048_v61 = vpop.f32.mrb[145].mxu1 }
 0x3d6   : > { %v9525_v26 = vcombine.low %v6087_v53, %v6095_v18  ;;  %v6434_v53 = vsel %vm11561_vm9, %v6426_v27, %v6433_v45  ;;  %v6716_v6 = vor.u32 %v6715_v30, %v6713_v41  ;;  %v16654_v2 = vshrl.u32 %v14368_v48, 16 }
 0x3d7   : > { %v16655_v17 = vshll.u32 %v14368_v48, 16  ;;  %v6712_v43 = vrot.slane %v6711_v33, 4  ;;  %v6721_v52 = vrot.slane %v6719_v49, 5  ;;  %v9540_v63 = vcombine.low %v6425_v29, %v6434_v53  ;;  %8642 = vmatprep.mubr.bf16.mxu0 %v9556_v16  ;;  %v16660_v49 = vld [vmem:[#allocation48_spill] sm:$0xff] }
 0x3d8   : > { %8489 = vmatprep.mubr.bf16.mxu1 %v9525_v26  ;;  %v6096_v31 = vrot.slane %v16654_v2, 4  ;;  %v16656_v18 = vshll.u32 %v14370_v19, 16  ;;  %v15052_v26 = vpop.f32.mrb[146].mxu1  ;;  %v6717_v27 = vrot.slane %v6716_v6, 4  ;;  %v16658_v45 = vshrl.u32 %v14370_v19, 16 }
 0x3d9   : > { %v6097_v50 = vrot.slane %v16655_v17, 5  ;;  %8490 = vmatmul.mubr.bf16.gmra.mrb[232].mxu1 %v9509_v11  ;;  %16657 = vst [vmem:[#allocation60_spill] sm:$0xff] %v15052_v26  ;;  %v6106_v48 = vshll.u32 %v5937_v51, 16  ;;  %v15056_v2 = vpop.f32.mrb[147].mxu1  ;;  %v6714_v33 = vsel %vm11582_vm10, %v6712_v43, %v6713_v41  ;;  %v15062_v29 = vadd.f32 %v14530_v20, %v16660_v49  ;;  %v15064_v16 = vld [vmem:[#allocation3 + $0xfc] sm:$0xf] }
 0x3da   : > { %v6100_v28 = vrot.slane %v16656_v18, 5  ;;  %v6102_v4 = vrot.slane %v16658_v45, 4  ;;  %16659 = vst [vmem:[#allocation61_spill] sm:$0xff] %v15056_v2  ;;  %16661 = vst [vmem:[#allocation62_spill] sm:$0xff] %v15064_v16  ;;  %v6436_v11 = vshrl.u32 %v6197_v38, 16  ;;  %v16230_v53 = vshrl.u32 %v15038_v10, 16 }
 0x3db   : > { %v6098_v30 = vor.u32 %v6097_v50, %v6096_v31  ;;  %v6722_v6 = vsel %vm11582_vm10, %v6717_v27, %v6721_v52  ;;  %v6108_v51 = vrot.slane %v6106_v48, 5  ;;  %8643 = vmatmul.mubr.bf16.gmra.mrb[4].mxu0 %v9540_v63  ;;  %v16228_v20 = vshll.u32 %v15038_v10, 16  ;;  %v15088_v48 = vld [vmem:[#allocation3 + $0x10c] sm:$0xf] }
 0x3dc   : > { %v6103_v31 = vor.u32 %v6102_v4, %v6100_v28  ;;  %v15069_v17 = vcombine.low %v6714_v33, %v6722_v6  ;;  %v9429_v50 = vrot.slane %v6436_v11, 11  ;;  %v6443_v41 = vrot.slane %v16230_v53, 7  ;;  %v6200_v6 = vld [vmem:[#allocation3 + $0x108] sm:$0x8]  ;;  %v16668_v53 = vld [vmem:[#allocation44_spill] sm:$0xff] }
 0x3dd   : > { %v6099_v19 = vrot.slane %v6098_v30, 4  ;;  %v16229_v18 = vshrl.u32 %v15064_v16, 16  ;;  %v16663_v52 = vshrl.u32 %v14650_v22, 16  ;;  %v16665_v30 = vshll.u32 %v14650_v22, 16  ;;  %v5938_v22 = vld [vmem:[#allocation3 + $0x114] sm:$0x1] }
 0x3de   : > { %16662 = vst [vmem:[#allocation63_spill] sm:$0xff] %v15069_v17  ;;  %v6104_v43 = vrot.slane %v6103_v31, 4  ;;  %v6446_v63 = vor.u32 %v16228_v20, %v6443_v41  ;;  %v16233_v4 = vshll.u32 %v15064_v16, 16  ;;  %v6448_v33 = vrot.slane %v6443_v41, 4  ;;  %v11133_v20 = vld [vmem:[#allocation3 + $0xfc] sm:$0xf] }
 0x3df   : > { %v6101_v38 = vsel %vm11582_vm10, %v6099_v19, %v6100_v28  ;;  %v15079_v27 = vrot.slane %v16663_v52, 4  ;;  %v15083_v45 = vrot.slane %v16665_v30, 5  ;;  %v6452_v49 = vrot.slane %v16229_v18, 7  ;;  %v11132_v30 = vld [vmem:[#allocation3 + $0xf8] sm:$0xf] }
 0x3e0   : > { %v6109_v28 = vsel %vm11582_vm10, %v6104_v43, %v6108_v51  ;;  %v9557_v11 = vcombine.low %v15038_v10, %v15064_v16  ;;  %v6447_v31 = vsel %vm11561_vm9, %v9429_v50, %v6446_v63  ;;  %v15100_v52 = vadd.f32 %v14554_v13, %v14544_v15  ;;  %v6202_v41 = vld [vmem:[#allocation3 + $0x110] sm:$0xf]  ;;  %v15102_v43 = vpop.f32.mrb[172].mxu0 }
 0x3e1   : > { %16664 = vst [vmem:[#allocation65_spill] sm:$0xff] %v15079_v27  ;;  %16666 = vst [vmem:[#allocation66_spill] sm:$0xff] %v15083_v45  ;;  %v9526_v19 = vcombine.low %v6101_v38, %v6109_v28  ;;  %v9510_v51 = vcombine.low %v11132_v30, %v11133_v20  ;;  %v6455_v18 = vor.u32 %v16233_v4, %v6452_v49  ;;  %v16669_v17 = vshrl.u32 %v16668_v53, 16  ;;  %v16671_v63 = vld [vmem:[#allocation47_spill] sm:$0xff]  ;;  %v15112_v13 = vpop.f32.mrb[173].mxu0 }
 0x3e2   : > { %16667 = vst [vmem:[#allocation67_spill] sm:$0xff] %v15102_v43  ;;  %8650 = vmatprep.mubr.bf16.mxu0 %v9557_v11  ;;  %v16670_v28 = vshll.u32 %v16668_v53, 16  ;;  %v16672_v10 = vshll.u32 %v16671_v63, 16  ;;  %16673 = vst [vmem:[#allocation68_spill] sm:$0xff] %v15112_v13  ;;  %v16674_v20 = vshrl.u32 %v16671_v63, 16  ;;  %v6120_v45 = vshll.u32 %v5938_v22, 16 }
 0x3e3   : > { %v6110_v38 = vrot.slane %v16669_v17, 4  ;;  %8497 = vmatprep.mubr.bf16.mxu1 %v9526_v19  ;;  %v6458_v27 = vshrl.u32 %v6200_v6, 16  ;;  %v6463_v49 = vshrl.u32 %v15088_v48, 16  ;;  %v15117_v11 = vpop.f32.mrb[174].mxu0  ;;  %v6456_v17 = vsel %vm11561_vm9, %v6448_v33, %v6455_v18  ;;  %v6578_v22 = vld [vmem:[#allocation3 + $0x114] sm:$0x1] }
 0x3e4   : > { %v6111_v50 = vrot.slane %v16670_v28, 5  ;;  %v6114_v15 = vrot.slane %v16672_v10, 5  ;;  %v6116_v30 = vrot.slane %v16674_v20, 4  ;;  %16675 = vst [vmem:[#allocation71_spill] sm:$0xff] %v15117_v11  ;;  %8498 = vmatmul.mubr.bf16.gmra.mrb[236].mxu1 %v9510_v51  ;;  %v6466_v28 = vshll.u32 %v15088_v48, 16  ;;  %v15122_v4 = vpop.f32.mrb[175].mxu0 }
 0x3e5   : > { %v6472_v10 = vshrl.u32 %v6202_v41, 16  ;;  %v9541_v19 = vcombine.low %v6447_v31, %v6456_v17  ;;  %v6122_v63 = vrot.slane %v6120_v45, 5  ;;  %v9430_v20 = vrot.slane %v6458_v27, 11  ;;  %v15124_v11 = vpop.f32.mrb[148].mxu1 }
 0x3e6   : > { %v6112_v53 = vor.u32 %v6111_v50, %v6110_v38  ;;  %v6117_v16 = vor.u32 %v6116_v30, %v6114_v15  ;;  %v6465_v2 = vrot.slane %v6463_v49, 7  ;;  %v6475_v13 = vshll.u32 %v6202_v41, 16  ;;  %16676 = vst [vmem:[#allocation72_spill] sm:$0xff] %v15124_v11  ;;  %v15126_v38 = vpop.f32.mrb[149].mxu1 }
 0x3e7   : > { %v6474_v26 = vrot.slane %v6472_v10, 7  ;;  %8651 = vmatmul.mubr.bf16.gmra.mrb[8].mxu0 %v9541_v19  ;;  %v6737_v18 = vrot.slane %v6463_v49, 4  ;;  %v6738_v33 = vrot.slane %v6466_v28, 5  ;;  %v6743_v51 = vrot.slane %v6472_v10, 4  ;;  %v15130_v30 = vpop.f32.mrb[150].mxu1 }
 0x3e8   : > { %v6113_v6 = vrot.slane %v6112_v53, 4  ;;  %v6118_v43 = vrot.slane %v6117_v16, 4  ;;  %v6468_v50 = vor.u32 %v6466_v28, %v6465_v2  ;;  %v6470_v45 = vrot.slane %v6465_v2, 4  ;;  %16677 = vst [vmem:[#allocation73_spill] sm:$0xff] %v15130_v30  ;;  %v15134_v19 = vpop.f32.mrb[151].mxu1 }
 0x3e9   : > { %v6477_v27 = vor.u32 %v6475_v13, %v6474_v26  ;;  %v6739_v53 = vor.u32 %v6738_v33, %v6737_v18  ;;  %v6741_v11 = vrot.slane %v6475_v13, 5  ;;  %v6747_v16 = vshll.u32 %v6578_v22, 16  ;;  %v16678_v22 = vld [vmem:[#allocation49_spill] sm:$0xff]  ;;  %v6203_v18 = vld [vmem:[#allocation3 + $0x11c] sm:$0x8] }
 0x3ea   : > { %v6115_v31 = vsel %vm11582_vm10, %v6113_v6, %v6114_v15  ;;  %v6123_v17 = vsel %vm11582_vm10, %v6118_v43, %v6122_v63  ;;  %v6469_v10 = vsel %vm11561_vm9, %v9430_v20, %v6468_v50  ;;  %v9558_v2 = vcombine.low %v15088_v48, %v6202_v41  ;;  %v5939_v20 = vld [vmem:[#allocation3 + $0x128] sm:$0x1] }
 0x3eb   : > { %v9527_v49 = vcombine.low %v6115_v31, %v6123_v17  ;;  %v6478_v15 = vsel %vm11561_vm9, %v6470_v45, %v6477_v27  ;;  %v6740_v26 = vrot.slane %v6739_v53, 4  ;;  %v6744_v28 = vor.u32 %v6743_v51, %v6741_v11  ;;  %v11135_v31 = vld [vmem:[#allocation3 + $0x110] sm:$0xf]  ;;  %v16684_v27 = vld [vmem:[#allocation50_spill] sm:$0xff] }
 0x3ec   : > { %v6749_v6 = vrot.slane %v6747_v16, 5  ;;  %v9542_v30 = vcombine.low %v6469_v10, %v6478_v15  ;;  %8658 = vmatprep.mubr.bf16.mxu0 %v9558_v2  ;;  %v15143_v43 = vadd.f32 %v14855_v47, %v14852_v12  ;;  %v10342_v13 = vadd.f32 %v14883_v34, %v14879_v3  ;;  %v11134_v47 = vld [vmem:[#allocation3 + $0x10c] sm:$0xf]  ;;  %v15157_v3 = vld [vmem:[#allocation3 + $0x120] sm:$0xf] }
 0x3ed   : > { %8505 = vmatprep.mubr.bf16.mxu1 %v9527_v49  ;;  %v15149_v63 = vadd.f32 %v14865_v24, %v14859_v25  ;;  %v16679_v48 = vshrl.u32 %v16678_v22, 16  ;;  %v6742_v33 = vsel %vm11582_vm10, %v6740_v26, %v6741_v11  ;;  %v6745_v51 = vrot.slane %v6744_v28, 4  ;;  %16680 = vst [vmem:[#allocation74_spill] sm:$0xff] %v15157_v3  ;;  %v15159_v34 = vld [vmem:[#allocation3 + $0x124] sm:$0xf] }
 0x3ee   : > { %v10345_v12 = vadd.f32 %v14892_v55, %v14887_v36  ;;  %v9511_v50 = vcombine.low %v11134_v47, %v11135_v31  ;;  %16681 = vst [vmem:[#allocation17_spill] sm:$0xff] %v15159_v34  ;;  %v15162_v25 = vadd.f32 %v10342_v13, %v15062_v29  ;;  %v16683_v24 = vshll.u32 %v16678_v22, 16  ;;  %v15170_v36 = vpop.f32.mrb[176].mxu0  ;;  %v15172_v55 = vpop.f32.mrb[152].mxu1 }
 0x3ef   : > { %v6124_v41 = vrot.slane %v16679_v48, 4  ;;  %v16685_v17 = vshll.u32 %v16684_v27, 16  ;;  %v16686_v53 = vshrl.u32 %v16684_v27, 16  ;;  %v6750_v49 = vsel %vm11582_vm10, %v6745_v51, %v6749_v6  ;;  %8659 = vmatmul.mubr.bf16.gmra.mrb[12].mxu0 %v9542_v30  ;;  %v15179_v2 = vpop.f32.mrb[177].mxu0  ;;  %v15181_v26 = vpop.f32.mrb[153].mxu1 }
 0x3f0   : > { %16682 = vst [vmem:[#allocation18_spill] sm:$0xff] %v15162_v25  ;;  %v6125_v45 = vrot.slane %v16683_v24, 5  ;;  %v15177_v10 = vadd.f32 %v10345_v12, %v15100_v52  ;;  %8506 = vmatmul.mubr.bf16.gmra.mrb[240].mxu1 %v9511_v50  ;;  %v6134_v29 = vshll.u32 %v5939_v20, 16  ;;  %v6480_v15 = vshrl.u32 %v6203_v18, 16  ;;  %v15186_v47 = vpop.f32.mrb[178].mxu0  ;;  %v15188_v6 = vpop.f32.mrb[154].mxu1 }
 0x3f1   : > { %v6128_v11 = vrot.slane %v16685_v17, 5  ;;  %v6130_v16 = vrot.slane %v16686_v53, 4  ;;  %v15183_v28 = vcombine.low %v6742_v33, %v6750_v49  ;;  %v16239_v48 = vshrl.u32 %v15157_v3, 16  ;;  %v15195_v12 = vpop.f32.mrb[179].mxu0  ;;  %v15197_v33 = vpop.f32.mrb[155].mxu1 }
 0x3f2   : > { %16687 = vst [vmem:[#allocation75_spill] sm:$0xff] %v15177_v10  ;;  %v6126_v13 = vor.u32 %v6125_v45, %v6124_v41  ;;  %v16689_v52 = vshrl.u32 %v14665_v8, 16  ;;  %v6136_v30 = vrot.slane %v6134_v29, 5  ;;  %v9431_v20 = vrot.slane %v6480_v15, 11 }
 0x3f3   : > { %16688 = vst [vmem:[#allocation76_spill] sm:$0xff] %v15183_v28  ;;  %v6131_v22 = vor.u32 %v6130_v16, %v6128_v11  ;;  %v16236_v18 = vshrl.u32 %v15159_v34, 16  ;;  %v6487_v50 = vrot.slane %v16239_v48, 7  ;;  %v16238_v24 = vshll.u32 %v15157_v3, 16 }
 0x3f4   : > { %v15192_v51 = vrot.slane %v16689_v52, 4  ;;  %v6127_v41 = vrot.slane %v6126_v13, 4  ;;  %v16690_v45 = vshrl.u32 %v14736_v57, 16  ;;  %v16691_v17 = vshll.u32 %v14736_v57, 16 }
 0x3f5   : > { %v6132_v31 = vrot.slane %v6131_v22, 4  ;;  %v6496_v16 = vrot.slane %v16236_v18, 7  ;;  %v16237_v49 = vshll.u32 %v15159_v34, 16  ;;  %v6490_v13 = vor.u32 %v16238_v24, %v6487_v50  ;;  %v15227_v18 = vld [vmem:[#allocation3 + $0x134] sm:$0xf] }
 0x3f6   : > { %v15204_v27 = vrot.slane %v16690_v45, 4  ;;  %v15208_v53 = vrot.slane %v16691_v17, 5  ;;  %v6129_v29 = vsel %vm11582_vm10, %v6127_v41, %v6128_v11  ;;  %v6492_v22 = vrot.slane %v6487_v50, 4  ;;  %v5940_v50 = vld [vmem:[#allocation3 + $0x13c] sm:$0x1] }
 0x3f7   : > { %v6137_v15 = vsel %vm11582_vm10, %v6132_v31, %v6136_v30  ;;  %v6499_v57 = vor.u32 %v16237_v49, %v6496_v16  ;;  %v9559_v45 = vcombine.low %v15157_v3, %v15159_v34  ;;  %v15225_v17 = vadd.f32 %v14917_v32, %v14908_v21  ;;  %v6206_v16 = vld [vmem:[#allocation3 + $0x130] sm:$0x8]  ;;  %v11136_v32 = vld [vmem:[#allocation3 + $0x120] sm:$0xf]  ;;  %v6208_v49 = vld [vmem:[#allocation3 + $0x138] sm:$0xf] }
 0x3f8   : > { %v9528_v52 = vcombine.low %v6129_v29, %v6137_v15  ;;  %v6491_v11 = vsel %vm11561_vm9, %v9431_v20, %v6490_v13  ;;  %v10348_v30 = vadd.f32 %v14965_v58, %v14961_v5  ;;  %v15235_v41 = vadd.f32 %v14933_v39, %v14925_v46  ;;  %v15239_v29 = vpop.f32.mrb[156].mxu1  ;;  %v11137_v20 = vld [vmem:[#allocation3 + $0x124] sm:$0xf]  ;;  %v16693_v5 = vld [vmem:[#allocation52_spill] sm:$0xff] }
 0x3f9   : > { %v10351_v31 = vadd.f32 %v14976_v23, %v14969_v0  ;;  %16692 = vst [vmem:[#allocation79_spill] sm:$0xff] %v15239_v29  ;;  %v6500_v21 = vsel %vm11561_vm9, %v6492_v22, %v6499_v57  ;;  %8666 = vmatprep.mubr.bf16.mxu0 %v9559_v45  ;;  %v9512_v15 = vcombine.low %v11136_v32, %v11137_v20  ;;  %v16694_v58 = vshrl.u32 %v16693_v5, 16  ;;  %v15247_v0 = vpop.f32.mrb[180].mxu0  ;;  %v15249_v23 = vpop.f32.mrb[157].mxu1  ;;  %v16699_v57 = vld [vmem:[#allocation53_spill] sm:$0xff] }
 0x3fa   : > { %8513 = vmatprep.mubr.bf16.mxu1 %v9528_v52  ;;  %v16695_v46 = vshll.u32 %v16693_v5, 16  ;;  %16696 = vst [vmem:[#allocation80_spill] sm:$0xff] %v15249_v23  ;;  %v9543_v24 = vcombine.low %v6491_v11, %v6500_v21  ;;  %v15252_v52 = vadd.f32 %v10348_v30, %v15143_v43  ;;  %v16700_v45 = vshll.u32 %v16699_v57, 16  ;;  %v15259_v20 = vpop.f32.mrb[181].mxu0 }
 0x3fb   : > { %v6138_v13 = vrot.slane %v16694_v58, 4  ;;  %v15255_v22 = vadd.f32 %v10351_v31, %v15149_v63  ;;  %v15261_v58 = vpop.f32.mrb[158].mxu1  ;;  %8514 = vmatmul.mubr.bf16.gmra.mrb[244].mxu1 %v9512_v15  ;;  %v6148_v10 = vshll.u32 %v5940_v50, 16  ;;  %v6502_v11 = vshrl.u32 %v6206_v16, 16  ;;  %v15265_v21 = vpop.f32.mrb[182].mxu0 }
 0x3fc   : > { %v6139_v39 = vrot.slane %v16695_v46, 5  ;;  %16697 = vst [vmem:[#allocation81_spill] sm:$0xff] %v15252_v52  ;;  %v6142_v32 = vrot.slane %v16700_v45, 5  ;;  %16701 = vst [vmem:[#allocation82_spill] sm:$0xff] %v15261_v58  ;;  %v16702_v46 = vshrl.u32 %v16699_v57, 16  ;;  %v15267_v43 = vpop.f32.mrb[159].mxu1  ;;  %8667 = vmatmul.mubr.bf16.gmra.mrb[16].mxu0 %v9543_v24 }
 0x3fd   : > { %16698 = vst [vmem:[#allocation20_spill] sm:$0xff] %v15255_v22  ;;  %16703 = vst [vmem:[#allocation83_spill] sm:$0xff] %v15267_v43  ;;  %v6507_v63 = vshrl.u32 %v15227_v18, 16  ;;  %v6510_v30 = vshll.u32 %v15227_v18, 16  ;;  %v6516_v31 = vshrl.u32 %v6208_v49, 16  ;;  %v6519_v45 = vshll.u32 %v6208_v49, 16 }
 0x3fe   : > { %v6140_v5 = vor.u32 %v6139_v39, %v6138_v13  ;;  %v6144_v48 = vrot.slane %v16702_v46, 4  ;;  %v15271_v22 = vpop.f32.mrb[183].mxu0  ;;  %v6150_v39 = vrot.slane %v6148_v10, 5  ;;  %v9432_v57 = vrot.slane %v6502_v11, 11  ;;  %v6580_v16 = vld [vmem:[#allocation3 + $0x13c] sm:$0x1] }
 0x3ff   : > { %16704 = vst [vmem:[#allocation84_spill] sm:$0xff] %v15271_v22  ;;  %v6509_v46 = vrot.slane %v6507_v63, 7  ;;  %v6518_v50 = vrot.slane %v6516_v31, 7  ;;  %v6765_v52 = vrot.slane %v6507_v63, 4  ;;  %v6766_v25 = vrot.slane %v6510_v30, 5  ;;  %v15278_v22 = vpop.f32.mrb[160].mxu1 }
 0x400   : > { %v6141_v15 = vrot.slane %v6140_v5, 4  ;;  %v6145_v13 = vor.u32 %v6144_v48, %v6142_v32  ;;  %v6769_v43 = vrot.slane %v6519_v45, 5  ;;  %v6771_v58 = vrot.slane %v6516_v31, 4 }
 0x401   : > { %v6512_v34 = vor.u32 %v6510_v30, %v6509_v46  ;;  %v6514_v23 = vrot.slane %v6509_v46, 4  ;;  %v6521_v29 = vor.u32 %v6519_v45, %v6518_v50  ;;  %v6767_v3 = vor.u32 %v6766_v25, %v6765_v52  ;;  %v15284_v45 = vpop.f32.mrb[184].mxu0  ;;  %v15286_v25 = vpop.f32.mrb[161].mxu1  ;;  %v11138_v46 = vld [vmem:[#allocation3 + $0x134] sm:$0xf] }
 0x402   : > { %v6143_v24 = vsel %vm11582_vm10, %v6141_v15, %v6142_v32  ;;  %v6146_v28 = vrot.slane %v6145_v13, 4  ;;  %v6772_v10 = vor.u32 %v6771_v58, %v6769_v43  ;;  %v6775_v5 = vshll.u32 %v6580_v16, 16  ;;  %v565_v15 = vld [vmem:[#allocation3 + $0x150] sm:$0x1]  ;;  %v11139_v50 = vld [vmem:[#allocation3 + $0x138] sm:$0xf] }
 0x403   : > { %v9560_v11 = vcombine.low %v15227_v18, %v6208_v49  ;;  %v6513_v32 = vsel %vm11561_vm9, %v9432_v57, %v6512_v34  ;;  %v6522_v31 = vsel %vm11561_vm9, %v6514_v23, %v6521_v29  ;;  %v6768_v30 = vrot.slane %v6767_v3, 4  ;;  %v15292_v49 = vpop.f32.mrb[185].mxu0  ;;  %v15294_v34 = vpop.f32.mrb[162].mxu1 }
 0x404   : > { %v6151_v48 = vsel %vm11582_vm10, %v6146_v28, %v6150_v39  ;;  %v6773_v28 = vrot.slane %v6772_v10, 4  ;;  %v6777_v52 = vrot.slane %v6775_v5, 5  ;;  %v9544_v58 = vcombine.low %v6513_v32, %v6522_v31  ;;  %v15308_v39 = vpop.f32.mrb[186].mxu0  ;;  %v15310_v57 = vpop.f32.mrb[163].mxu1 }
 0x405   : > { %v9529_v63 = vcombine.low %v6143_v24, %v6151_v48  ;;  %8674 = vmatprep.mubr.bf16.mxu0 %v9560_v11  ;;  %v15290_v18 = vadd.f32 %v14991_v56, %v14985_v37  ;;  %v6770_v3 = vsel %vm11582_vm10, %v6768_v30, %v6769_v43  ;;  %v10354_v29 = vadd.f32 %v15025_v59, %v15023_v14  ;;  %v6209_v37 = vld [vmem:[#allocation3 + $0x144] sm:$0x8]  ;;  %v15306_v56 = vld [vmem:[#allocation3 + $0x148] sm:$0xf] }
 0x406   : > { %v15302_v23 = vadd.f32 %v15003_v1, %v14996_v44  ;;  %v10357_v13 = vadd.f32 %v15035_v42, %v15031_v35  ;;  %16705 = vst [vmem:[#allocation22_spill] sm:$0xff] %v15306_v56  ;;  %v6778_v43 = vsel %vm11582_vm10, %v6773_v28, %v6777_v52  ;;  %v9513_v14 = vcombine.low %v11138_v46, %v11139_v50  ;;  %v15318_v35 = vld [vmem:[#allocation3 + $0x14c] sm:$0xf]  ;;  %v15320_v42 = vpop.f32.mrb[187].mxu0 }
 0x407   : > { %8521 = vmatprep.mubr.bf16.mxu1 %v9529_v63  ;;  %v566_v44 = vsel %vm11551_vm8, 0, %v565_v15  ;;  %v16706_v1 = vshrl.u32 %v14612_v62, 16  ;;  %8675 = vmatmul.mubr.bf16.gmra.mrb[20].mxu0 %v9544_v58  ;;  %16707 = vst [vmem:[#allocation23_spill] sm:$0xff] %v15318_v35  ;;  %v15322_v16 = vcombine.low %v6770_v3, %v6778_v43  ;;  %v15325_v24 = vadd.f32 %v10354_v29, %v15225_v17  ;;  %v16714_v17 = vld [vmem:[#allocation54_spill] sm:$0xff] }
 0x408   : > { %v15328_v48 = vadd.f32 %v10357_v13, %v15235_v41  ;;  %567 = vst [vmem:[#allocation3 + $0x150] sm:$0x1] %v566_v44  ;;  %v16711_v10 = vshll.u32 %v14612_v62, 16  ;;  %8522 = vmatmul.mubr.bf16.gmra.mrb[248].mxu1 %v9513_v14  ;;  %v16712_v11 = vshll.u32 %v14618_v40, 16  ;;  %v16713_v32 = vshrl.u32 %v14618_v40, 16  ;;  %v16716_v41 = vld [vmem:[#allocation56_spill] sm:$0xff] }
 0x409   : > { %v6152_v59 = vrot.slane %v16706_v1, 4  ;;  %16708 = vst [vmem:[#allocation21_spill] sm:$0xff] %v15322_v16  ;;  %16709 = vst [vmem:[#allocation25_spill] sm:$0xff] %v15325_v24  ;;  %v6524_v30 = vshrl.u32 %v6209_v37, 16  ;;  %v16245_v15 = vshrl.u32 %v15306_v56, 16  ;;  %v16715_v28 = vshrl.u32 %v16714_v17, 16 }
 0x40a   : > { %16710 = vst [vmem:[#allocation77_spill] sm:$0xff] %v15328_v48  ;;  %v6153_v5 = vrot.slane %v16711_v10, 5  ;;  %v15334_v63 = vrot.slane %v16712_v11, 5  ;;  %v6158_v31 = vrot.slane %v16713_v32, 4  ;;  %v16717_v58 = vshrl.u32 %v16716_v41, 16  ;;  %v16720_v10 = vld [vmem:[#allocation57_spill] sm:$0xff] }
 0x40b   : > { %v15341_v52 = vrot.slane %v16715_v28, 4  ;;  %v16244_v29 = vshrl.u32 %v15318_v35, 16  ;;  %v9433_v43 = vrot.slane %v6524_v30, 11  ;;  %v6531_v40 = vrot.slane %v16245_v15, 7  ;;  %v15369_v28 = vpop.f32.mrb[188].mxu0 }
 0x40c   : > { %v15345_v3 = vrot.slane %v16717_v58, 4  ;;  %v6154_v62 = vor.u32 %v6153_v5, %v6152_v59  ;;  %v6159_v13 = vor.u32 %v6158_v31, %v15334_v63  ;;  %v16246_v37 = vshll.u32 %v15306_v56, 16  ;;  %v15359_v59 = vpop.f32.mrb[164].mxu1  ;;  %v6567_v48 = vld [vmem:[#allocation3 + $0x38] sm:$0x1] }
 0x40d   : > { %v16718_v46 = vshll.u32 %v16716_v41, 16  ;;  %v6540_v44 = vrot.slane %v16244_v29, 7  ;;  %v16247_v1 = vshll.u32 %v15318_v35, 16  ;;  %16719 = vst [vmem:[#allocation78_spill] sm:$0xff] %v15359_v59  ;;  %v16721_v5 = vshrl.u32 %v16720_v10, 16  ;;  %v15371_v41 = vpop.f32.mrb[165].mxu1 }
 0x40e   : > { %v6155_v14 = vrot.slane %v6154_v62, 4  ;;  %v6534_v32 = vor.u32 %v16246_v37, %v6531_v40  ;;  %v6536_v31 = vrot.slane %v6531_v40, 4  ;;  %v9561_v30 = vcombine.low %v15306_v56, %v15318_v35  ;;  %16722 = vst [vmem:[#allocation26_spill] sm:$0xff] %v15371_v41  ;;  %v16724_v29 = vld [vmem:[#allocation68_spill] sm:$0xff]  ;;  %v15379_v37 = vpop.f32.mrb[189].mxu0  ;;  %v15381_v40 = vpop.f32.mrb[166].mxu1 }
 0x40f   : > { %v15354_v50 = vrot.slane %v16718_v46, 5  ;;  %v15363_v11 = vrot.slane %v16721_v5, 4  ;;  %v6160_v58 = vrot.slane %v6159_v13, 4  ;;  %v6543_v62 = vor.u32 %v16247_v1, %v6540_v44  ;;  %v16723_v5 = vld [vmem:[#allocation67_spill] sm:$0xff]  ;;  %16725 = vst [vmem:[#allocation29_spill] sm:$0xff] %v15381_v40  ;;  %v16726_v44 = vld [vmem:[#allocation60_spill] sm:$0xff] }
 0x410   : > { %v10254_v46 = vadd.f32 %v15048_v61, %v15040_v9  ;;  %v10360_v15 = vadd.f32 %v16724_v29, %v16723_v5  ;;  %v5941_v24 = vld [vmem:[#allocation3 + $0x150] sm:$0x1]  ;;  %v6157_v16 = vsel %vm11582_vm10, %v6155_v14, %v15334_v63  ;;  %v6535_v13 = vsel %vm11561_vm9, %v9433_v43, %v6534_v32  ;;  %8682 = vmatprep.mubr.bf16.mxu0 %v9561_v30  ;;  %v16727_v1 = vld [vmem:[#allocation61_spill] sm:$0xff]  ;;  %v15392_v5 = vpop.f32.mrb[190].mxu0  ;;  %v15394_v35 = vpop.f32.mrb[167].mxu1  ;;  %v16732_v43 = vld [vmem:[#allocation66_spill] sm:$0xff] }
 0x411   : > { %v10257_v9 = vadd.f32 %v16727_v1, %v16726_v44  ;;  %v16728_v61 = vld [vmem:[#allocation71_spill] sm:$0xff]  ;;  %16729 = vst [vmem:[#allocation24_spill] sm:$0xff] %v15394_v35  ;;  %v6162_v56 = vshll.u32 %v5941_v24, 16  ;;  %v6544_v40 = vsel %vm11561_vm9, %v6536_v31, %v6543_v62  ;;  %v16731_v14 = vld [vmem:[#allocation65_spill] sm:$0xff]  ;;  %v15403_v30 = vpop.f32.mrb[191].mxu0  ;;  %v6593_v35 = vshll.u32 %v6567_v48, 16 }
 0x412   : > { %v10363_v29 = vadd.f32 %v15122_v4, %v16728_v61  ;;  %v15399_v63 = vadd.f32 %v10360_v15, %v15290_v18  ;;  %v6585_v32 = vor.u32 %v16732_v43, %v16731_v14  ;;  %v9545_v1 = vcombine.low %v6535_v13, %v6544_v40  ;;  %v514_v24 = vld [vmem:[#allocation3 + $0x158] sm:$0x8]  ;;  %v568_v62 = vld [vmem:[#allocation3 + $0x164] sm:$0x1]  ;;  %v15423_v48 = vld [vmem:[#allocation3 + $0x15c] sm:$0xf] }
 0x413   : > { %v16734_v4 = vshll.u32 %v14665_v8, 16  ;;  %v6164_v41 = vrot.slane %v6162_v56, 5  ;;  %v16735_v31 = vld [vmem:[#allocation72_spill] sm:$0xff]  ;;  %v10366_v15 = vadd.f32 %v15179_v2, %v15170_v36  ;;  %v16736_v13 = vld [vmem:[#allocation73_spill] sm:$0xff]  ;;  %v10369_v56 = vadd.f32 %v15195_v12, %v15186_v47  ;;  %v15439_v12 = vpop.f32.mrb[168].mxu1 }
 0x414   : > { %16730 = vst [vmem:[#allocation27_spill] sm:$0xff] %v15399_v63  ;;  %v15406_v44 = vadd.f32 %v10363_v29, %v15302_v23  ;;  %v6586_v59 = vrot.slane %v6585_v32, 4  ;;  %v15412_v18 = vadd.f32 %v15126_v38, %v16735_v31  ;;  %8683 = vmatmul.mubr.bf16.gmra.mrb[24].mxu0 %v9545_v1  ;;  %v6595_v23 = vrot.slane %v6593_v35, 5  ;;  %v15425_v29 = vld [vmem:[#allocation3 + $0x160] sm:$0xf] }
 0x415   : > { %v6587_v61 = vrot.slane %v16734_v4, 5  ;;  %v15419_v8 = vadd.f32 %v15134_v19, %v16736_v13  ;;  %16737 = vst [vmem:[#allocation37_spill] sm:$0xff] %v15425_v29  ;;  %v6165_v38 = vsel %vm11582_vm10, %v6160_v58, %v6164_v41  ;;  %v15431_v2 = vadd.f32 %v10366_v15, %v10254_v46  ;;  %v11140_v32 = vld [vmem:[#allocation3 + $0x148] sm:$0xf]  ;;  %v11141_v41 = vld [vmem:[#allocation3 + $0x14c] sm:$0xf] }
 0x416   : > { %16733 = vst [vmem:[#allocation30_spill] sm:$0xff] %v15406_v44  ;;  %v515_v35 = vsel %vm11545_vm3, 0, %v514_v24  ;;  %v9530_v19 = vcombine.low %v6157_v16, %v6165_v38  ;;  %v15435_v43 = vadd.f32 %v10369_v56, %v10257_v9  ;;  %v569_v47 = vsel %vm11551_vm8, 0, %v568_v62  ;;  %v15444_v16 = vpop.f32.mrb[192].mxu0  ;;  %v15446_v9 = vpop.f32.mrb[169].mxu1  ;;  %v16743_v13 = vld [vmem:[#allocation55_spill] sm:$0xff] }
 0x417   : > { %v6590_v40 = vor.u32 %v15192_v51, %v6587_v61  ;;  %v6588_v36 = vsel %vm11582_vm10, %v6586_v59, %v6587_v61  ;;  %16738 = vst [vmem:[#allocation28_spill] sm:$0xff] %v15431_v2  ;;  %516 = vst [vmem:[#allocation3 + $0x158] sm:$0x8] %v515_v35  ;;  %v9514_v58 = vcombine.low %v11140_v32, %v11141_v41  ;;  %v16253_v59 = vshrl.u32 %v15423_v48, 16  ;;  %v6569_v61 = vld [vmem:[#allocation3 + $0x60] sm:$0x1] }
 0x418   : > { %16740 = vst [vmem:[#allocation31_spill] sm:$0xff] %v15435_v43  ;;  %570 = vst [vmem:[#allocation3 + $0x164] sm:$0x1] %v569_v47  ;;  %v16252_v46 = vshrl.u32 %v15425_v29, 16  ;;  %8529 = vmatprep.mubr.bf16.mxu1 %v9530_v19  ;;  %v9562_v4 = vcombine.low %v15423_v48, %v15425_v29  ;;  %v6613_v24 = vor.u32 %v15208_v53, %v15204_v27  ;;  %v16741_v31 = vshll.u32 %v16714_v17, 16  ;;  %v15456_v62 = vpop.f32.mrb[193].mxu0 }
 0x419   : > { %v6591_v14 = vrot.slane %v6590_v40, 4  ;;  %v15458_v40 = vpop.f32.mrb[170].mxu1  ;;  %v16744_v56 = vshrl.u32 %v16743_v13, 16  ;;  %8530 = vmatmul.mubr.bf16.gmra.mrb[252].mxu1 %v9514_v58  ;;  %v6553_v51 = vrot.slane %v16253_v59, 7  ;;  %v15468_v27 = vpop.f32.mrb[194].mxu0  ;;  %v16746_v17 = vshll.u32 %v16743_v13, 16 }
 0x41a   : > { %v6615_v15 = vrot.slane %v16741_v31, 5  ;;  %16742 = vst [vmem:[#allocation33_spill] sm:$0xff] %v15458_v40  ;;  %v6562_v35 = vrot.slane %v16252_v46, 7  ;;  %v15470_v53 = vpop.f32.mrb[171].mxu1  ;;  %8690 = vmatprep.mubr.bf16.mxu0 %v9562_v4  ;;  %v6614_v41 = vrot.slane %v6613_v24, 4  ;;  %v15481_v58 = vpop.f32.mrb[195].mxu0  ;;  %v10378_v54 = vadd.f32 %v15292_v49, %v15284_v45 }
 0x41b   : > { %v6596_v60 = vsel %vm11582_vm10, %v6591_v14, %v6595_v23  ;;  %v15462_v38 = vrot.slane %v16744_v56, 4  ;;  %16745 = vst [vmem:[#allocation34_spill] sm:$0xff] %v15470_v53  ;;  %v15474_v19 = vrot.slane %v16746_v17, 5  ;;  %v16747_v14 = vld [vmem:[#allocation59_spill] sm:$0xff]  ;;  %v16752_v13 = vld [vmem:[#allocation16_spill] sm:$0xff]  ;;  %v6558_v43 = vrot.slane %v6553_v51, 4 }
 0x41c   : > { %v9563_v23 = vcombine.low %v6588_v36, %v6596_v60  ;;  %v16748_v47 = vshrl.u32 %v16747_v14, 16  ;;  %v16749_v60 = vld [vmem:[#allocation69_spill] sm:$0xff]  ;;  %v16753_v17 = vshrl.u32 %v16752_v13, 16  ;;  %v16754_v36 = vld [vmem:[#allocation19_spill] sm:$0xff]  ;;  %v16756_v2 = vshll.u32 %v15425_v29, 16 }
 0x41d   : > { %v16750_v31 = vshrl.u32 %v16749_v60, 16  ;;  %v16751_v46 = vshll.u32 %v16749_v60, 16  ;;  %v16755_v4 = vshrl.u32 %v16754_v36, 16  ;;  %v6621_v44 = vshll.u32 %v6569_v61, 16 }
 0x41e   : > { %v15478_v32 = vrot.slane %v16748_v47, 4  ;;  %v15493_v1 = vrot.slane %v16753_v17, 4  ;;  %10748 = vmatprep.mubr.bf16.mxu1 %v9563_v23  ;;  %v6618_v47 = vor.u32 %v15341_v52, %v6615_v15  ;;  %v16757_v60 = vshll.u32 %v16754_v36, 16  ;;  %v6212_v63 = vld [vmem:[#allocation3 + $0x158] sm:$0x8] }
 0x41f   : > { %v15485_v56 = vrot.slane %v16750_v31, 4  ;;  %v15489_v59 = vrot.slane %v16751_v46, 5  ;;  %v15498_v24 = vrot.slane %v16755_v4, 4  ;;  %v6565_v31 = vor.u32 %v16756_v2, %v6562_v35  ;;  %v16759_v35 = vld [vmem:[#allocation62_spill] sm:$0xff] }
 0x420   : > { %v15504_v46 = vrot.slane %v16757_v60, 5  ;;  %v6619_v53 = vrot.slane %v6618_v47, 4  ;;  %v10266_v23 = vadd.f32 %v15181_v26, %v15172_v55  ;;  %v10372_v52 = vadd.f32 %v15259_v20, %v15247_v0  ;;  %v16762_v26 = vld [vmem:[#allocation84_spill] sm:$0xff]  ;;  %v6571_v20 = vld [vmem:[#allocation3 + $0x88] sm:$0x1] }
 0x421   : > { %v6546_v17 = vshrl.u32 %v6212_v63, 16  ;;  %v16758_v4 = vshll.u32 %v15423_v48, 16  ;;  %v6616_v2 = vsel %vm11582_vm10, %v6614_v41, %v6615_v15  ;;  %v6623_v61 = vrot.slane %v6621_v44, 5  ;;  %v15525_v63 = vpop.f32.mrb[172].mxu1  ;;  %v15533_v41 = vpop.f32.mrb[196].mxu0 }
 0x422   : > { %v16760_v36 = vshrl.u32 %v16759_v35, 16  ;;  %v15519_v47 = vadd.f32 %v10372_v52, %v15412_v18  ;;  %v10269_v55 = vadd.f32 %v15197_v33, %v15188_v6  ;;  %v10375_v0 = vadd.f32 %v16762_v26, %v15265_v21  ;;  %v15535_v52 = vpop.f32.mrb[173].mxu1  ;;  %v16763_v6 = vld [vmem:[#allocation74_spill] sm:$0xff] }
 0x423   : > { %v6556_v40 = vor.u32 %v16758_v4, %v6553_v51  ;;  %v9434_v51 = vrot.slane %v6546_v17, 11  ;;  %v6566_v44 = vsel %vm11561_vm9, %v6558_v43, %v6565_v31  ;;  %v6624_v15 = vsel %vm11582_vm10, %v6619_v53, %v6623_v61  ;;  %v16765_v4 = vld [vmem:[#allocation51_spill] sm:$0xff]  ;;  %v15547_v31 = vpop.f32.mrb[197].mxu0 }
 0x424   : > { %v15516_v60 = vrot.slane %v16760_v36, 4  ;;  %16761 = vst [vmem:[#allocation38_spill] sm:$0xff] %v15519_v47  ;;  %v6641_v18 = vor.u32 %v15354_v50, %v15345_v3  ;;  %v16764_v33 = vshrl.u32 %v16763_v6, 16  ;;  %10749 = vmatmul.mubr.bf16.vlgmr.msra.gmra.mrb[0].mxu1 %v16765_v4  ;;  %v9565_v17 = vcombine.low %v6616_v2, %v6624_v15  ;;  %v15549_v3 = vpop.f32.mrb[174].mxu1  ;;  %v16769_v47 = vld [vmem:[#allocation80_spill] sm:$0xff]  ;;  %v15555_v4 = vpop.f32.mrb[198].mxu0 }
 0x425   : > { %v15543_v36 = vadd.f32 %v10375_v0, %v15419_v8  ;;  %v16767_v43 = vshll.u32 %v16720_v10, 16  ;;  %v6557_v50 = vsel %vm11561_vm9, %v9434_v51, %v6556_v40  ;;  %v6649_v26 = vshll.u32 %v6571_v20, 16  ;;  %v15557_v2 = vpop.f32.mrb[175].mxu1  ;;  %v6573_v40 = vld [vmem:[#allocation3 + $0xb0] sm:$0x1]  ;;  %v15566_v20 = vpop.f32.mrb[199].mxu0 }
 0x426   : > { %v15539_v21 = vrot.slane %v16764_v33, 4  ;;  %v6642_v61 = vrot.slane %v6641_v18, 4  ;;  %v16768_v33 = vld [vmem:[#allocation79_spill] sm:$0xff]  ;;  %v16770_v8 = vshll.u32 %v16763_v6, 16  ;;  %v9546_v0 = vcombine.low %v6557_v50, %v6566_v44  ;;  %10752 = vmatprep.mubr.bf16.mxu1 %v9565_v17  ;;  %v16771_v51 = vld [vmem:[#allocation17_spill] sm:$0xff] }
 0x427   : > { %16766 = vst [vmem:[#allocation32_spill] sm:$0xff] %v15543_v36  ;;  %v6643_v53 = vrot.slane %v16767_v43, 5  ;;  %v10272_v29 = vadd.f32 %v16769_v47, %v16768_v33  ;;  %v16772_v47 = vshrl.u32 %v16771_v51, 16  ;;  %v6651_v6 = vrot.slane %v6649_v26, 5  ;;  %v16773_v33 = vld [vmem:[#allocation82_spill] sm:$0xff] }
 0x428   : > { %v15561_v10 = vrot.slane %v16770_v8, 5  ;;  %v16774_v8 = vld [vmem:[#allocation83_spill] sm:$0xff]  ;;  %8691 = vmatmul.mubr.bf16.gmra.mrb[28].mxu0 %v9546_v0  ;;  %v10381_v45 = vadd.f32 %v15320_v42, %v15308_v39  ;;  %v6669_v49 = vor.u32 %v15474_v19, %v15462_v38  ;;  %v16775_v50 = vshll.u32 %v16747_v14, 16  ;;  %v6575_v42 = vld [vmem:[#allocation3 + $0xd8] sm:$0x1] }
 0x429   : > { %v6646_v15 = vor.u32 %v15363_v11, %v6643_v53  ;;  %v15570_v18 = vrot.slane %v16772_v47, 4  ;;  %v6644_v43 = vsel %vm11582_vm10, %v6642_v61, %v6643_v53  ;;  %v10275_v44 = vadd.f32 %v16774_v8, %v16773_v33  ;;  %v10300_v33 = vpop.f32.mrb[176].mxu1 }
 0x42a   : > { %v15576_v11 = vadd.f32 %v10378_v54, %v10266_v23  ;;  %v6671_v47 = vrot.slane %v16775_v50, 5  ;;  %v6677_v36 = vshll.u32 %v6573_v40, 16  ;;  %v10278_v53 = vadd.f32 %v15286_v25, %v15278_v22  ;;  %v16776_v22 = vld [vmem:[#allocation58_spill] sm:$0xff] }
 0x42b   : > { %v6647_v17 = vrot.slane %v6646_v15, 4  ;;  %v10384_v61 = vadd.f32 %v15379_v37, %v15369_v28  ;;  %v15590_v26 = vadd.f32 %v10381_v45, %v10269_v55  ;;  %v6670_v0 = vrot.slane %v6669_v49, 4  ;;  %v10400_v55 = vpop.f32.mrb[200].mxu0  ;;  %v16779_v54 = vld [vmem:[#allocation26_spill] sm:$0xff]  ;;  %v10301_v49 = vpop.f32.mrb[177].mxu1 }
 0x42c   : > { %v10281_v39 = vadd.f32 %v15310_v57, %v15294_v34  ;;  %v6674_v19 = vor.u32 %v15478_v32, %v6671_v47  ;;  %v6679_v14 = vrot.slane %v6677_v36, 5  ;;  %10753 = vmatmul.mubr.bf16.gmra.mrb[4].mxu1 %v16776_v22  ;;  %v10387_v37 = vadd.f32 %v15403_v30, %v15392_v5 }
 0x42d   : > { %v6652_v23 = vsel %vm11582_vm10, %v6647_v17, %v6651_v6  ;;  %v15595_v15 = vadd.f32 %v10384_v61, %v10272_v29  ;;  %v6672_v25 = vsel %vm11582_vm10, %v6670_v0, %v6671_v47  ;;  %v6697_v28 = vor.u32 %v15489_v59, %v15485_v56  ;;  %v16778_v29 = vld [vmem:[#allocation78_spill] sm:$0xff]  ;;  %v10401_v6 = vpop.f32.mrb[201].mxu0  ;;  %v16780_v59 = vld [vmem:[#allocation29_spill] sm:$0xff]  ;;  %v16781_v56 = vld [vmem:[#allocation24_spill] sm:$0xff] }
 0x42e   : > { %v9567_v38 = vcombine.low %v6644_v43, %v6652_v23  ;;  %v16777_v34 = vshll.u32 %v16752_v13, 16  ;;  %v6675_v32 = vrot.slane %v6674_v19, 4  ;;  %v6705_v36 = vshll.u32 %v6575_v42, 16  ;;  %v6577_v17 = vld [vmem:[#allocation3 + $0x100] sm:$0x1]  ;;  %v10403_v45 = vpop.f32.mrb[202].mxu0 }
 0x42f   : > { %v10284_v40 = vadd.f32 %v16779_v54, %v16778_v29  ;;  %v10390_v43 = vadd.f32 %v15456_v62, %v15444_v16  ;;  %v15610_v8 = vadd.f32 %v10387_v37, %v10275_v44  ;;  %v6698_v5 = vrot.slane %v6697_v28, 4  ;;  %v10404_v62 = vpop.f32.mrb[203].mxu0  ;;  %v10303_v44 = vpop.f32.mrb[178].mxu1  ;;  %v16783_v28 = vld [vmem:[#allocation33_spill] sm:$0xff] }
 0x430   : > { %v6699_v57 = vrot.slane %v16777_v34, 5  ;;  %10756 = vmatprep.mubr.bf16.mxu1 %v9567_v38  ;;  %v10287_v13 = vadd.f32 %v16781_v56, %v16780_v59  ;;  %v6680_v50 = vsel %vm11582_vm10, %v6675_v32, %v6679_v14  ;;  %v6707_v47 = vrot.slane %v6705_v36, 5  ;;  %v10304_v38 = vpop.f32.mrb[179].mxu1  ;;  %v16784_v34 = vld [vmem:[#allocation34_spill] sm:$0xff]  ;;  %v16785_v36 = vld [vmem:[#allocation64_spill] sm:$0xff] }
 0x431   : > { %v15617_v61 = vadd.f32 %v10390_v43, %v10278_v53  ;;  %v10393_v16 = vadd.f32 %v15481_v58, %v15468_v27  ;;  %v9569_v23 = vcombine.low %v6672_v25, %v6680_v50  ;;  %v6725_v42 = vor.u32 %v15504_v46, %v15498_v24  ;;  %v6579_v46 = vld [vmem:[#allocation3 + $0x128] sm:$0x1]  ;;  %v10306_v50 = vpop.f32.mrb[180].mxu1 }
 0x432   : > { %v6702_v30 = vor.u32 %v15493_v1, %v6699_v57  ;;  %v6700_v1 = vsel %vm11582_vm10, %v6698_v5, %v6699_v57  ;;  %v16782_v14 = vshll.u32 %v16759_v35, 16  ;;  %v6733_v22 = vshll.u32 %v6577_v17, 16 }
 0x433   : > { %v15625_v19 = vadd.f32 %v10393_v16, %v10281_v39  ;;  %v10290_v27 = vadd.f32 %v15446_v9, %v15439_v12  ;;  %v6726_v25 = vrot.slane %v6725_v42, 4  ;;  %v10396_v37 = vadd.f32 %v15547_v31, %v15533_v41 }
 0x434   : > { %v6703_v0 = vrot.slane %v6702_v30, 4  ;;  %v6727_v53 = vrot.slane %v16782_v14, 5  ;;  %v10293_v24 = vadd.f32 %v16784_v34, %v16783_v28  ;;  %v6735_v35 = vrot.slane %v6733_v22, 5  ;;  %10757 = vmatmul.mubr.bf16.gmra.mrb[8].mxu1 %v16785_v36  ;;  %v16793_v34 = vld [vmem:[#allocation63_spill] sm:$0xff] }
 0x435   : > { %v10399_v32 = vadd.f32 %v15566_v20, %v15555_v4  ;;  %v15643_v9 = vadd.f32 %v10396_v37, %v10284_v40  ;;  %v6753_v41 = vor.u32 %v15561_v10, %v15539_v21  ;;  %v16786_v31 = vshll.u32 %v16771_v51, 16  ;;  %10760 = vmatprep.mubr.bf16.mxu1 %v9569_v23 }
 0x436   : > { %v6708_v58 = vsel %vm11582_vm10, %v6703_v0, %v6707_v47  ;;  %v6730_v57 = vor.u32 %v15516_v60, %v6727_v53  ;;  %v6728_v12 = vsel %vm11582_vm10, %v6726_v25, %v6727_v53  ;;  %v6761_v43 = vshll.u32 %v6579_v46, 16  ;;  %v16791_v25 = vld [vmem:[#allocation23_spill] sm:$0xff] }
 0x437   : > { %v9571_v39 = vcombine.low %v6700_v1, %v6708_v58  ;;  %v6755_v29 = vrot.slane %v16786_v31, 5  ;;  %v15649_v60 = vadd.f32 %v10399_v32, %v10287_v13  ;;  %v10296_v4 = vadd.f32 %v15535_v52, %v15525_v63 }
 0x438   : > { %v6731_v54 = vrot.slane %v6730_v57, 4  ;;  %v6754_v20 = vrot.slane %v6753_v41, 4  ;;  %v10402_v30 = vadd.f32 %v10401_v6, %v10400_v55  ;;  %v10299_v40 = vadd.f32 %v15557_v2, %v15549_v3  ;;  %v16787_v2 = vld [vmem:[#allocation70_spill] sm:$0xff]  ;;  %v10406_v6 = vpop.f32.mrb[204].mxu0 }
 0x439   : > { %v6758_v5 = vor.u32 %v15570_v18, %v6755_v29  ;;  %v6763_v10 = vrot.slane %v6761_v43, 5  ;;  %v10405_v51 = vadd.f32 %v10404_v62, %v10403_v45  ;;  %v10302_v18 = vadd.f32 %v10301_v49, %v10300_v33  ;;  %v10407_v45 = vpop.f32.mrb[205].mxu0  ;;  %v10307_v62 = vpop.f32.mrb[181].mxu1  ;;  %v16788_v49 = vld [vmem:[#allocation22_spill] sm:$0xff]  ;;  %v16797_v43 = vld [vmem:[#allocation37_spill] sm:$0xff] }
 0x43a   : > { %v6736_v21 = vsel %vm11582_vm10, %v6731_v54, %v6735_v35  ;;  %v6756_v56 = vsel %vm11582_vm10, %v6754_v20, %v6755_v29  ;;  %v15660_v17 = vadd.f32 %v10402_v30, %v10290_v27  ;;  %v10305_v55 = vadd.f32 %v10304_v38, %v10303_v44  ;;  %v10409_v16 = vpop.f32.mrb[206].mxu0  ;;  %v10309_v0 = vpop.f32.mrb[182].mxu1 }
 0x43b   : > { %v9573_v59 = vcombine.low %v6728_v12, %v6736_v21  ;;  %v6759_v13 = vrot.slane %v6758_v5, 4  ;;  %v15662_v63 = vadd.f32 %v10405_v51, %v10293_v24  ;;  %v10408_v47 = vadd.f32 %v10407_v45, %v10406_v6  ;;  %v10410_v23 = vpop.f32.mrb[207].mxu0  ;;  %v10310_v53 = vpop.f32.mrb[183].mxu1 }
 0x43c   : > { %10761 = vmatmul.mubr.bf16.gmra.mrb[12].mxu1 %v16787_v2  ;;  %v10308_v1 = vadd.f32 %v10307_v62, %v10306_v50  ;;  %v10411_v14 = vadd.f32 %v10410_v23, %v10409_v16  ;;  %v10311_v22 = vadd.f32 %v10310_v53, %v10309_v0  ;;  %v16789_v44 = vshrl.u32 %v16788_v49, 16  ;;  %v10412_v57 = vpop.f32.mrb[208].mxu0  ;;  %v10312_v54 = vpop.f32.mrb[184].mxu1  ;;  %v6582_v2 = vld [vmem:[#allocation3 + $0x164] sm:$0x1] }
 0x43d   : > { %v6764_v52 = vsel %vm11582_vm10, %v6759_v13, %v6763_v10  ;;  %10764 = vmatprep.mubr.bf16.mxu1 %v9571_v39  ;;  %v15667_v42 = vadd.f32 %v10408_v47, %v10296_v4  ;;  %v16790_v27 = vshll.u32 %v16788_v49, 16  ;;  %v16792_v37 = vshrl.u32 %v16791_v25, 16  ;;  %v6581_v39 = vld [vmem:[#allocation3 + $0x150] sm:$0x1]  ;;  %v10413_v35 = vpop.f32.mrb[209].mxu0  ;;  %v10313_v10 = vpop.f32.mrb[185].mxu1 }
 0x43e   : > { %v9575_v3 = vcombine.low %v6756_v56, %v6764_v52  ;;  %v15669_v33 = vadd.f32 %v10411_v14, %v10299_v40  ;;  %v6779_v38 = vrot.slane %v16789_v44, 4  ;;  %v16794_v24 = vshll.u32 %v16791_v25, 16  ;;  %v10415_v29 = vpop.f32.mrb[210].mxu0  ;;  %v16800_v47 = vld [vmem:[#allocation76_spill] sm:$0xff] }
 0x43f   : > { %v6780_v58 = vrot.slane %v16790_v27, 5  ;;  %v6785_v28 = vrot.slane %v16792_v37, 4  ;;  %v16795_v32 = vshrl.u32 %v15423_v48, 16  ;;  %v16796_v12 = vshll.u32 %v15423_v48, 16  ;;  %v10416_v21 = vpop.f32.mrb[211].mxu0  ;;  %v10315_v48 = vpop.f32.mrb[186].mxu1 }
 0x440   : > { %v6783_v46 = vrot.slane %v16794_v24, 5  ;;  %v10414_v31 = vadd.f32 %v10413_v35, %v10412_v57  ;;  %v16798_v4 = vshll.u32 %v16797_v43, 16  ;;  %v6789_v40 = vshll.u32 %v6581_v39, 16  ;;  %v10316_v6 = vpop.f32.mrb[187].mxu1  ;;  %v10418_v49 = vpop.f32.mrb[212].mxu0 }
 0x441   : > { %v6793_v36 = vrot.slane %v16795_v32, 4  ;;  %v6794_v41 = vrot.slane %v16796_v12, 5  ;;  %v6781_v5 = vor.u32 %v6780_v58, %v6779_v38  ;;  %v16799_v51 = vshrl.u32 %v16797_v43, 16  ;;  %v10419_v38 = vpop.f32.mrb[213].mxu0 }
 0x442   : > { %v6797_v20 = vrot.slane %v16798_v4, 5  ;;  %v6786_v30 = vor.u32 %v6785_v28, %v6783_v46  ;;  %v15688_v56 = vadd.f32 %v10414_v31, %v10302_v18  ;;  %v10417_v13 = vadd.f32 %v10416_v21, %v10415_v29  ;;  %v10421_v37 = vpop.f32.mrb[214].mxu0  ;;  %v10318_v57 = vpop.f32.mrb[188].mxu1 }
 0x443   : > { %v10314_v52 = vadd.f32 %v10313_v10, %v10312_v54  ;;  %v10317_v50 = vadd.f32 %v10316_v6, %v10315_v48  ;;  %v6782_v16 = vrot.slane %v6781_v5, 4  ;;  %v6791_v23 = vrot.slane %v6789_v40, 5  ;;  %v10422_v28 = vpop.f32.mrb[215].mxu0  ;;  %v10319_v35 = vpop.f32.mrb[189].mxu1  ;;  %v16803_v6 = vld [vmem:[#allocation75_spill] sm:$0xff] }
 0x444   : > { %10765 = vmatmul.mubr.bf16.gmra.mrb[16].mxu1 %v16793_v34  ;;  %v15690_v45 = vadd.f32 %v10417_v13, %v10305_v55  ;;  %v6787_v62 = vrot.slane %v6786_v30, 4  ;;  %v6795_v0 = vor.u32 %v6794_v41, %v6793_v36  ;;  %v6803_v53 = vshll.u32 %v6582_v2, 16  ;;  %v10321_v41 = vpop.f32.mrb[190].mxu1  ;;  %v16802_v13 = vld [vmem:[#allocation18_spill] sm:$0xff] }
 0x445   : > { %10768 = vmatprep.mubr.bf16.mxu1 %v9573_v59  ;;  %v6799_v59 = vrot.slane %v16799_v51, 4  ;;  %v6784_v18 = vsel %vm11582_vm10, %v6782_v16, %v6783_v46  ;;  %v10420_v25 = vadd.f32 %v10419_v38, %v10418_v49  ;;  %v10423_v39 = vadd.f32 %v10422_v28, %v10421_v37  ;;  %v10322_v31 = vpop.f32.mrb[191].mxu1  ;;  %v16804_v38 = vld [vmem:[#allocation81_spill] sm:$0xff] }
 0x446   : > { %v6792_v44 = vsel %vm11582_vm10, %v6787_v62, %v6791_v23  ;;  %v6796_v55 = vrot.slane %v6795_v0, 4  ;;  %v6805_v58 = vrot.slane %v6803_v53, 5  ;;  %v10320_v12 = vadd.f32 %v10319_v35, %v10318_v57 }
 0x447   : > { %v6800_v14 = vor.u32 %v6799_v59, %v6797_v20  ;;  %v9577_v34 = vcombine.low %v6784_v18, %v6792_v44  ;;  %v15697_v24 = vadd.f32 %v10420_v25, %v10308_v1  ;;  %v15704_v36 = vadd.f32 %v10423_v39, %v10311_v22  ;;  %v10424_v54 = vpop.f32.mrb[216].mxu0  ;;  %v16805_v25 = vld [vmem:[#allocation20_spill] sm:$0xff] }
 0x448   : > { %v6798_v46 = vsel %vm11582_vm10, %v6796_v55, %v6797_v20  ;;  %v10323_v29 = vadd.f32 %v10322_v31, %v10321_v41  ;;  %v10425_v43 = vpop.f32.mrb[217].mxu0 }
 0x449   : > { %v6801_v27 = vrot.slane %v6800_v14, 4  ;;  %v10426_v4 = vadd.f32 %v10425_v43, %v10424_v54  ;;  %v10427_v5 = vpop.f32.mrb[218].mxu0  ;;  %v16806_v54 = vld [vmem:[#allocation25_spill] sm:$0xff] }
 0x44a   : > { %v10428_v30 = vpop.f32.mrb[219].mxu0 }
 0x44b   : > { %v6806_v32 = vsel %vm11582_vm10, %v6801_v27, %v6805_v58  ;;  %v10452_v40 = vpop.f32.mrb[192].mxu1  ;;  %v15706_v21 = vadd.f32 %v10426_v4, %v10314_v52  ;;  %v10429_v20 = vadd.f32 %v10428_v30, %v10427_v5  ;;  %v16807_v5 = vld [vmem:[#allocation77_spill] sm:$0xff] }
 0x44c   : > { %10769 = vmatmul.mubr.bf16.gmra.mrb[20].mxu1 %v16800_v47  ;;  %v9578_v1 = vcombine.low %v6798_v46, %v6806_v32  ;;  %v10453_v7 = vpop.f32.mrb[193].mxu1 }
 0x44d   : > { %10772 = vmatprep.mubr.bf16.mxu1 %v9575_v3  ;;  %v16801_v3 = vld [vmem:[#allocation21_spill] sm:$0xff]  ;;  %v10454_v10 = vadd.f32 %v10453_v7, %v10452_v40  ;;  %v10455_v51 = vpop.f32.mrb[194].mxu1  ;;  %v15708_v22 = vadd.f32 %v10429_v20, %v10317_v50 }
 0x44e   : > { %v10456_v59 = vpop.f32.mrb[195].mxu1 }
 0x44f   : > { %v8412_v48 = vadd.f32 %v10454_v10, %v16802_v13  ;;  %v10457_v2 = vadd.f32 %v10456_v59, %v10455_v51 }
 0x451   : > { %v8415_v47 = vadd.f32 %v10457_v2, %v16803_v6 }
 0x453   : > { %v10458_v16 = vpop.f32.mrb[196].mxu1 }
 0x454   : > { %10773 = vmatmul.mubr.bf16.gmra.mrb[24].mxu1 %v16801_v3  ;;  %v10459_v23 = vpop.f32.mrb[197].mxu1 }
 0x455   : > { %10776 = vmatprep.mubr.bf16.mxu1 %v9577_v34  ;;  %v10430_v62 = vpop.f32.mrb[220].mxu0  ;;  %v10460_v14 = vadd.f32 %v10459_v23, %v10458_v16  ;;  %v10461_v53 = vpop.f32.mrb[198].mxu1  ;;  %v16808_v16 = vld [vmem:[#allocation27_spill] sm:$0xff] }
 0x456   : > { %v10431_v0 = vpop.f32.mrb[221].mxu0  ;;  %v10462_v18 = vpop.f32.mrb[199].mxu1 }
 0x457   : > { %v10432_v52 = vadd.f32 %v10431_v0, %v10430_v62  ;;  %v10433_v49 = vpop.f32.mrb[222].mxu0  ;;  %v8420_v55 = vadd.f32 %v10460_v14, %v16804_v38  ;;  %v10463_v50 = vadd.f32 %v10462_v18, %v10461_v53  ;;  %v16809_v53 = vld [vmem:[#allocation30_spill] sm:$0xff] }
 0x458   : > { %v10434_v44 = vpop.f32.mrb[223].mxu0 }
 0x459   : > { %v15713_v27 = vadd.f32 %v10432_v52, %v10320_v12  ;;  %v10435_v58 = vadd.f32 %v10434_v44, %v10433_v49  ;;  %v8423_v37 = vadd.f32 %v10463_v50, %v16805_v25 }
 0x45b   : > { %v15716_v28 = vadd.f32 %v10435_v58, %v10323_v29 }
 0x45c   : > { %10777 = vmatmul.mubr.bf16.gmra.mrb[28].mxu1 %v9578_v1  ;;  %v10464_v34 = vpop.f32.mrb[200].mxu1 }
 0x45d   : > { %v10564_v39 = vpop.f32.mrb[224].mxu0  ;;  %v10465_v57 = vpop.f32.mrb[201].mxu1 }
 0x45e   : > { %v10565_v3 = vpop.f32.mrb[225].mxu0  ;;  %v10466_v35 = vadd.f32 %v10465_v57, %v10464_v34  ;;  %v10467_v46 = vpop.f32.mrb[202].mxu1 }
 0x45f   : > { %v10566_v32 = vadd.f32 %v10565_v3, %v10564_v39  ;;  %v10567_v41 = vpop.f32.mrb[226].mxu0  ;;  %v10468_v31 = vpop.f32.mrb[203].mxu1 }
 0x460   : > { %v10568_v1 = vpop.f32.mrb[227].mxu0  ;;  %v8428_v43 = vadd.f32 %v10466_v35, %v16806_v54  ;;  %v10469_v4 = vadd.f32 %v10468_v31, %v10467_v46  ;;  %v16811_v54 = vld [vmem:[#allocation31_spill] sm:$0xff] }
 0x461   : > { %v10569_v12 = vadd.f32 %v10568_v1, %v10567_v41  ;;  %v15724_v39 = vadd.f32 %v10566_v32, %v8412_v48  ;;  %v16810_v41 = vld [vmem:[#allocation28_spill] sm:$0xff] }
 0x462   : > { %v8431_v30 = vadd.f32 %v10469_v4, %v16807_v5 }
 0x463   : > { %v15729_v1 = vadd.f32 %v10569_v12, %v8415_v47  ;;  %v16812_v47 = vld [vmem:[#allocation38_spill] sm:$0xff] }
 0x465   : > { %v10570_v20 = vpop.f32.mrb[228].mxu0 }
 0x466   : > { %v10470_v40 = vpop.f32.mrb[204].mxu1  ;;  %v10571_v7 = vpop.f32.mrb[229].mxu0 }
 0x467   : > { %v10471_v29 = vpop.f32.mrb[205].mxu1  ;;  %v10572_v59 = vadd.f32 %v10571_v7, %v10570_v20  ;;  %v10573_v13 = vpop.f32.mrb[230].mxu0 }
 0x468   : > { %v10472_v10 = vadd.f32 %v10471_v29, %v10470_v40  ;;  %v10473_v51 = vpop.f32.mrb[206].mxu1  ;;  %v10574_v6 = vpop.f32.mrb[231].mxu0 }
 0x469   : > { %v10474_v2 = vpop.f32.mrb[207].mxu1  ;;  %v10575_v0 = vadd.f32 %v10574_v6, %v10573_v13  ;;  %v15721_v14 = vadd.f32 %v10572_v59, %v8420_v55 }
 0x46a   : > { %v8436_v62 = vadd.f32 %v10472_v10, %v16808_v16  ;;  %v10475_v23 = vadd.f32 %v10474_v2, %v10473_v51 }
 0x46b   : > { %v15726_v35 = vadd.f32 %v10575_v0, %v8423_v37  ;;  %v16813_v0 = vld [vmem:[#allocation32_spill] sm:$0xff] }
 0x46c   : > { %v8439_v52 = vadd.f32 %v10475_v23, %v16809_v53 }
 0x46d   : > { %v10576_v49 = vpop.f32.mrb[232].mxu0 }
 0x46e   : > { %v10577_v44 = vpop.f32.mrb[233].mxu0 }
 0x46f   : > { %v10476_v18 = vpop.f32.mrb[208].mxu1  ;;  %v10578_v50 = vadd.f32 %v10577_v44, %v10576_v49  ;;  %v10579_v58 = vpop.f32.mrb[234].mxu0 }
 0x470   : > { %v10477_v38 = vpop.f32.mrb[209].mxu1  ;;  %v10580_v57 = vpop.f32.mrb[235].mxu0 }
 0x471   : > { %v10478_v25 = vadd.f32 %v10477_v38, %v10476_v18  ;;  %v10479_v34 = vpop.f32.mrb[210].mxu1  ;;  %v10581_v46 = vadd.f32 %v10580_v57, %v10579_v58  ;;  %v15732_v48 = vadd.f32 %v10578_v50, %v8428_v43 }
 0x472   : > { %v10480_v3 = vpop.f32.mrb[211].mxu1 }
 0x473   : > { %v8444_v55 = vadd.f32 %v10478_v25, %v16810_v41  ;;  %v10481_v31 = vadd.f32 %v10480_v3, %v10479_v34  ;;  %v15736_v6 = vadd.f32 %v10581_v46, %v8431_v30 }
 0x475   : > { %v8447_v4 = vadd.f32 %v10481_v31, %v16811_v54 }
 0x477   : > { %v10582_v5 = vpop.f32.mrb[236].mxu0 }
 0x478   : > { %v10583_v40 = vpop.f32.mrb[237].mxu0 }
 0x479   : > { %v10482_v20 = vpop.f32.mrb[212].mxu1  ;;  %v10584_v29 = vadd.f32 %v10583_v40, %v10582_v5  ;;  %v10585_v7 = vpop.f32.mrb[238].mxu0 }
 0x47a   : > { %v10483_v10 = vpop.f32.mrb[213].mxu1  ;;  %v10586_v32 = vpop.f32.mrb[239].mxu0 }
 0x47b   : > { %v10484_v51 = vadd.f32 %v10483_v10, %v10482_v20  ;;  %v10485_v37 = vpop.f32.mrb[214].mxu1  ;;  %v10587_v59 = vadd.f32 %v10586_v32, %v10585_v7  ;;  %v15734_v2 = vadd.f32 %v10584_v29, %v8436_v62 }
 0x47c   : > { %v10486_v13 = vpop.f32.mrb[215].mxu1 }
 0x47d   : > { %v8452_v12 = vadd.f32 %v10484_v51, %v16812_v47  ;;  %v10487_v16 = vadd.f32 %v10486_v13, %v10485_v37  ;;  %v15739_v23 = vadd.f32 %v10587_v59, %v8439_v52 }
 0x47f   : > { %v8455_v53 = vadd.f32 %v10487_v16, %v16813_v0  ;;  %v10588_v49 = vpop.f32.mrb[240].mxu0 }
 0x480   : > { %v10589_v18 = vpop.f32.mrb[241].mxu0 }
 0x481   : > { %v10590_v43 = vadd.f32 %v10589_v18, %v10588_v49  ;;  %v10591_v44 = vpop.f32.mrb[242].mxu0 }
 0x482   : > { %v10592_v50 = vpop.f32.mrb[243].mxu0 }
 0x483   : > { %v10488_v38 = vpop.f32.mrb[216].mxu1  ;;  %v10593_v25 = vadd.f32 %v10592_v50, %v10591_v44  ;;  %v15742_v57 = vadd.f32 %v10590_v43, %v8444_v55 }
 0x484   : > { %v10489_v58 = vpop.f32.mrb[217].mxu1 }
 0x485   : > { %v10490_v34 = vadd.f32 %v10489_v58, %v10488_v38  ;;  %v10491_v62 = vpop.f32.mrb[218].mxu1  ;;  %v15745_v52 = vadd.f32 %v10593_v25, %v8447_v4 }
 0x486   : > { %v10492_v30 = vpop.f32.mrb[219].mxu1 }
 0x487   : > { %v8460_v3 = vadd.f32 %v10490_v34, %v15576_v11  ;;  %v10493_v46 = vadd.f32 %v10492_v30, %v10491_v62 }
 0x489   : > { %v8463_v41 = vadd.f32 %v10493_v46, %v15590_v26 }
 0x48a   : > { %v10594_v31 = vpop.f32.mrb[244].mxu0 }
 0x48b   : > { %v10595_v54 = vpop.f32.mrb[245].mxu0 }
 0x48c   : > { %v10596_v5 = vadd.f32 %v10595_v54, %v10594_v31  ;;  %v10597_v40 = vpop.f32.mrb[246].mxu0 }
 0x48d   : > { %v10494_v20 = vpop.f32.mrb[220].mxu1  ;;  %v10598_v29 = vpop.f32.mrb[247].mxu0 }
 0x48e   : > { %v10495_v7 = vpop.f32.mrb[221].mxu1  ;;  %v10599_v10 = vadd.f32 %v10598_v29, %v10597_v40  ;;  %v15748_v55 = vadd.f32 %v10596_v5, %v8452_v12 }
 0x48f   : > { %v10496_v32 = vadd.f32 %v10495_v7, %v10494_v20  ;;  %v10497_v51 = vpop.f32.mrb[222].mxu1 }
 0x490   : > { %v10498_v37 = vpop.f32.mrb[223].mxu1  ;;  %v15751_v4 = vadd.f32 %v10599_v10, %v8455_v53 }
 0x491   : > { %v8468_v11 = vadd.f32 %v10496_v32, %v15595_v15  ;;  %v10499_v59 = vadd.f32 %v10498_v37, %v10497_v51 }
 0x493   : > { %v10600_v13 = vpop.f32.mrb[248].mxu0  ;;  %v8471_v26 = vadd.f32 %v10499_v59, %v15610_v8 }
 0x494   : > { %v10601_v47 = vpop.f32.mrb[249].mxu0 }
 0x495   : > { %v10602_v16 = vadd.f32 %v10601_v47, %v10600_v13  ;;  %v10603_v0 = vpop.f32.mrb[250].mxu0 }
 0x496   : > { %v10604_v49 = vpop.f32.mrb[251].mxu0 }
 0x497   : > { %v10500_v18 = vpop.f32.mrb[224].mxu1  ;;  %v10605_v43 = vadd.f32 %v10604_v49, %v10603_v0  ;;  %v15754_v38 = vadd.f32 %v10602_v16, %v8460_v3 }
 0x498   : > { %v10501_v44 = vpop.f32.mrb[225].mxu1 }
 0x499   : > { %v10502_v12 = vadd.f32 %v10501_v44, %v10500_v18  ;;  %v10503_v50 = vpop.f32.mrb[226].mxu1  ;;  %v15756_v25 = vadd.f32 %v10605_v43, %v8463_v41 }
 0x49a   : > { %v10504_v58 = vpop.f32.mrb[227].mxu1 }
 0x49b   : > { %v8476_v15 = vadd.f32 %v10502_v12, %v15617_v61  ;;  %v10505_v53 = vadd.f32 %v10504_v58, %v10503_v50 }
 0x49d   : > { %v8479_v34 = vadd.f32 %v10505_v53, %v15625_v19 }
 0x49e   : > { %v10606_v8 = vpop.f32.mrb[252].mxu0 }
 0x49f   : > { %v10607_v62 = vpop.f32.mrb[253].mxu0 }
 0x4a0   : > { %v10608_v30 = vadd.f32 %v10607_v62, %v10606_v8  ;;  %v10609_v46 = vpop.f32.mrb[254].mxu0 }
 0x4a1   : > { %v10610_v31 = vpop.f32.mrb[255].mxu0  ;;  %v10506_v54 = vpop.f32.mrb[228].mxu1 }
 0x4a2   : > { %v10611_v5 = vadd.f32 %v10610_v31, %v10609_v46  ;;  %v10507_v40 = vpop.f32.mrb[229].mxu1  ;;  %v15760_v3 = vadd.f32 %v10608_v30, %v8468_v11 }
 0x4a3   : > { %v10508_v20 = vadd.f32 %v10507_v40, %v10506_v54  ;;  %v10509_v29 = vpop.f32.mrb[230].mxu1 }
 0x4a4   : > { %v10510_v7 = vpop.f32.mrb[231].mxu1  ;;  %v15762_v41 = vadd.f32 %v10611_v5, %v8471_v26 }
 0x4a5   : > { %v8484_v61 = vadd.f32 %v10508_v20, %v15643_v9  ;;  %v10511_v10 = vadd.f32 %v10510_v7, %v10509_v29 }
 0x4a6   : > { %v10612_v32 = vpop.f32.mrb[0].mxu0 }
 0x4a7   : > { %v10613_v19 = vpop.f32.mrb[1].mxu0  ;;  %v8487_v51 = vadd.f32 %v10511_v10, %v15649_v60 }
 0x4a8   : > { %v10614_v37 = vadd.f32 %v10613_v19, %v10612_v32  ;;  %v10615_v59 = vpop.f32.mrb[2].mxu0 }
 0x4a9   : > { %v10616_v13 = vpop.f32.mrb[3].mxu0 }
 0x4aa   : > { %v10617_v47 = vadd.f32 %v10616_v13, %v10615_v59  ;;  %v15766_v0 = vadd.f32 %v10614_v37, %v8476_v15 }
 0x4ac   : > { %v10512_v16 = vpop.f32.mrb[232].mxu1  ;;  %v15768_v43 = vadd.f32 %v10617_v47, %v8479_v34 }
 0x4ad   : > { %v10513_v11 = vpop.f32.mrb[233].mxu1 }
 0x4ae   : > { %v10514_v49 = vadd.f32 %v10513_v11, %v10512_v16  ;;  %v10515_v18 = vpop.f32.mrb[234].mxu1  ;;  %v10618_v44 = vpop.f32.mrb[4].mxu0 }
 0x4af   : > { %v10516_v26 = vpop.f32.mrb[235].mxu1  ;;  %v10619_v50 = vpop.f32.mrb[5].mxu0 }
 0x4b0   : > { %v8492_v9 = vadd.f32 %v10514_v49, %v15660_v17  ;;  %v10517_v12 = vadd.f32 %v10516_v26, %v10515_v18  ;;  %v10620_v58 = vadd.f32 %v10619_v50, %v10618_v44  ;;  %v10621_v53 = vpop.f32.mrb[6].mxu0 }
 0x4b1   : > { %v10622_v8 = vpop.f32.mrb[7].mxu0 }
 0x4b2   : > { %v8495_v60 = vadd.f32 %v10517_v12, %v15662_v63  ;;  %v10623_v62 = vadd.f32 %v10622_v8, %v10621_v53  ;;  %v15772_v30 = vadd.f32 %v10620_v58, %v8484_v61 }
 0x4b4   : > { %v15774_v15 = vadd.f32 %v10623_v62, %v8487_v51 }
 0x4b7   : > { %v10518_v46 = vpop.f32.mrb[236].mxu1 }
 0x4b8   : > { %v10519_v31 = vpop.f32.mrb[237].mxu1 }
 0x4b9   : > { %v10520_v34 = vadd.f32 %v10519_v31, %v10518_v46  ;;  %v10521_v54 = vpop.f32.mrb[238].mxu1 }
 0x4ba   : > { %v10624_v5 = vpop.f32.mrb[8].mxu0  ;;  %v10522_v40 = vpop.f32.mrb[239].mxu1 }
 0x4bb   : > { %v8500_v17 = vadd.f32 %v10520_v34, %v15667_v42  ;;  %v10625_v20 = vpop.f32.mrb[9].mxu0  ;;  %v10523_v29 = vadd.f32 %v10522_v40, %v10521_v54 }
 0x4bc   : > { %v10626_v7 = vadd.f32 %v10625_v20, %v10624_v5  ;;  %v10627_v10 = vpop.f32.mrb[10].mxu0 }
 0x4bd   : > { %v8503_v63 = vadd.f32 %v10523_v29, %v15669_v33  ;;  %v10628_v32 = vpop.f32.mrb[11].mxu0 }
 0x4be   : > { %v10629_v19 = vadd.f32 %v10628_v32, %v10627_v10  ;;  %v15778_v61 = vadd.f32 %v10626_v7, %v8492_v9 }
 0x4c0   : > { %v15780_v51 = vadd.f32 %v10629_v19, %v8495_v60 }
 0x4c2   : > { %v10630_v59 = vpop.f32.mrb[12].mxu0 }
 0x4c3   : > { %v10524_v37 = vpop.f32.mrb[240].mxu1  ;;  %v10631_v47 = vpop.f32.mrb[13].mxu0 }
 0x4c4   : > { %v10525_v13 = vpop.f32.mrb[241].mxu1  ;;  %v10632_v49 = vadd.f32 %v10631_v47, %v10630_v59  ;;  %v10633_v42 = vpop.f32.mrb[14].mxu0 }
 0x4c5   : > { %v10526_v16 = vadd.f32 %v10525_v13, %v10524_v37  ;;  %v10527_v11 = vpop.f32.mrb[242].mxu1  ;;  %v10634_v26 = vpop.f32.mrb[15].mxu0 }
 0x4c6   : > { %v10528_v18 = vpop.f32.mrb[243].mxu1  ;;  %v10635_v33 = vadd.f32 %v10634_v26, %v10633_v42  ;;  %v15783_v50 = vadd.f32 %v10632_v49, %v8500_v17 }
 0x4c7   : > { %v8508_v44 = vadd.f32 %v10526_v16, %v15688_v56  ;;  %v10529_v12 = vadd.f32 %v10528_v18, %v10527_v11 }
 0x4c8   : > { %v15786_v58 = vadd.f32 %v10635_v33, %v8503_v63 }
 0x4c9   : > { %v8511_v9 = vadd.f32 %v10529_v12, %v15690_v45 }
 0x4ce   : > { %v10530_v60 = vpop.f32.mrb[244].mxu1 }
 0x4cf   : > { %v10531_v53 = vpop.f32.mrb[245].mxu1  ;;  %v10636_v8 = vpop.f32.mrb[16].mxu0 }
 0x4d0   : > { %v10532_v62 = vadd.f32 %v10531_v53, %v10530_v60  ;;  %v10533_v46 = vpop.f32.mrb[246].mxu1  ;;  %v10637_v31 = vpop.f32.mrb[17].mxu0 }
 0x4d1   : > { %v10638_v34 = vadd.f32 %v10637_v31, %v10636_v8  ;;  %v10534_v54 = vpop.f32.mrb[247].mxu1  ;;  %v10639_v5 = vpop.f32.mrb[18].mxu0 }
 0x4d2   : > { %v8516_v40 = vadd.f32 %v10532_v62, %v15697_v24  ;;  %v10535_v56 = vadd.f32 %v10534_v54, %v10533_v46  ;;  %v10640_v20 = vpop.f32.mrb[19].mxu0 }
 0x4d3   : > { %v10641_v29 = vadd.f32 %v10640_v20, %v10639_v5  ;;  %v15789_v17 = vadd.f32 %v10638_v34, %v8508_v44  ;;  %v15809_v20 = vld [vmem:[%s16007_s5] ss:$0 sm:$0xff] }
 0x4d4   : > { %v8519_v45 = vadd.f32 %v10535_v56, %v15704_v36 }
 0x4d5   : > { %v15792_v7 = vadd.f32 %v10641_v29, %v8511_v9 }
 0x4da   : > { %v10642_v10 = vpop.f32.mrb[20].mxu0 }
 0x4db   : > { %v10643_v63 = vpop.f32.mrb[21].mxu0  ;;  %v10536_v32 = vpop.f32.mrb[248].mxu1 }
 0x4dc   : > { %v10644_v19 = vadd.f32 %v10643_v63, %v10642_v10  ;;  %v10645_v37 = vpop.f32.mrb[22].mxu0  ;;  %v10537_v59 = vpop.f32.mrb[249].mxu1  ;;  %v15816_v10 = vld [vmem:[%s16008_s6] ss:$0 sm:$0xff] }
 0x4dd   : > { %v10646_v13 = vpop.f32.mrb[23].mxu0  ;;  %v10538_v47 = vadd.f32 %v10537_v59, %v10536_v32  ;;  %v10539_v16 = vpop.f32.mrb[250].mxu1 }
 0x4de   : > { %v10647_v11 = vadd.f32 %v10646_v13, %v10645_v37  ;;  %v15794_v24 = vadd.f32 %v10644_v19, %v8516_v40  ;;  %v10540_v49 = vpop.f32.mrb[251].mxu1 }
 0x4df   : > { %v8524_v42 = vadd.f32 %v10538_v47, %v15706_v21  ;;  %v10541_v18 = vadd.f32 %v10540_v49, %v10539_v16 }
 0x4e0   : > { %v15797_v26 = vadd.f32 %v10647_v11, %v8519_v45 }
 0x4e1   : > { %v8527_v36 = vadd.f32 %v10541_v18, %v15708_v22 }
 0x4e7   : > { %v10648_v44 = vpop.f32.mrb[24].mxu0 }
 0x4e8   : > { %v10649_v12 = vpop.f32.mrb[25].mxu0 }
 0x4e9   : > { %v10650_v33 = vadd.f32 %v10649_v12, %v10648_v44  ;;  %v10651_v9 = vpop.f32.mrb[26].mxu0 }
 0x4ea   : > { %v10652_v60 = vpop.f32.mrb[27].mxu0 }
 0x4eb   : > { %v10653_v53 = vadd.f32 %v10652_v60, %v10651_v9  ;;  %v15800_v8 = vadd.f32 %v10650_v33, %v8524_v42 }
 0x4ec   : > { %v10542_v62 = vpop.f32.mrb[252].mxu1 }
 0x4ed   : > { %v10543_v46 = vpop.f32.mrb[253].mxu1  ;;  %v15802_v31 = vadd.f32 %v10653_v53, %v8527_v36 }
 0x4ee   : > { %v10544_v34 = vadd.f32 %v10543_v46, %v10542_v62  ;;  %v10545_v21 = vpop.f32.mrb[254].mxu1 }
 0x4ef   : > { %v10546_v54 = vpop.f32.mrb[255].mxu1 }
 0x4f0   : > { %v8532_v5 = vadd.f32 %v10544_v34, %v15713_v27  ;;  %v10547_v40 = vadd.f32 %v10546_v54, %v10545_v21 }
 0x4f2   : > { %v8535_v22 = vadd.f32 %v10547_v40, %v15716_v28 }
 0x4f7   : > { %v10750_v56 = vpop.f32.mrb[0].mxu1 }
 0x4f8   : > { %v8742_v29 = vadd.f32 %v10750_v56, %v15721_v14  ;;  %v8733_v45 = vpop.f32.mrb[1].mxu1 }
 0x4f9   : > { %v8734_v27 = vadd.f32 %v8733_v45, %v15724_v39  ;;  %v10751_v63 = vpop.f32.mrb[2].mxu1 }
 0x4fa   : > { %v8869_v28 = vmul.f32 %v15809_v20, %v8742_v29  ;;  %v8745_v32 = vadd.f32 %v10751_v63, %v15726_v35  ;;  %v8736_v19 = vpop.f32.mrb[3].mxu1 }
 0x4fb   : > { %v10654_v37 = vpop.f32.mrb[28].mxu0  ;;  %v8867_v59 = vmul.f32 %v15809_v20, %v8734_v27  ;;  %v8737_v13 = vadd.f32 %v8736_v19, %v15729_v1 }
 0x4fc   : > { %v8908_v14 = vadd.f32 %v15816_v10, %v8869_v28  ;;  %v10655_v47 = vpop.f32.mrb[29].mxu0  ;;  %v8870_v16 = vmul.f32 %v15809_v20, %v8745_v32 }
 0x4fd   : > { %v8906_v11 = vadd.f32 %v15816_v10, %v8867_v59  ;;  %v10656_v49 = vadd.f32 %v10655_v47, %v10654_v37  ;;  %v10657_v39 = vpop.f32.mrb[30].mxu0  ;;  %v8868_v42 = vmul.f32 %v15809_v20, %v8737_v13 }
 0x4fe   : > { %8940 = vst [vmem:[%s15827_s23 + $0x10] sm:$0xff] %v8908_v14  ;;  %v8909_v35 = vadd.f32 %v15816_v10, %v8870_v16  ;;  %v10658_v1 = vpop.f32.mrb[31].mxu0 }
 0x4ff   : > { %8938 = vst [vmem:[%s15827_s23] sm:$0xff] %v8906_v11  ;;  %v8907_v18 = vadd.f32 %v15816_v10, %v8868_v42  ;;  %v10659_v36 = vadd.f32 %v10658_v1, %v10657_v39  ;;  %v10754_v44 = vpop.f32.mrb[4].mxu1  ;;  %v15833_v12 = vadd.f32 %v10656_v49, %v8532_v5 }
 0x500   : > { %8941 = vst [vmem:[%s15827_s23 + $0x18] sm:$0xff] %v8909_v35  ;;  %v8758_v33 = vadd.f32 %v10754_v44, %v15734_v2  ;;  %v8749_v9 = vpop.f32.mrb[5].mxu1 }
 0x501   : > { %8939 = vst [vmem:[%s15827_s23 + $0x8] sm:$0xff] %v8907_v18  ;;  %v8750_v60 = vadd.f32 %v8749_v9, %v15732_v48  ;;  %v10755_v53 = vpop.f32.mrb[6].mxu1  ;;  %v15839_v62 = vadd.f32 %v10659_v36, %v8535_v22 }
 0x502   : > { %v8873_v46 = vmul.f32 %v15809_v20, %v8758_v33  ;;  %v8761_v34 = vadd.f32 %v10755_v53, %v15739_v23  ;;  %v8752_v21 = vpop.f32.mrb[7].mxu1 }
 0x503   : > { %v8871_v54 = vmul.f32 %v15809_v20, %v8750_v60  ;;  %v8753_v5 = vadd.f32 %v8752_v21, %v15736_v6 }
 0x504   : > { %v8912_v2 = vadd.f32 %v15816_v10, %v8873_v46  ;;  %v8874_v40 = vmul.f32 %v15809_v20, %v8761_v34 }
 0x505   : > { %v8910_v48 = vadd.f32 %v15816_v10, %v8871_v54  ;;  %v8872_v56 = vmul.f32 %v15809_v20, %v8753_v5 }
 0x506   : > { %8944 = vst [vmem:[%s15827_s23 + $0x30] sm:$0xff] %v8912_v2  ;;  %v8913_v22 = vadd.f32 %v15816_v10, %v8874_v40 }
 0x507   : > { %8942 = vst [vmem:[%s15827_s23 + $0x20] sm:$0xff] %v8910_v48  ;;  %v8911_v23 = vadd.f32 %v15816_v10, %v8872_v56  ;;  %v10758_v29 = vpop.f32.mrb[8].mxu1 }
 0x508   : > { %8945 = vst [vmem:[%s15827_s23 + $0x38] sm:$0xff] %v8913_v22  ;;  %v8774_v45 = vadd.f32 %v10758_v29, %v15748_v55  ;;  %v8765_v6 = vpop.f32.mrb[9].mxu1 }
 0x509   : > { %8943 = vst [vmem:[%s15827_s23 + $0x28] sm:$0xff] %v8911_v23  ;;  %v8766_v27 = vadd.f32 %v8765_v6, %v15742_v57  ;;  %v10759_v63 = vpop.f32.mrb[10].mxu1 }
 0x50a   : > { %v8877_v28 = vmul.f32 %v15809_v20, %v8774_v45  ;;  %v8777_v32 = vadd.f32 %v10759_v63, %v15751_v4  ;;  %v8768_v19 = vpop.f32.mrb[11].mxu1 }
 0x50b   : > { %v8875_v37 = vmul.f32 %v15809_v20, %v8766_v27  ;;  %v8769_v59 = vadd.f32 %v8768_v19, %v15745_v52 }
 0x50c   : > { %v8916_v13 = vadd.f32 %v15816_v10, %v8877_v28  ;;  %v8878_v55 = vmul.f32 %v15809_v20, %v8777_v32 }
 0x50d   : > { %v8914_v14 = vadd.f32 %v15816_v10, %v8875_v37  ;;  %v8876_v57 = vmul.f32 %v15809_v20, %v8769_v59 }
 0x50e   : > { %8948 = vst [vmem:[%s15827_s23 + $0x50] sm:$0xff] %v8916_v13  ;;  %v8917_v47 = vadd.f32 %v15816_v10, %v8878_v55 }
 0x50f   : > { %8946 = vst [vmem:[%s15827_s23 + $0x40] sm:$0xff] %v8914_v14  ;;  %v8915_v4 = vadd.f32 %v15816_v10, %v8876_v57  ;;  %v10762_v16 = vpop.f32.mrb[12].mxu1 }
 0x510   : > { %8949 = vst [vmem:[%s15827_s23 + $0x58] sm:$0xff] %v8917_v47  ;;  %v8790_v11 = vadd.f32 %v10762_v16, %v15760_v3  ;;  %v8781_v52 = vpop.f32.mrb[13].mxu1 }
 0x511   : > { %8947 = vst [vmem:[%s15827_s23 + $0x48] sm:$0xff] %v8915_v4  ;;  %v8782_v49 = vadd.f32 %v8781_v52, %v15754_v38  ;;  %v10763_v39 = vpop.f32.mrb[14].mxu1 }
 0x512   : > { %v8881_v42 = vmul.f32 %v15809_v20, %v8790_v11  ;;  %v8793_v35 = vadd.f32 %v10763_v39, %v15762_v41  ;;  %v8784_v1 = vpop.f32.mrb[15].mxu1 }
 0x513   : > { %v8879_v18 = vmul.f32 %v15809_v20, %v8782_v49  ;;  %v8785_v36 = vadd.f32 %v8784_v1, %v15756_v25 }
 0x514   : > { %v8920_v44 = vadd.f32 %v15816_v10, %v8881_v42  ;;  %v8882_v3 = vmul.f32 %v15809_v20, %v8793_v35 }
 0x515   : > { %v8918_v33 = vadd.f32 %v15816_v10, %v8879_v18  ;;  %v8880_v38 = vmul.f32 %v15809_v20, %v8785_v36 }
 0x516   : > { %8952 = vst [vmem:[%s15827_s23 + $0x70] sm:$0xff] %v8920_v44  ;;  %v8921_v9 = vadd.f32 %v15816_v10, %v8882_v3 }
 0x517   : > { %8950 = vst [vmem:[%s15827_s23 + $0x60] sm:$0xff] %v8918_v33  ;;  %v8919_v41 = vadd.f32 %v15816_v10, %v8880_v38  ;;  %v10766_v60 = vpop.f32.mrb[16].mxu1 }
 0x518   : > { %8953 = vst [vmem:[%s15827_s23 + $0x78] sm:$0xff] %v8921_v9  ;;  %v8806_v53 = vadd.f32 %v10766_v60, %v15772_v30  ;;  %v8797_v25 = vpop.f32.mrb[17].mxu1 }
 0x519   : > { %8951 = vst [vmem:[%s15827_s23 + $0x68] sm:$0xff] %v8919_v41  ;;  %v8798_v46 = vadd.f32 %v8797_v25, %v15766_v0  ;;  %v10767_v34 = vpop.f32.mrb[18].mxu1 }
 0x51a   : > { %v8885_v21 = vmul.f32 %v15809_v20, %v8806_v53  ;;  %v8809_v54 = vadd.f32 %v10767_v34, %v15774_v15  ;;  %v8800_v5 = vpop.f32.mrb[19].mxu1 }
 0x51b   : > { %v8883_v2 = vmul.f32 %v15809_v20, %v8798_v46  ;;  %v8801_v40 = vadd.f32 %v8800_v5, %v15768_v43 }
 0x51c   : > { %v8924_v48 = vadd.f32 %v15816_v10, %v8885_v21  ;;  %v8886_v30 = vmul.f32 %v15809_v20, %v8809_v54 }
 0x51d   : > { %v8922_v56 = vadd.f32 %v15816_v10, %v8883_v2  ;;  %v8884_v0 = vmul.f32 %v15809_v20, %v8801_v40 }
 0x51e   : > { %8956 = vst [vmem:[%s15827_s23 + $0x90] sm:$0xff] %v8924_v48  ;;  %v8925_v22 = vadd.f32 %v15816_v10, %v8886_v30 }
 0x51f   : > { %8954 = vst [vmem:[%s15827_s23 + $0x80] sm:$0xff] %v8922_v56  ;;  %v8923_v15 = vadd.f32 %v15816_v10, %v8884_v0  ;;  %v10770_v23 = vpop.f32.mrb[20].mxu1 }
 0x520   : > { %8957 = vst [vmem:[%s15827_s23 + $0x98] sm:$0xff] %v8925_v22  ;;  %v8822_v29 = vadd.f32 %v10770_v23, %v15783_v50  ;;  %v8813_v43 = vpop.f32.mrb[21].mxu1 }
 0x521   : > { %8955 = vst [vmem:[%s15827_s23 + $0x88] sm:$0xff] %v8923_v15  ;;  %v8814_v45 = vadd.f32 %v8813_v43, %v15778_v61  ;;  %v10771_v6 = vpop.f32.mrb[22].mxu1 }
 0x522   : > { %v8889_v27 = vmul.f32 %v15809_v20, %v8822_v29  ;;  %v8825_v63 = vadd.f32 %v10771_v6, %v15786_v58  ;;  %v8816_v28 = vpop.f32.mrb[23].mxu1 }
 0x523   : > { %v8887_v32 = vmul.f32 %v15809_v20, %v8814_v45  ;;  %v8817_v19 = vadd.f32 %v8816_v28, %v15780_v51 }
 0x524   : > { %v8928_v37 = vadd.f32 %v15816_v10, %v8889_v27  ;;  %v8890_v50 = vmul.f32 %v15809_v20, %v8825_v63 }
 0x525   : > { %v8926_v59 = vadd.f32 %v15816_v10, %v8887_v32  ;;  %v8888_v61 = vmul.f32 %v15809_v20, %v8817_v19 }
 0x526   : > { %8960 = vst [vmem:[%s15827_s23 + $0xb0] sm:$0xff] %v8928_v37  ;;  %v8929_v13 = vadd.f32 %v15816_v10, %v8890_v50 }
 0x527   : > { %8958 = vst [vmem:[%s15827_s23 + $0xa0] sm:$0xff] %v8926_v59  ;;  %v8927_v58 = vadd.f32 %v15816_v10, %v8888_v61  ;;  %v10774_v55 = vpop.f32.mrb[24].mxu1 }
 0x528   : > { %8961 = vst [vmem:[%s15827_s23 + $0xb8] sm:$0xff] %v8929_v13  ;;  %v8838_v14 = vadd.f32 %v10774_v55, %v15794_v24  ;;  %v8829_v51 = vpop.f32.mrb[25].mxu1 }
 0x529   : > { %8959 = vst [vmem:[%s15827_s23 + $0xa8] sm:$0xff] %v8927_v58  ;;  %v8830_v57 = vadd.f32 %v8829_v51, %v15789_v17  ;;  %v10775_v47 = vpop.f32.mrb[26].mxu1 }
 0x52a   : > { %v8893_v4 = vmul.f32 %v15809_v20, %v8838_v14  ;;  %v8841_v16 = vadd.f32 %v10775_v47, %v15797_v26  ;;  %v8832_v11 = vpop.f32.mrb[27].mxu1 }
 0x52b   : > { %v8891_v52 = vmul.f32 %v15809_v20, %v8830_v57  ;;  %v8833_v49 = vadd.f32 %v8832_v11, %v15792_v7 }
 0x52c   : > { %v8932_v39 = vadd.f32 %v15816_v10, %v8893_v4  ;;  %v8894_v24 = vmul.f32 %v15809_v20, %v8841_v16 }
 0x52d   : > { %v8930_v42 = vadd.f32 %v15816_v10, %v8891_v52  ;;  %v8892_v17 = vmul.f32 %v15809_v20, %v8833_v49 }
 0x52e   : > { %8964 = vst [vmem:[%s15827_s23 + $0xd0] sm:$0xff] %v8932_v39  ;;  %v8933_v35 = vadd.f32 %v15816_v10, %v8894_v24 }
 0x52f   : > { %8962 = vst [vmem:[%s15827_s23 + $0xc0] sm:$0xff] %v8930_v42  ;;  %v8931_v26 = vadd.f32 %v15816_v10, %v8892_v17  ;;  %v10778_v1 = vpop.f32.mrb[28].mxu1 }
 0x530   : > { %8965 = vst [vmem:[%s15827_s23 + $0xd8] sm:$0xff] %v8933_v35  ;;  %v8854_v7 = vadd.f32 %v10778_v1, %v15833_v12  ;;  %v8845_v18 = vpop.f32.mrb[29].mxu1 }
 0x531   : > { %8963 = vst [vmem:[%s15827_s23 + $0xc8] sm:$0xff] %v8931_v26  ;;  %v8846_v36 = vadd.f32 %v8845_v18, %v15800_v8  ;;  %v10779_v44 = vpop.f32.mrb[30].mxu1 }
 0x532   : > { %v8897_v3 = vmul.f32 %v15809_v20, %v8854_v7  ;;  %v8857_v33 = vadd.f32 %v10779_v44, %v15839_v62  ;;  %v8848_v38 = vpop.f32.mrb[31].mxu1 }
 0x533   : > { %v8895_v9 = vmul.f32 %v15809_v20, %v8846_v36  ;;  %v8849_v41 = vadd.f32 %v8848_v38, %v15802_v31 }
 0x534   : > { %v8936_v12 = vadd.f32 %v15816_v10, %v8897_v3  ;;  %v8898_v8 = vmul.f32 %v15809_v20, %v8857_v33 }
 0x535   : > { %v8934_v60 = vadd.f32 %v15816_v10, %v8895_v9  ;;  %v8896_v53 = vmul.f32 %v15809_v20, %v8849_v41 }
 0x536   : > { %8968 = vst [vmem:[%s15827_s23 + $0xf0] sm:$0xff] %v8936_v12  ;;  %v8937_v62 = vadd.f32 %v15816_v10, %v8898_v8 }
 0x537   : > { %8966 = vst [vmem:[%s15827_s23 + $0xe0] sm:$0xff] %v8934_v60  ;;  %v8935_v31 = vadd.f32 %v15816_v10, %v8896_v53 }
 0x538   : > { %8969 = vst [vmem:[%s15827_s23 + $0xf8] sm:$0xff] %v8937_v62 }
 0x539   : > { %8967 = vst [vmem:[%s15827_s23 + $0xe8] sm:$0xff] %v8935_v31 }
 0x53a   : > { %11241 = shalt.err (!%p11238_p1)
}
 0x53b   : > { %s11242_s15 = scalar_lea.hbm %s15952_s9, 4096  ;;  %s11246_s23 = scalar_lea.hbm %s16009_s7, 8192 }
 0x53c   : > { %p11243_p13 = scmp.ne.s32.totalorder %s15952_s9, %s11242_s15  ;;  %p11247_p4 = scmp.lt.u32.totalorder %s15952_s9, %s16009_s7 }
 0x53d   : > { %p11248_p5 = scmp.lt.u32.totalorder %s11246_s23, %s11242_s15  ;;  %p11250_p11 = scmp.lt.u32.totalorder %s11242_s15, %s15952_s9 }
 0x53e   : > { %p11244_p6 = pnand %p11243_p13, %p16814_p0 }
 0x53f   : > { %p11249_p8 = por %p11248_p5, %p11247_p4 }
 0x540   : > { %p11245_p10 = pneg %p11244_p6 }
 0x541   : > { %p11251_p2 = por %p11250_p11, %p11249_p8 }
 0x543   : > { %p11252_p3 = pnand %p11251_p2, %p11245_p10 }
 0x545   : > { %11255 = shalt.err (!%p11252_p3)
}
 0x546   : > { %s11307_s30 = smov 128   ;;  %s11308_s29 = smov 8  }
 0x547   : > { %10790 = dma.vmem_to_hbm [thread:$0]  (%p16814_p0), %s15954_s18, 4096, %s15952_s9, %s8971_s28, %s11307_s30, %s11307_s30, %s11308_s29  }
 0x548 PF: > { %s8999_s11 = sand.u32 1, %s11286_s24   ;;  %p16815_p7 = scmp.ne.s32.totalorder %s16257_s8, 0 }
 0x549   : > { %p16816_p9 = scmp.ge.s32.totalorder %s11298_s27, 2  ;;  %s9000_s10 = scalar_lea.sflag [#allocation6], %s8999_s11 }
 0x54b   : > { %p10804_p12 = pnand %p16816_p9, %p16815_p7 }
 0x54d   : > { %11281 = dma.done.wait (!%p10804_p12), %s9000_s10, 4096  }
 0x54e   : > { %11283 = vsyncadd (!%p10804_p12), %s9000_s10, 4294963200  ;;  %p21_p1 = scmp.ge.s32.totalorder %s11465_s12, 4   ;;  %s16817_s24 = smov %s11290_s25 }
 0x54f   : > { %s16818_s25 = smov %s11294_s26  ;;  %s16819_s26 = smov %s11481_s17 }
 0x550   : > { %s16820_s27 = smov %s11465_s12  ;;  %23 = sbr.rel (!%p21_p1) target bundleno = 6 (0x6), region = 107 }
 0x557   :  { %9005 = vsyncpa [#allocation5], 1 }
 0x558   :  { %9007 = vsyncpa [#allocation5 + $0x1], 1 }
 0x559   :  { %9008 = vsyncpa [#allocation8], 1 }
 0x55a   :  { %9009 = vsyncpa [#allocation6], 1 }
 0x55b   :  { %9011 = vsyncpa [#allocation6 + $0x1], 1 }

</bundles_post_ra>
